<compile_context>
chip_gen: v7x
topology: tpu7x:2x2x1
jax: 0.10.0
libtpu: 0.0.40
codegen_flags: <defaults>
</compile_context>

<pallas_src>
import jax
import jax.numpy as jnp
from jax.experimental import pallas as pl
from jax.experimental.pallas import tpu as pltpu


# ----------------------------- kernel helpers --------------------------------
def _swish(h):
    return h * jax.nn.sigmoid(h)


def _group_norm(h, gmat, scale, bias, ones_row, n_per_group, eps):
    """GroupNorm over a (H*W, C) f32 tile of one sample (channels on lanes).

    Per-channel sum / sum-of-squares use a ones-row MXU matmul (frees VPU/XLU
    slots); per-group folding uses the constant block-diagonal `gmat`, built
    once in the wrapper (not rebuilt per grid step).
    """
    s = jnp.dot(ones_row, h, preferred_element_type=jnp.float32)        # (1, C)
    s2 = jnp.dot(ones_row, h * h, preferred_element_type=jnp.float32)   # (1, C)
    stats = jnp.concatenate([s, s2], axis=0)                            # (2, C)
    g = jnp.dot(stats, gmat,
                preferred_element_type=jnp.float32) * (1.0 / n_per_group)
    mean = g[0:1, :]
    # TODO(synk): single-pass variance (E[x^2]-E[x]^2) can cancel for huge
    # activation magnitudes; fine for normalized VQGAN activations.
    var = g[1:2, :] - mean * mean
    inv = jax.lax.rsqrt(var + eps)
    return (h - mean) * (inv * scale) + bias


def _conv3x3(hf, w_ref, bias, H, W, cout, mask_l, mask_r):
    """3x3 conv (padding=1) on a flattened (H*W, Cin) bf16 image.

    hf rows are y*W + x.  Three zero-padded flat copies realize the horizontal
    taps; each vertical tap dy is an aligned slice at offset dy*W (W % 8 == 0),
    so all 9 taps are contiguous MXU operands.  mask_l / mask_r zero the
    wrapped first/last-column rows of the shifted copies.
    """
    HW = H * W
    cin = hf.shape[-1]
    dt = hf.dtype

    def zrows(n):
        return jnp.zeros((n, cin), dt)

    hv_c = jnp.concatenate([zrows(W), hf, zrows(W)], axis=0)                    # dx=1
    hv_l = jnp.concatenate([zrows(W + 1), hf, zrows(W - 1)], axis=0) * mask_l   # dx=0
    hv_r = jnp.concatenate([zrows(W - 1), hf, zrows(W + 1)], axis=0) * mask_r   # dx=2

    acc = jnp.zeros((HW, cout), jnp.float32)
    for dy in range(3):                      # static unroll: 9 MXU matmuls
        off = dy * W                         # multiple of 8 -> tile-aligned slice
        acc = acc + jnp.dot(hv_l[off:off + HW], w_ref[3 * dy + 0],
                            preferred_element_type=jnp.float32)
        acc = acc + jnp.dot(hv_c[off:off + HW], w_ref[3 * dy + 1],
                            preferred_element_type=jnp.float32)
        acc = acc + jnp.dot(hv_r[off:off + HW], w_ref[3 * dy + 2],
                            preferred_element_type=jnp.float32)
    return acc + bias


def _make_resnet_kernel(H, W, cin, cout, groups, eps, has_nin_shortcut):
    HW = H * W
    N = (H + 2) * W
    n1 = float(HW * (cin // groups))
    n2 = float(HW * (cout // groups))

    def kernel(*refs):
        if has_nin_shortcut:
            (x_ref, gmat1_ref, g1s_ref, g1b_ref, w1_ref, b1_ref,
             gmat2_ref, g2s_ref, g2b_ref, w2_ref, b2_ref,
             wsc_ref, bsc_ref, out_ref) = refs
        else:
            (x_ref, gmat1_ref, g1s_ref, g1b_ref, w1_ref, b1_ref,
             gmat2_ref, g2s_ref, g2b_ref, w2_ref, b2_ref, out_ref) = refs

        ones_row = jnp.ones((1, HW), jnp.float32)
        col = jax.lax.broadcasted_iota(jnp.int32, (N, 1), 0) % W
        mask_l = (col != 0).astype(jnp.bfloat16)        # left neighbour invalid at x==0
        mask_r = (col != W - 1).astype(jnp.bfloat16)    # right neighbour invalid at x==W-1

        # ---- GroupNorm1 + swish (f32 elementwise, MXU stats) ----------------
        x32 = x_ref[0].reshape(HW, cin).astype(jnp.float32)
        h = _swish(_group_norm(x32, gmat1_ref[...], g1s_ref[...], g1b_ref[...],
                               ones_row, n1, eps))

        # ---- conv1 (3x3, pad 1): bf16 MXU inputs, f32 accumulate ------------
        h = _conv3x3(h.astype(jnp.bfloat16), w1_ref, b1_ref[...],
                     H, W, cout, mask_l, mask_r)

        # ---- GroupNorm2 + swish ---------------------------------------------
        h = _swish(_group_norm(h, gmat2_ref[...], g2s_ref[...], g2b_ref[...],
                               ones_row, n2, eps))
        # TODO(synk): training-mode dropout (module default p=0.0 -> identity).

        # ---- conv2 (3x3, pad 1) ----------------------------------------------
        h = _conv3x3(h.astype(jnp.bfloat16), w2_ref, b2_ref[...],
                     H, W, cout, mask_l, mask_r)

        # ---- shortcut + residual (re-read x; keep no f32 x live across convs)
        if has_nin_shortcut:
            x_sc = x_ref[0].reshape(HW, cin).astype(jnp.bfloat16)
            xs = jnp.dot(x_sc, wsc_ref[...],
                         preferred_element_type=jnp.float32) + bsc_ref[...]
        else:
            xs = x_ref[0].reshape(HW, cin).astype(jnp.float32)

        out_ref[0] = (xs + h).reshape(H, W, cout).astype(out_ref.dtype)

    return kernel


def _group_matrix(c, groups):
    gid = jnp.arange(c, dtype=jnp.int32) // (c // groups)
    return (gid[:, None] == gid[None, :]).astype(jnp.float32)


# ------------------------------- module wrapper -------------------------------
class ResnetBlock:
    """GroupNorm -> swish -> conv3x3 -> GroupNorm -> swish -> dropout(identity)
    -> conv3x3 -> (1x1 nin_shortcut) -> residual add, fused in one Pallas kernel.

    TODO(synk): norm_type='batch' (SyncBatchNorm) and conv_shortcut=True (3x3
    shortcut) are not implemented; PyTorch default path uses the 1x1 shortcut.
    """

    def __init__(self, in_channels, out_channels=None, conv_shortcut=False,
                 dropout=0.0, norm_type='group', *, key):
        assert norm_type == 'group', \
            "TODO(synk): SyncBatchNorm (norm_type='batch') not implemented"
        if conv_shortcut:
            raise NotImplementedError(
                "TODO(synk): conv_shortcut=True (3x3 shortcut) not implemented")
        out_channels = in_channels if out_channels is None else out_channels
        assert in_channels % 32 == 0 and out_channels % 32 == 0, \
            "GroupNorm(num_groups=32) requires channels divisible by 32"

        self.in_channels = in_channels
        self.out_channels = out_channels
        self.dropout = dropout
        self.groups = 32
        self.eps = 1e-6

        k1, k2, k3 = jax.random.split(key, 3)

        def conv_init(k, kh, kw, cin, cout):
            fan_in = cin * kh * kw
            bound = 1.0 / (fan_in ** 0.5)
            kw_, kb_ = jax.random.split(k)
            w = jax.random.uniform(kw_, (kh, kw, cin, cout), jnp.float32,
                                   minval=-bound, maxval=bound)   # HWIO
            b = jax.random.uniform(kb_, (1, cout), jnp.float32,
                                   minval=-bound, maxval=bound)
            return w, b

        # GroupNorm affine params (PyTorch init: weight=1, bias=0)
        self.gn1_scale = jnp.ones((1, in_channels), jnp.float32)
        self.gn1_bias = jnp.zeros((1, in_channels), jnp.float32)
        self.gn2_scale = jnp.ones((1, out_channels), jnp.float32)
        self.gn2_bias = jnp.zeros((1, out_channels), jnp.float32)

        # Constant block-diagonal "same group" matrices (hoisted out of kernel).
        self.gmat1 = _group_matrix(in_channels, self.groups)
        self.gmat2 = _group_matrix(out_channels, self.groups)

        self.w1, self.b1 = conv_init(k1, 3, 3, in_channels, out_channels)
        self.w2, self.b2 = conv_init(k2, 3, 3, out_channels, out_channels)
        # bf16 weight layouts for the MXU: (9, Cin, Cout), k = dy*3 + dx.
        self.w1_k = self.w1.reshape(9, in_channels, out_channels).astype(jnp.bfloat16)
        self.w2_k = self.w2.reshape(9, out_channels, out_channels).astype(jnp.bfloat16)

        self.has_nin_shortcut = in_channels != out_channels
        if self.has_nin_shortcut:
            wsc, bsc = conv_init(k3, 1, 1, in_channels, out_channels)
            self.wsc = wsc.reshape(in_channels, out_channels)     # f32 (ref)
            self.wsc_k = self.wsc.astype(jnp.bfloat16)            # bf16 (kernel)
            self.bsc = bsc

    # -- one pallas_call; single_buffer_params toggles pl.Buffered(1) on params
    def _forward(self, x_nhwc, single_buffer_params):
        b, hh, ww, _ = x_nhwc.shape
        cin, cout = self.in_channels, self.out_channels

        kernel = _make_resnet_kernel(hh, ww, cin, cout, self.groups, self.eps,
                                     self.has_nin_shortcut)

        params = [self.gmat1, self.gn1_scale, self.gn1_bias, self.w1_k, self.b1,
                  self.gmat2, self.gn2_scale, self.gn2_bias, self.w2_k, self.b2]
        if self.has_nin_shortcut:
            params += [self.wsc_k, self.bsc]

        def const_spec(arr):
            nd = arr.ndim
            idx = lambda i, _nd=nd: (0,) * _nd
            if single_buffer_params:
                # Grid-invariant params: no need for a double buffer in VMEM.
                return pl.BlockSpec(arr.shape, idx, pipeline_mode=pl.Buffered(1))
            return pl.BlockSpec(arr.shape, idx)

        in_specs = [pl.BlockSpec((1, hh, ww, cin), lambda i: (i, 0, 0, 0))]
        in_specs += [const_spec(a) for a in params]

        # Explicit scoped-VMEM budget (params + double-buffered IO + headroom
        # for in-register activations / spills), clamped to be v7x-safe.
        param_bytes = sum(int(a.size) * a.dtype.itemsize for a in params)
        io_bytes = hh * ww * (cin + cout) * x_nhwc.dtype.itemsize
        act_bytes = (hh + 2) * ww * max(cin, cout) * 4
        vmem_limit = int(min(64 * 2**20,
                             max(32 * 2**20,
                                 2 * param_bytes + 2 * io_bytes + 10 * act_bytes)))

        return pl.pallas_call(
            kernel,
            out_shape=jax.ShapeDtypeStruct((b, hh, ww, cout), x_nhwc.dtype),
            grid_spec=pltpu.PrefetchScalarGridSpec(
                num_scalar_prefetch=0,
                grid=(b,),
                in_specs=in_specs,
                out_specs=pl.BlockSpec((1, hh, ww, cout),
                                       lambda i: (i, 0, 0, 0)),
            ),
            compiler_params=pltpu.CompilerParams(
                dimension_semantics=("parallel",),
                vmem_limit_bytes=vmem_limit),
        )(x_nhwc, *params)

    def __call__(self, x):
        b, c, hh, ww = x.shape
        assert c == self.in_channels
        assert ww % 8 == 0, \
            "W must be a multiple of 8 so (H, W, C) <-> (H*W, C) reshapes and " \
            "the per-row conv slices stay tile-aligned"

        x_nhwc = jnp.transpose(x, (0, 2, 3, 1))       # channels on the lane axis
        try:
            out_nhwc = self._forward(x_nhwc, single_buffer_params=True)
            jax.block_until_ready(out_nhwc)
        except Exception:
            # TODO(synk): pl.Buffered(1) single-buffering rejected by this JAX
            # build; fall back to default double-buffered params.
            out_nhwc = self._forward(x_nhwc, single_buffer_params=False)
        return jnp.transpose(out_nhwc, (0, 3, 1, 2))   # back to NCHW


# ------------------------------ pure-JAX reference ----------------------------
def _reference_forward(x, blk):
    groups, eps = blk.groups, blk.eps

    def gn(h, scale, bias):
        B, C, H, W = h.shape
        hr = h.reshape(B, groups, C // groups, H, W)
        mean = jnp.mean(hr, axis=(2, 3, 4), keepdims=True)
        var = jnp.mean((hr - mean) ** 2, axis=(2, 3, 4), keepdims=True)
        hn = ((hr - mean) / jnp.sqrt(var + eps)).reshape(B, C, H, W)
        return hn * scale.reshape(1, C, 1, 1) + bias.reshape(1, C, 1, 1)

    def swish(h):
        return h * jax.nn.sigmoid(h)

    def conv3x3(h, w_hwio, bias):
        out = jax.lax.conv_general_dilated(
            h, w_hwio, window_strides=(1, 1), padding="SAME",
            dimension_numbers=("NCHW", "HWIO", "NCHW"))
        return out + bias.reshape(1, -1, 1, 1)

    h = conv3x3(swish(gn(x, blk.gn1_scale, blk.gn1_bias)), blk.w1, blk.b1)
    h = conv3x3(swish(gn(h, blk.gn2_scale, blk.gn2_bias)), blk.w2, blk.b2)
    if blk.has_nin_shortcut:
        xs = jnp.einsum("bchw,co->bohw", x, blk.wsc) + blk.bsc.reshape(1, -1, 1, 1)
    else:
        xs = x
    return xs + h


if __name__ == "__main__":
    key = jax.random.PRNGKey(0)
    kp1, kp2, kx1, kx2 = jax.random.split(key, 4)

    # Case 1: in != out exercises the 1x1 nin_shortcut path.
    B, Cin, Cout, H, W = 2, 64, 128, 16, 16
    blk = ResnetBlock(in_channels=Cin, out_channels=Cout, key=kp1)
    x = jax.random.normal(kx1, (B, Cin, H, W), jnp.float32)     # NCHW input

    out = blk(x)
    jax.block_until_ready(out)
    assert out.shape == (B, Cout, H, W)

    ref = _reference_forward(x, blk)
    max_err = float(jnp.max(jnp.abs(out - ref)))
    mean_err = float(jnp.mean(jnp.abs(out - ref)))
    # Tolerances account for bf16 MXU inputs (f32 accumulation) vs f32 reference.
    assert max_err < 1e-1, f"max abs error too large: {max_err}"
    assert mean_err < 2e-2, f"mean abs error too large: {mean_err}"

    # Case 2: in == out exercises the identity-shortcut path.
    B2, C2, H2, W2 = 2, 64, 8, 8
    blk2 = ResnetBlock(in_channels=C2, key=kp2)
    x2 = jax.random.normal(kx2, (B2, C2, H2, W2), jnp.float32)
    out2 = blk2(x2)
    jax.block_until_ready(out2)
    ref2 = _reference_forward(x2, blk2)
    max_err2 = float(jnp.max(jnp.abs(out2 - ref2)))
    assert max_err2 < 1e-1, f"max abs error too large (identity path): {max_err2}"

    print("KERNEL_OK")
</pallas_src>

<mosaic_0001>
module attributes {stable_mosaic.version = 11 : i64} {
  func.func @kernel(%arg0: i32, %arg1: memref<1x16x16x64xf32, #tpu.memory_space<vmem>>, %arg2: memref<64x64xf32, #tpu.memory_space<vmem>>, %arg3: memref<1x64xf32, #tpu.memory_space<vmem>>, %arg4: memref<1x64xf32, #tpu.memory_space<vmem>>, %arg5: memref<9x64x128xbf16, #tpu.memory_space<vmem>>, %arg6: memref<1x128xf32, #tpu.memory_space<vmem>>, %arg7: memref<128x128xf32, #tpu.memory_space<vmem>>, %arg8: memref<1x128xf32, #tpu.memory_space<vmem>>, %arg9: memref<1x128xf32, #tpu.memory_space<vmem>>, %arg10: memref<9x128x128xbf16, #tpu.memory_space<vmem>>, %arg11: memref<1x128xf32, #tpu.memory_space<vmem>>, %arg12: memref<64x128xbf16, #tpu.memory_space<vmem>>, %arg13: memref<1x128xf32, #tpu.memory_space<vmem>>, %arg14: memref<1x16x16x128xf32, #tpu.memory_space<vmem>>) attributes {dimension_semantics = [#tpu.dimension_semantics<parallel>], iteration_bounds = array<i64: 2>, scalar_prefetch = 0 : i64, scratch_operands = 0 : i64, tpu.core_type = #tpu.core_type<tc>, window_params = [{transform_indices = @transform_0, window_bounds = array<i64: 1, 16, 16, 64>}, {pipeline_mode = #tpu.pipeline_mode<synchronous>, transform_indices = @transform_1, window_bounds = array<i64: 64, 64>}, {pipeline_mode = #tpu.pipeline_mode<synchronous>, transform_indices = @transform_2, window_bounds = array<i64: 1, 64>}, {pipeline_mode = #tpu.pipeline_mode<synchronous>, transform_indices = @transform_3, window_bounds = array<i64: 1, 64>}, {pipeline_mode = #tpu.pipeline_mode<synchronous>, transform_indices = @transform_4, window_bounds = array<i64: 9, 64, 128>}, {pipeline_mode = #tpu.pipeline_mode<synchronous>, transform_indices = @transform_5, window_bounds = array<i64: 1, 128>}, {pipeline_mode = #tpu.pipeline_mode<synchronous>, transform_indices = @transform_6, window_bounds = array<i64: 128, 128>}, {pipeline_mode = #tpu.pipeline_mode<synchronous>, transform_indices = @transform_7, window_bounds = array<i64: 1, 128>}, {pipeline_mode = #tpu.pipeline_mode<synchronous>, transform_indices = @transform_8, window_bounds = array<i64: 1, 128>}, {pipeline_mode = #tpu.pipeline_mode<synchronous>, transform_indices = @transform_9, window_bounds = array<i64: 9, 128, 128>}, {pipeline_mode = #tpu.pipeline_mode<synchronous>, transform_indices = @transform_10, window_bounds = array<i64: 1, 128>}, {pipeline_mode = #tpu.pipeline_mode<synchronous>, transform_indices = @transform_11, window_bounds = array<i64: 64, 128>}, {pipeline_mode = #tpu.pipeline_mode<synchronous>, transform_indices = @transform_12, window_bounds = array<i64: 1, 128>}, {transform_indices = @transform_13, window_bounds = array<i64: 1, 16, 16, 128>}]} {
    %cst = arith.constant 1.000000e+00 : f32
    %0 = vector.broadcast %cst : f32 to vector<1x256xf32>
    %1 = tpu.iota {dimensions = array<i32: 0>} : vector<288x1xi32>
    %c16_i32 = arith.constant 16 : i32
    %c0_i32 = arith.constant 0 : i32
    %2 = arith.cmpi eq, %c16_i32, %c0_i32 : i32
    %c1_i32 = arith.constant 1 : i32
    %3 = arith.select %2, %c1_i32, %c16_i32 : i32
    %4 = vector.broadcast %3 : i32 to vector<288x1xi32>
    %5 = arith.remsi %1, %4 : vector<288x1xi32>
    %c0_i32_0 = arith.constant 0 : i32
    %6 = vector.broadcast %c0_i32_0 : i32 to vector<288x1xi32>
    %7 = arith.cmpi ne, %5, %6 : vector<288x1xi32>
    %c0_i32_1 = arith.constant 0 : i32
    %8 = vector.broadcast %c0_i32_1 : i32 to vector<288x1xi32>
    %9 = arith.cmpi slt, %5, %8 : vector<288x1xi32>
    %c0_i32_2 = arith.constant 0 : i32
    %10 = arith.cmpi slt, %3, %c0_i32_2 : i32
    %11 = vector.broadcast %10 : i1 to vector<288x1xi1>
    %12 = vector.broadcast %11 : vector<288x1xi1> to vector<288x1xi1>
    %13 = arith.xori %9, %12 : vector<288x1xi1>
    %14 = arith.andi %13, %7 : vector<288x1xi1>
    %15 = vector.broadcast %3 : i32 to vector<288x1xi32>
    %16 = arith.addi %5, %15 : vector<288x1xi32>
    %17 = arith.select %14, %16, %5 : vector<288x1xi1>, vector<288x1xi32>
    %c0_i32_3 = arith.constant 0 : i32
    %18 = vector.broadcast %c0_i32_3 : i32 to vector<288x1xi32>
    %19 = arith.cmpi ne, %17, %18 : vector<288x1xi32>
    %20 = arith.extui %19 : vector<288x1xi1> to vector<288x1xi32>
    %21 = arith.sitofp %20 : vector<288x1xi32> to vector<288x1xf32>
    %22 = arith.truncf %21 : vector<288x1xf32> to vector<288x1xbf16>
    %c15_i32 = arith.constant 15 : i32
    %23 = vector.broadcast %c15_i32 : i32 to vector<288x1xi32>
    %24 = arith.cmpi ne, %17, %23 : vector<288x1xi32>
    %25 = arith.extui %24 : vector<288x1xi1> to vector<288x1xi32>
    %26 = arith.sitofp %25 : vector<288x1xi32> to vector<288x1xf32>
    %27 = arith.truncf %26 : vector<288x1xf32> to vector<288x1xbf16>
    %c0 = arith.constant 0 : index
    %c0_4 = arith.constant 0 : index
    %c0_5 = arith.constant 0 : index
    %c0_6 = arith.constant 0 : index
    %28 = vector.load %arg1[%c0, %c0_4, %c0_5, %c0_6] : memref<1x16x16x64xf32, #tpu.memory_space<vmem>>, vector<1x16x16x64xf32>
    %29 = vector.shape_cast %28 : vector<1x16x16x64xf32> to vector<16x16x64xf32>
    %30 = vector.shape_cast %29 : vector<16x16x64xf32> to vector<256x64xf32>
    %c0_7 = arith.constant 0 : index
    %c0_8 = arith.constant 0 : index
    %31 = vector.load %arg2[%c0_7, %c0_8] : memref<64x64xf32, #tpu.memory_space<vmem>>, vector<64x64xf32>
    %c0_9 = arith.constant 0 : index
    %c0_10 = arith.constant 0 : index
    %32 = vector.load %arg3[%c0_9, %c0_10] : memref<1x64xf32, #tpu.memory_space<vmem>>, vector<1x64xf32>
    %c0_11 = arith.constant 0 : index
    %c0_12 = arith.constant 0 : index
    %33 = vector.load %arg4[%c0_11, %c0_12] : memref<1x64xf32, #tpu.memory_space<vmem>>, vector<1x64xf32>
    %cst_13 = arith.constant dense<0.000000e+00> : vector<1x64xf32>
    %34 = tpu.matmul %0, %30, %cst_13 {dimension_numbers = #tpu.dot_dimension_numbers<[1], [0], [0], [1], [0, 0, 1, 1], [], []>} : vector<1x256xf32>, vector<256x64xf32>, vector<1x64xf32> -> vector<1x64xf32>
    %35 = arith.mulf %30, %30 : vector<256x64xf32>
    %cst_14 = arith.constant dense<0.000000e+00> : vector<1x64xf32>
    %36 = tpu.matmul %0, %35, %cst_14 {dimension_numbers = #tpu.dot_dimension_numbers<[1], [0], [0], [1], [0, 0, 1, 1], [], []>} : vector<1x256xf32>, vector<256x64xf32>, vector<1x64xf32> -> vector<1x64xf32>
    %37 = tpu.concatenate %34, %36 in 0 : vector<1x64xf32>, vector<1x64xf32> -> vector<2x64xf32>
    %cst_15 = arith.constant dense<0.000000e+00> : vector<2x64xf32>
    %38 = tpu.matmul %37, %31, %cst_15 {dimension_numbers = #tpu.dot_dimension_numbers<[1], [0], [0], [1], [0, 0, 1, 1], [], []>} : vector<2x64xf32>, vector<64x64xf32>, vector<2x64xf32> -> vector<2x64xf32>
    %cst_16 = arith.constant 0.001953125 : f32
    %39 = vector.broadcast %cst_16 : f32 to vector<2x64xf32>
    %40 = arith.mulf %38, %39 : vector<2x64xf32>
    %41 = vector.extract_strided_slice %40 {offsets = [0, 0], sizes = [1, 64], strides = [1, 1]} : vector<2x64xf32> to vector<1x64xf32>
    %42 = vector.extract_strided_slice %40 {offsets = [1, 0], sizes = [1, 64], strides = [1, 1]} : vector<2x64xf32> to vector<1x64xf32>
    %43 = arith.mulf %41, %41 : vector<1x64xf32>
    %44 = arith.subf %42, %43 : vector<1x64xf32>
    %cst_17 = arith.constant 9.99999997E-7 : f32
    %45 = vector.broadcast %cst_17 : f32 to vector<1x64xf32>
    %46 = arith.addf %44, %45 : vector<1x64xf32>
    %47 = math.rsqrt %46 : vector<1x64xf32>
    %48 = vector.broadcast %41 : vector<1x64xf32> to vector<256x64xf32>
    %49 = arith.subf %30, %48 : vector<256x64xf32>
    %50 = arith.mulf %47, %32 : vector<1x64xf32>
    %51 = vector.broadcast %50 : vector<1x64xf32> to vector<256x64xf32>
    %52 = arith.mulf %49, %51 : vector<256x64xf32>
    %53 = vector.broadcast %33 : vector<1x64xf32> to vector<256x64xf32>
    %54 = arith.addf %52, %53 : vector<256x64xf32>
    %55 = arith.negf %54 : vector<256x64xf32>
    %56 = math.exp %55 : vector<256x64xf32>
    %cst_18 = arith.constant 1.000000e+00 : f32
    %57 = vector.broadcast %cst_18 : f32 to vector<256x64xf32>
    %58 = arith.addf %57, %56 : vector<256x64xf32>
    %59 = arith.divf %57, %58 : vector<256x64xf32>
    %60 = arith.mulf %54, %59 : vector<256x64xf32>
    %61 = arith.truncf %60 : vector<256x64xf32> to vector<256x64xbf16>
    %c0_19 = arith.constant 0 : index
    %c0_20 = arith.constant 0 : index
    %62 = vector.load %arg6[%c0_19, %c0_20] : memref<1x128xf32, #tpu.memory_space<vmem>>, vector<1x128xf32>
    %cst_21 = arith.constant 0.000000e+00 : bf16
    %63 = vector.broadcast %cst_21 : bf16 to vector<16x64xbf16>
    %cst_22 = arith.constant 0.000000e+00 : bf16
    %64 = vector.broadcast %cst_22 : bf16 to vector<16x64xbf16>
    %65 = tpu.concatenate %63, %61, %64 in 0 : vector<16x64xbf16>, vector<256x64xbf16>, vector<16x64xbf16> -> vector<288x64xbf16>
    %cst_23 = arith.constant 0.000000e+00 : bf16
    %66 = vector.broadcast %cst_23 : bf16 to vector<17x64xbf16>
    %cst_24 = arith.constant 0.000000e+00 : bf16
    %67 = vector.broadcast %cst_24 : bf16 to vector<15x64xbf16>
    %68 = tpu.concatenate %66, %61, %67 in 0 : vector<17x64xbf16>, vector<256x64xbf16>, vector<15x64xbf16> -> vector<288x64xbf16>
    %69 = vector.broadcast %22 : vector<288x1xbf16> to vector<288x64xbf16>
    %70 = arith.mulf %68, %69 : vector<288x64xbf16>
    %cst_25 = arith.constant 0.000000e+00 : bf16
    %71 = vector.broadcast %cst_25 : bf16 to vector<15x64xbf16>
    %cst_26 = arith.constant 0.000000e+00 : bf16
    %72 = vector.broadcast %cst_26 : bf16 to vector<17x64xbf16>
    %73 = tpu.concatenate %71, %61, %72 in 0 : vector<15x64xbf16>, vector<256x64xbf16>, vector<17x64xbf16> -> vector<288x64xbf16>
    %74 = vector.broadcast %27 : vector<288x1xbf16> to vector<288x64xbf16>
    %75 = arith.mulf %73, %74 : vector<288x64xbf16>
    %cst_27 = arith.constant 0.000000e+00 : f32
    %76 = vector.broadcast %cst_27 : f32 to vector<256x128xf32>
    %77 = vector.extract_strided_slice %70 {offsets = [0, 0], sizes = [256, 64], strides = [1, 1]} : vector<288x64xbf16> to vector<256x64xbf16>
    %c0_28 = arith.constant 0 : index
    %c0_29 = arith.constant 0 : index
    %c0_30 = arith.constant 0 : index
    %78 = vector.load %arg5[%c0_28, %c0_29, %c0_30] : memref<9x64x128xbf16, #tpu.memory_space<vmem>>, vector<1x64x128xbf16>
    %79 = vector.shape_cast %78 : vector<1x64x128xbf16> to vector<64x128xbf16>
    %cst_31 = arith.constant dense<0.000000e+00> : vector<256x128xf32>
    %80 = tpu.matmul %77, %79, %cst_31 {dimension_numbers = #tpu.dot_dimension_numbers<[1], [0], [0], [1], [0, 0, 1, 1], [], []>} : vector<256x64xbf16>, vector<64x128xbf16>, vector<256x128xf32> -> vector<256x128xf32>
    %81 = arith.addf %76, %80 : vector<256x128xf32>
    %82 = vector.extract_strided_slice %65 {offsets = [0, 0], sizes = [256, 64], strides = [1, 1]} : vector<288x64xbf16> to vector<256x64xbf16>
    %c1 = arith.constant 1 : index
    %c0_32 = arith.constant 0 : index
    %c0_33 = arith.constant 0 : index
    %83 = vector.load %arg5[%c1, %c0_32, %c0_33] : memref<9x64x128xbf16, #tpu.memory_space<vmem>>, vector<1x64x128xbf16>
    %84 = vector.shape_cast %83 : vector<1x64x128xbf16> to vector<64x128xbf16>
    %cst_34 = arith.constant dense<0.000000e+00> : vector<256x128xf32>
    %85 = tpu.matmul %82, %84, %cst_34 {dimension_numbers = #tpu.dot_dimension_numbers<[1], [0], [0], [1], [0, 0, 1, 1], [], []>} : vector<256x64xbf16>, vector<64x128xbf16>, vector<256x128xf32> -> vector<256x128xf32>
    %86 = arith.addf %81, %85 : vector<256x128xf32>
    %87 = vector.extract_strided_slice %75 {offsets = [0, 0], sizes = [256, 64], strides = [1, 1]} : vector<288x64xbf16> to vector<256x64xbf16>
    %c2 = arith.constant 2 : index
    %c0_35 = arith.constant 0 : index
    %c0_36 = arith.constant 0 : index
    %88 = vector.load %arg5[%c2, %c0_35, %c0_36] : memref<9x64x128xbf16, #tpu.memory_space<vmem>>, vector<1x64x128xbf16>
    %89 = vector.shape_cast %88 : vector<1x64x128xbf16> to vector<64x128xbf16>
    %cst_37 = arith.constant dense<0.000000e+00> : vector<256x128xf32>
    %90 = tpu.matmul %87, %89, %cst_37 {dimension_numbers = #tpu.dot_dimension_numbers<[1], [0], [0], [1], [0, 0, 1, 1], [], []>} : vector<256x64xbf16>, vector<64x128xbf16>, vector<256x128xf32> -> vector<256x128xf32>
    %91 = arith.addf %86, %90 : vector<256x128xf32>
    %92 = vector.extract_strided_slice %70 {offsets = [16, 0], sizes = [256, 64], strides = [1, 1]} : vector<288x64xbf16> to vector<256x64xbf16>
    %c3 = arith.constant 3 : index
    %c0_38 = arith.constant 0 : index
    %c0_39 = arith.constant 0 : index
    %93 = vector.load %arg5[%c3, %c0_38, %c0_39] : memref<9x64x128xbf16, #tpu.memory_space<vmem>>, vector<1x64x128xbf16>
    %94 = vector.shape_cast %93 : vector<1x64x128xbf16> to vector<64x128xbf16>
    %cst_40 = arith.constant dense<0.000000e+00> : vector<256x128xf32>
    %95 = tpu.matmul %92, %94, %cst_40 {dimension_numbers = #tpu.dot_dimension_numbers<[1], [0], [0], [1], [0, 0, 1, 1], [], []>} : vector<256x64xbf16>, vector<64x128xbf16>, vector<256x128xf32> -> vector<256x128xf32>
    %96 = arith.addf %91, %95 : vector<256x128xf32>
    %97 = vector.extract_strided_slice %65 {offsets = [16, 0], sizes = [256, 64], strides = [1, 1]} : vector<288x64xbf16> to vector<256x64xbf16>
    %c4 = arith.constant 4 : index
    %c0_41 = arith.constant 0 : index
    %c0_42 = arith.constant 0 : index
    %98 = vector.load %arg5[%c4, %c0_41, %c0_42] : memref<9x64x128xbf16, #tpu.memory_space<vmem>>, vector<1x64x128xbf16>
    %99 = vector.shape_cast %98 : vector<1x64x128xbf16> to vector<64x128xbf16>
    %cst_43 = arith.constant dense<0.000000e+00> : vector<256x128xf32>
    %100 = tpu.matmul %97, %99, %cst_43 {dimension_numbers = #tpu.dot_dimension_numbers<[1], [0], [0], [1], [0, 0, 1, 1], [], []>} : vector<256x64xbf16>, vector<64x128xbf16>, vector<256x128xf32> -> vector<256x128xf32>
    %101 = arith.addf %96, %100 : vector<256x128xf32>
    %102 = vector.extract_strided_slice %75 {offsets = [16, 0], sizes = [256, 64], strides = [1, 1]} : vector<288x64xbf16> to vector<256x64xbf16>
    %c5 = arith.constant 5 : index
    %c0_44 = arith.constant 0 : index
    %c0_45 = arith.constant 0 : index
    %103 = vector.load %arg5[%c5, %c0_44, %c0_45] : memref<9x64x128xbf16, #tpu.memory_space<vmem>>, vector<1x64x128xbf16>
    %104 = vector.shape_cast %103 : vector<1x64x128xbf16> to vector<64x128xbf16>
    %cst_46 = arith.constant dense<0.000000e+00> : vector<256x128xf32>
    %105 = tpu.matmul %102, %104, %cst_46 {dimension_numbers = #tpu.dot_dimension_numbers<[1], [0], [0], [1], [0, 0, 1, 1], [], []>} : vector<256x64xbf16>, vector<64x128xbf16>, vector<256x128xf32> -> vector<256x128xf32>
    %106 = arith.addf %101, %105 : vector<256x128xf32>
    %107 = vector.extract_strided_slice %70 {offsets = [32, 0], sizes = [256, 64], strides = [1, 1]} : vector<288x64xbf16> to vector<256x64xbf16>
    %c6 = arith.constant 6 : index
    %c0_47 = arith.constant 0 : index
    %c0_48 = arith.constant 0 : index
    %108 = vector.load %arg5[%c6, %c0_47, %c0_48] : memref<9x64x128xbf16, #tpu.memory_space<vmem>>, vector<1x64x128xbf16>
    %109 = vector.shape_cast %108 : vector<1x64x128xbf16> to vector<64x128xbf16>
    %cst_49 = arith.constant dense<0.000000e+00> : vector<256x128xf32>
    %110 = tpu.matmul %107, %109, %cst_49 {dimension_numbers = #tpu.dot_dimension_numbers<[1], [0], [0], [1], [0, 0, 1, 1], [], []>} : vector<256x64xbf16>, vector<64x128xbf16>, vector<256x128xf32> -> vector<256x128xf32>
    %111 = arith.addf %106, %110 : vector<256x128xf32>
    %112 = vector.extract_strided_slice %65 {offsets = [32, 0], sizes = [256, 64], strides = [1, 1]} : vector<288x64xbf16> to vector<256x64xbf16>
    %c7 = arith.constant 7 : index
    %c0_50 = arith.constant 0 : index
    %c0_51 = arith.constant 0 : index
    %113 = vector.load %arg5[%c7, %c0_50, %c0_51] : memref<9x64x128xbf16, #tpu.memory_space<vmem>>, vector<1x64x128xbf16>
    %114 = vector.shape_cast %113 : vector<1x64x128xbf16> to vector<64x128xbf16>
    %cst_52 = arith.constant dense<0.000000e+00> : vector<256x128xf32>
    %115 = tpu.matmul %112, %114, %cst_52 {dimension_numbers = #tpu.dot_dimension_numbers<[1], [0], [0], [1], [0, 0, 1, 1], [], []>} : vector<256x64xbf16>, vector<64x128xbf16>, vector<256x128xf32> -> vector<256x128xf32>
    %116 = arith.addf %111, %115 : vector<256x128xf32>
    %117 = vector.extract_strided_slice %75 {offsets = [32, 0], sizes = [256, 64], strides = [1, 1]} : vector<288x64xbf16> to vector<256x64xbf16>
    %c8 = arith.constant 8 : index
    %c0_53 = arith.constant 0 : index
    %c0_54 = arith.constant 0 : index
    %118 = vector.load %arg5[%c8, %c0_53, %c0_54] : memref<9x64x128xbf16, #tpu.memory_space<vmem>>, vector<1x64x128xbf16>
    %119 = vector.shape_cast %118 : vector<1x64x128xbf16> to vector<64x128xbf16>
    %cst_55 = arith.constant dense<0.000000e+00> : vector<256x128xf32>
    %120 = tpu.matmul %117, %119, %cst_55 {dimension_numbers = #tpu.dot_dimension_numbers<[1], [0], [0], [1], [0, 0, 1, 1], [], []>} : vector<256x64xbf16>, vector<64x128xbf16>, vector<256x128xf32> -> vector<256x128xf32>
    %121 = arith.addf %116, %120 : vector<256x128xf32>
    %122 = vector.broadcast %62 : vector<1x128xf32> to vector<256x128xf32>
    %123 = arith.addf %121, %122 : vector<256x128xf32>
    %c0_56 = arith.constant 0 : index
    %c0_57 = arith.constant 0 : index
    %124 = vector.load %arg7[%c0_56, %c0_57] : memref<128x128xf32, #tpu.memory_space<vmem>>, vector<128x128xf32>
    %c0_58 = arith.constant 0 : index
    %c0_59 = arith.constant 0 : index
    %125 = vector.load %arg8[%c0_58, %c0_59] : memref<1x128xf32, #tpu.memory_space<vmem>>, vector<1x128xf32>
    %c0_60 = arith.constant 0 : index
    %c0_61 = arith.constant 0 : index
    %126 = vector.load %arg9[%c0_60, %c0_61] : memref<1x128xf32, #tpu.memory_space<vmem>>, vector<1x128xf32>
    %cst_62 = arith.constant dense<0.000000e+00> : vector<1x128xf32>
    %127 = tpu.matmul %0, %123, %cst_62 {dimension_numbers = #tpu.dot_dimension_numbers<[1], [0], [0], [1], [0, 0, 1, 1], [], []>} : vector<1x256xf32>, vector<256x128xf32>, vector<1x128xf32> -> vector<1x128xf32>
    %128 = arith.mulf %123, %123 : vector<256x128xf32>
    %cst_63 = arith.constant dense<0.000000e+00> : vector<1x128xf32>
    %129 = tpu.matmul %0, %128, %cst_63 {dimension_numbers = #tpu.dot_dimension_numbers<[1], [0], [0], [1], [0, 0, 1, 1], [], []>} : vector<1x256xf32>, vector<256x128xf32>, vector<1x128xf32> -> vector<1x128xf32>
    %130 = tpu.concatenate %127, %129 in 0 : vector<1x128xf32>, vector<1x128xf32> -> vector<2x128xf32>
    %cst_64 = arith.constant dense<0.000000e+00> : vector<2x128xf32>
    %131 = tpu.matmul %130, %124, %cst_64 {dimension_numbers = #tpu.dot_dimension_numbers<[1], [0], [0], [1], [0, 0, 1, 1], [], []>} : vector<2x128xf32>, vector<128x128xf32>, vector<2x128xf32> -> vector<2x128xf32>
    %cst_65 = arith.constant 9.765625E-4 : f32
    %132 = vector.broadcast %cst_65 : f32 to vector<2x128xf32>
    %133 = arith.mulf %131, %132 : vector<2x128xf32>
    %134 = vector.extract_strided_slice %133 {offsets = [0, 0], sizes = [1, 128], strides = [1, 1]} : vector<2x128xf32> to vector<1x128xf32>
    %135 = vector.extract_strided_slice %133 {offsets = [1, 0], sizes = [1, 128], strides = [1, 1]} : vector<2x128xf32> to vector<1x128xf32>
    %136 = arith.mulf %134, %134 : vector<1x128xf32>
    %137 = arith.subf %135, %136 : vector<1x128xf32>
    %cst_66 = arith.constant 9.99999997E-7 : f32
    %138 = vector.broadcast %cst_66 : f32 to vector<1x128xf32>
    %139 = arith.addf %137, %138 : vector<1x128xf32>
    %140 = math.rsqrt %139 : vector<1x128xf32>
    %141 = vector.broadcast %134 : vector<1x128xf32> to vector<256x128xf32>
    %142 = arith.subf %123, %141 : vector<256x128xf32>
    %143 = arith.mulf %140, %125 : vector<1x128xf32>
    %144 = vector.broadcast %143 : vector<1x128xf32> to vector<256x128xf32>
    %145 = arith.mulf %142, %144 : vector<256x128xf32>
    %146 = vector.broadcast %126 : vector<1x128xf32> to vector<256x128xf32>
    %147 = arith.addf %145, %146 : vector<256x128xf32>
    %148 = arith.negf %147 : vector<256x128xf32>
    %149 = math.exp %148 : vector<256x128xf32>
    %cst_67 = arith.constant 1.000000e+00 : f32
    %150 = vector.broadcast %cst_67 : f32 to vector<256x128xf32>
    %151 = arith.addf %150, %149 : vector<256x128xf32>
    %152 = arith.divf %150, %151 : vector<256x128xf32>
    %153 = arith.mulf %147, %152 : vector<256x128xf32>
    %154 = arith.truncf %153 : vector<256x128xf32> to vector<256x128xbf16>
    %c0_68 = arith.constant 0 : index
    %c0_69 = arith.constant 0 : index
    %155 = vector.load %arg11[%c0_68, %c0_69] : memref<1x128xf32, #tpu.memory_space<vmem>>, vector<1x128xf32>
    %cst_70 = arith.constant 0.000000e+00 : bf16
    %156 = vector.broadcast %cst_70 : bf16 to vector<16x128xbf16>
    %cst_71 = arith.constant 0.000000e+00 : bf16
    %157 = vector.broadcast %cst_71 : bf16 to vector<16x128xbf16>
    %158 = tpu.concatenate %156, %154, %157 in 0 : vector<16x128xbf16>, vector<256x128xbf16>, vector<16x128xbf16> -> vector<288x128xbf16>
    %cst_72 = arith.constant 0.000000e+00 : bf16
    %159 = vector.broadcast %cst_72 : bf16 to vector<17x128xbf16>
    %cst_73 = arith.constant 0.000000e+00 : bf16
    %160 = vector.broadcast %cst_73 : bf16 to vector<15x128xbf16>
    %161 = tpu.concatenate %159, %154, %160 in 0 : vector<17x128xbf16>, vector<256x128xbf16>, vector<15x128xbf16> -> vector<288x128xbf16>
    %162 = vector.broadcast %22 : vector<288x1xbf16> to vector<288x128xbf16>
    %163 = arith.mulf %161, %162 : vector<288x128xbf16>
    %cst_74 = arith.constant 0.000000e+00 : bf16
    %164 = vector.broadcast %cst_74 : bf16 to vector<15x128xbf16>
    %cst_75 = arith.constant 0.000000e+00 : bf16
    %165 = vector.broadcast %cst_75 : bf16 to vector<17x128xbf16>
    %166 = tpu.concatenate %164, %154, %165 in 0 : vector<15x128xbf16>, vector<256x128xbf16>, vector<17x128xbf16> -> vector<288x128xbf16>
    %167 = vector.broadcast %27 : vector<288x1xbf16> to vector<288x128xbf16>
    %168 = arith.mulf %166, %167 : vector<288x128xbf16>
    %cst_76 = arith.constant 0.000000e+00 : f32
    %169 = vector.broadcast %cst_76 : f32 to vector<256x128xf32>
    %170 = vector.extract_strided_slice %163 {offsets = [0, 0], sizes = [256, 128], strides = [1, 1]} : vector<288x128xbf16> to vector<256x128xbf16>
    %c0_77 = arith.constant 0 : index
    %c0_78 = arith.constant 0 : index
    %c0_79 = arith.constant 0 : index
    %171 = vector.load %arg10[%c0_77, %c0_78, %c0_79] : memref<9x128x128xbf16, #tpu.memory_space<vmem>>, vector<1x128x128xbf16>
    %172 = vector.shape_cast %171 : vector<1x128x128xbf16> to vector<128x128xbf16>
    %cst_80 = arith.constant dense<0.000000e+00> : vector<256x128xf32>
    %173 = tpu.matmul %170, %172, %cst_80 {dimension_numbers = #tpu.dot_dimension_numbers<[1], [0], [0], [1], [0, 0, 1, 1], [], []>} : vector<256x128xbf16>, vector<128x128xbf16>, vector<256x128xf32> -> vector<256x128xf32>
    %174 = arith.addf %169, %173 : vector<256x128xf32>
    %175 = vector.extract_strided_slice %158 {offsets = [0, 0], sizes = [256, 128], strides = [1, 1]} : vector<288x128xbf16> to vector<256x128xbf16>
    %c1_81 = arith.constant 1 : index
    %c0_82 = arith.constant 0 : index
    %c0_83 = arith.constant 0 : index
    %176 = vector.load %arg10[%c1_81, %c0_82, %c0_83] : memref<9x128x128xbf16, #tpu.memory_space<vmem>>, vector<1x128x128xbf16>
    %177 = vector.shape_cast %176 : vector<1x128x128xbf16> to vector<128x128xbf16>
    %cst_84 = arith.constant dense<0.000000e+00> : vector<256x128xf32>
    %178 = tpu.matmul %175, %177, %cst_84 {dimension_numbers = #tpu.dot_dimension_numbers<[1], [0], [0], [1], [0, 0, 1, 1], [], []>} : vector<256x128xbf16>, vector<128x128xbf16>, vector<256x128xf32> -> vector<256x128xf32>
    %179 = arith.addf %174, %178 : vector<256x128xf32>
    %180 = vector.extract_strided_slice %168 {offsets = [0, 0], sizes = [256, 128], strides = [1, 1]} : vector<288x128xbf16> to vector<256x128xbf16>
    %c2_85 = arith.constant 2 : index
    %c0_86 = arith.constant 0 : index
    %c0_87 = arith.constant 0 : index
    %181 = vector.load %arg10[%c2_85, %c0_86, %c0_87] : memref<9x128x128xbf16, #tpu.memory_space<vmem>>, vector<1x128x128xbf16>
    %182 = vector.shape_cast %181 : vector<1x128x128xbf16> to vector<128x128xbf16>
    %cst_88 = arith.constant dense<0.000000e+00> : vector<256x128xf32>
    %183 = tpu.matmul %180, %182, %cst_88 {dimension_numbers = #tpu.dot_dimension_numbers<[1], [0], [0], [1], [0, 0, 1, 1], [], []>} : vector<256x128xbf16>, vector<128x128xbf16>, vector<256x128xf32> -> vector<256x128xf32>
    %184 = arith.addf %179, %183 : vector<256x128xf32>
    %185 = vector.extract_strided_slice %163 {offsets = [16, 0], sizes = [256, 128], strides = [1, 1]} : vector<288x128xbf16> to vector<256x128xbf16>
    %c3_89 = arith.constant 3 : index
    %c0_90 = arith.constant 0 : index
    %c0_91 = arith.constant 0 : index
    %186 = vector.load %arg10[%c3_89, %c0_90, %c0_91] : memref<9x128x128xbf16, #tpu.memory_space<vmem>>, vector<1x128x128xbf16>
    %187 = vector.shape_cast %186 : vector<1x128x128xbf16> to vector<128x128xbf16>
    %cst_92 = arith.constant dense<0.000000e+00> : vector<256x128xf32>
    %188 = tpu.matmul %185, %187, %cst_92 {dimension_numbers = #tpu.dot_dimension_numbers<[1], [0], [0], [1], [0, 0, 1, 1], [], []>} : vector<256x128xbf16>, vector<128x128xbf16>, vector<256x128xf32> -> vector<256x128xf32>
    %189 = arith.addf %184, %188 : vector<256x128xf32>
    %190 = vector.extract_strided_slice %158 {offsets = [16, 0], sizes = [256, 128], strides = [1, 1]} : vector<288x128xbf16> to vector<256x128xbf16>
    %c4_93 = arith.constant 4 : index
    %c0_94 = arith.constant 0 : index
    %c0_95 = arith.constant 0 : index
    %191 = vector.load %arg10[%c4_93, %c0_94, %c0_95] : memref<9x128x128xbf16, #tpu.memory_space<vmem>>, vector<1x128x128xbf16>
    %192 = vector.shape_cast %191 : vector<1x128x128xbf16> to vector<128x128xbf16>
    %cst_96 = arith.constant dense<0.000000e+00> : vector<256x128xf32>
    %193 = tpu.matmul %190, %192, %cst_96 {dimension_numbers = #tpu.dot_dimension_numbers<[1], [0], [0], [1], [0, 0, 1, 1], [], []>} : vector<256x128xbf16>, vector<128x128xbf16>, vector<256x128xf32> -> vector<256x128xf32>
    %194 = arith.addf %189, %193 : vector<256x128xf32>
    %195 = vector.extract_strided_slice %168 {offsets = [16, 0], sizes = [256, 128], strides = [1, 1]} : vector<288x128xbf16> to vector<256x128xbf16>
    %c5_97 = arith.constant 5 : index
    %c0_98 = arith.constant 0 : index
    %c0_99 = arith.constant 0 : index
    %196 = vector.load %arg10[%c5_97, %c0_98, %c0_99] : memref<9x128x128xbf16, #tpu.memory_space<vmem>>, vector<1x128x128xbf16>
    %197 = vector.shape_cast %196 : vector<1x128x128xbf16> to vector<128x128xbf16>
    %cst_100 = arith.constant dense<0.000000e+00> : vector<256x128xf32>
    %198 = tpu.matmul %195, %197, %cst_100 {dimension_numbers = #tpu.dot_dimension_numbers<[1], [0], [0], [1], [0, 0, 1, 1], [], []>} : vector<256x128xbf16>, vector<128x128xbf16>, vector<256x128xf32> -> vector<256x128xf32>
    %199 = arith.addf %194, %198 : vector<256x128xf32>
    %200 = vector.extract_strided_slice %163 {offsets = [32, 0], sizes = [256, 128], strides = [1, 1]} : vector<288x128xbf16> to vector<256x128xbf16>
    %c6_101 = arith.constant 6 : index
    %c0_102 = arith.constant 0 : index
    %c0_103 = arith.constant 0 : index
    %201 = vector.load %arg10[%c6_101, %c0_102, %c0_103] : memref<9x128x128xbf16, #tpu.memory_space<vmem>>, vector<1x128x128xbf16>
    %202 = vector.shape_cast %201 : vector<1x128x128xbf16> to vector<128x128xbf16>
    %cst_104 = arith.constant dense<0.000000e+00> : vector<256x128xf32>
    %203 = tpu.matmul %200, %202, %cst_104 {dimension_numbers = #tpu.dot_dimension_numbers<[1], [0], [0], [1], [0, 0, 1, 1], [], []>} : vector<256x128xbf16>, vector<128x128xbf16>, vector<256x128xf32> -> vector<256x128xf32>
    %204 = arith.addf %199, %203 : vector<256x128xf32>
    %205 = vector.extract_strided_slice %158 {offsets = [32, 0], sizes = [256, 128], strides = [1, 1]} : vector<288x128xbf16> to vector<256x128xbf16>
    %c7_105 = arith.constant 7 : index
    %c0_106 = arith.constant 0 : index
    %c0_107 = arith.constant 0 : index
    %206 = vector.load %arg10[%c7_105, %c0_106, %c0_107] : memref<9x128x128xbf16, #tpu.memory_space<vmem>>, vector<1x128x128xbf16>
    %207 = vector.shape_cast %206 : vector<1x128x128xbf16> to vector<128x128xbf16>
    %cst_108 = arith.constant dense<0.000000e+00> : vector<256x128xf32>
    %208 = tpu.matmul %205, %207, %cst_108 {dimension_numbers = #tpu.dot_dimension_numbers<[1], [0], [0], [1], [0, 0, 1, 1], [], []>} : vector<256x128xbf16>, vector<128x128xbf16>, vector<256x128xf32> -> vector<256x128xf32>
    %209 = arith.addf %204, %208 : vector<256x128xf32>
    %210 = vector.extract_strided_slice %168 {offsets = [32, 0], sizes = [256, 128], strides = [1, 1]} : vector<288x128xbf16> to vector<256x128xbf16>
    %c8_109 = arith.constant 8 : index
    %c0_110 = arith.constant 0 : index
    %c0_111 = arith.constant 0 : index
    %211 = vector.load %arg10[%c8_109, %c0_110, %c0_111] : memref<9x128x128xbf16, #tpu.memory_space<vmem>>, vector<1x128x128xbf16>
    %212 = vector.shape_cast %211 : vector<1x128x128xbf16> to vector<128x128xbf16>
    %cst_112 = arith.constant dense<0.000000e+00> : vector<256x128xf32>
    %213 = tpu.matmul %210, %212, %cst_112 {dimension_numbers = #tpu.dot_dimension_numbers<[1], [0], [0], [1], [0, 0, 1, 1], [], []>} : vector<256x128xbf16>, vector<128x128xbf16>, vector<256x128xf32> -> vector<256x128xf32>
    %214 = arith.addf %209, %213 : vector<256x128xf32>
    %215 = vector.broadcast %155 : vector<1x128xf32> to vector<256x128xf32>
    %216 = arith.addf %214, %215 : vector<256x128xf32>
    %c0_113 = arith.constant 0 : index
    %c0_114 = arith.constant 0 : index
    %c0_115 = arith.constant 0 : index
    %c0_116 = arith.constant 0 : index
    %217 = vector.load %arg1[%c0_113, %c0_114, %c0_115, %c0_116] : memref<1x16x16x64xf32, #tpu.memory_space<vmem>>, vector<1x16x16x64xf32>
    %218 = vector.shape_cast %217 : vector<1x16x16x64xf32> to vector<16x16x64xf32>
    %219 = vector.shape_cast %218 : vector<16x16x64xf32> to vector<256x64xf32>
    %220 = arith.truncf %219 : vector<256x64xf32> to vector<256x64xbf16>
    %c0_117 = arith.constant 0 : index
    %c0_118 = arith.constant 0 : index
    %221 = vector.load %arg12[%c0_117, %c0_118] : memref<64x128xbf16, #tpu.memory_space<vmem>>, vector<64x128xbf16>
    %cst_119 = arith.constant dense<0.000000e+00> : vector<256x128xf32>
    %222 = tpu.matmul %220, %221, %cst_119 {dimension_numbers = #tpu.dot_dimension_numbers<[1], [0], [0], [1], [0, 0, 1, 1], [], []>} : vector<256x64xbf16>, vector<64x128xbf16>, vector<256x128xf32> -> vector<256x128xf32>
    %c0_120 = arith.constant 0 : index
    %c0_121 = arith.constant 0 : index
    %223 = vector.load %arg13[%c0_120, %c0_121] : memref<1x128xf32, #tpu.memory_space<vmem>>, vector<1x128xf32>
    %224 = vector.broadcast %223 : vector<1x128xf32> to vector<256x128xf32>
    %225 = arith.addf %222, %224 : vector<256x128xf32>
    %226 = arith.addf %225, %216 : vector<256x128xf32>
    %227 = vector.shape_cast %226 : vector<256x128xf32> to vector<16x16x128xf32>
    %c0_122 = arith.constant 0 : index
    %c0_123 = arith.constant 0 : index
    %c0_124 = arith.constant 0 : index
    %c0_125 = arith.constant 0 : index
    %228 = vector.load %arg14[%c0_122, %c0_123, %c0_124, %c0_125] : memref<1x16x16x128xf32, #tpu.memory_space<vmem>>, vector<1x16x16x128xf32>
    %229 = vector.shape_cast %228 : vector<1x16x16x128xf32> to vector<16x16x128xf32>
    %230 = vector.shape_cast %227 : vector<16x16x128xf32> to vector<1x16x16x128xf32>
    tpu.vector_store %arg14[%c0_122, %c0_123, %c0_124, %c0_125], %230 {strides = array<i32>} : memref<1x16x16x128xf32, #tpu.memory_space<vmem>>, vector<1x16x16x128xf32>,
    return
  }
  func.func @transform_0(%arg0: i32) -> (i32, i32, i32, i32) {
    %c0_i32 = arith.constant 0 : i32
    %c0_i32_0 = arith.constant 0 : i32
    %c0_i32_1 = arith.constant 0 : i32
    %c0_i32_2 = arith.constant 0 : i32
    return %arg0, %c0_i32, %c0_i32_0, %c0_i32_1 : i32, i32, i32, i32
  }
  func.func @transform_1(%arg0: i32) -> (i32, i32) {
    %c0_i32 = arith.constant 0 : i32
    %c0_i32_0 = arith.constant 0 : i32
    %c0_i32_1 = arith.constant 0 : i32
    return %c0_i32, %c0_i32_0 : i32, i32
  }
  func.func @transform_2(%arg0: i32) -> (i32, i32) {
    %c0_i32 = arith.constant 0 : i32
    %c0_i32_0 = arith.constant 0 : i32
    %c0_i32_1 = arith.constant 0 : i32
    return %c0_i32, %c0_i32_0 : i32, i32
  }
  func.func @transform_3(%arg0: i32) -> (i32, i32) {
    %c0_i32 = arith.constant 0 : i32
    %c0_i32_0 = arith.constant 0 : i32
    %c0_i32_1 = arith.constant 0 : i32
    return %c0_i32, %c0_i32_0 : i32, i32
  }
  func.func @transform_4(%arg0: i32) -> (i32, i32, i32) {
    %c0_i32 = arith.constant 0 : i32
    %c0_i32_0 = arith.constant 0 : i32
    %c0_i32_1 = arith.constant 0 : i32
    %c0_i32_2 = arith.constant 0 : i32
    return %c0_i32, %c0_i32_0, %c0_i32_1 : i32, i32, i32
  }
  func.func @transform_5(%arg0: i32) -> (i32, i32) {
    %c0_i32 = arith.constant 0 : i32
    %c0_i32_0 = arith.constant 0 : i32
    %c0_i32_1 = arith.constant 0 : i32
    return %c0_i32, %c0_i32_0 : i32, i32
  }
  func.func @transform_6(%arg0: i32) -> (i32, i32) {
    %c0_i32 = arith.constant 0 : i32
    %c0_i32_0 = arith.constant 0 : i32
    %c0_i32_1 = arith.constant 0 : i32
    return %c0_i32, %c0_i32_0 : i32, i32
  }
  func.func @transform_7(%arg0: i32) -> (i32, i32) {
    %c0_i32 = arith.constant 0 : i32
    %c0_i32_0 = arith.constant 0 : i32
    %c0_i32_1 = arith.constant 0 : i32
    return %c0_i32, %c0_i32_0 : i32, i32
  }
  func.func @transform_8(%arg0: i32) -> (i32, i32) {
    %c0_i32 = arith.constant 0 : i32
    %c0_i32_0 = arith.constant 0 : i32
    %c0_i32_1 = arith.constant 0 : i32
    return %c0_i32, %c0_i32_0 : i32, i32
  }
  func.func @transform_9(%arg0: i32) -> (i32, i32, i32) {
    %c0_i32 = arith.constant 0 : i32
    %c0_i32_0 = arith.constant 0 : i32
    %c0_i32_1 = arith.constant 0 : i32
    %c0_i32_2 = arith.constant 0 : i32
    return %c0_i32, %c0_i32_0, %c0_i32_1 : i32, i32, i32
  }
  func.func @transform_10(%arg0: i32) -> (i32, i32) {
    %c0_i32 = arith.constant 0 : i32
    %c0_i32_0 = arith.constant 0 : i32
    %c0_i32_1 = arith.constant 0 : i32
    return %c0_i32, %c0_i32_0 : i32, i32
  }
  func.func @transform_11(%arg0: i32) -> (i32, i32) {
    %c0_i32 = arith.constant 0 : i32
    %c0_i32_0 = arith.constant 0 : i32
    %c0_i32_1 = arith.constant 0 : i32
    return %c0_i32, %c0_i32_0 : i32, i32
  }
  func.func @transform_12(%arg0: i32) -> (i32, i32) {
    %c0_i32 = arith.constant 0 : i32
    %c0_i32_0 = arith.constant 0 : i32
    %c0_i32_1 = arith.constant 0 : i32
    return %c0_i32, %c0_i32_0 : i32, i32
  }
  func.func @transform_13(%arg0: i32) -> (i32, i32, i32, i32) {
    %c0_i32 = arith.constant 0 : i32
    %c0_i32_0 = arith.constant 0 : i32
    %c0_i32_1 = arith.constant 0 : i32
    %c0_i32_2 = arith.constant 0 : i32
    return %arg0, %c0_i32, %c0_i32_0, %c0_i32_1 : i32, i32, i32, i32
  }
}

module attributes {stable_mosaic.version = 11 : i64} {
  func.func @kernel(%arg0: i32, %arg1: memref<1x16x16x64xf32, #tpu.memory_space<vmem>>, %arg2: memref<64x64xf32, #tpu.memory_space<vmem>>, %arg3: memref<1x64xf32, #tpu.memory_space<vmem>>, %arg4: memref<1x64xf32, #tpu.memory_space<vmem>>, %arg5: memref<9x64x128xbf16, #tpu.memory_space<vmem>>, %arg6: memref<1x128xf32, #tpu.memory_space<vmem>>, %arg7: memref<128x128xf32, #tpu.memory_space<vmem>>, %arg8: memref<1x128xf32, #tpu.memory_space<vmem>>, %arg9: memref<1x128xf32, #tpu.memory_space<vmem>>, %arg10: memref<9x128x128xbf16, #tpu.memory_space<vmem>>, %arg11: memref<1x128xf32, #tpu.memory_space<vmem>>, %arg12: memref<64x128xbf16, #tpu.memory_space<vmem>>, %arg13: memref<1x128xf32, #tpu.memory_space<vmem>>, %arg14: memref<1x16x16x128xf32, #tpu.memory_space<vmem>>) attributes {dimension_semantics = [#tpu.dimension_semantics<parallel>], iteration_bounds = array<i64: 2>, scalar_prefetch = 0 : i64, scratch_operands = 0 : i64, tpu.core_type = #tpu.core_type<tc>, window_params = [{transform_indices = @transform_0, window_bounds = array<i64: 1, 16, 16, 64>}, {pipeline_mode = #tpu.pipeline_mode<synchronous>, transform_indices = @transform_1, window_bounds = array<i64: 64, 64>}, {pipeline_mode = #tpu.pipeline_mode<synchronous>, transform_indices = @transform_2, window_bounds = array<i64: 1, 64>}, {pipeline_mode = #tpu.pipeline_mode<synchronous>, transform_indices = @transform_3, window_bounds = array<i64: 1, 64>}, {pipeline_mode = #tpu.pipeline_mode<synchronous>, transform_indices = @transform_4, window_bounds = array<i64: 9, 64, 128>}, {pipeline_mode = #tpu.pipeline_mode<synchronous>, transform_indices = @transform_5, window_bounds = array<i64: 1, 128>}, {pipeline_mode = #tpu.pipeline_mode<synchronous>, transform_indices = @transform_6, window_bounds = array<i64: 128, 128>}, {pipeline_mode = #tpu.pipeline_mode<synchronous>, transform_indices = @transform_7, window_bounds = array<i64: 1, 128>}, {pipeline_mode = #tpu.pipeline_mode<synchronous>, transform_indices = @transform_8, window_bounds = array<i64: 1, 128>}, {pipeline_mode = #tpu.pipeline_mode<synchronous>, transform_indices = @transform_9, window_bounds = array<i64: 9, 128, 128>}, {pipeline_mode = #tpu.pipeline_mode<synchronous>, transform_indices = @transform_10, window_bounds = array<i64: 1, 128>}, {pipeline_mode = #tpu.pipeline_mode<synchronous>, transform_indices = @transform_11, window_bounds = array<i64: 64, 128>}, {pipeline_mode = #tpu.pipeline_mode<synchronous>, transform_indices = @transform_12, window_bounds = array<i64: 1, 128>}, {transform_indices = @transform_13, window_bounds = array<i64: 1, 16, 16, 128>}]} {
    %cst = arith.constant 1.000000e+00 : f32
    %0 = vector.broadcast %cst : f32 to vector<1x256xf32>
    %1 = tpu.iota {dimensions = array<i32: 0>} : vector<288x1xi32>
    %c16_i32 = arith.constant 16 : i32
    %c0_i32 = arith.constant 0 : i32
    %2 = arith.cmpi eq, %c16_i32, %c0_i32 : i32
    %c1_i32 = arith.constant 1 : i32
    %3 = arith.select %2, %c1_i32, %c16_i32 : i32
    %4 = vector.broadcast %3 : i32 to vector<288x1xi32>
    %5 = arith.remsi %1, %4 : vector<288x1xi32>
    %c0_i32_0 = arith.constant 0 : i32
    %6 = vector.broadcast %c0_i32_0 : i32 to vector<288x1xi32>
    %7 = arith.cmpi ne, %5, %6 : vector<288x1xi32>
    %c0_i32_1 = arith.constant 0 : i32
    %8 = vector.broadcast %c0_i32_1 : i32 to vector<288x1xi32>
    %9 = arith.cmpi slt, %5, %8 : vector<288x1xi32>
    %c0_i32_2 = arith.constant 0 : i32
    %10 = arith.cmpi slt, %3, %c0_i32_2 : i32
    %11 = vector.broadcast %10 : i1 to vector<288x1xi1>
    %12 = vector.broadcast %11 : vector<288x1xi1> to vector<288x1xi1>
    %13 = arith.xori %9, %12 : vector<288x1xi1>
    %14 = arith.andi %13, %7 : vector<288x1xi1>
    %15 = vector.broadcast %3 : i32 to vector<288x1xi32>
    %16 = arith.addi %5, %15 : vector<288x1xi32>
    %17 = arith.select %14, %16, %5 : vector<288x1xi1>, vector<288x1xi32>
    %c0_i32_3 = arith.constant 0 : i32
    %18 = vector.broadcast %c0_i32_3 : i32 to vector<288x1xi32>
    %19 = arith.cmpi ne, %17, %18 : vector<288x1xi32>
    %20 = arith.extui %19 : vector<288x1xi1> to vector<288x1xi32>
    %21 = arith.sitofp %20 : vector<288x1xi32> to vector<288x1xf32>
    %22 = arith.truncf %21 : vector<288x1xf32> to vector<288x1xbf16>
    %c15_i32 = arith.constant 15 : i32
    %23 = vector.broadcast %c15_i32 : i32 to vector<288x1xi32>
    %24 = arith.cmpi ne, %17, %23 : vector<288x1xi32>
    %25 = arith.extui %24 : vector<288x1xi1> to vector<288x1xi32>
    %26 = arith.sitofp %25 : vector<288x1xi32> to vector<288x1xf32>
    %27 = arith.truncf %26 : vector<288x1xf32> to vector<288x1xbf16>
    %c0 = arith.constant 0 : index
    %c0_4 = arith.constant 0 : index
    %c0_5 = arith.constant 0 : index
    %c0_6 = arith.constant 0 : index
    %28 = vector.load %arg1[%c0, %c0_4, %c0_5, %c0_6] : memref<1x16x16x64xf32, #tpu.memory_space<vmem>>, vector<1x16x16x64xf32>
    %29 = vector.shape_cast %28 : vector<1x16x16x64xf32> to vector<16x16x64xf32>
    %30 = vector.shape_cast %29 : vector<16x16x64xf32> to vector<256x64xf32>
    %c0_7 = arith.constant 0 : index
    %c0_8 = arith.constant 0 : index
    %31 = vector.load %arg2[%c0_7, %c0_8] : memref<64x64xf32, #tpu.memory_space<vmem>>, vector<64x64xf32>
    %c0_9 = arith.constant 0 : index
    %c0_10 = arith.constant 0 : index
    %32 = vector.load %arg3[%c0_9, %c0_10] : memref<1x64xf32, #tpu.memory_space<vmem>>, vector<1x64xf32>
    %c0_11 = arith.constant 0 : index
    %c0_12 = arith.constant 0 : index
    %33 = vector.load %arg4[%c0_11, %c0_12] : memref<1x64xf32, #tpu.memory_space<vmem>>, vector<1x64xf32>
    %cst_13 = arith.constant dense<0.000000e+00> : vector<1x64xf32>
    %34 = tpu.matmul %0, %30, %cst_13 {dimension_numbers = #tpu.dot_dimension_numbers<[1], [0], [0], [1], [0, 0, 1, 1], [], []>} : vector<1x256xf32>, vector<256x64xf32>, vector<1x64xf32> -> vector<1x64xf32>
    %35 = arith.mulf %30, %30 : vector<256x64xf32>
    %cst_14 = arith.constant dense<0.000000e+00> : vector<1x64xf32>
    %36 = tpu.matmul %0, %35, %cst_14 {dimension_numbers = #tpu.dot_dimension_numbers<[1], [0], [0], [1], [0, 0, 1, 1], [], []>} : vector<1x256xf32>, vector<256x64xf32>, vector<1x64xf32> -> vector<1x64xf32>
    %37 = tpu.concatenate %34, %36 in 0 : vector<1x64xf32>, vector<1x64xf32> -> vector<2x64xf32>
    %cst_15 = arith.constant dense<0.000000e+00> : vector<2x64xf32>
    %38 = tpu.matmul %37, %31, %cst_15 {dimension_numbers = #tpu.dot_dimension_numbers<[1], [0], [0], [1], [0, 0, 1, 1], [], []>} : vector<2x64xf32>, vector<64x64xf32>, vector<2x64xf32> -> vector<2x64xf32>
    %cst_16 = arith.constant 0.001953125 : f32
    %39 = vector.broadcast %cst_16 : f32 to vector<2x64xf32>
    %40 = arith.mulf %38, %39 : vector<2x64xf32>
    %41 = vector.extract_strided_slice %40 {offsets = [0, 0], sizes = [1, 64], strides = [1, 1]} : vector<2x64xf32> to vector<1x64xf32>
    %42 = vector.extract_strided_slice %40 {offsets = [1, 0], sizes = [1, 64], strides = [1, 1]} : vector<2x64xf32> to vector<1x64xf32>
    %43 = arith.mulf %41, %41 : vector<1x64xf32>
    %44 = arith.subf %42, %43 : vector<1x64xf32>
    %cst_17 = arith.constant 9.99999997E-7 : f32
    %45 = vector.broadcast %cst_17 : f32 to vector<1x64xf32>
    %46 = arith.addf %44, %45 : vector<1x64xf32>
    %47 = math.rsqrt %46 : vector<1x64xf32>
    %48 = vector.broadcast %41 : vector<1x64xf32> to vector<256x64xf32>
    %49 = arith.subf %30, %48 : vector<256x64xf32>
    %50 = arith.mulf %47, %32 : vector<1x64xf32>
    %51 = vector.broadcast %50 : vector<1x64xf32> to vector<256x64xf32>
    %52 = arith.mulf %49, %51 : vector<256x64xf32>
    %53 = vector.broadcast %33 : vector<1x64xf32> to vector<256x64xf32>
    %54 = arith.addf %52, %53 : vector<256x64xf32>
    %55 = arith.negf %54 : vector<256x64xf32>
    %56 = math.exp %55 : vector<256x64xf32>
    %cst_18 = arith.constant 1.000000e+00 : f32
    %57 = vector.broadcast %cst_18 : f32 to vector<256x64xf32>
    %58 = arith.addf %57, %56 : vector<256x64xf32>
    %59 = arith.divf %57, %58 : vector<256x64xf32>
    %60 = arith.mulf %54, %59 : vector<256x64xf32>
    %61 = arith.truncf %60 : vector<256x64xf32> to vector<256x64xbf16>
    %c0_19 = arith.constant 0 : index
    %c0_20 = arith.constant 0 : index
    %62 = vector.load %arg6[%c0_19, %c0_20] : memref<1x128xf32, #tpu.memory_space<vmem>>, vector<1x128xf32>
    %cst_21 = arith.constant 0.000000e+00 : bf16
    %63 = vector.broadcast %cst_21 : bf16 to vector<16x64xbf16>
    %cst_22 = arith.constant 0.000000e+00 : bf16
    %64 = vector.broadcast %cst_22 : bf16 to vector<16x64xbf16>
    %65 = tpu.concatenate %63, %61, %64 in 0 : vector<16x64xbf16>, vector<256x64xbf16>, vector<16x64xbf16> -> vector<288x64xbf16>
    %cst_23 = arith.constant 0.000000e+00 : bf16
    %66 = vector.broadcast %cst_23 : bf16 to vector<17x64xbf16>
    %cst_24 = arith.constant 0.000000e+00 : bf16
    %67 = vector.broadcast %cst_24 : bf16 to vector<15x64xbf16>
    %68 = tpu.concatenate %66, %61, %67 in 0 : vector<17x64xbf16>, vector<256x64xbf16>, vector<15x64xbf16> -> vector<288x64xbf16>
    %69 = vector.broadcast %22 : vector<288x1xbf16> to vector<288x64xbf16>
    %70 = arith.mulf %68, %69 : vector<288x64xbf16>
    %cst_25 = arith.constant 0.000000e+00 : bf16
    %71 = vector.broadcast %cst_25 : bf16 to vector<15x64xbf16>
    %cst_26 = arith.constant 0.000000e+00 : bf16
    %72 = vector.broadcast %cst_26 : bf16 to vector<17x64xbf16>
    %73 = tpu.concatenate %71, %61, %72 in 0 : vector<15x64xbf16>, vector<256x64xbf16>, vector<17x64xbf16> -> vector<288x64xbf16>
    %74 = vector.broadcast %27 : vector<288x1xbf16> to vector<288x64xbf16>
    %75 = arith.mulf %73, %74 : vector<288x64xbf16>
    %cst_27 = arith.constant 0.000000e+00 : f32
    %76 = vector.broadcast %cst_27 : f32 to vector<256x128xf32>
    %77 = vector.extract_strided_slice %70 {offsets = [0, 0], sizes = [256, 64], strides = [1, 1]} : vector<288x64xbf16> to vector<256x64xbf16>
    %c0_28 = arith.constant 0 : index
    %c0_29 = arith.constant 0 : index
    %c0_30 = arith.constant 0 : index
    %78 = vector.load %arg5[%c0_28, %c0_29, %c0_30] : memref<9x64x128xbf16, #tpu.memory_space<vmem>>, vector<1x64x128xbf16>
    %79 = vector.shape_cast %78 : vector<1x64x128xbf16> to vector<64x128xbf16>
    %cst_31 = arith.constant dense<0.000000e+00> : vector<256x128xf32>
    %80 = tpu.matmul %77, %79, %cst_31 {dimension_numbers = #tpu.dot_dimension_numbers<[1], [0], [0], [1], [0, 0, 1, 1], [], []>} : vector<256x64xbf16>, vector<64x128xbf16>, vector<256x128xf32> -> vector<256x128xf32>
    %81 = arith.addf %76, %80 : vector<256x128xf32>
    %82 = vector.extract_strided_slice %65 {offsets = [0, 0], sizes = [256, 64], strides = [1, 1]} : vector<288x64xbf16> to vector<256x64xbf16>
    %c1 = arith.constant 1 : index
    %c0_32 = arith.constant 0 : index
    %c0_33 = arith.constant 0 : index
    %83 = vector.load %arg5[%c1, %c0_32, %c0_33] : memref<9x64x128xbf16, #tpu.memory_space<vmem>>, vector<1x64x128xbf16>
    %84 = vector.shape_cast %83 : vector<1x64x128xbf16> to vector<64x128xbf16>
    %cst_34 = arith.constant dense<0.000000e+00> : vector<256x128xf32>
    %85 = tpu.matmul %82, %84, %cst_34 {dimension_numbers = #tpu.dot_dimension_numbers<[1], [0], [0], [1], [0, 0, 1, 1], [], []>} : vector<256x64xbf16>, vector<64x128xbf16>, vector<256x128xf32> -> vector<256x128xf32>
    %86 = arith.addf %81, %85 : vector<256x128xf32>
    %87 = vector.extract_strided_slice %75 {offsets = [0, 0], sizes = [256, 64], strides = [1, 1]} : vector<288x64xbf16> to vector<256x64xbf16>
    %c2 = arith.constant 2 : index
    %c0_35 = arith.constant 0 : index
    %c0_36 = arith.constant 0 : index
    %88 = vector.load %arg5[%c2, %c0_35, %c0_36] : memref<9x64x128xbf16, #tpu.memory_space<vmem>>, vector<1x64x128xbf16>
    %89 = vector.shape_cast %88 : vector<1x64x128xbf16> to vector<64x128xbf16>
    %cst_37 = arith.constant dense<0.000000e+00> : vector<256x128xf32>
    %90 = tpu.matmul %87, %89, %cst_37 {dimension_numbers = #tpu.dot_dimension_numbers<[1], [0], [0], [1], [0, 0, 1, 1], [], []>} : vector<256x64xbf16>, vector<64x128xbf16>, vector<256x128xf32> -> vector<256x128xf32>
    %91 = arith.addf %86, %90 : vector<256x128xf32>
    %92 = vector.extract_strided_slice %70 {offsets = [16, 0], sizes = [256, 64], strides = [1, 1]} : vector<288x64xbf16> to vector<256x64xbf16>
    %c3 = arith.constant 3 : index
    %c0_38 = arith.constant 0 : index
    %c0_39 = arith.constant 0 : index
    %93 = vector.load %arg5[%c3, %c0_38, %c0_39] : memref<9x64x128xbf16, #tpu.memory_space<vmem>>, vector<1x64x128xbf16>
    %94 = vector.shape_cast %93 : vector<1x64x128xbf16> to vector<64x128xbf16>
    %cst_40 = arith.constant dense<0.000000e+00> : vector<256x128xf32>
    %95 = tpu.matmul %92, %94, %cst_40 {dimension_numbers = #tpu.dot_dimension_numbers<[1], [0], [0], [1], [0, 0, 1, 1], [], []>} : vector<256x64xbf16>, vector<64x128xbf16>, vector<256x128xf32> -> vector<256x128xf32>
    %96 = arith.addf %91, %95 : vector<256x128xf32>
    %97 = vector.extract_strided_slice %65 {offsets = [16, 0], sizes = [256, 64], strides = [1, 1]} : vector<288x64xbf16> to vector<256x64xbf16>
    %c4 = arith.constant 4 : index
    %c0_41 = arith.constant 0 : index
    %c0_42 = arith.constant 0 : index
    %98 = vector.load %arg5[%c4, %c0_41, %c0_42] : memref<9x64x128xbf16, #tpu.memory_space<vmem>>, vector<1x64x128xbf16>
    %99 = vector.shape_cast %98 : vector<1x64x128xbf16> to vector<64x128xbf16>
    %cst_43 = arith.constant dense<0.000000e+00> : vector<256x128xf32>
    %100 = tpu.matmul %97, %99, %cst_43 {dimension_numbers = #tpu.dot_dimension_numbers<[1], [0], [0], [1], [0, 0, 1, 1], [], []>} : vector<256x64xbf16>, vector<64x128xbf16>, vector<256x128xf32> -> vector<256x128xf32>
    %101 = arith.addf %96, %100 : vector<256x128xf32>
    %102 = vector.extract_strided_slice %75 {offsets = [16, 0], sizes = [256, 64], strides = [1, 1]} : vector<288x64xbf16> to vector<256x64xbf16>
    %c5 = arith.constant 5 : index
    %c0_44 = arith.constant 0 : index
    %c0_45 = arith.constant 0 : index
    %103 = vector.load %arg5[%c5, %c0_44, %c0_45] : memref<9x64x128xbf16, #tpu.memory_space<vmem>>, vector<1x64x128xbf16>
    %104 = vector.shape_cast %103 : vector<1x64x128xbf16> to vector<64x128xbf16>
    %cst_46 = arith.constant dense<0.000000e+00> : vector<256x128xf32>
    %105 = tpu.matmul %102, %104, %cst_46 {dimension_numbers = #tpu.dot_dimension_numbers<[1], [0], [0], [1], [0, 0, 1, 1], [], []>} : vector<256x64xbf16>, vector<64x128xbf16>, vector<256x128xf32> -> vector<256x128xf32>
    %106 = arith.addf %101, %105 : vector<256x128xf32>
    %107 = vector.extract_strided_slice %70 {offsets = [32, 0], sizes = [256, 64], strides = [1, 1]} : vector<288x64xbf16> to vector<256x64xbf16>
    %c6 = arith.constant 6 : index
    %c0_47 = arith.constant 0 : index
    %c0_48 = arith.constant 0 : index
    %108 = vector.load %arg5[%c6, %c0_47, %c0_48] : memref<9x64x128xbf16, #tpu.memory_space<vmem>>, vector<1x64x128xbf16>
    %109 = vector.shape_cast %108 : vector<1x64x128xbf16> to vector<64x128xbf16>
    %cst_49 = arith.constant dense<0.000000e+00> : vector<256x128xf32>
    %110 = tpu.matmul %107, %109, %cst_49 {dimension_numbers = #tpu.dot_dimension_numbers<[1], [0], [0], [1], [0, 0, 1, 1], [], []>} : vector<256x64xbf16>, vector<64x128xbf16>, vector<256x128xf32> -> vector<256x128xf32>
    %111 = arith.addf %106, %110 : vector<256x128xf32>
    %112 = vector.extract_strided_slice %65 {offsets = [32, 0], sizes = [256, 64], strides = [1, 1]} : vector<288x64xbf16> to vector<256x64xbf16>
    %c7 = arith.constant 7 : index
    %c0_50 = arith.constant 0 : index
    %c0_51 = arith.constant 0 : index
    %113 = vector.load %arg5[%c7, %c0_50, %c0_51] : memref<9x64x128xbf16, #tpu.memory_space<vmem>>, vector<1x64x128xbf16>
    %114 = vector.shape_cast %113 : vector<1x64x128xbf16> to vector<64x128xbf16>
    %cst_52 = arith.constant dense<0.000000e+00> : vector<256x128xf32>
    %115 = tpu.matmul %112, %114, %cst_52 {dimension_numbers = #tpu.dot_dimension_numbers<[1], [0], [0], [1], [0, 0, 1, 1], [], []>} : vector<256x64xbf16>, vector<64x128xbf16>, vector<256x128xf32> -> vector<256x128xf32>
    %116 = arith.addf %111, %115 : vector<256x128xf32>
    %117 = vector.extract_strided_slice %75 {offsets = [32, 0], sizes = [256, 64], strides = [1, 1]} : vector<288x64xbf16> to vector<256x64xbf16>
    %c8 = arith.constant 8 : index
    %c0_53 = arith.constant 0 : index
    %c0_54 = arith.constant 0 : index
    %118 = vector.load %arg5[%c8, %c0_53, %c0_54] : memref<9x64x128xbf16, #tpu.memory_space<vmem>>, vector<1x64x128xbf16>
    %119 = vector.shape_cast %118 : vector<1x64x128xbf16> to vector<64x128xbf16>
    %cst_55 = arith.constant dense<0.000000e+00> : vector<256x128xf32>
    %120 = tpu.matmul %117, %119, %cst_55 {dimension_numbers = #tpu.dot_dimension_numbers<[1], [0], [0], [1], [0, 0, 1, 1], [], []>} : vector<256x64xbf16>, vector<64x128xbf16>, vector<256x128xf32> -> vector<256x128xf32>
    %121 = arith.addf %116, %120 : vector<256x128xf32>
    %122 = vector.broadcast %62 : vector<1x128xf32> to vector<256x128xf32>
    %123 = arith.addf %121, %122 : vector<256x128xf32>
    %c0_56 = arith.constant 0 : index
    %c0_57 = arith.constant 0 : index
    %124 = vector.load %arg7[%c0_56, %c0_57] : memref<128x128xf32, #tpu.memory_space<vmem>>, vector<128x128xf32>
    %c0_58 = arith.constant 0 : index
    %c0_59 = arith.constant 0 : index
    %125 = vector.load %arg8[%c0_58, %c0_59] : memref<1x128xf32, #tpu.memory_space<vmem>>, vector<1x128xf32>
    %c0_60 = arith.constant 0 : index
    %c0_61 = arith.constant 0 : index
    %126 = vector.load %arg9[%c0_60, %c0_61] : memref<1x128xf32, #tpu.memory_space<vmem>>, vector<1x128xf32>
    %cst_62 = arith.constant dense<0.000000e+00> : vector<1x128xf32>
    %127 = tpu.matmul %0, %123, %cst_62 {dimension_numbers = #tpu.dot_dimension_numbers<[1], [0], [0], [1], [0, 0, 1, 1], [], []>} : vector<1x256xf32>, vector<256x128xf32>, vector<1x128xf32> -> vector<1x128xf32>
    %128 = arith.mulf %123, %123 : vector<256x128xf32>
    %cst_63 = arith.constant dense<0.000000e+00> : vector<1x128xf32>
    %129 = tpu.matmul %0, %128, %cst_63 {dimension_numbers = #tpu.dot_dimension_numbers<[1], [0], [0], [1], [0, 0, 1, 1], [], []>} : vector<1x256xf32>, vector<256x128xf32>, vector<1x128xf32> -> vector<1x128xf32>
    %130 = tpu.concatenate %127, %129 in 0 : vector<1x128xf32>, vector<1x128xf32> -> vector<2x128xf32>
    %cst_64 = arith.constant dense<0.000000e+00> : vector<2x128xf32>
    %131 = tpu.matmul %130, %124, %cst_64 {dimension_numbers = #tpu.dot_dimension_numbers<[1], [0], [0], [1], [0, 0, 1, 1], [], []>} : vector<2x128xf32>, vector<128x128xf32>, vector<2x128xf32> -> vector<2x128xf32>
    %cst_65 = arith.constant 9.765625E-4 : f32
    %132 = vector.broadcast %cst_65 : f32 to vector<2x128xf32>
    %133 = arith.mulf %131, %132 : vector<2x128xf32>
    %134 = vector.extract_strided_slice %133 {offsets = [0, 0], sizes = [1, 128], strides = [1, 1]} : vector<2x128xf32> to vector<1x128xf32>
    %135 = vector.extract_strided_slice %133 {offsets = [1, 0], sizes = [1, 128], strides = [1, 1]} : vector<2x128xf32> to vector<1x128xf32>
    %136 = arith.mulf %134, %134 : vector<1x128xf32>
    %137 = arith.subf %135, %136 : vector<1x128xf32>
    %cst_66 = arith.constant 9.99999997E-7 : f32
    %138 = vector.broadcast %cst_66 : f32 to vector<1x128xf32>
    %139 = arith.addf %137, %138 : vector<1x128xf32>
    %140 = math.rsqrt %139 : vector<1x128xf32>
    %141 = vector.broadcast %134 : vector<1x128xf32> to vector<256x128xf32>
    %142 = arith.subf %123, %141 : vector<256x128xf32>
    %143 = arith.mulf %140, %125 : vector<1x128xf32>
    %144 = vector.broadcast %143 : vector<1x128xf32> to vector<256x128xf32>
    %145 = arith.mulf %142, %144 : vector<256x128xf32>
    %146 = vector.broadcast %126 : vector<1x128xf32> to vector<256x128xf32>
    %147 = arith.addf %145, %146 : vector<256x128xf32>
    %148 = arith.negf %147 : vector<256x128xf32>
    %149 = math.exp %148 : vector<256x128xf32>
    %cst_67 = arith.constant 1.000000e+00 : f32
    %150 = vector.broadcast %cst_67 : f32 to vector<256x128xf32>
    %151 = arith.addf %150, %149 : vector<256x128xf32>
    %152 = arith.divf %150, %151 : vector<256x128xf32>
    %153 = arith.mulf %147, %152 : vector<256x128xf32>
    %154 = arith.truncf %153 : vector<256x128xf32> to vector<256x128xbf16>
    %c0_68 = arith.constant 0 : index
    %c0_69 = arith.constant 0 : index
    %155 = vector.load %arg11[%c0_68, %c0_69] : memref<1x128xf32, #tpu.memory_space<vmem>>, vector<1x128xf32>
    %cst_70 = arith.constant 0.000000e+00 : bf16
    %156 = vector.broadcast %cst_70 : bf16 to vector<16x128xbf16>
    %cst_71 = arith.constant 0.000000e+00 : bf16
    %157 = vector.broadcast %cst_71 : bf16 to vector<16x128xbf16>
    %158 = tpu.concatenate %156, %154, %157 in 0 : vector<16x128xbf16>, vector<256x128xbf16>, vector<16x128xbf16> -> vector<288x128xbf16>
    %cst_72 = arith.constant 0.000000e+00 : bf16
    %159 = vector.broadcast %cst_72 : bf16 to vector<17x128xbf16>
    %cst_73 = arith.constant 0.000000e+00 : bf16
    %160 = vector.broadcast %cst_73 : bf16 to vector<15x128xbf16>
    %161 = tpu.concatenate %159, %154, %160 in 0 : vector<17x128xbf16>, vector<256x128xbf16>, vector<15x128xbf16> -> vector<288x128xbf16>
    %162 = vector.broadcast %22 : vector<288x1xbf16> to vector<288x128xbf16>
    %163 = arith.mulf %161, %162 : vector<288x128xbf16>
    %cst_74 = arith.constant 0.000000e+00 : bf16
    %164 = vector.broadcast %cst_74 : bf16 to vector<15x128xbf16>
    %cst_75 = arith.constant 0.000000e+00 : bf16
    %165 = vector.broadcast %cst_75 : bf16 to vector<17x128xbf16>
    %166 = tpu.concatenate %164, %154, %165 in 0 : vector<15x128xbf16>, vector<256x128xbf16>, vector<17x128xbf16> -> vector<288x128xbf16>
    %167 = vector.broadcast %27 : vector<288x1xbf16> to vector<288x128xbf16>
    %168 = arith.mulf %166, %167 : vector<288x128xbf16>
    %cst_76 = arith.constant 0.000000e+00 : f32
    %169 = vector.broadcast %cst_76 : f32 to vector<256x128xf32>
    %170 = vector.extract_strided_slice %163 {offsets = [0, 0], sizes = [256, 128], strides = [1, 1]} : vector<288x128xbf16> to vector<256x128xbf16>
    %c0_77 = arith.constant 0 : index
    %c0_78 = arith.constant 0 : index
    %c0_79 = arith.constant 0 : index
    %171 = vector.load %arg10[%c0_77, %c0_78, %c0_79] : memref<9x128x128xbf16, #tpu.memory_space<vmem>>, vector<1x128x128xbf16>
    %172 = vector.shape_cast %171 : vector<1x128x128xbf16> to vector<128x128xbf16>
    %cst_80 = arith.constant dense<0.000000e+00> : vector<256x128xf32>
    %173 = tpu.matmul %170, %172, %cst_80 {dimension_numbers = #tpu.dot_dimension_numbers<[1], [0], [0], [1], [0, 0, 1, 1], [], []>} : vector<256x128xbf16>, vector<128x128xbf16>, vector<256x128xf32> -> vector<256x128xf32>
    %174 = arith.addf %169, %173 : vector<256x128xf32>
    %175 = vector.extract_strided_slice %158 {offsets = [0, 0], sizes = [256, 128], strides = [1, 1]} : vector<288x128xbf16> to vector<256x128xbf16>
    %c1_81 = arith.constant 1 : index
    %c0_82 = arith.constant 0 : index
    %c0_83 = arith.constant 0 : index
    %176 = vector.load %arg10[%c1_81, %c0_82, %c0_83] : memref<9x128x128xbf16, #tpu.memory_space<vmem>>, vector<1x128x128xbf16>
    %177 = vector.shape_cast %176 : vector<1x128x128xbf16> to vector<128x128xbf16>
    %cst_84 = arith.constant dense<0.000000e+00> : vector<256x128xf32>
    %178 = tpu.matmul %175, %177, %cst_84 {dimension_numbers = #tpu.dot_dimension_numbers<[1], [0], [0], [1], [0, 0, 1, 1], [], []>} : vector<256x128xbf16>, vector<128x128xbf16>, vector<256x128xf32> -> vector<256x128xf32>
    %179 = arith.addf %174, %178 : vector<256x128xf32>
    %180 = vector.extract_strided_slice %168 {offsets = [0, 0], sizes = [256, 128], strides = [1, 1]} : vector<288x128xbf16> to vector<256x128xbf16>
    %c2_85 = arith.constant 2 : index
    %c0_86 = arith.constant 0 : index
    %c0_87 = arith.constant 0 : index
    %181 = vector.load %arg10[%c2_85, %c0_86, %c0_87] : memref<9x128x128xbf16, #tpu.memory_space<vmem>>, vector<1x128x128xbf16>
    %182 = vector.shape_cast %181 : vector<1x128x128xbf16> to vector<128x128xbf16>
    %cst_88 = arith.constant dense<0.000000e+00> : vector<256x128xf32>
    %183 = tpu.matmul %180, %182, %cst_88 {dimension_numbers = #tpu.dot_dimension_numbers<[1], [0], [0], [1], [0, 0, 1, 1], [], []>} : vector<256x128xbf16>, vector<128x128xbf16>, vector<256x128xf32> -> vector<256x128xf32>
    %184 = arith.addf %179, %183 : vector<256x128xf32>
    %185 = vector.extract_strided_slice %163 {offsets = [16, 0], sizes = [256, 128], strides = [1, 1]} : vector<288x128xbf16> to vector<256x128xbf16>
    %c3_89 = arith.constant 3 : index
    %c0_90 = arith.constant 0 : index
    %c0_91 = arith.constant 0 : index
    %186 = vector.load %arg10[%c3_89, %c0_90, %c0_91] : memref<9x128x128xbf16, #tpu.memory_space<vmem>>, vector<1x128x128xbf16>
    %187 = vector.shape_cast %186 : vector<1x128x128xbf16> to vector<128x128xbf16>
    %cst_92 = arith.constant dense<0.000000e+00> : vector<256x128xf32>
    %188 = tpu.matmul %185, %187, %cst_92 {dimension_numbers = #tpu.dot_dimension_numbers<[1], [0], [0], [1], [0, 0, 1, 1], [], []>} : vector<256x128xbf16>, vector<128x128xbf16>, vector<256x128xf32> -> vector<256x128xf32>
    %189 = arith.addf %184, %188 : vector<256x128xf32>
    %190 = vector.extract_strided_slice %158 {offsets = [16, 0], sizes = [256, 128], strides = [1, 1]} : vector<288x128xbf16> to vector<256x128xbf16>
    %c4_93 = arith.constant 4 : index
    %c0_94 = arith.constant 0 : index
    %c0_95 = arith.constant 0 : index
    %191 = vector.load %arg10[%c4_93, %c0_94, %c0_95] : memref<9x128x128xbf16, #tpu.memory_space<vmem>>, vector<1x128x128xbf16>
    %192 = vector.shape_cast %191 : vector<1x128x128xbf16> to vector<128x128xbf16>
    %cst_96 = arith.constant dense<0.000000e+00> : vector<256x128xf32>
    %193 = tpu.matmul %190, %192, %cst_96 {dimension_numbers = #tpu.dot_dimension_numbers<[1], [0], [0], [1], [0, 0, 1, 1], [], []>} : vector<256x128xbf16>, vector<128x128xbf16>, vector<256x128xf32> -> vector<256x128xf32>
    %194 = arith.addf %189, %193 : vector<256x128xf32>
    %195 = vector.extract_strided_slice %168 {offsets = [16, 0], sizes = [256, 128], strides = [1, 1]} : vector<288x128xbf16> to vector<256x128xbf16>
    %c5_97 = arith.constant 5 : index
    %c0_98 = arith.constant 0 : index
    %c0_99 = arith.constant 0 : index
    %196 = vector.load %arg10[%c5_97, %c0_98, %c0_99] : memref<9x128x128xbf16, #tpu.memory_space<vmem>>, vector<1x128x128xbf16>
    %197 = vector.shape_cast %196 : vector<1x128x128xbf16> to vector<128x128xbf16>
    %cst_100 = arith.constant dense<0.000000e+00> : vector<256x128xf32>
    %198 = tpu.matmul %195, %197, %cst_100 {dimension_numbers = #tpu.dot_dimension_numbers<[1], [0], [0], [1], [0, 0, 1, 1], [], []>} : vector<256x128xbf16>, vector<128x128xbf16>, vector<256x128xf32> -> vector<256x128xf32>
    %199 = arith.addf %194, %198 : vector<256x128xf32>
    %200 = vector.extract_strided_slice %163 {offsets = [32, 0], sizes = [256, 128], strides = [1, 1]} : vector<288x128xbf16> to vector<256x128xbf16>
    %c6_101 = arith.constant 6 : index
    %c0_102 = arith.constant 0 : index
    %c0_103 = arith.constant 0 : index
    %201 = vector.load %arg10[%c6_101, %c0_102, %c0_103] : memref<9x128x128xbf16, #tpu.memory_space<vmem>>, vector<1x128x128xbf16>
    %202 = vector.shape_cast %201 : vector<1x128x128xbf16> to vector<128x128xbf16>
    %cst_104 = arith.constant dense<0.000000e+00> : vector<256x128xf32>
    %203 = tpu.matmul %200, %202, %cst_104 {dimension_numbers = #tpu.dot_dimension_numbers<[1], [0], [0], [1], [0, 0, 1, 1], [], []>} : vector<256x128xbf16>, vector<128x128xbf16>, vector<256x128xf32> -> vector<256x128xf32>
    %204 = arith.addf %199, %203 : vector<256x128xf32>
    %205 = vector.extract_strided_slice %158 {offsets = [32, 0], sizes = [256, 128], strides = [1, 1]} : vector<288x128xbf16> to vector<256x128xbf16>
    %c7_105 = arith.constant 7 : index
    %c0_106 = arith.constant 0 : index
    %c0_107 = arith.constant 0 : index
    %206 = vector.load %arg10[%c7_105, %c0_106, %c0_107] : memref<9x128x128xbf16, #tpu.memory_space<vmem>>, vector<1x128x128xbf16>
    %207 = vector.shape_cast %206 : vector<1x128x128xbf16> to vector<128x128xbf16>
    %cst_108 = arith.constant dense<0.000000e+00> : vector<256x128xf32>
    %208 = tpu.matmul %205, %207, %cst_108 {dimension_numbers = #tpu.dot_dimension_numbers<[1], [0], [0], [1], [0, 0, 1, 1], [], []>} : vector<256x128xbf16>, vector<128x128xbf16>, vector<256x128xf32> -> vector<256x128xf32>
    %209 = arith.addf %204, %208 : vector<256x128xf32>
    %210 = vector.extract_strided_slice %168 {offsets = [32, 0], sizes = [256, 128], strides = [1, 1]} : vector<288x128xbf16> to vector<256x128xbf16>
    %c8_109 = arith.constant 8 : index
    %c0_110 = arith.constant 0 : index
    %c0_111 = arith.constant 0 : index
    %211 = vector.load %arg10[%c8_109, %c0_110, %c0_111] : memref<9x128x128xbf16, #tpu.memory_space<vmem>>, vector<1x128x128xbf16>
    %212 = vector.shape_cast %211 : vector<1x128x128xbf16> to vector<128x128xbf16>
    %cst_112 = arith.constant dense<0.000000e+00> : vector<256x128xf32>
    %213 = tpu.matmul %210, %212, %cst_112 {dimension_numbers = #tpu.dot_dimension_numbers<[1], [0], [0], [1], [0, 0, 1, 1], [], []>} : vector<256x128xbf16>, vector<128x128xbf16>, vector<256x128xf32> -> vector<256x128xf32>
    %214 = arith.addf %209, %213 : vector<256x128xf32>
    %215 = vector.broadcast %155 : vector<1x128xf32> to vector<256x128xf32>
    %216 = arith.addf %214, %215 : vector<256x128xf32>
    %c0_113 = arith.constant 0 : index
    %c0_114 = arith.constant 0 : index
    %c0_115 = arith.constant 0 : index
    %c0_116 = arith.constant 0 : index
    %217 = vector.load %arg1[%c0_113, %c0_114, %c0_115, %c0_116] : memref<1x16x16x64xf32, #tpu.memory_space<vmem>>, vector<1x16x16x64xf32>
    %218 = vector.shape_cast %217 : vector<1x16x16x64xf32> to vector<16x16x64xf32>
    %219 = vector.shape_cast %218 : vector<16x16x64xf32> to vector<256x64xf32>
    %220 = arith.truncf %219 : vector<256x64xf32> to vector<256x64xbf16>
    %c0_117 = arith.constant 0 : index
    %c0_118 = arith.constant 0 : index
    %221 = vector.load %arg12[%c0_117, %c0_118] : memref<64x128xbf16, #tpu.memory_space<vmem>>, vector<64x128xbf16>
    %cst_119 = arith.constant dense<0.000000e+00> : vector<256x128xf32>
    %222 = tpu.matmul %220, %221, %cst_119 {dimension_numbers = #tpu.dot_dimension_numbers<[1], [0], [0], [1], [0, 0, 1, 1], [], []>} : vector<256x64xbf16>, vector<64x128xbf16>, vector<256x128xf32> -> vector<256x128xf32>
    %c0_120 = arith.constant 0 : index
    %c0_121 = arith.constant 0 : index
    %223 = vector.load %arg13[%c0_120, %c0_121] : memref<1x128xf32, #tpu.memory_space<vmem>>, vector<1x128xf32>
    %224 = vector.broadcast %223 : vector<1x128xf32> to vector<256x128xf32>
    %225 = arith.addf %222, %224 : vector<256x128xf32>
    %226 = arith.addf %225, %216 : vector<256x128xf32>
    %227 = vector.shape_cast %226 : vector<256x128xf32> to vector<16x16x128xf32>
    %c0_122 = arith.constant 0 : index
    %c0_123 = arith.constant 0 : index
    %c0_124 = arith.constant 0 : index
    %c0_125 = arith.constant 0 : index
    %228 = vector.load %arg14[%c0_122, %c0_123, %c0_124, %c0_125] : memref<1x16x16x128xf32, #tpu.memory_space<vmem>>, vector<1x16x16x128xf32>
    %229 = vector.shape_cast %228 : vector<1x16x16x128xf32> to vector<16x16x128xf32>
    %230 = vector.shape_cast %227 : vector<16x16x128xf32> to vector<1x16x16x128xf32>
    tpu.vector_store %arg14[%c0_122, %c0_123, %c0_124, %c0_125], %230 {strides = array<i32>} : memref<1x16x16x128xf32, #tpu.memory_space<vmem>>, vector<1x16x16x128xf32>,
    return
  }
  func.func @transform_0(%arg0: i32) -> (i32, i32, i32, i32) {
    %c0_i32 = arith.constant 0 : i32
    %c0_i32_0 = arith.constant 0 : i32
    %c0_i32_1 = arith.constant 0 : i32
    %c0_i32_2 = arith.constant 0 : i32
    return %arg0, %c0_i32, %c0_i32_0, %c0_i32_1 : i32, i32, i32, i32
  }
  func.func @transform_1(%arg0: i32) -> (i32, i32) {
    %c0_i32 = arith.constant 0 : i32
    %c0_i32_0 = arith.constant 0 : i32
    %c0_i32_1 = arith.constant 0 : i32
    return %c0_i32, %c0_i32_0 : i32, i32
  }
  func.func @transform_2(%arg0: i32) -> (i32, i32) {
    %c0_i32 = arith.constant 0 : i32
    %c0_i32_0 = arith.constant 0 : i32
    %c0_i32_1 = arith.constant 0 : i32
    return %c0_i32, %c0_i32_0 : i32, i32
  }
  func.func @transform_3(%arg0: i32) -> (i32, i32) {
    %c0_i32 = arith.constant 0 : i32
    %c0_i32_0 = arith.constant 0 : i32
    %c0_i32_1 = arith.constant 0 : i32
    return %c0_i32, %c0_i32_0 : i32, i32
  }
  func.func @transform_4(%arg0: i32) -> (i32, i32, i32) {
    %c0_i32 = arith.constant 0 : i32
    %c0_i32_0 = arith.constant 0 : i32
    %c0_i32_1 = arith.constant 0 : i32
    %c0_i32_2 = arith.constant 0 : i32
    return %c0_i32, %c0_i32_0, %c0_i32_1 : i32, i32, i32
  }
  func.func @transform_5(%arg0: i32) -> (i32, i32) {
    %c0_i32 = arith.constant 0 : i32
    %c0_i32_0 = arith.constant 0 : i32
    %c0_i32_1 = arith.constant 0 : i32
    return %c0_i32, %c0_i32_0 : i32, i32
  }
  func.func @transform_6(%arg0: i32) -> (i32, i32) {
    %c0_i32 = arith.constant 0 : i32
    %c0_i32_0 = arith.constant 0 : i32
    %c0_i32_1 = arith.constant 0 : i32
    return %c0_i32, %c0_i32_0 : i32, i32
  }
  func.func @transform_7(%arg0: i32) -> (i32, i32) {
    %c0_i32 = arith.constant 0 : i32
    %c0_i32_0 = arith.constant 0 : i32
    %c0_i32_1 = arith.constant 0 : i32
    return %c0_i32, %c0_i32_0 : i32, i32
  }
  func.func @transform_8(%arg0: i32) -> (i32, i32) {
    %c0_i32 = arith.constant 0 : i32
    %c0_i32_0 = arith.constant 0 : i32
    %c0_i32_1 = arith.constant 0 : i32
    return %c0_i32, %c0_i32_0 : i32, i32
  }
  func.func @transform_9(%arg0: i32) -> (i32, i32, i32) {
    %c0_i32 = arith.constant 0 : i32
    %c0_i32_0 = arith.constant 0 : i32
    %c0_i32_1 = arith.constant 0 : i32
    %c0_i32_2 = arith.constant 0 : i32
    return %c0_i32, %c0_i32_0, %c0_i32_1 : i32, i32, i32
  }
  func.func @transform_10(%arg0: i32) -> (i32, i32) {
    %c0_i32 = arith.constant 0 : i32
    %c0_i32_0 = arith.constant 0 : i32
    %c0_i32_1 = arith.constant 0 : i32
    return %c0_i32, %c0_i32_0 : i32, i32
  }
  func.func @transform_11(%arg0: i32) -> (i32, i32) {
    %c0_i32 = arith.constant 0 : i32
    %c0_i32_0 = arith.constant 0 : i32
    %c0_i32_1 = arith.constant 0 : i32
    return %c0_i32, %c0_i32_0 : i32, i32
  }
  func.func @transform_12(%arg0: i32) -> (i32, i32) {
    %c0_i32 = arith.constant 0 : i32
    %c0_i32_0 = arith.constant 0 : i32
    %c0_i32_1 = arith.constant 0 : i32
    return %c0_i32, %c0_i32_0 : i32, i32
  }
  func.func @transform_13(%arg0: i32) -> (i32, i32, i32, i32) {
    %c0_i32 = arith.constant 0 : i32
    %c0_i32_0 = arith.constant 0 : i32
    %c0_i32_1 = arith.constant 0 : i32
    %c0_i32_2 = arith.constant 0 : i32
    return %arg0, %c0_i32, %c0_i32_0, %c0_i32_1 : i32, i32, i32, i32
  }
}

</mosaic_0001>

<bundles_post_ra>
// kernel: tpu_custom_call.1
= control target key start
LH: loop header
LB: loop body
LE: loop exit
PB: predicated region body
PF: predicated region fallthrough
CT: control target
= control target key end

     0   :  { %s14352_s0 = inlined_call_operand.hbm [shape: f32[2,16,16,64], index: 0, kind: input, shape index: {}]   ;;  %s14353_s1 = inlined_call_operand.hbm [shape: f32[64,64], index: 1, kind: input, shape index: {}]   ;;  %s14354_s2 = inlined_call_operand.vmem [shape: f32[1,64], index: 2, kind: input, shape index: {}]   ;;  %s14355_s3 = inlined_call_operand.vmem [shape: f32[1,64], index: 3, kind: input, shape index: {}]   ;;  %s14356_s4 = inlined_call_operand.hbm [shape: bf16[9,64,128], index: 4, kind: input, shape index: {}]   ;;  %s14357_s5 = inlined_call_operand.vmem [shape: f32[1,128], index: 5, kind: input, shape index: {}]   ;;  %s14358_s6 = inlined_call_operand.hbm [shape: f32[128,128], index: 6, kind: input, shape index: {}]   ;;  %s14359_s7 = inlined_call_operand.vmem [shape: f32[1,128], index: 7, kind: input, shape index: {}]   ;;  %s14360_s8 = inlined_call_operand.vmem [shape: f32[1,128], index: 8, kind: input, shape index: {}]   ;;  %s14361_s9 = inlined_call_operand.hbm [shape: bf16[9,128,128], index: 9, kind: input, shape index: {}]   ;;  %s14362_s10 = inlined_call_operand.vmem [shape: f32[1,128], index: 10, kind: input, shape index: {}]   ;;  %s14363_s11 = inlined_call_operand.vmem [shape: bf16[64,128], index: 11, kind: input, shape index: {}]   ;;  %s14364_s12 = inlined_call_operand.vmem [shape: f32[1,128], index: 12, kind: input, shape index: {}]   ;;  %s14365_s13 = inlined_call_operand.hbm [shape: f32[2,16,16,128], index: 13, kind: output, shape index: {}]  }
   0x1   :  { %14496 = sst [smem:[#allocation75_spill]] %s14360_s8 }
   0x2   :  { %14497 = sst [smem:[#allocation76_spill]] %s14362_s10 }
   0x3   :  { %14498 = sst [smem:[#allocation77_spill]] %s14363_s11 }
   0x4   :  { %14499 = sst [smem:[#allocation78_spill]] %s14364_s12 }
   0x5   :  { %14500 = sst [smem:[#allocation79_spill]] %s14365_s13 }
   0x6   :  { %18 = vsyncpa [#allocation3], 0 }
   0x7   :  { %20 = vsyncpa [#allocation3 + $0x1], 0 }
   0x8   :  { %21 = vsyncpa [#allocation6], 0 }
   0x9   :  { %22 = vsyncpa [#allocation9], 0 }
   0xa   :  { %23 = vsyncpa [#allocation4], 0 }
   0xb   :  { %25 = vsyncpa [#allocation4 + $0x1], 0  ;;  %s11351_s25 = smov 0   ;;  %s11353_s26 = smov 0  }
   0xc   :  { %s11355_s27 = smov 0   ;;  %s11357_s28 = smov 0  }
   0xd LB: > { %14501 = sst [smem:[#allocation16_spill]] %s11250_s25  ;;  %s11372_s29 = sadd.s32 4294967295, %s11262_s28   ;;  %s11262_s28 = sphi %s11357_s28, %s14765_s28   ;;  %s11258_s27 = sphi %s11355_s27, %s14764_s27   ;;  %s11254_s26 = sphi %s11353_s26, %s14763_s26   ;;  %s11250_s25 = sphi %s11351_s25, %s14762_s25  }
   0xe   : > { %s7926_s30 = sadd.s32 4294967294, %s11262_s28   ;;  %p51_p0 = scmp.ne.s32.totalorder %s11254_s26, %s11250_s25 }
   0xf   : > { %p14369_p1 = scmp.eq.s32.totalorder %s11372_s29, 0  ;;  %p333_p3 = scmp.eq.s32.totalorder %s7926_s30, 1 }
  0x10   : > { %p7927_p5 = scmp.ge.s32.totalorder %s11262_s28, 1  ;;  %p340_p7 = scmp.lt.s32.totalorder %s11262_s28, 3 }
  0x11   : > { %p11381_p4 = por %p14369_p1, %p51_p0  ;;  %p11386_p6 = por %p333_p3, %p51_p0 }
  0x12   : > { %p11391_p8 = pnand %p7927_p5, %p340_p7  ;;  %s11264_s17 = smov [#allocation5]  }
  0x13   : > { %s14502_s14 = scalar_select %p11381_p4, 1, 0 }
  0x14   : > { %s14503_s15 = scalar_select %p11386_p6, 1, 0 }
  0x15   : > { %s14505_s16 = scalar_select %p11391_p8, 1, 0 }
  0x16   : > { %14504 = sst [smem:[#allocation17_spill]] %s14503_s15  ;;  %s352_s18 = sshll.u32 %s11264_s17, 4  ;;  %s11395_s18 = int_to_ptr.vmem [resolvable:$true] %s352_s18 }
  0x17   : > { %p10588_p9 = pneg %p11391_p8  ;;  %s11265_s20 = smov [#allocation8]  }
  0x18   : > { %s387_s21 = sshll.u32 %s11265_s20, 4  ;;  %s11266_s22 = smov [#allocation7]   ;;  %s11406_s21 = int_to_ptr.vmem [resolvable:$true] %s387_s21 }
  0x19   : > { %p11402_p11 = pnand %p10588_p9, %p14369_p1  ;;  %s11408_s23 = sshll.u32 %s11266_s22, 4  ;;  %s372_s23 = int_to_ptr.vmem [resolvable:$true] %s11408_s23 }
  0x1a   : > { %s11046_s17 = scalar_lea.hbm %s14353_s1, 1024 }
  0x1b   : > { %p11047_p12 = scmp.ne.s32.totalorder %s14353_s1, %s11046_s17  ;;  %p11418_p13 = pneg %p11402_p11 }
  0x1c   : > { %p11053_p5 = scmp.lt.u32.totalorder %s11046_s17, %s14353_s1 }
  0x1d   : > { %p11049_p0 = pnand %p11418_p13, %p11047_p12 }
  0x1f   : > { %p11050_p3 = pneg %p11049_p0 }
  0x21   : > { %p11055_p7 = pnand %p11053_p5, %p11050_p3 }
  0x23   : > { %11058 = shalt.err (!%p11055_p7)
}
  0x24   : > { %s11059_s25 = scalar_lea.vmem %s11395_s18, 1024  ;;  %p11067_p2 = scmp.lt.s32.totalorder %s11395_s18, %s11395_s18 }
  0x25   : > { %p11060_p9 = scmp.ne.s32.totalorder %s11395_s18, %s11059_s25  ;;  %p11068_p6 = scmp.lt.s32.totalorder %s11059_s25, %s11059_s25 }
  0x27   : > { %p11062_p10 = pnand %p11060_p9, %p11418_p13  ;;  %p11069_p12 = por %p11068_p6, %p11067_p2 }
  0x29   : > { %p11063_p1 = pneg %p11062_p10 }
  0x2b   : > { %p11070_p0 = pnand %p11069_p12, %p11063_p1 }
  0x2d   : > { %11073 = shalt.err (!%p11070_p0)
}
  0x2e   : > { %s14373_s15 = smov 128   ;;  %s14374_s24 = smov 8  }
  0x2f   : > { %10591 = dma.hbm_to_vmem [thread:$0]  (!%p11402_p11), %s14353_s1, 1024, %s11395_s18, [#allocation6], %s14373_s15, %s14373_s15, %s14374_s24  }
  0x30   : > { %s11074_s25 = scalar_lea.hbm %s14358_s6, 2048 }
  0x31   : > { %p11075_p1 = scmp.ne.s32.totalorder %s14358_s6, %s11074_s25  ;;  %p11081_p10 = scmp.lt.u32.totalorder %s11074_s25, %s14358_s6 }
  0x33   : > { %p11077_p2 = pnand %p11075_p1, %p11418_p13 }
  0x35   : > { %p11078_p6 = pneg %p11077_p2 }
  0x37   : > { %p11083_p3 = pnand %p11081_p10, %p11078_p6 }
  0x39   : > { %11086 = shalt.err (!%p11083_p3)
}
  0x3a   : > { %s11087_s18 = scalar_lea.vmem %s11406_s21, 2048  ;;  %p11095_p12 = scmp.lt.s32.totalorder %s11406_s21, %s11406_s21 }
  0x3b   : > { %p11088_p5 = scmp.ne.s32.totalorder %s11406_s21, %s11087_s18  ;;  %p11096_p0 = scmp.lt.s32.totalorder %s11087_s18, %s11087_s18 }
  0x3d   : > { %p11090_p7 = pnand %p11088_p5, %p11418_p13  ;;  %p11097_p1 = por %p11096_p0, %p11095_p12 }
  0x3f   : > { %p11091_p9 = pneg %p11090_p7 }
  0x41   : > { %p11098_p2 = pnand %p11097_p1, %p11091_p9 }
  0x43   : > { %11101 = shalt.err (!%p11098_p2)
}
  0x44   : > { %10597 = dma.hbm_to_vmem [thread:$0]  (!%p11402_p11), %s14358_s6, 2048, %s11406_s21, [#allocation9], %s14373_s15, %s14373_s15, %s14374_s24  }
  0x45   : > { %s11102_s30 = scalar_lea.hbm %s14356_s4, 4608 }
  0x46   : > { %p11103_p6 = scmp.ne.s32.totalorder %s14356_s4, %s11102_s30  ;;  %p11109_p5 = scmp.lt.u32.totalorder %s11102_s30, %s14356_s4 }
  0x48   : > { %p11105_p10 = pnand %p11103_p6, %p11418_p13 }
  0x4a   : > { %p11106_p3 = pneg %p11105_p10 }
  0x4c   : > { %p11111_p7 = pnand %p11109_p5, %p11106_p3 }
  0x4e   : > { %11114 = shalt.err (!%p11111_p7)
}
  0x4f   : > { %s11115_s18 = scalar_lea.vmem %s372_s23, 4608  ;;  %p11123_p1 = scmp.lt.s32.totalorder %s372_s23, %s372_s23 }
  0x50   : > { %p11116_p9 = scmp.ne.s32.totalorder %s372_s23, %s11115_s18  ;;  %p11124_p2 = scmp.lt.s32.totalorder %s11115_s18, %s11115_s18 }
  0x52   : > { %p11118_p12 = pnand %p11116_p9, %p11418_p13  ;;  %p11125_p4 = por %p11124_p2, %p11123_p1 }
  0x54   : > { %p11119_p0 = pneg %p11118_p12 }
  0x56   : > { %p11126_p8 = pnand %p11125_p4, %p11119_p0 }
  0x58   : > { %11129 = shalt.err (!%p11126_p8)
}
  0x59   : > { %s11269_s21 = smov 64   ;;  %s11270_s8 = smov 4  }
  0x5a   : > { %10594 = dma.hbm_to_vmem [thread:$0]  (!%p11402_p11), %s14356_s4, 4608, %s372_s23, [#allocation6], %s11269_s21, %s11269_s21, %s11270_s8  }
  0x5b   : > { %s11271_s12 = smov [#allocation10]   ;;  %s11130_s22 = scalar_lea.hbm %s14361_s9, 9216 }
  0x5c   : > { %s406_s30 = sshll.u32 %s11271_s12, 4  ;;  %p11131_p4 = scmp.ne.s32.totalorder %s14361_s9, %s11130_s22  ;;  %s407_s30 = int_to_ptr.vmem [resolvable:$true] %s406_s30 }
  0x5d   : > { %p11137_p10 = scmp.lt.u32.totalorder %s11130_s22, %s14361_s9 }
  0x5e   : > { %p11133_p8 = pnand %p11131_p4, %p11418_p13 }
  0x60   : > { %p11134_p6 = pneg %p11133_p8 }
  0x62   : > { %p11139_p3 = pnand %p11137_p10, %p11134_p6 }
  0x64   : > { %11142 = shalt.err (!%p11139_p3)
}
  0x65   : > { %s11143_s23 = scalar_lea.vmem %s407_s30, 9216  ;;  %p11151_p12 = scmp.lt.s32.totalorder %s407_s30, %s407_s30 }
  0x66   : > { %p11144_p5 = scmp.ne.s32.totalorder %s407_s30, %s11143_s23  ;;  %p11152_p0 = scmp.lt.s32.totalorder %s11143_s23, %s11143_s23 }
  0x68   : > { %p11146_p7 = pnand %p11144_p5, %p11418_p13  ;;  %p11153_p1 = por %p11152_p0, %p11151_p12 }
  0x6a   : > { %p11147_p9 = pneg %p11146_p7 }
  0x6c   : > { %p11154_p2 = pnand %p11153_p1, %p11147_p9 }
  0x6e   : > { %11157 = shalt.err (!%p11154_p2)
}
  0x6f   : > { %10600 = dma.hbm_to_vmem [thread:$0]  (!%p11402_p11), %s14361_s9, 9216, %s407_s30, [#allocation9], %s11269_s21, %s11269_s21, %s11270_s8  }
  0x70   : > { %s11506_s13 = sadd.s32 1, %s11262_s28   ;;  %s38_s15 = sadd.s32 1, %s11258_s27 }
  0x71   : > { %s35_s19 = ssub.s32 %s11262_s28, %s11506_s13  ;;  %p45_p13 = scmp.ne.s32.totalorder %s11258_s27, %s11254_s26 }
  0x72   : > { %p36_p4 = scmp.eq.s32.totalorder %s35_s19, 0  ;;  %p46_p8 = scmp.eq.s32.totalorder %s11262_s28, 0 }
  0x73   : > { %p14508_p6 = scmp.eq.s32.totalorder %s11372_s29, 1  ;;  %p10613_p3 = scmp.lt.s32.totalorder %s11262_s28, 2 }
  0x74   : > { %s11522_s12 = scalar_select %p36_p4, %s11258_s27, %s38_s15  }
  0x75   : > { %p11516_p10 = por %p14508_p6, %p45_p13  ;;  %p47_p5 = por %p46_p8, %p45_p13 }
  0x76   : > { %s429_s17 = sand.u32 1, %s11258_s27   ;;  %s8326_s21 = sshll.u32 %s11262_s28, 12 }
  0x77   : > { %s7933_s20 = sshll.u32 %s429_s17, 8  ;;  %s11529_s22 = scalar_lea.hbm %s14352_s0, %s8326_s21 }
  0x78   : > { %s433_s25 = scalar_lea.vmem [#allocation2], %s7933_s20  ;;  %p11533_p11 = pnand %p10613_p3, %p47_p5 }
  0x79   : > { %s440_s18 = sshll.u32 %s433_s25, 4  ;;  %s11537_s10 = scalar_lea.sflag [#allocation3], %s429_s17  ;;  %s11531_s18 = int_to_ptr.vmem [resolvable:$true] %s440_s18 }
  0x7a   : > { %s11158_s11 = scalar_lea.hbm %s11529_s22, 4096  ;;  %p11160_p9 = pneg %p11533_p11 }
  0x7b   : > { %p11159_p7 = scmp.ne.s32.totalorder %s11529_s22, %s11158_s11  ;;  %s11163_s20 = scalar_lea.hbm %s14352_s0, 8192 }
  0x7c   : > { %p11164_p1 = scmp.lt.u32.totalorder %s11529_s22, %s14352_s0  ;;  %p11165_p2 = scmp.lt.u32.totalorder %s11163_s20, %s11158_s11 }
  0x7d   : > { %p11161_p12 = pnand %p11160_p9, %p11159_p7  ;;  %p11167_p4 = scmp.lt.u32.totalorder %s11158_s11, %s11529_s22 }
  0x7e   : > { %p11166_p13 = por %p11165_p2, %p11164_p1 }
  0x7f   : > { %p11162_p0 = pneg %p11161_p12 }
  0x80   : > { %p11168_p8 = por %p11167_p4, %p11166_p13 }
  0x82   : > { %p11169_p6 = pnand %p11168_p8, %p11162_p0 }
  0x84   : > { %11172 = shalt.err (!%p11169_p6)
}
  0x85   : > { %s11173_s17 = scalar_lea.vmem %s11531_s18, 4096  ;;  %s11272_s30 = smov [#allocation2]  }
  0x86   : > { %p11174_p3 = scmp.ne.s32.totalorder %s11531_s18, %s11173_s17  ;;  %s11178_s25 = sshll.u32 %s11272_s30, 4  ;;  %s11179_s25 = int_to_ptr.vmem [resolvable:$false] %s11178_s25 }
  0x87   : > { %s11180_s15 = scalar_lea.vmem %s11179_s25, 8192  ;;  %p11181_p12 = scmp.lt.s32.totalorder %s11531_s18, %s11179_s25 }
  0x88   : > { %p11176_p5 = pnand %p11174_p3, %p11160_p9  ;;  %p11182_p1 = scmp.lt.s32.totalorder %s11180_s15, %s11173_s17 }
  0x8a   : > { %p11177_p7 = pneg %p11176_p5  ;;  %p11183_p2 = por %p11182_p1, %p11181_p12 }
  0x8c   : > { %p11184_p13 = pnand %p11183_p2, %p11177_p7 }
  0x8e   : > { %11187 = shalt.err (!%p11184_p13)
}
  0x8f   : > { %s14511_s11 = smov 8   ;;  %s14512_s19 = smov 128  }
  0x90   : > { %10604 = dma.hbm_to_vmem [thread:$0]  (!%p11533_p11), %s11529_s22, 4096, %s11531_s18, %s11537_s10, %s14512_s19, %s14512_s19, %s14511_s11  }
  0x91   : > { %p14513_p9 = scmp.ne.s32.totalorder %s14505_s16, 0 }
  0x93   : > { %452 = sbr.rel (%p14513_p9) target bundleno = 2879 (0xb3f), region = 72 }
  0x9a   : > { %s11571_s20 = sand.u32 1, %s11254_s26   ;;  %p14514_p0 = scmp.ne.s32.totalorder %s14502_s14, 0 }
  0x9b   : > { %s7937_s21 = sshll.u32 %s11571_s20, 8  ;;  %s455_s8 = scalar_lea.sflag [#allocation3], %s11571_s20 }
  0x9c   : > { %s11577_s23 = scalar_lea.vmem [#allocation2], %s7937_s21 }
  0x9d   : > { %11233 = dma.done.wait (%p14514_p0), %s455_s8, 4096  }
  0x9e   : > { %11235 = vsyncadd (%p14514_p0), %s455_s8, 4294963200  ;;  %p14515_p11 = scmp.eq.s32.totalorder %s11372_s29, 0 }
  0xa0   : > { %11237 = dma.done.wait (%p14515_p11), [#allocation6], 5632   ;;  %p14516_p4 = pmov %p14515_p11 }
  0xa2   : > { %11239 = vsyncadd (%p14516_p4), [#allocation6], 4294961664  ;;  %p14517_p8 = pmov %p14516_p4 }
  0xa3   : > { %p14518_p6 = pmov %p14516_p4 }
  0xa4   : > { %11241 = dma.done.wait (%p14517_p8), [#allocation9], 11264  }
  0xa5   : > { %11243 = vsyncadd (%p14518_p6), [#allocation9], 4294956032  ;;  %v14381_v0 = vmov 1.0   ;;  %v11593_v1 = vld [vmem:[%s11577_s23 + $0x80] sm:$0xff]  ;;  %v11596_v2 = vld [vmem:[%s11577_s23 + $0x88] sm:$0xff]  ;;  %vm11275_vm0 = vmmov 0  }
  0xa6   : > { %1345 = vmatprep.mubr.f32.mxu1 %v14381_v0  ;;  %v11600_v3 = vpack.c.bf16 %v11596_v2, %v11593_v1  ;;  %v11603_v4 = vld [vmem:[%s11577_s23] sm:$0xff]  ;;  %v11606_v5 = vld [vmem:[%s11577_s23 + $0x8] sm:$0xff]  ;;  %v11609_v6 = vld [vmem:[%s11577_s23 + $0x90] sm:$0xff]  ;;  %v1367_v48 = vmul.f32 %v11593_v1, %v11593_v1  ;;  %v1368_v49 = vmul.f32 %v11596_v2, %v11596_v2  ;;  %vm1456_vm1 = vcmask 1040384   ;;  %s14624_s19 = sld [smem:[#allocation75_spill]]  ;;  %s14712_s14 = sld [smem:[#allocation77_spill]] }
  0xa7   : > { %v11613_v7 = vpack.c.bf16 %v11606_v5, %v11603_v4  ;;  %v11616_v8 = vld [vmem:[%s11577_s23 + $0x98] sm:$0xff]  ;;  %v11619_v9 = vld [vmem:[%s11577_s23 + $0x10] sm:$0xff]  ;;  %v11630_v12 = vld [vmem:[%s11577_s23 + $0xa0] sm:$0xff]  ;;  %v1351_v50 = vmul.f32 %v11603_v4, %v11603_v4  ;;  %v1352_v51 = vmul.f32 %v11606_v5, %v11606_v5  ;;  %v1369_v54 = vmul.f32 %v11609_v6, %v11609_v6  ;;  %s14732_s11 = sld [smem:[#allocation76_spill]]  ;;  %s14189_s16 = scalar_lea.vmem [#allocation11], %s7937_s21 }
  0xa8   : > { %14519 = vst [vmem:[#allocation18_spill] sm:$0xff] %v11600_v3  ;;  %v11622_v10 = vld [vmem:[%s11577_s23 + $0x18] sm:$0xff]  ;;  %9797 = vmatprep.subr.bf16.mxu1 %v11600_v3  ;;  %v11627_v11 = vpack.c.bf16 %v11616_v8, %v11609_v6  ;;  %v11633_v13 = vld [vmem:[%s11577_s23 + $0xa8] sm:$0xff]  ;;  %v11646_v16 = vld [vmem:[%s11577_s23 + $0x20] sm:$0xff]  ;;  %v9828_v53 = vpack.c.bf16 %v1368_v49, %v1367_v48  ;;  %v1370_v55 = vmul.f32 %v11616_v8, %v11616_v8  ;;  %vm1458_vm2 = vcmask 523264   ;;  %s8327_s21 = sshll.u32 %s11372_s29, 12 }
  0xa9   : > { %14520 = vst [vmem:[#allocation19_spill] sm:$0xff] %v11613_v7  ;;  %9799 = vmatpush3.bf16.msra.mxu1 %v11613_v7  ;;  %v11638_v14 = vpack.c.bf16 %v11622_v10, %v11619_v9  ;;  %v11643_v15 = vpack.c.bf16 %v11633_v13, %v11630_v12  ;;  %v11649_v17 = vld [vmem:[%s11577_s23 + $0x28] sm:$0xff]  ;;  %v11652_v18 = vld [vmem:[%s11577_s23 + $0xb0] sm:$0xff]  ;;  %v11655_v19 = vld [vmem:[%s11577_s23 + $0xb8] sm:$0xff]  ;;  %v1353_v56 = vmul.f32 %v11619_v9, %v11619_v9  ;;  %vm1898_vm6 = vsmask.f32 256 }
  0xaa   : > { %14521 = vst [vmem:[#allocation20_spill] sm:$0xff] %v11627_v11  ;;  %9801 = vmatprep.subr.bf16.mxu1 %v11627_v11  ;;  %v11660_v20 = vpack.c.bf16 %v11649_v17, %v11646_v16  ;;  %v11665_v21 = vpack.c.bf16 %v11655_v19, %v11652_v18  ;;  %v11668_v22 = vld [vmem:[%s11577_s23 + $0x30] sm:$0xff]  ;;  %v11671_v23 = vld [vmem:[%s11577_s23 + $0x38] sm:$0xff]  ;;  %v11674_v24 = vld [vmem:[%s11577_s23 + $0xc0] sm:$0xff]  ;;  %v1354_v57 = vmul.f32 %v11622_v10, %v11622_v10  ;;  %s7815_s22 = sshll.u32 %s14189_s16, 4  ;;  %s14757_s17 = sld [smem:[#allocation79_spill]]  ;;  %s14305_s22 = int_to_ptr.vmem [resolvable:$true] %s7815_s22 }
  0xab   : > { %14522 = vst [vmem:[#allocation21_spill] sm:$0xff] %v11638_v14  ;;  %14523 = vst [vmem:[#allocation22_spill] sm:$0xff] %v11643_v15  ;;  %v11677_v25 = vld [vmem:[%s11577_s23 + $0xc8] sm:$0xff]  ;;  %v11680_v26 = vld [vmem:[%s11577_s23 + $0x40] sm:$0xff]  ;;  %v11688_v28 = vpack.c.bf16 %v11671_v23, %v11668_v22  ;;  %v9830_v58 = vpack.c.bf16 %v1352_v51, %v1351_v50  ;;  %v9832_v59 = vpack.c.bf16 %v1370_v55, %v1369_v54  ;;  %s7802_s29 = scalar_lea.sflag [#allocation4], %s11571_s20  ;;  %s11188_s25 = scalar_lea.vmem %s14305_s22, 4096 }
  0xac   : > { %14524 = vst [vmem:[#allocation23_spill] sm:$0xff] %v11660_v20  ;;  %14525 = vst [vmem:[#allocation24_spill] sm:$0xff] %v11665_v21  ;;  %v11683_v27 = vld [vmem:[%s11577_s23 + $0x48] sm:$0xff]  ;;  %v11691_v29 = vld [vmem:[%s11577_s23 + $0xd0] sm:$0xff]  ;;  %v11699_v31 = vpack.c.bf16 %v11677_v25, %v11674_v24  ;;  %v1371_v60 = vmul.f32 %v11630_v12, %v11630_v12  ;;  %v1372_v61 = vmul.f32 %v11633_v13, %v11633_v13  ;;  %p11189_p3 = scmp.ne.s32.totalorder %s14305_s22, %s11188_s25  ;;  %s11278_s15 = smov [#allocation11]  }
  0xad   : > { %9803 = vmatpush3.bf16.msra.mxu1 %v11638_v14  ;;  %14526 = vst [vmem:[#allocation25_spill] sm:$0xff] %v11688_v28  ;;  %v11694_v30 = vld [vmem:[%s11577_s23 + $0xd8] sm:$0xff]  ;;  %v11702_v32 = vld [vmem:[%s11577_s23 + $0x50] sm:$0xff]  ;;  %v11710_v34 = vpack.c.bf16 %v11683_v27, %v11680_v26  ;;  %v11713_v35 = vld [vmem:[%s11577_s23 + $0xe0] sm:$0xff]  ;;  %v1355_v62 = vmul.f32 %v11646_v16, %v11646_v16  ;;  %v1356_v63 = vmul.f32 %v11649_v17, %v11649_v17 }
  0xae   : > { %9805 = vmatprep.subr.bf16.mxu1 %v11643_v15  ;;  %14527 = vst [vmem:[#allocation26_spill] sm:$0xff] %v11699_v31  ;;  %v11705_v33 = vld [vmem:[%s11577_s23 + $0x58] sm:$0xff]  ;;  %v11716_v36 = vld [vmem:[%s11577_s23 + $0xe8] sm:$0xff]  ;;  %v11721_v37 = vpack.c.bf16 %v11694_v30, %v11691_v29  ;;  %v11724_v38 = vld [vmem:[%s11577_s23 + $0x60] sm:$0xff]  ;;  %v9834_v48 = vpack.c.bf16 %v1354_v57, %v1353_v56  ;;  %v9836_v49 = vpack.c.bf16 %v1372_v61, %v1371_v60  ;;  %p11190_p5 = pnand %p11189_p3, %p11516_p10 }
  0xaf   : > { %14528 = vst [vmem:[#allocation27_spill] sm:$0xff] %v11710_v34  ;;  %v11727_v39 = vld [vmem:[%s11577_s23 + $0x68] sm:$0xff]  ;;  %v11732_v40 = vpack.c.bf16 %v11705_v33, %v11702_v32  ;;  %v11735_v41 = vld [vmem:[%s11577_s23 + $0xf0] sm:$0xff]  ;;  %v11738_v42 = vld [vmem:[%s11577_s23 + $0xf8] sm:$0xff]  ;;  %v11743_v43 = vpack.c.bf16 %v11716_v36, %v11713_v35  ;;  %v1373_v50 = vmul.f32 %v11652_v18, %v11652_v18  ;;  %v1374_v51 = vmul.f32 %v11655_v19, %v11655_v19 }
  0xb0   : > { %14529 = vst [vmem:[#allocation28_spill] sm:$0xff] %v11721_v37  ;;  %v11746_v44 = vld [vmem:[%s11577_s23 + $0x70] sm:$0xff]  ;;  %v11749_v45 = vld [vmem:[%s11577_s23 + $0x78] sm:$0xff]  ;;  %v11754_v46 = vpack.c.bf16 %v11727_v39, %v11724_v38  ;;  %v11759_v47 = vpack.c.bf16 %v11738_v42, %v11735_v41  ;;  %v1358_v54 = vmul.f32 %v11671_v23, %v11671_v23  ;;  %v9838_v55 = vpack.c.bf16 %v1356_v63, %v1355_v62  ;;  %vm12276_vm7 = vmand %vm1456_vm1, %vm1898_vm6  ;;  %s14303_s30 = scalar_lea.hbm %s14757_s17, %s8327_s21  ;;  %p11191_p7 = pneg %p11190_p5 }
  0xb1   : > { %9807 = vmatpush3.bf16.msra.mxu1 %v11660_v20  ;;  %14530 = vst [vmem:[#allocation29_spill] sm:$0xff] %v11732_v40  ;;  %14531 = vst [vmem:[#allocation30_spill] sm:$0xff] %v11743_v43  ;;  %v11772_v52 = vpack.c.bf16 %v11749_v45, %v11746_v44  ;;  %v9840_v56 = vpack.c.bf16 %v1374_v51, %v1373_v50  ;;  %v1375_v57 = vmul.f32 %v11674_v24, %v11674_v24 }
  0xb2   : > { %9809 = vmatprep.subr.bf16.mxu1 %v11665_v21  ;;  %14532 = vst [vmem:[#allocation31_spill] sm:$0xff] %v11754_v46  ;;  %14533 = vst [vmem:[#allocation32_spill] sm:$0xff] %v11759_v47  ;;  %v1359_v18 = vmul.f32 %v11680_v26, %v11680_v26  ;;  %v1360_v19 = vmul.f32 %v11683_v27, %v11683_v27  ;;  %v1377_v61 = vmul.f32 %v11691_v29, %v11691_v29 }
  0xb3   : > { %14534 = vst [vmem:[#allocation33_spill] sm:$0xff] %v11772_v52  ;;  %v1378_v62 = vmul.f32 %v11694_v30, %v11694_v30  ;;  %v1361_v24 = vmul.f32 %v11702_v32, %v11702_v32  ;;  %v1380_v50 = vmul.f32 %v11716_v36, %v11716_v36  ;;  %v1363_v29 = vmul.f32 %v11724_v38, %v11724_v38 }
  0xb4   : > { %v9846_v63 = vpack.c.bf16 %v1360_v19, %v1359_v18  ;;  %v1364_v30 = vmul.f32 %v11727_v39, %v11727_v39  ;;  %v1366_v36 = vmul.f32 %v11749_v45, %v11749_v45  ;;  %v1271_v18 = vld [vmem:[#allocation5] sm:$0xff]  ;;  %v1272_v19 = vld [vmem:[#allocation5 + $0x8] sm:$0xff] }
  0xb5   : > { %9811 = vmatpush3.bf16.msra.mxu1 %v11688_v28  ;;  %v11045_v28 = vld [vmem:[%s11577_s23 + $0xe8] sm:$0xff] }
  0xb6   : > { %9813 = vmatprep.subr.bf16.mxu1 %v11699_v31 }
  0xb9   : > { %9815 = vmatpush3.bf16.msra.mxu1 %v11710_v34 }
  0xba   : > { %9817 = vmatprep.subr.bf16.mxu1 %v11721_v37 }
  0xbd   : > { %9819 = vmatpush3.bf16.msra.mxu1 %v11732_v40 }
  0xbe   : > { %9821 = vmatprep.subr.bf16.mxu1 %v11743_v43 }
  0xc1   : > { %9823 = vmatpush3.bf16.msra.mxu1 %v11754_v46 }
  0xc2   : > { %9825 = vmatprep.subr.bf16.mxu1 %v11759_v47 }
  0xc5   : > { %9827 = vmatpush3.bf16.msra.mxu1 %v11772_v52  ;;  %v11043_v52 = vld [vmem:[%s11577_s23 + $0xd8] sm:$0xff] }
  0xc6   : > { %9829 = vmatprep.subr.bf16.mxu1 %v9828_v53  ;;  %v1357_v53 = vmul.f32 %v11668_v22, %v11668_v22 }
  0xc8   : > { %1346 = vmatmul.mubr.f32.vlgmr.msra.gmra.mrb[0].mxu1 %v14381_v0 }
  0xc9   : > { %9831 = vmatpush3.bf16.msra.mxu1 %v9830_v58  ;;  %1447 = vmatprep.mubr.f32.mxu1 %v14381_v0  ;;  %v1376_v58 = vmul.f32 %v11677_v25, %v11677_v25  ;;  %v1362_v25 = vmul.f32 %v11705_v33, %v11705_v33 }
  0xca   : > { %9833 = vmatprep.subr.bf16.mxu1 %v9832_v59  ;;  %v9842_v59 = vpack.c.bf16 %v1358_v54, %v1357_v53  ;;  %v1381_v54 = vmul.f32 %v11735_v41, %v11735_v41 }
  0xcb   : > { %v9844_v60 = vpack.c.bf16 %v1376_v58, %v1375_v57  ;;  %v9850_v51 = vpack.c.bf16 %v1362_v25, %v1361_v24  ;;  %v1275_v25 = vld [vmem:[#allocation5 + $0x20] sm:$0xff] }
  0xcd   : > { %9835 = vmatpush3.bf16.msra.mxu1 %v9834_v48  ;;  %v9848_v48 = vpack.c.bf16 %v1378_v62, %v1377_v61  ;;  %v9861_v61 = vpack.c.bf16 %v1272_v19, %v1271_v18  ;;  %v1274_v62 = vld [vmem:[#allocation5 + $0x18] sm:$0xff]  ;;  %v10667_v18 = vld [vmem:[#allocation7 + $0x28] sm:$0xff]   ;;  %v10668_v19 = vld [vmem:[#allocation7 + $0x30] sm:$0xff]  }
  0xce   : > { %9837 = vmatprep.subr.bf16.mxu1 %v9836_v49  ;;  %v1379_v49 = vmul.f32 %v11713_v35, %v11713_v35  ;;  %v1365_v35 = vmul.f32 %v11746_v44, %v11746_v44 }
  0xd0   : > { %v9852_v53 = vpack.c.bf16 %v1380_v50, %v1379_v49  ;;  %v9858_v58 = vpack.c.bf16 %v1366_v36, %v1365_v35  ;;  %v1277_v49 = vld [vmem:[#allocation5 + $0x30] sm:$0xff]  ;;  %v1278_v50 = vld [vmem:[#allocation5 + $0x38] sm:$0xff] }
  0xd1   : > { %9839 = vmatpush3.bf16.msra.mxu1 %v9838_v55  ;;  %v1382_v55 = vmul.f32 %v11738_v42, %v11738_v42 }
  0xd2   : > { %9841 = vmatprep.subr.bf16.mxu1 %v9840_v56  ;;  %v9854_v56 = vpack.c.bf16 %v1364_v30, %v1363_v29  ;;  %v9870_v29 = vpack.c.bf16 %v1278_v50, %v1277_v49  ;;  %v14383_v30 = vmov 0.0  }
  0xd3   : > { %v9856_v57 = vpack.c.bf16 %v1382_v55, %v1381_v54  ;;  %8926 = vmatprep.mubr.msk.f32.mxu0 %vm11275_vm0, %v14383_v30 }
  0xd5   : > { %9843 = vmatpush3.bf16.msra.mxu1 %v9842_v59  ;;  %v1273_v59 = vld [vmem:[#allocation5 + $0x10] sm:$0xff] }
  0xd6   : > { %9845 = vmatprep.subr.bf16.mxu1 %v9844_v60  ;;  %v14377_v60 = vmov 0.0|0.0   ;;  %v9864_v24 = vpack.c.bf16 %v1274_v62, %v1273_v59  ;;  %v10669_v59 = vld [vmem:[#allocation7 + $0x38] sm:$0xff]   ;;  %v14379_v62 = vmov 0  }
  0xd7   : > { %9860 = vmatprep.subr.bf16.mxu0 %v14377_v60 }
  0xd8   : > { %9862 = vmatpush3.bf16.msra.mxu0 %v9861_v61  ;;  %v11844_v61 = vld [vmem:[#allocation7] sm:$0xff]  }
  0xd9   : > { %9847 = vmatpush3.bf16.msra.mxu1 %v9846_v63  ;;  %9863 = vmatprep.subr.bf16.mxu0 %v14377_v60  ;;  %v1276_v63 = vld [vmem:[#allocation5 + $0x28] sm:$0xff] }
  0xda   : > { %9849 = vmatprep.subr.bf16.mxu1 %v9848_v48  ;;  %v9867_v48 = vpack.c.bf16 %v1276_v63, %v1275_v25 }
  0xdc   : > { %9865 = vmatpush3.bf16.msra.mxu0 %v9864_v24 }
  0xdd   : > { %9851 = vmatpush3.bf16.msra.mxu1 %v9850_v51  ;;  %9866 = vmatprep.subr.bf16.mxu0 %v14377_v60 }
  0xde   : > { %9853 = vmatprep.subr.bf16.mxu1 %v9852_v53 }
  0xe0   : > { %9868 = vmatpush3.bf16.msra.mxu0 %v9867_v48 }
  0xe1   : > { %9855 = vmatpush3.bf16.msra.mxu1 %v9854_v56  ;;  %9869 = vmatprep.subr.bf16.mxu0 %v14377_v60 }
  0xe2   : > { %9857 = vmatprep.subr.bf16.mxu1 %v9856_v57 }
  0xe4   : > { %9871 = vmatpush3.bf16.msra.mxu0 %v9870_v29 }
  0xe5   : > { %9859 = vmatpush3.bf16.msra.mxu1 %v9858_v58  ;;  %v10666_v58 = vld [vmem:[#allocation7 + $0x20] sm:$0xff]  }
  0xe6   : > { %8929 = vmatprep.subr.bf16.mxu1 %v10666_v58 }
  0xe8   : > { %1448 = vmatmul.mubr.f32.vlgmr.msra.gmra.mrb[2].mxu1 %v14381_v0 }
  0xe9   : > { %8930 = vmatpush3.bf16.msra.mxu1 %v10666_v58  ;;  %8937 = vmatprep.mubr.bf16.mxu1 %v14379_v62  ;;  %v11038_v62 = vld [vmem:[%s11577_s23 + $0xb0] sm:$0xff] }
  0xea   : > { %8931 = vmatprep.subr.bf16.mxu1 %v10667_v18 }
  0xed   : > { %8932 = vmatpush3.bf16.msra.mxu1 %v10667_v18 }
  0xee   : > { %8933 = vmatprep.subr.bf16.mxu1 %v10668_v19 }
  0xf1   : > { %8934 = vmatpush3.bf16.msra.mxu1 %v10668_v19 }
  0xf2   : > { %8935 = vmatprep.subr.bf16.mxu1 %v10669_v59 }
  0xf5   : > { %8936 = vmatpush3.bf16.msra.mxu1 %v10669_v59 }
  0xf6   : > { %8969 = vmatprep.subr.bf16.mxu1 %v11844_v61 }
 0x19b   : > { %v8360_v51 = vpop.f32.mrb[0].mxu1 }
 0x19c   : > { %v8361_v53 = vpop.f32.mrb[1].mxu1 }
 0x19d   : > { %v8362_v54 = vadd.f32 %v8361_v53, %v8360_v51  ;;  %v518_v51 = vlaneseq }
 0x19f   : > { %v11848_v53 = vshrl.u32 %v518_v51, 7 }
 0x1bb   : > { %v8395_v55 = vpop.f32.mrb[2].mxu1 }
 0x1bc   : > { %v8396_v35 = vpop.f32.mrb[3].mxu1 }
 0x1bd   : > { %v8397_v36 = vadd.f32 %v8396_v35, %v8395_v55  ;;  %v7980_v55 = vld [vmem:[%s14354_s2] ss:$0 sm:$0xff]  ;;  %v14376_v35 = vsub.s32 0, %v11848_v53 }
 0x1bf   : > { %v1454_v56 = vrot.slane %v8397_v36, 7 }
 0x1c1   : > { %v1457_v57 = vsel %vm1456_vm1, %v8362_v54, %v1454_v56  ;;  %v14375_v56 = vsub.s32 1, %v11848_v53 }
 0x1c2   : > { %8927 = vmatmul.mubr.msk.f32.vlgmr.msra.gmra.mrb[0].mxu0 %vm1458_vm2, %v1457_v57 }
 0x1c3   : > { %4384 = vmatprep.mubr.f32.mxu0 %v14381_v0 }
 0x295   : > { %v1528_v24 = vpop.f32.mrb[0].mxu0 }
 0x296   : > { %v1532_v25 = vmul.f32 0.001953125, %v1528_v24  ;;  %v8928_v63 = vpop.f32.mrb[1].mxu0 }
 0x297   : > { %v11872_v63 = vld [vmem:[%s14355_s3] ss:$0 sm:$0xff] }
 0x298   : > { %v1533_v48 = vmul.f32 %v1532_v25, %v1532_v25  ;;  %v11857_v57 = vrot.slane %v1532_v25, %v14376_v35 }
 0x29a   : > { %v1535_v49 = vrot.slane %v1533_v48, 7  ;;  %v1574_v18 = vsub.f32 %v11735_v41, %v11857_v57  ;;  %v1575_v19 = vsub.f32 %v11738_v42, %v11857_v57  ;;  %v1545_v48 = vsub.f32 %v11606_v5, %v11857_v57 }
 0x29b   : > { %v1549_v5 = vsub.f32 %v11649_v17, %v11857_v57  ;;  %v1555_v17 = vsub.f32 %v11705_v33, %v11857_v57  ;;  %v1559_v33 = vsub.f32 %v11749_v45, %v11857_v57  ;;  %v1573_v20 = vsub.f32 %v11045_v28, %v11857_v57 }
 0x29c   : > { %v1537_v50 = vsub.f32 %v1532_v25, %v1535_v49  ;;  %v1544_v25 = vsub.f32 %v11603_v4, %v11857_v57  ;;  %v1546_v49 = vsub.f32 %v11619_v9, %v11857_v57  ;;  %v1548_v4 = vsub.f32 %v11646_v16, %v11857_v57 }
 0x29d   : > { %v1551_v9 = vsub.f32 %v11671_v23, %v11857_v57  ;;  %v1554_v16 = vsub.f32 %v11702_v32, %v11857_v57  ;;  %v1556_v23 = vsub.f32 %v11724_v38, %v11857_v57  ;;  %v1558_v32 = vsub.f32 %v11746_v44, %v11857_v57 }
 0x29e   : > { %v1538_v29 = vadd.f32 1e-06, %v1537_v50  ;;  %v1560_v38 = vsub.f32 %v11593_v1, %v11857_v57  ;;  %v1562_v44 = vsub.f32 %v11609_v6, %v11857_v57  ;;  %v1563_v1 = vsub.f32 %v11616_v8, %v11857_v57 }
 0x29f   : > { %v1564_v6 = vsub.f32 %v11630_v12, %v11857_v57  ;;  %v1565_v8 = vsub.f32 %v11633_v13, %v11857_v57 }
 0x2a0   : > { %10778 = vrsqrt.f32 %v1538_v29  ;;  %v1547_v29 = vsub.f32 %v11622_v10, %v11857_v57  ;;  %v1553_v10 = vsub.f32 %v11683_v27, %v11857_v57 }
 0x2aa   : > { %v10779_v54 = vpop.eup %10778 }
 0x2ab   : > { %v1582_v36 = vmul.f32 %v10779_v54, %v7980_v55  ;;  %v1550_v54 = vsub.f32 %v11668_v22, %v11857_v57 }
 0x2ad   : > { %v11861_v58 = vrot.slane %v1582_v36, %v14375_v56  ;;  %v1552_v36 = vsub.f32 %v11680_v26, %v11857_v57  ;;  %v1557_v26 = vsub.f32 %v11727_v39, %v11857_v57  ;;  %v1561_v39 = vsub.f32 %v11596_v2, %v11857_v57 }
 0x2af   : > { %v1617_v59 = vmul.f32 %v11861_v58, %v1574_v18  ;;  %v1618_v24 = vmul.f32 %v11861_v58, %v1575_v19  ;;  %v1587_v50 = vmul.f32 %v11861_v58, %v1544_v25  ;;  %v1588_v51 = vmul.f32 %v11861_v58, %v1545_v48 }
 0x2b0   : > { %v1589_v55 = vmul.f32 %v11861_v58, %v1546_v49  ;;  %v1590_v18 = vmul.f32 %v11861_v58, %v1547_v29  ;;  %v1591_v22 = vmul.f32 %v11861_v58, %v1548_v4  ;;  %v1592_v27 = vmul.f32 %v11861_v58, %v1549_v5 }
 0x2b1   : > { %v11879_v41 = vadd.f32 %v11872_v63, %v1617_v59  ;;  %v11882_v42 = vadd.f32 %v11872_v63, %v1618_v24  ;;  %v11910_v19 = vadd.f32 %v11872_v63, %v1587_v50  ;;  %v11918_v59 = vadd.f32 %v11872_v63, %v1588_v51 }
 0x2b2   : > { %v1593_v24 = vmul.f32 %v11861_v58, %v1550_v54  ;;  %v11926_v25 = vadd.f32 %v11872_v63, %v1589_v55  ;;  %v1594_v48 = vmul.f32 %v11861_v58, %v1551_v9  ;;  %v11934_v49 = vadd.f32 %v11872_v63, %v1590_v18 }
 0x2b3   : > { %v1595_v45 = vmul.f32 %v11861_v58, %v1552_v36  ;;  %v11940_v50 = vadd.f32 %v11872_v63, %v1591_v22  ;;  %v7982_v29 = vmul.f32 -1.442695, %v11910_v19  ;;  %v1596_v2 = vmul.f32 %v11861_v58, %v1553_v10 }
 0x2b4   : > { %v11947_v51 = vadd.f32 %v11872_v63, %v1592_v27  ;;  %v7983_v4 = vmul.f32 -1.442695, %v11918_v59  ;;  %v1597_v5 = vmul.f32 %v11861_v58, %v1554_v16  ;;  %v11954_v54 = vadd.f32 %v11872_v63, %v1593_v24 }
 0x2b5   : > { %v7984_v55 = vmul.f32 -1.442695, %v11926_v25  ;;  %v1598_v9 = vmul.f32 %v11861_v58, %v1555_v17  ;;  %v11961_v36 = vadd.f32 %v11872_v63, %v1594_v48  ;;  %v7985_v10 = vmul.f32 -1.442695, %v11934_v49 }
 0x2b6   : > { %v1599_v18 = vmul.f32 %v11861_v58, %v1556_v23  ;;  %v11966_v12 = vadd.f32 %v11872_v63, %v1595_v45  ;;  %10780 = vpow2.f32 %v7982_v29  ;;  %v7986_v16 = vmul.f32 -1.442695, %v11940_v50 }
 0x2b7   : > { %v1600_v22 = vmul.f32 %v11861_v58, %v1557_v26  ;;  %v11971_v27 = vadd.f32 %v11872_v63, %v1596_v2  ;;  %10782 = vpow2.f32 %v7983_v4  ;;  %v7987_v13 = vmul.f32 -1.442695, %v11947_v51 }
 0x2b8   : > { %v1601_v17 = vmul.f32 %v11861_v58, %v1558_v32  ;;  %v11976_v24 = vadd.f32 %v11872_v63, %v1597_v5  ;;  %10784 = vpow2.f32 %v7984_v55  ;;  %v7988_v23 = vmul.f32 -1.442695, %v11954_v54 }
 0x2b9   : > { %v1602_v48 = vmul.f32 %v11861_v58, %v1559_v33  ;;  %v11981_v45 = vadd.f32 %v11872_v63, %v1598_v9  ;;  %10786 = vpow2.f32 %v7985_v10  ;;  %v7989_v26 = vmul.f32 -1.442695, %v11961_v36 }
 0x2ba   : > { %v1603_v29 = vmul.f32 %v11861_v58, %v1560_v38  ;;  %v11986_v2 = vadd.f32 %v11872_v63, %v1599_v18  ;;  %10788 = vpow2.f32 %v7986_v16  ;;  %v7990_v32 = vmul.f32 -1.442695, %v11966_v12 }
 0x2bb   : > { %v1604_v4 = vmul.f32 %v11861_v58, %v1561_v39  ;;  %v11991_v5 = vadd.f32 %v11872_v63, %v1600_v22  ;;  %10790 = vpow2.f32 %v7987_v13  ;;  %v7991_v33 = vmul.f32 -1.442695, %v11971_v27 }
 0x2bc   : > { %v1605_v55 = vmul.f32 %v11861_v58, %v1562_v44  ;;  %v11996_v9 = vadd.f32 %v11872_v63, %v1601_v17  ;;  %10792 = vpow2.f32 %v7988_v23  ;;  %v7992_v38 = vmul.f32 -1.442695, %v11976_v24 }
 0x2bd   : > { %v1606_v10 = vmul.f32 %v11861_v58, %v1563_v1  ;;  %v12001_v18 = vadd.f32 %v11872_v63, %v1602_v48  ;;  %10794 = vpow2.f32 %v7989_v26  ;;  %v7993_v39 = vmul.f32 -1.442695, %v11981_v45 }
 0x2be   : > { %v1607_v16 = vmul.f32 %v11861_v58, %v1564_v6  ;;  %v12006_v22 = vadd.f32 %v11872_v63, %v1603_v29  ;;  %10796 = vpow2.f32 %v7990_v32  ;;  %v7994_v44 = vmul.f32 -1.442695, %v11986_v2 }
 0x2bf   : > { %v1608_v13 = vmul.f32 %v11861_v58, %v1565_v8  ;;  %v12011_v17 = vadd.f32 %v11872_v63, %v1604_v4  ;;  %10798 = vpow2.f32 %v7991_v33  ;;  %v7995_v1 = vmul.f32 -1.442695, %v11991_v5 }
 0x2c0   : > { %v10781_v23 = vpop.eup %10780  ;;  %v12015_v48 = vadd.f32 %v11872_v63, %v1605_v55  ;;  %10800 = vpow2.f32 %v7992_v38  ;;  %v7996_v6 = vmul.f32 -1.442695, %v11996_v9  ;;  %v12019_v29 = vadd.f32 %v11872_v63, %v1606_v10 }
 0x2c1   : > { %v10783_v26 = vpop.eup %10782  ;;  %10802 = vpow2.f32 %v7993_v39  ;;  %v7997_v8 = vmul.f32 -1.442695, %v12001_v18  ;;  %v12023_v4 = vadd.f32 %v11872_v63, %v1607_v16  ;;  %v7998_v33 = vmul.f32 -1.442695, %v12006_v22 }
 0x2c2   : > { %v10785_v32 = vpop.eup %10784  ;;  %10804 = vpow2.f32 %v7994_v44  ;;  %v12027_v38 = vadd.f32 %v11872_v63, %v1608_v13  ;;  %v7999_v56 = vmul.f32 -1.442695, %v12011_v17  ;;  %v8000_v39 = vmul.f32 -1.442695, %v12015_v48 }
 0x2c3   : > { %v10787_v55 = vpop.eup %10786  ;;  %10806 = vpow2.f32 %v7995_v1  ;;  %v8001_v60 = vmul.f32 -1.442695, %v12019_v29  ;;  %v1566_v44 = vsub.f32 %v11038_v62, %v11857_v57  ;;  %v8002_v0 = vmul.f32 -1.442695, %v12023_v4 }
 0x2c4   : > { %v10789_v10 = vpop.eup %10788  ;;  %10808 = vpow2.f32 %v7996_v6  ;;  %v8003_v1 = vmul.f32 -1.442695, %v12027_v38  ;;  %v1753_v47 = vadd.f32 1.0, %v10781_v23  ;;  %v1754_v43 = vadd.f32 1.0, %v10783_v26  ;;  %v11039_v23 = vld [vmem:[%s11577_s23 + $0xb8] sm:$0xff] }
 0x2c5   : > { %v10791_v35 = vpop.eup %10790  ;;  %10810 = vpow2.f32 %v7997_v8  ;;  %v1609_v6 = vmul.f32 %v11861_v58, %v1566_v44  ;;  %v1755_v62 = vadd.f32 1.0, %v10785_v32  ;;  %v1756_v31 = vadd.f32 1.0, %v10787_v55  ;;  %v11040_v32 = vld [vmem:[%s11577_s23 + $0xc0] sm:$0xff] }
 0x2c6   : > { %v10793_v16 = vpop.eup %10792  ;;  %10812 = vpow2.f32 %v7998_v33  ;;  %v1757_v44 = vadd.f32 1.0, %v10789_v10  ;;  %v1758_v26 = vadd.f32 1.0, %v10791_v35  ;;  %v1568_v55 = vsub.f32 %v11040_v32, %v11857_v57  ;;  %v11042_v35 = vld [vmem:[%s11577_s23 + $0xd0] sm:$0xff] }
 0x2c7   : > { %v10795_v13 = vpop.eup %10794  ;;  %10814 = vpow2.f32 %v7999_v56  ;;  %v12040_v21 = vadd.f32 %v11872_v63, %v1609_v6  ;;  %v11041_v6 = vld [vmem:[%s11577_s23 + $0xc8] sm:$0xff] }
 0x2c8   : > { %v10797_v30 = vpop.eup %10796  ;;  %10816 = vpow2.f32 %v8000_v39  ;;  %v1760_v11 = vadd.f32 1.0, %v10795_v13 }
 0x2c9   : > { %v10799_v8 = vpop.eup %10798  ;;  %10818 = vpow2.f32 %v8001_v60  ;;  %v1567_v60 = vsub.f32 %v11039_v23, %v11857_v57  ;;  %v1611_v23 = vmul.f32 %v11861_v58, %v1568_v55 }
 0x2ca   : > { %v10801_v37 = vpop.eup %10800  ;;  %10820 = vpow2.f32 %v8002_v0 }
 0x2cb   : > { %v10803_v33 = vpop.eup %10802  ;;  %10822 = vpow2.f32 %v8003_v1  ;;  %v1759_v1 = vadd.f32 1.0, %v10793_v16  ;;  %v1610_v10 = vmul.f32 %v11861_v58, %v1567_v60  ;;  %v8004_v16 = vmul.f32 -1.442695, %v12040_v21 }
 0x2cc   : > { %v12037_v56 = vpop.eup %10804  ;;  %10824 = vrcp.f32 %v1753_v47  ;;  %v1569_v47 = vsub.f32 %v11041_v6, %v11857_v57  ;;  %v8012_v6 = vmul.f32 -1.442695, %v11879_v41  ;;  %v8013_v60 = vmul.f32 -1.442695, %v11882_v42 }
 0x2cd   : > { %v12042_v39 = vpop.eup %10806  ;;  %10826 = vrcp.f32 %v1754_v43  ;;  %v1570_v43 = vsub.f32 %v11042_v35, %v11857_v57  ;;  %v12072_v35 = vadd.f32 %v11872_v63, %v1610_v10  ;;  %v12079_v46 = vadd.f32 %v11872_v63, %v1611_v23 }
 0x2ce   : > { %v12046_v0 = vpop.eup %10808  ;;  %10828 = vrcp.f32 %v1755_v62  ;;  %v1612_v32 = vmul.f32 %v11861_v58, %v1569_v47  ;;  %v1764_v23 = vadd.f32 1.0, %v10803_v33 }
 0x2cf   : > { %v12050_v15 = vpop.eup %10810  ;;  %10830 = vrcp.f32 %v1756_v31  ;;  %v1613_v13 = vmul.f32 %v11861_v58, %v1570_v43  ;;  %v1762_v43 = vadd.f32 1.0, %v10799_v8  ;;  %v8005_v14 = vmul.f32 -1.442695, %v12072_v35 }
 0x2d0   : > { %v12055_v3 = vpop.eup %10812  ;;  %10832 = vrcp.f32 %v1757_v44  ;;  %v1761_v44 = vadd.f32 1.0, %v10797_v30  ;;  %v12086_v10 = vadd.f32 %v11872_v63, %v1612_v32 }
 0x2d1   : > { %v12061_v62 = vpop.eup %10814  ;;  %10834 = vrcp.f32 %v1758_v26  ;;  %v1571_v26 = vsub.f32 %v11043_v52, %v11857_v57  ;;  %v12091_v52 = vadd.f32 %v11872_v63, %v1613_v13  ;;  %v1616_v13 = vmul.f32 %v11861_v58, %v1573_v20 }
 0x2d2   : > { %v12065_v31 = vpop.eup %10816  ;;  %10836 = vrcp.f32 %v1759_v1  ;;  %v11044_v1 = vld [vmem:[%s11577_s23 + $0xe0] sm:$0xff]  ;;  %v8007_v33 = vmul.f32 -1.442695, %v12086_v10  ;;  %v1765_v20 = vadd.f32 1.0, %v12037_v56  ;;  %s14733_s23 = sld [smem:[#allocation78_spill]] }
 0x2d3   : > { %v12069_v55 = vpop.eup %10818  ;;  %10838 = vrcp.f32 %v1760_v11  ;;  %v1572_v34 = vsub.f32 %v11044_v1, %v11857_v57  ;;  %v1763_v11 = vadd.f32 1.0, %v10801_v37 }
 0x2d4   : > { %v12074_v47 = vpop.eup %10820  ;;  %10840 = vpow2.f32 %v8004_v16  ;;  %v1614_v16 = vmul.f32 %v11861_v58, %v1571_v26 }
 0x2d5   : > { %v12081_v40 = vpop.eup %10822  ;;  %10842 = vpow2.f32 %v8012_v6  ;;  %v1615_v37 = vmul.f32 %v11861_v58, %v1572_v34  ;;  %v8006_v6 = vmul.f32 -1.442695, %v12079_v46 }
 0x2d6   : > { %v10825_v30 = vpop.eup %10824  ;;  %10844 = vpow2.f32 %v8013_v60 }
 0x2d7   : > { %v10827_v8 = vpop.eup %10826  ;;  %10846 = vrcp.f32 %v1761_v44  ;;  %v1849_v32 = vmul.f32 %v10825_v30, %v11910_v19  ;;  %v8008_v44 = vmul.f32 -1.442695, %v12091_v52  ;;  %v10671_v30 = vld [vmem:[#allocation7 + $0x8] sm:$0xff]  }
 0x2d8   : > { %v10829_v1 = vpop.eup %10828  ;;  %10848 = vrcp.f32 %v1762_v43  ;;  %v1850_v28 = vmul.f32 %v10827_v8, %v11918_v59  ;;  %v12107_v59 = vadd.f32 %v11872_v63, %v1614_v16  ;;  %v12119_v8 = vadd.f32 %v11872_v63, %v1616_v13 }
 0x2d9   : > { %v10831_v57 = vpop.eup %10830  ;;  %10850 = vrcp.f32 %v1763_v11  ;;  %v1851_v60 = vmul.f32 %v10829_v1, %v11926_v25  ;;  %v12111_v11 = vadd.f32 %v11872_v63, %v1615_v37  ;;  %v1766_v25 = vadd.f32 1.0, %v12042_v39  ;;  %v10672_v63 = vld [vmem:[#allocation7 + $0x10] sm:$0xff]  }
 0x2da   : > { %v10833_v26 = vpop.eup %10832  ;;  %10852 = vrcp.f32 %v1764_v23  ;;  %v12103_v19 = vpack.c.bf16 %v1850_v28, %v1849_v32  ;;  %v1852_v34 = vmul.f32 %v10831_v57, %v11934_v49  ;;  %v1768_v16 = vadd.f32 1.0, %v12050_v15 }
 0x2db   : > { %v10835_v43 = vpop.eup %10834  ;;  %10854 = vpow2.f32 %v8005_v14  ;;  %v1767_v14 = vadd.f32 1.0, %v12046_v0  ;;  %v1853_v39 = vmul.f32 %v10833_v26, %v11940_v50  ;;  %v8009_v37 = vmul.f32 -1.442695, %v12107_v59 }
 0x2dc   : > { %v10837_v58 = vpop.eup %10836  ;;  %10856 = vpow2.f32 %v8006_v6  ;;  %8938 = vmatmul.mubr.msk.bf16.vlgmr.msra.gmra.mrb[4].mxu1 %vm1458_vm2, %v12103_v19  ;;  %v12116_v23 = vpack.c.bf16 %v1852_v34, %v1851_v60  ;;  %v1854_v32 = vmul.f32 %v10835_v43, %v11947_v51  ;;  %v8010_v15 = vmul.f32 -1.442695, %v12111_v11 }
 0x2dd   : > { %v10839_v49 = vpop.eup %10838  ;;  %10858 = vpow2.f32 %v8007_v33  ;;  %8970 = vmatpush3.bf16.msra.mxu1 %v11844_v61  ;;  %v1855_v61 = vmul.f32 %v10837_v58, %v11954_v54  ;;  %v8011_v57 = vmul.f32 -1.442695, %v12119_v8  ;;  %v1769_v51 = vadd.f32 1.0, %v12055_v3  ;;  %v10673_v33 = vld [vmem:[#allocation7 + $0x18] sm:$0xff]  }
 0x2de   : > { %v12123_v56 = vpop.eup %10840  ;;  %10860 = vpow2.f32 %v8008_v44  ;;  %8941 = vmatprep.mubr.msk.bf16.mxu1 %vm1458_vm2, %v12116_v23  ;;  %8971 = vmatprep.subr.bf16.mxu1 %v10671_v30  ;;  %v1856_v0 = vmul.f32 %v10839_v49, %v11961_v36  ;;  %v12136_v13 = vpack.c.bf16 %v1854_v32, %v1853_v39  ;;  %v1770_v36 = vadd.f32 1.0, %v12061_v62 }
 0x2df   : > { %v10843_v1 = vpop.eup %10842  ;;  %10862 = vrcp.f32 %v1765_v20  ;;  %v1771_v44 = vadd.f32 1.0, %v12065_v31  ;;  %v1772_v3 = vadd.f32 1.0, %v12069_v55  ;;  %v12149_v31 = vld [vmem:[#allocation7 + $0x40] sm:$0xff]   ;;  %v1773_v32 = vadd.f32 1.0, %v12074_v47 }
 0x2e0   : > { %v10845_v6 = vpop.eup %10844  ;;  %10864 = vrcp.f32 %v1766_v25  ;;  %v12139_v60 = vpack.c.bf16 %v1856_v0, %v1855_v61  ;;  %v1783_v43 = vadd.f32 1.0, %v10843_v1 }
 0x2e1   : > { %v10847_v28 = vpop.eup %10846  ;;  %10866 = vrcp.f32 %v1767_v14  ;;  %8972 = vmatpush3.bf16.msra.mxu1 %v10671_v30  ;;  %v1784_v25 = vadd.f32 1.0, %v10845_v6 }
 0x2e2   : > { %v10849_v50 = vpop.eup %10848  ;;  %10868 = vrcp.f32 %v1768_v16  ;;  %8973 = vmatprep.subr.bf16.mxu1 %v10672_v63  ;;  %v1857_v62 = vmul.f32 %v10847_v28, %v11966_v12 }
 0x2e3   : > { %v10851_v54 = vpop.eup %10850  ;;  %10870 = vpow2.f32 %v8009_v37  ;;  %v1858_v20 = vmul.f32 %v10849_v50, %v11971_v27  ;;  %v1775_v37 = vadd.f32 1.0, %v12123_v56 }
 0x2e4   : > { %v10853_v26 = vpop.eup %10852  ;;  %10872 = vpow2.f32 %v8010_v15  ;;  %8942 = vmatmul.mubr.msk.bf16.gmra.mrb[8].mxu1 %vm1458_vm2, %v12136_v13  ;;  %v1859_v49 = vmul.f32 %v10851_v54, %v11976_v24 }
 0x2e5   : > { %v10855_v34 = vpop.eup %10854  ;;  %10874 = vpow2.f32 %v8011_v57  ;;  %8945 = vmatprep.mubr.msk.bf16.mxu1 %vm1458_vm2, %v12139_v60  ;;  %8974 = vmatpush3.bf16.msra.mxu1 %v10672_v63  ;;  %v1860_v55 = vmul.f32 %v10853_v26, %v11981_v45  ;;  %v12153_v12 = vpack.c.bf16 %v1858_v20, %v1857_v62  ;;  %v1774_v45 = vadd.f32 1.0, %v12081_v40 }
 0x2e6   : > { %v10857_v30 = vpop.eup %10856  ;;  %10876 = vrcp.f32 %v1769_v51  ;;  %8975 = vmatprep.subr.bf16.mxu1 %v10673_v33  ;;  %v1776_v0 = vadd.f32 1.0, %v10855_v34 }
 0x2e7   : > { %v10859_v58 = vpop.eup %10858  ;;  %10878 = vrcp.f32 %v1770_v36  ;;  %v12157_v63 = vpack.c.bf16 %v1860_v55, %v1859_v49  ;;  %v1777_v51 = vadd.f32 1.0, %v10857_v30 }
 0x2e8   : > { %v10861_v14 = vpop.eup %10860  ;;  %10880 = vrcp.f32 %v1771_v44 }
 0x2e9   : > { %v10863_v16 = vpop.eup %10862  ;;  %10882 = vrcp.f32 %v1772_v3  ;;  %8976 = vmatpush3.bf16.msra.mxu1 %v10673_v33  ;;  %v1778_v33 = vadd.f32 1.0, %v10859_v58 }
 0x2ea   : > { %v10865_v39 = vpop.eup %10864  ;;  %10884 = vrcp.f32 %v1783_v43  ;;  %9009 = vmatprep.subr.bf16.mxu1 %v12149_v31  ;;  %v1861_v6 = vmul.f32 %v10863_v16, %v11986_v2  ;;  %v1779_v2 = vadd.f32 1.0, %v10861_v14 }
 0x2eb   : > { %v10867_v27 = vpop.eup %10866  ;;  %10886 = vrcp.f32 %v1784_v25  ;;  %v1862_v47 = vmul.f32 %v10865_v39, %v11991_v5 }
 0x2ec   : > { %v10869_v24 = vpop.eup %10868  ;;  %8946 = vmatmul.mubr.msk.bf16.gmra.mrb[12].mxu1 %vm1458_vm2, %v12153_v12  ;;  %10888 = vrcp.f32 %v1773_v32  ;;  %v1863_v28 = vmul.f32 %v10867_v27, %v11996_v9 }
 0x2ed   : > { %v10871_v1 = vpop.eup %10870  ;;  %8949 = vmatprep.mubr.msk.bf16.mxu1 %vm1458_vm2, %v12157_v63  ;;  %v1864_v40 = vmul.f32 %v10869_v24, %v12001_v18  ;;  %10890 = vrcp.f32 %v1774_v45  ;;  %v12169_v54 = vpack.c.bf16 %v1862_v47, %v1861_v6 }
 0x2ee   : > { %v10873_v61 = vpop.eup %10872  ;;  %10892 = vrcp.f32 %v1775_v37  ;;  %v1780_v18 = vadd.f32 1.0, %v10871_v1 }
 0x2ef   : > { %v10875_v15 = vpop.eup %10874  ;;  %10894 = vrcp.f32 %v1776_v0  ;;  %v12171_v26 = vpack.c.bf16 %v1864_v40, %v1863_v28  ;;  %v1781_v44 = vadd.f32 1.0, %v10873_v61  ;;  %v559_v61 = vand.u32 15, %v11848_v53 }
 0x2f0   : > { %v10877_v57 = vpop.eup %10876  ;;  %v1782_v34 = vadd.f32 1.0, %v10875_v15  ;;  %10896 = vrcp.f32 %v1777_v51  ;;  %v521_v15 = vadd.s32 16, %v11848_v53  ;;  %v523_v28 = vadd.s32 32, %v11848_v53 }
 0x2f1   : > { %v10879_v50 = vpop.eup %10878  ;;  %10898 = vrcp.f32 %v1778_v33  ;;  %v1865_v30 = vmul.f32 %v10877_v57, %v12006_v22  ;;  %vm987_vm3 = vcmp.ne.s32.totalorder %v559_v61, 0 }
 0x2f2   : > { %v10881_v56 = vpop.eup %10880  ;;  %v1866_v43 = vmul.f32 %v10879_v50, %v12011_v17  ;;  %10900 = vrcp.f32 %v1779_v2 }
 0x2f3   : > { %v10883_v36 = vpop.eup %10882  ;;  %v1867_v20 = vmul.f32 %v10881_v56, %v12015_v48  ;;  %10902 = vrcp.f32 %v1781_v44  ;;  %v587_v56 = vand.u32 15, %v523_v28  ;;  %v525_v44 = vadd.s32 48, %v11848_v53  ;;  %v10675_v28 = vld [vmem:[#allocation7 + $0x48] sm:$0xff]  }
 0x2f4   : > { %v10885_v5 = vpop.eup %10884  ;;  %8950 = vmatmul.mubr.msk.bf16.gmra.mrb[16].mxu1 %vm1458_vm2, %v12169_v54  ;;  %v1868_v58 = vmul.f32 %v10883_v36, %v12019_v29  ;;  %10904 = vrcp.f32 %v1782_v34  ;;  %v12185_v55 = vpack.c.bf16 %v1866_v43, %v1865_v30  ;;  %v527_v34 = vadd.s32 64, %v11848_v53 }
 0x2f5   : > { %v10887_v9 = vpop.eup %10886  ;;  %v1879_v3 = vmul.f32 %v10885_v5, %v11879_v41  ;;  %8953 = vmatprep.mubr.msk.bf16.mxu1 %vm1458_vm2, %v12171_v26  ;;  %10906 = vrcp.f32 %v1780_v18  ;;  %v14423_v30 = vshll.u32 %v12103_v19, 16  ;;  %vm991_vm5 = vcmp.ne.s32.totalorder %v587_v56, 0 }
 0x2f6   : > { %v1880_v62 = vmul.f32 %v10887_v9, %v11882_v42  ;;  %v10889_v49 = vpop.eup %10888  ;;  %v12187_v22 = vpack.c.bf16 %v1868_v58, %v1867_v20  ;;  %v14420_v20 = vshll.u32 %v12116_v23, 16 }
 0x2f7   : > { %v10891_v41 = vpop.eup %10890  ;;  %v1869_v42 = vmul.f32 %v10889_v49, %v12023_v4 }
 0x2f8   : > { %v12183_v25 = vpack.c.bf16 %v1880_v62, %v1879_v3  ;;  %v10893_v14 = vpop.eup %10892  ;;  %v1870_v48 = vmul.f32 %v10891_v41, %v12027_v38 }
 0x2f9   : > { %v10895_v17 = vpop.eup %10894  ;;  %v1871_v16 = vmul.f32 %v10893_v14, %v12040_v21 }
 0x2fa   : > { %v10897_v29 = vpop.eup %10896  ;;  %v1872_v39 = vmul.f32 %v10895_v17, %v12072_v35  ;;  %v12197_v45 = vpack.c.bf16 %v1870_v48, %v1869_v42  ;;  %v2022_v33 = vshll.u32 %v12183_v25, 16  ;;  %v2019_v2 = vshrl.u32 %v12183_v25, 16 }
 0x2fb   : > { %v10899_v27 = vpop.eup %10898  ;;  %v1873_v21 = vmul.f32 %v10897_v29, %v12079_v46  ;;  %v14535_v46 = vmov 0.0   ;;  %v601_v17 = vand.u32 15, %v525_v44  ;;  %v14410_v42 = vshrl.u32 %v12136_v13, 16 }
 0x2fc   : > { %8954 = vmatmul.mubr.msk.bf16.gmra.mrb[20].mxu1 %vm1458_vm2, %v12185_v55  ;;  %v10901_v32 = vpop.eup %10900  ;;  %v12199_v37 = vpack.c.bf16 %v1872_v39, %v1871_v16  ;;  %v1874_v4 = vmul.f32 %v10899_v27, %v12086_v10  ;;  %v7943_v50 = vsel %vm987_vm3, 1.0, %v14535_v46  ;;  %v14418_v10 = vshrl.u32 %v12103_v19, 16 }
 0x2fd   : > { %8957 = vmatprep.mubr.msk.bf16.mxu1 %vm1458_vm2, %v12187_v22  ;;  %v10903_v24 = vpop.eup %10902  ;;  %v1875_v6 = vmul.f32 %v10901_v32, %v12091_v52  ;;  %v14417_v52 = vshrl.u32 %v12116_v23, 16  ;;  %v12236_v9 = vrot.slane %v2022_v33, 1  ;;  %v12241_v3 = vrot.slane %v2019_v2, 7 }
 0x2fe   : > { %v10905_v1 = vpop.eup %10904  ;;  %v1877_v38 = vmul.f32 %v10903_v24, %v12111_v11  ;;  %v12214_v40 = vpack.c.bf16 %v1874_v4, %v1873_v21  ;;  %v1902_v5 = vrot.slane %v14418_v10, 7  ;;  %v7945_v48 = vsel %vm991_vm5, 1.0, %v14535_v46 }
 0x2ff   : > { %v10907_v0 = vpop.eup %10906  ;;  %v1878_v35 = vmul.f32 %v10905_v1, %v12119_v8  ;;  %v573_v8 = vand.u32 15, %v521_v15  ;;  %v1909_v18 = vrot.slane %v14417_v52, 7  ;;  %14538 = vst [vmem:[#allocation35_spill] sm:$0xff] %v12241_v3  ;;  %v12246_v62 = vor.u32 %v12236_v9, %v2019_v2 }
 0x300   : > { %v1876_v47 = vmul.f32 %v10907_v0, %v12107_v59  ;;  %v14536_v59 = vmov 1.0   ;;  %v2024_v49 = vor.u32 %v2022_v33, %v12241_v3  ;;  %v1905_v14 = vor.u32 %v14423_v30, %v1902_v5 }
 0x301   : > { %v12216_v57 = vpack.c.bf16 %v1878_v35, %v1877_v38  ;;  %v12228_v51 = vpack.c.bf16 %v14536_v59, %v7943_v50  ;;  %vm989_vm4 = vcmp.ne.s32.totalorder %v573_v8, 0  ;;  %14539 = vst [vmem:[#allocation36_spill] sm:$0xff] %v12246_v62  ;;  %v1912_v29 = vor.u32 %v14420_v20, %v1909_v18 }
 0x302   : > { %v12220_v11 = vpack.c.bf16 %v1876_v47, %v1875_v6  ;;  %v7944_v41 = vsel %vm989_vm4, 1.0, %v14535_v46  ;;  %v14409_v16 = vshrl.u32 %v12139_v60, 16  ;;  %v615_v27 = vand.u32 15, %v527_v34 }
 0x303   : > { %14537 = vst [vmem:[#allocation34_spill] sm:$0xff] %v12228_v51  ;;  %v14401_v36 = vshrl.u32 %v12216_v57, 16  ;;  %v14400_v43 = vmul.bf16 0, %v12228_v51  ;;  %v12272_v32 = vpack.c.bf16 %v14536_v59, %v7944_v41  ;;  %v14541_v24 = vmov 0 }
 0x304   : > { %8958 = vmatmul.mubr.msk.bf16.gmra.mrb[24].mxu1 %vm1458_vm2, %v12197_v45  ;;  %v14542_v24 = vsel %vm12276_vm7, 4294967295, %v14541_v24  ;;  %v2045_v1 = vsel %vm12276_vm7, 0, %v1905_v14  ;;  %v12283_v61 = vpack.c.bf16 %v14536_v59, %v7945_v48  ;;  %v1917_v0 = vrot.slane %v14410_v42, 7  ;;  %v10676_v14 = vld [vmem:[#allocation7 + $0x50] sm:$0xff]  }
 0x305   : > { %8961 = vmatprep.mubr.msk.bf16.mxu1 %vm1458_vm2, %v12199_v37  ;;  %v12251_v58 = vrot.slane %v14401_v36, 7  ;;  %14540 = vst [vmem:[#allocation37_spill] sm:$0xff] %v12272_v32  ;;  %14543 = vst [vmem:[#allocation38_spill] sm:$0xff] %v14542_v24  ;;  %v1913_v21 = vsel %vm1898_vm6, %v1902_v5, %v1912_v29  ;;  %vm993_vm8 = vcmp.ne.s32.totalorder %v601_v17, 0  ;;  %v1925_v4 = vrot.slane %v14409_v16, 7  ;;  %v12350_v36 = vld [vmem:[#allocation7 + $0x60] sm:$0xff]  }
 0x306   : > { %14544 = vst [vmem:[#allocation39_spill] sm:$0xff] %v12283_v61  ;;  %v529_v38 = vadd.s32 80, %v11848_v53  ;;  %v14415_v35 = vshll.u32 %v12136_v13, 16  ;;  %vm995_vm9 = vcmp.ne.s32.totalorder %v615_v27, 0  ;;  %v531_v6 = vadd.s32 96, %v11848_v53 }
 0x307   : > { %v12266_v39 = vsel %vm1898_vm6, %v12251_v58, %v2024_v49  ;;  %v12294_v47 = vmul.bf16 %v2045_v1, %v12272_v32  ;;  %v14412_v15 = vshll.u32 %v12139_v60, 16  ;;  %v12298_v50 = vmul.bf16 %v1913_v21, %v12283_v61 }
 0x308   : > { %v7946_v8 = vsel %vm993_vm8, 1.0, %v14535_v46  ;;  %v1920_v56 = vor.u32 %v14415_v35, %v1917_v0  ;;  %v14403_v33 = vshrl.u32 %v12153_v12, 16  ;;  %v7947_v2 = vsel %vm995_vm9, 1.0, %v14535_v46 }
 0x309   : > { %v1928_v5 = vor.u32 %v14412_v15, %v1925_v4  ;;  %v629_v44 = vand.u32 15, %v529_v38  ;;  %v14402_v34 = vshrl.u32 %v12157_v63, 16  ;;  %v643_v49 = vand.u32 15, %v531_v6 }
 0x30a   : > { %v12314_v41 = vpack.c.bf16 %v14536_v59, %v7946_v8  ;;  %v1921_v17 = vsel %vm1898_vm6, %v1909_v18, %v1920_v56  ;;  %v12318_v48 = vpack.c.bf16 %v14536_v59, %v7947_v2  ;;  %v1933_v29 = vrot.slane %v14403_v33, 7  ;;  %v10677_v8 = vld [vmem:[#allocation7 + $0x58] sm:$0xff]  }
 0x30b   : > { %v1929_v27 = vsel %vm1898_vm6, %v1917_v0, %v1928_v5  ;;  %vm997_vm10 = vcmp.ne.s32.totalorder %v629_v44, 0  ;;  %v533_v1 = vadd.s32 112, %v11848_v53  ;;  %v14405_v21 = vshll.u32 %v12153_v12, 16 }
 0x30c   : > { %8962 = vmatmul.mubr.msk.bf16.gmra.mrb[28].mxu1 %vm1458_vm2, %v12214_v40  ;;  %14545 = vst [vmem:[#allocation40_spill] sm:$0xff] %v12314_v41  ;;  %14546 = vst [vmem:[#allocation41_spill] sm:$0xff] %v12318_v48  ;;  %vm999_vm11 = vcmp.ne.s32.totalorder %v643_v49, 0  ;;  %v535_v18 = vadd.s32 128, %v11848_v53  ;;  %v12329_v38 = vmul.bf16 %v1921_v17, %v12314_v41  ;;  %v14404_v6 = vshll.u32 %v12157_v63, 16 }
 0x30d   : > { %8965 = vmatprep.mubr.msk.bf16.mxu1 %vm1458_vm2, %v12220_v11  ;;  %v12333_v0 = vmul.bf16 %v1929_v27, %v12318_v48  ;;  %v7948_v56 = vsel %vm997_vm10, 1.0, %v14535_v46  ;;  %v1936_v2 = vor.u32 %v14405_v21, %v1933_v29  ;;  %v7949_v5 = vsel %vm999_vm11, 1.0, %v14535_v46 }
 0x30e   : > { %v657_v49 = vand.u32 15, %v533_v1  ;;  %v14406_v17 = vshrl.u32 %v12171_v26, 16  ;;  %v671_v27 = vand.u32 15, %v535_v18  ;;  %v12354_v33 = vpack.c.bf16 %v14536_v59, %v7949_v5 }
 0x30f   : > { %v537_v18 = vadd.s32 144, %v11848_v53  ;;  %v539_v21 = vadd.s32 160, %v11848_v53  ;;  %v541_v15 = vadd.s32 176, %v11848_v53  ;;  %v545_v20 = vadd.s32 208, %v11848_v53 }
 0x310   : > { %14548 = vst [vmem:[#allocation43_spill] sm:$0xff] %v12354_v33  ;;  %vm1001_vm12 = vcmp.ne.s32.totalorder %v657_v49, 0  ;;  %vm1003_vm13 = vcmp.ne.s32.totalorder %v671_v27, 0  ;;  %v14414_v49 = vshrl.u32 %v12185_v55, 16  ;;  %v14555_v7 = vshrl.u32 %v12214_v40, 16 }
 0x311   : > { %v7950_v5 = vsel %vm1001_vm12, 1.0, %v14535_v46  ;;  %v685_v27 = vand.u32 15, %v537_v18  ;;  %vm2065_vm11 = vsmask.f32 7424  ;;  %vm2130_vm12 = vcmask 1047552  }
 0x312   : > { %v1965_v42 = vrot.slane %v14414_v49, 7  ;;  %v14421_v49 = vshrl.u32 %v12199_v37, 16  ;;  %v542_v51 = vadd.s32 184, %v11848_v53  ;;  %v546_v3 = vadd.s32 216, %v11848_v53 }
 0x313   : > { %vm1005_vm14 = vcmp.ne.s32.totalorder %v685_v27, 0  ;;  %v14422_v27 = vshrl.u32 %v12197_v45, 16  ;;  %v550_v62 = vadd.s32 248, %v11848_v53 }
 0x314   : > { %8966 = vmatmul.mubr.msk.bf16.gmra.mrb[32].mxu1 %vm1458_vm2, %v12216_v57 }
 0x315   : > { %8977 = vmatprep.mubr.msk.bf16.mxu1 %vm1458_vm2, %v14400_v43  ;;  %v12348_v43 = vpack.c.bf16 %v14536_v59, %v7948_v56  ;;  %v14408_v56 = vshll.u32 %v12169_v54, 16  ;;  %v1981_v10 = vrot.slane %v14422_v27, 7  ;;  %v14429_v27 = vshrl.u32 %v12220_v11, 16 }
 0x317   : > { %14547 = vst [vmem:[#allocation42_spill] sm:$0xff] %v12348_v43 }
 0x31c   : > { %8978 = vmatmul.mubr.msk.bf16.vlgmr.msra.gmra.mrb[4].mxu1 %vm1458_vm2, %v12294_v47 }
 0x31d   : > { %9010 = vmatpush3.bf16.msra.mxu1 %v12149_v31  ;;  %8981 = vmatprep.mubr.msk.bf16.mxu1 %vm1458_vm2, %v12298_v50  ;;  %v1941_v31 = vrot.slane %v14402_v34, 7  ;;  %v1937_v34 = vsel %vm1898_vm6, %v1925_v4, %v1936_v2  ;;  %v14411_v2 = vshll.u32 %v12171_v26, 16 }
 0x31e   : > { %9011 = vmatprep.subr.bf16.mxu1 %v10675_v28  ;;  %v12365_v4 = vmul.bf16 %v1937_v34, %v12348_v43  ;;  %v7951_v34 = vsel %vm1003_vm13, 1.0, %v14535_v46  ;;  %vm12513_vm13 = vmand %vm2130_vm12, %vm2065_vm11 }
 0x31f   : > { %v1944_v44 = vor.u32 %v14404_v6, %v1941_v31  ;;  %v12389_v16 = vpack.c.bf16 %v14536_v59, %v7951_v34 }
 0x321   : > { %9012 = vmatpush3.bf16.msra.mxu1 %v10675_v28  ;;  %v14407_v28 = vshrl.u32 %v12169_v54, 16  ;;  %v1945_v6 = vsel %vm1898_vm6, %v1933_v29, %v1944_v44  ;;  %14550 = vst [vmem:[#allocation45_spill] sm:$0xff] %v12389_v16 }
 0x322   : > { %9013 = vmatprep.subr.bf16.mxu1 %v10676_v14  ;;  %v12370_v29 = vmul.bf16 %v1945_v6, %v12354_v33  ;;  %v699_v6 = vand.u32 15, %v539_v21  ;;  %v14416_v21 = vshll.u32 %v12185_v55, 16 }
 0x323   : > { %v1949_v1 = vrot.slane %v14407_v28, 7  ;;  %v12385_v28 = vpack.c.bf16 %v14536_v59, %v7950_v5  ;;  %v543_v5 = vadd.s32 192, %v11848_v53 }
 0x324   : > { %8982 = vmatmul.mubr.msk.bf16.gmra.mrb[8].mxu1 %vm1458_vm2, %v12329_v38  ;;  %vm1007_vm15 = vcmp.ne.s32.totalorder %v699_v6, 0 }
 0x325   : > { %8985 = vmatprep.mubr.msk.bf16.mxu1 %vm1458_vm2, %v12333_v0  ;;  %9014 = vmatpush3.bf16.msra.mxu1 %v10676_v14  ;;  %v1957_v14 = vrot.slane %v14406_v17, 7  ;;  %v1952_v44 = vor.u32 %v14408_v56, %v1949_v1  ;;  %v14413_v17 = vshrl.u32 %v12187_v22, 16  ;;  %14549 = vst [vmem:[#allocation44_spill] sm:$0xff] %v12385_v28  ;;  %v7953_v6 = vsel %vm1007_vm15, 1.0, %v14535_v46 }
 0x326   : > { %9015 = vmatprep.subr.bf16.mxu1 %v10677_v8  ;;  %v12423_v52 = vpack.c.bf16 %v14536_v59, %v7953_v6 }
 0x327   : > { %v1953_v56 = vsel %vm1898_vm6, %v1941_v31, %v1952_v44  ;;  %v1973_v18 = vrot.slane %v14413_v17, 7  ;;  %v14419_v44 = vshll.u32 %v12187_v22, 16  ;;  %v713_v17 = vand.u32 15, %v541_v15 }
 0x328   : > { %v12400_v31 = vmul.bf16 %v1953_v56, %v12385_v28  ;;  %14552 = vst [vmem:[#allocation47_spill] sm:$0xff] %v12423_v52  ;;  %v1989_v15 = vrot.slane %v14421_v49, 7  ;;  %v741_v49 = vand.u32 15, %v545_v20  ;;  %v2005_v20 = vrot.slane %v14429_v27, 7 }
 0x329   : > { %9016 = vmatpush3.bf16.msra.mxu1 %v10677_v8  ;;  %v1960_v8 = vor.u32 %v14411_v2, %v1957_v14  ;;  %v1976_v56 = vor.u32 %v14419_v44, %v1973_v18  ;;  %vm1009_vm3 = vcmp.ne.s32.totalorder %v713_v17, 0 }
 0x32a   : > { %9049 = vmatprep.subr.bf16.mxu1 %v12350_v36  ;;  %vm1013_vm5 = vcmp.ne.s32.totalorder %v741_v49, 0 }
 0x32b   : > { %v1961_v2 = vsel %vm1898_vm6, %v1949_v1, %v1960_v8  ;;  %v7952_v1 = vsel %vm1005_vm14, 1.0, %v14535_v46  ;;  %v1968_v8 = vor.u32 %v14416_v21, %v1965_v42  ;;  %v1977_v44 = vsel %vm1898_vm6, %v1965_v42, %v1976_v56 }
 0x32c   : > { %8986 = vmatmul.mubr.msk.bf16.gmra.mrb[12].mxu1 %vm1458_vm2, %v12365_v4  ;;  %v12404_v34 = vmul.bf16 %v1961_v2, %v12389_v16  ;;  %v727_v2 = vand.u32 15, %v543_v5  ;;  %v12419_v35 = vpack.c.bf16 %v14536_v59, %v7952_v1  ;;  %v14424_v5 = vshll.u32 %v12197_v45, 16 }
 0x32d   : > { %8989 = vmatprep.mubr.msk.bf16.mxu1 %vm1458_vm2, %v12370_v29  ;;  %v1969_v21 = vsel %vm1898_vm6, %v1957_v14, %v1968_v8  ;;  %v547_v1 = vadd.s32 224, %v11848_v53  ;;  %v14427_v8 = vshll.u32 %v12199_v37, 16  ;;  %v12438_v6 = vmul.bf16 %v1977_v44, %v12423_v52 }
 0x32e   : > { %14551 = vst [vmem:[#allocation46_spill] sm:$0xff] %v12419_v35  ;;  %vm1011_vm4 = vcmp.ne.s32.totalorder %v727_v2, 0  ;;  %v12434_v14 = vmul.bf16 %v1969_v21, %v12419_v35  ;;  %v7954_v42 = vsel %vm1009_vm3, 1.0, %v14535_v46  ;;  %v1984_v17 = vor.u32 %v14424_v5, %v1981_v10 }
 0x32f   : > { %v7955_v2 = vsel %vm1011_vm4, 1.0, %v14535_v46  ;;  %v1992_v21 = vor.u32 %v14427_v8, %v1989_v15  ;;  %v755_v44 = vand.u32 15, %v547_v1  ;;  %v12453_v30 = vpack.c.bf16 %v14536_v59, %v7954_v42 }
 0x330   : > { %v1985_v5 = vsel %vm1898_vm6, %v1973_v18, %v1984_v17  ;;  %v12457_v56 = vpack.c.bf16 %v14536_v59, %v7955_v2  ;;  %v1997_v52 = vrot.slane %v14555_v7, 7  ;;  %v549_v35 = vadd.s32 240, %v11848_v53 }
 0x331   : > { %14553 = vst [vmem:[#allocation48_spill] sm:$0xff] %v12453_v30  ;;  %v1993_v8 = vsel %vm1898_vm6, %v1981_v10, %v1992_v21  ;;  %v14430_v1 = vshll.u32 %v12214_v40, 16  ;;  %vm1015_vm8 = vcmp.ne.s32.totalorder %v755_v44, 0  ;;  %v520_v42 = vadd.s32 8, %v11848_v53 }
 0x332   : > { %14554 = vst [vmem:[#allocation49_spill] sm:$0xff] %v12457_v56  ;;  %v12468_v18 = vmul.bf16 %v1985_v5, %v12453_v30  ;;  %v14433_v17 = vshll.u32 %v12220_v11, 16  ;;  %v12472_v7 = vmul.bf16 %v1993_v8, %v12457_v56  ;;  %v7956_v10 = vsel %vm1013_vm5, 1.0, %v14535_v46 }
 0x333   : > { %v2000_v49 = vor.u32 %v14430_v1, %v1997_v52  ;;  %v7957_v2 = vsel %vm1015_vm8, 1.0, %v14535_v46  ;;  %v769_v5 = vand.u32 15, %v549_v35  ;;  %v566_v44 = vand.u32 15, %v520_v42 }
 0x334   : > { %8990 = vmatmul.mubr.msk.bf16.gmra.mrb[16].mxu1 %vm1458_vm2, %v12400_v31  ;;  %v2008_v21 = vor.u32 %v14433_v17, %v2005_v20  ;;  %v12485_v8 = vpack.c.bf16 %v14536_v59, %v7956_v10  ;;  %v12489_v1 = vpack.c.bf16 %v14536_v59, %v7957_v2  ;;  %v522_v30 = vadd.s32 24, %v11848_v53 }
 0x335   : > { %8993 = vmatprep.mubr.msk.bf16.mxu1 %vm1458_vm2, %v12404_v34  ;;  %v2001_v27 = vsel %vm1898_vm6, %v1989_v15, %v2000_v49  ;;  %vm1017_vm9 = vcmp.ne.s32.totalorder %v769_v5, 0  ;;  %v14434_v17 = vshll.u32 %v12216_v57, 16  ;;  %vm1114_vm10 = vcmp.ne.s32.totalorder %v566_v44, 15 }
 0x336   : > { %14556 = vst [vmem:[#allocation50_spill] sm:$0xff] %v12485_v8  ;;  %14557 = vst [vmem:[#allocation51_spill] sm:$0xff] %v12489_v1  ;;  %v2009_v56 = vsel %vm1898_vm6, %v1997_v52, %v2008_v21  ;;  %v524_v35 = vadd.s32 40, %v11848_v53  ;;  %v12496_v42 = vmul.bf16 %v2001_v27, %v12485_v8  ;;  %v7958_v10 = vsel %vm1017_vm9, 1.0, %v14535_v46 }
 0x337   : > { %v12499_v15 = vmul.bf16 %v2009_v56, %v12489_v1  ;;  %v2016_v52 = vor.u32 %v14434_v17, %v12251_v58  ;;  %v7961_v49 = vsel %vm1114_vm10, 1.0, %v14535_v46  ;;  %v14558_v2 = vshll.u32 %v12103_v19, 16 }
 0x338   : > { %v580_v21 = vand.u32 15, %v522_v30  ;;  %v14559_v56 = vmov 0  ;;  %v594_v5 = vand.u32 15, %v524_v35  ;;  %v12518_v58 = vpack.c.bf16 %v14536_v59, %v7958_v10 }
 0x339   : > { %v2066_v27 = vrot.slane %v14558_v2, 1  ;;  %v14560_v56 = vsel %vm12513_vm13, 4294967295, %v14559_v56  ;;  %v2017_v44 = vsel %vm1898_vm6, %v2005_v20, %v2016_v52  ;;  %v12522_v17 = vpack.c.bf16 %v7961_v49, %v14536_v59 }
 0x33a   : > { %14561 = vst [vmem:[#allocation52_spill] sm:$0xff] %v14560_v56  ;;  %14562 = vst [vmem:[#allocation53_spill] sm:$0xff] %v12518_v58  ;;  %v14564_v2 = vshll.u32 %v12116_v23, 16  ;;  %vm1116_vm14 = vcmp.ne.s32.totalorder %v580_v21, 15  ;;  %v526_v8 = vadd.s32 56, %v11848_v53  ;;  %vm1118_vm15 = vcmp.ne.s32.totalorder %v594_v5, 15 }
 0x33b   : > { %14563 = vst [vmem:[#allocation54_spill] sm:$0xff] %v12522_v17  ;;  %v2132_v1 = vsel %vm12513_vm13, 0, %v2066_v27  ;;  %v528_v35 = vadd.s32 72, %v11848_v53  ;;  %v12531_v10 = vmul.bf16 %v2017_v44, %v12518_v58  ;;  %v14565_v20 = vshrl.u32 %v12103_v19, 16 }
 0x33c   : > { %8994 = vmatmul.mubr.msk.bf16.gmra.mrb[20].mxu1 %vm1458_vm2, %v12434_v14  ;;  %v2068_v30 = vrot.slane %v14564_v2, 1  ;;  %v2134_v49 = vmul.bf16 %v2132_v1, %v12522_v17  ;;  %v7962_v16 = vsel %vm1116_vm14, 1.0, %v14535_v46  ;;  %v7963_v21 = vsel %vm1118_vm15, 1.0, %v14535_v46 }
 0x33d   : > { %8997 = vmatprep.mubr.msk.bf16.mxu1 %vm1458_vm2, %v12438_v6  ;;  %v2067_v52 = vor.u32 %v2066_v27, %v14565_v20  ;;  %v14566_v2 = vshrl.u32 %v12116_v23, 16  ;;  %v608_v28 = vand.u32 15, %v526_v8  ;;  %v622_v44 = vand.u32 15, %v528_v35 }
 0x33e   : > { %v12544_v58 = vpack.c.bf16 %v7962_v16, %v14536_v59  ;;  %v14568_v27 = vshll.u32 %v12136_v13, 16  ;;  %v12550_v17 = vpack.c.bf16 %v7963_v21, %v14536_v59  ;;  %v532_v16 = vadd.s32 104, %v11848_v53 }
 0x33f   : > { %v2070_v5 = vor.u32 %v2068_v30, %v14566_v2  ;;  %v2069_v20 = vsel %vm2065_vm11, %v2067_v52, %v2068_v30  ;;  %vm1120_vm3 = vcmp.ne.s32.totalorder %v608_v28, 15  ;;  %v14570_v2 = vshll.u32 %v12139_v60, 16 }
 0x340   : > { %14567 = vst [vmem:[#allocation55_spill] sm:$0xff] %v12544_v58  ;;  %v2071_v1 = vrot.slane %v14568_v27, 1  ;;  %14569 = vst [vmem:[#allocation56_spill] sm:$0xff] %v12550_v17  ;;  %vm1122_vm4 = vcmp.ne.s32.totalorder %v622_v44, 15  ;;  %v12558_v35 = vmul.bf16 %v2069_v20, %v12544_v58  ;;  %v10679_v27 = vld [vmem:[#allocation7 + $0x68] sm:$0xff]   ;;  %v7964_v52 = vsel %vm1120_vm3, 1.0, %v14535_v46 }
 0x341   : > { %v2074_v8 = vrot.slane %v14570_v2, 1  ;;  %v14571_v21 = vshrl.u32 %v12136_v13, 16  ;;  %v14572_v44 = vshrl.u32 %v12139_v60, 16  ;;  %v12575_v20 = vpack.c.bf16 %v7964_v52, %v14536_v59 }
 0x342   : > { %v2072_v33 = vsel %vm2065_vm11, %v2070_v5, %v2071_v1  ;;  %v7965_v5 = vsel %vm1122_vm4, 1.0, %v14535_v46  ;;  %v536_v52 = vadd.s32 136, %v11848_v53 }
 0x343   : > { %v12561_v30 = vmul.bf16 %v2072_v33, %v12550_v17  ;;  %v2073_v28 = vor.u32 %v2071_v1, %v14571_v21  ;;  %v2076_v2 = vor.u32 %v2074_v8, %v14572_v44  ;;  %v650_v33 = vand.u32 15, %v532_v16  ;;  %14573 = vst [vmem:[#allocation57_spill] sm:$0xff] %v12575_v20  ;;  %v10680_v17 = vld [vmem:[#allocation7 + $0x70] sm:$0xff]  }
 0x344   : > { %8998 = vmatmul.mubr.msk.bf16.gmra.mrb[24].mxu1 %vm1458_vm2, %v12468_v18  ;;  %v14574_v1 = vshll.u32 %v12153_v12, 16  ;;  %v12581_v48 = vpack.c.bf16 %v7965_v5, %v14536_v59  ;;  %v534_v16 = vadd.s32 120, %v11848_v53 }
 0x345   : > { %9001 = vmatprep.mubr.msk.bf16.mxu1 %vm1458_vm2, %v12472_v7  ;;  %v2075_v58 = vsel %vm2065_vm11, %v2073_v28, %v2074_v8  ;;  %vm1126_vm8 = vcmp.ne.s32.totalorder %v650_v33, 15  ;;  %v10681_v8 = vld [vmem:[#allocation7 + $0x78] sm:$0xff]   ;;  %v14578_v33 = vshrl.u32 %v12157_v63, 16 }
 0x346   : > { %v2077_v21 = vrot.slane %v14574_v1, 1  ;;  %14575 = vst [vmem:[#allocation58_spill] sm:$0xff] %v12581_v48  ;;  %v12589_v1 = vmul.bf16 %v2075_v58, %v12575_v20  ;;  %v664_v58 = vand.u32 15, %v534_v16  ;;  %v678_v20 = vand.u32 15, %v536_v52 }
 0x347   : > { %v14582_v52 = vshll.u32 %v12171_v26, 16 }
 0x348   : > { %vm1128_vm9 = vcmp.ne.s32.totalorder %v664_v58, 15  ;;  %vm1130_vm10 = vcmp.ne.s32.totalorder %v678_v20, 15 }
 0x349   : > { %v7969_v20 = vsel %vm1130_vm10, 1.0, %v14535_v46 }
 0x34c   : > { %9002 = vmatmul.mubr.msk.bf16.gmra.mrb[28].mxu1 %vm1458_vm2, %v12496_v42 }
 0x34d   : > { %9005 = vmatprep.mubr.msk.bf16.mxu1 %vm1458_vm2, %v12499_v15 }
 0x354   : > { %9006 = vmatmul.mubr.msk.bf16.gmra.mrb[32].mxu1 %vm1458_vm2, %v12531_v10 }
 0x355   : > { %9017 = vmatprep.mubr.msk.bf16.mxu1 %vm1458_vm2, %v2134_v49  ;;  %v530_v49 = vadd.s32 88, %v11848_v53 }
 0x357   : > { %v636_v43 = vand.u32 15, %v530_v49  ;;  %v2078_v49 = vsel %vm2065_vm11, %v2076_v2, %v2077_v21 }
 0x358   : > { %v12592_v28 = vmul.bf16 %v2078_v49, %v12581_v48  ;;  %v14580_v48 = vshll.u32 %v12169_v54, 16 }
 0x359   : > { %vm1124_vm5 = vcmp.ne.s32.totalorder %v636_v43, 15  ;;  %v14577_v43 = vshrl.u32 %v12153_v12, 16 }
 0x35a   : > { %v7966_v5 = vsel %vm1124_vm5, 1.0, %v14535_v46 }
 0x35b   : > { %v2079_v2 = vor.u32 %v2077_v21, %v14577_v43  ;;  %v12605_v49 = vpack.c.bf16 %v7966_v5, %v14536_v59  ;;  %v2083_v21 = vrot.slane %v14580_v48, 1  ;;  %v12609_v43 = vld [vmem:[#allocation7 + $0x80] sm:$0xff]   ;;  %v538_v5 = vadd.s32 152, %v11848_v53 }
 0x35c   : > { %9018 = vmatmul.mubr.msk.bf16.vlgmr.msra.gmra.mrb[4].mxu1 %vm1458_vm2, %v12558_v35 }
 0x35d   : > { %9050 = vmatpush3.bf16.msra.mxu1 %v12350_v36  ;;  %9021 = vmatprep.mubr.msk.bf16.mxu1 %vm1458_vm2, %v12561_v30  ;;  %v14576_v36 = vshll.u32 %v12157_v63, 16  ;;  %14579 = vst [vmem:[#allocation59_spill] sm:$0xff] %v12605_v49 }
 0x35e   : > { %9051 = vmatprep.subr.bf16.mxu1 %v10679_v27 }
 0x35f   : > { %v2080_v44 = vrot.slane %v14576_v36, 1 }
 0x361   : > { %9052 = vmatpush3.bf16.msra.mxu1 %v10679_v27  ;;  %v7967_v27 = vsel %vm1126_vm8, 1.0, %v14535_v46  ;;  %v2082_v36 = vor.u32 %v2080_v44, %v14578_v33  ;;  %v2081_v41 = vsel %vm2065_vm11, %v2079_v2, %v2080_v44  ;;  %v540_v33 = vadd.s32 168, %v11848_v53 }
 0x362   : > { %9053 = vmatprep.subr.bf16.mxu1 %v10680_v17  ;;  %v12613_v61 = vpack.c.bf16 %v7967_v27, %v14536_v59  ;;  %v12621_v48 = vmul.bf16 %v2081_v41, %v12605_v49  ;;  %v7968_v2 = vsel %vm1128_vm9, 1.0, %v14535_v46  ;;  %v14583_v27 = vshrl.u32 %v12169_v54, 16 }
 0x363   : > { %v2084_v16 = vsel %vm2065_vm11, %v2082_v36, %v2083_v21  ;;  %v692_v41 = vand.u32 15, %v538_v5  ;;  %v14588_v5 = vshll.u32 %v12187_v22, 16 }
 0x364   : > { %9022 = vmatmul.mubr.msk.bf16.gmra.mrb[8].mxu1 %vm1458_vm2, %v12589_v1  ;;  %14581 = vst [vmem:[#allocation60_spill] sm:$0xff] %v12613_v61  ;;  %v12625_v44 = vmul.bf16 %v2084_v16, %v12613_v61  ;;  %v2085_v36 = vor.u32 %v2083_v21, %v14583_v27  ;;  %v12638_v16 = vpack.c.bf16 %v7968_v2, %v14536_v59  ;;  %v14586_v61 = vshll.u32 %v12185_v55, 16 }
 0x365   : > { %9025 = vmatprep.mubr.msk.bf16.mxu1 %vm1458_vm2, %v12592_v28  ;;  %9054 = vmatpush3.bf16.msra.mxu1 %v10680_v17  ;;  %v2086_v17 = vrot.slane %v14582_v52, 1  ;;  %v706_v52 = vand.u32 15, %v540_v33  ;;  %v12644_v27 = vpack.c.bf16 %v7969_v20, %v14536_v59  ;;  %vm1132_vm12 = vcmp.ne.s32.totalorder %v692_v41, 15 }
 0x366   : > { %9055 = vmatprep.subr.bf16.mxu1 %v10681_v8  ;;  %14585 = vst [vmem:[#allocation61_spill] sm:$0xff] %v12638_v16  ;;  %v2089_v49 = vrot.slane %v14586_v61, 1  ;;  %v544_v33 = vadd.s32 200, %v11848_v53  ;;  %v14590_v41 = vshrl.u32 %v12187_v22, 16 }
 0x367   : > { %v2087_v21 = vsel %vm2065_vm11, %v2085_v36, %v2086_v17  ;;  %14587 = vst [vmem:[#allocation62_spill] sm:$0xff] %v12644_v27  ;;  %vm1134_vm14 = vcmp.ne.s32.totalorder %v706_v52, 15  ;;  %v14589_v36 = vshrl.u32 %v12185_v55, 16 }
 0x368   : > { %v12652_v2 = vmul.bf16 %v2087_v21, %v12638_v16  ;;  %v734_v21 = vand.u32 15, %v544_v33  ;;  %v548_v33 = vadd.s32 232, %v11848_v53 }
 0x369   : > { %9056 = vmatpush3.bf16.msra.mxu1 %v10681_v8  ;;  %v14584_v8 = vshrl.u32 %v12171_v26, 16  ;;  %v2091_v20 = vor.u32 %v2089_v49, %v14589_v36 }
 0x36a   : > { %9089 = vmatprep.subr.bf16.mxu1 %v12609_v43  ;;  %vm1138_vm3 = vcmp.ne.s32.totalorder %v734_v21, 15 }
 0x36b   : > { %v2088_v58 = vor.u32 %v2086_v17, %v14584_v8  ;;  %v2092_v8 = vrot.slane %v14588_v5, 1  ;;  %v7970_v17 = vsel %vm1132_vm12, 1.0, %v14535_v46  ;;  %v720_v5 = vand.u32 15, %v542_v51 }
 0x36c   : > { %9026 = vmatmul.mubr.msk.bf16.gmra.mrb[12].mxu1 %vm1458_vm2, %v12621_v48  ;;  %v14594_v51 = vshll.u32 %v12199_v37, 16 }
 0x36d   : > { %9029 = vmatprep.mubr.msk.bf16.mxu1 %vm1458_vm2, %v12625_v44  ;;  %v2090_v32 = vsel %vm2065_vm11, %v2088_v58, %v2089_v49  ;;  %v7971_v58 = vsel %vm1134_vm14, 1.0, %v14535_v46  ;;  %v2094_v52 = vor.u32 %v2092_v8, %v14590_v41  ;;  %v2093_v49 = vsel %vm2065_vm11, %v2091_v20, %v2092_v8 }
 0x36e   : > { %v12655_v61 = vmul.bf16 %v2090_v32, %v12644_v27  ;;  %v12668_v32 = vpack.c.bf16 %v7970_v17, %v14536_v59  ;;  %v14592_v27 = vshll.u32 %v12197_v45, 16  ;;  %v12674_v36 = vpack.c.bf16 %v7971_v58, %v14536_v59 }
 0x36f   : > { %vm1136_vm15 = vcmp.ne.s32.totalorder %v720_v5, 15  ;;  %v2098_v41 = vrot.slane %v14594_v51, 1  ;;  %v14595_v20 = vshrl.u32 %v12197_v45, 16  ;;  %v14596_v5 = vshrl.u32 %v12199_v37, 16 }
 0x370   : > { %14591 = vst [vmem:[#allocation63_spill] sm:$0xff] %v12668_v32  ;;  %v2095_v16 = vrot.slane %v14592_v27, 1  ;;  %14593 = vst [vmem:[#allocation64_spill] sm:$0xff] %v12674_v36  ;;  %v12682_v17 = vmul.bf16 %v2093_v49, %v12668_v32  ;;  %v7972_v8 = vsel %vm1136_vm15, 1.0, %v14535_v46  ;;  %v748_v51 = vand.u32 15, %v546_v3 }
 0x371   : > { %v2100_v21 = vor.u32 %v2098_v41, %v14596_v5  ;;  %v762_v49 = vand.u32 15, %v548_v33  ;;  %v14600_v3 = vshll.u32 %v12220_v11, 16 }
 0x372   : > { %v2096_v24 = vsel %vm2065_vm11, %v2094_v52, %v2095_v16  ;;  %v2097_v58 = vor.u32 %v2095_v16, %v14595_v20  ;;  %v7973_v52 = vsel %vm1138_vm3, 1.0, %v14535_v46  ;;  %vm1140_vm4 = vcmp.ne.s32.totalorder %v748_v51, 15 }
 0x373   : > { %v12685_v27 = vmul.bf16 %v2096_v24, %v12674_v36  ;;  %v12698_v24 = vpack.c.bf16 %v7972_v8, %v14536_v59  ;;  %v14598_v36 = vshll.u32 %v12214_v40, 16  ;;  %v12704_v20 = vpack.c.bf16 %v7973_v52, %v14536_v59 }
 0x374   : > { %9030 = vmatmul.mubr.msk.bf16.gmra.mrb[16].mxu1 %vm1458_vm2, %v12652_v2  ;;  %v2099_v16 = vsel %vm2065_vm11, %v2097_v58, %v2098_v41  ;;  %v2104_v5 = vrot.slane %v14600_v3, 1  ;;  %vm1142_vm5 = vcmp.ne.s32.totalorder %v762_v49, 15  ;;  %v14602_v41 = vshrl.u32 %v12214_v40, 16 }
 0x375   : > { %9033 = vmatprep.mubr.msk.bf16.mxu1 %vm1458_vm2, %v12655_v61  ;;  %14597 = vst [vmem:[#allocation65_spill] sm:$0xff] %v12698_v24  ;;  %v2101_v32 = vrot.slane %v14598_v36, 1  ;;  %14599 = vst [vmem:[#allocation66_spill] sm:$0xff] %v12704_v20  ;;  %v12711_v33 = vmul.bf16 %v2099_v16, %v12698_v24  ;;  %v7974_v36 = vsel %vm1140_vm4, 1.0, %v14535_v46  ;;  %v7975_v52 = vsel %vm1142_vm5, 1.0, %v14535_v46 }
 0x376   : > { %v776_v49 = vand.u32 15, %v550_v62  ;;  %v14605_v16 = vshll.u32 %v12216_v57, 16  ;;  %v14607_v24 = vshrl.u32 %v12216_v57, 16 }
 0x377   : > { %v2102_v56 = vsel %vm2065_vm11, %v2100_v21, %v2101_v32  ;;  %v2103_v58 = vor.u32 %v2101_v32, %v14602_v41  ;;  %v14603_v21 = vshrl.u32 %v12220_v11, 16  ;;  %v12733_v41 = vpack.c.bf16 %v7975_v52, %v14536_v59 }
 0x378   : > { %v12714_v8 = vmul.bf16 %v2102_v56, %v12704_v20  ;;  %v12727_v56 = vpack.c.bf16 %v7974_v36, %v14536_v59  ;;  %v2107_v3 = vrot.slane %v14605_v16, 1  ;;  %vm1144_vm8 = vcmp.ne.s32.totalorder %v776_v49, 15 }
 0x379   : > { %v2106_v51 = vor.u32 %v2104_v5, %v14603_v21  ;;  %v2105_v32 = vsel %vm2065_vm11, %v2103_v58, %v2104_v5  ;;  %14606 = vst [vmem:[#allocation69_spill] sm:$0xff] %v12733_v41  ;;  %v7976_v36 = vsel %vm1144_vm8, 1.0, %v14535_v46 }
 0x37a   : > { %14601 = vst [vmem:[#allocation67_spill] sm:$0xff] %v12714_v8  ;;  %14604 = vst [vmem:[#allocation68_spill] sm:$0xff] %v12727_v56  ;;  %v12737_v21 = vmul.bf16 %v2105_v32, %v12727_v56  ;;  %v12750_v5 = vpack.c.bf16 %v7976_v36, %v14536_v59  ;;  %v10688_v32 = vld [vmem:[#allocation7 + $0xb0] sm:$0xff]   ;;  %v10691_v36 = vld [vmem:[#allocation7 + $0xc8] sm:$0xff]  }
 0x37b   : > { %v2108_v20 = vsel %vm2065_vm11, %v2106_v51, %v2107_v3 }
 0x37c   : > { %9034 = vmatmul.mubr.msk.bf16.gmra.mrb[20].mxu1 %vm1458_vm2, %v12682_v17  ;;  %v12740_v62 = vmul.bf16 %v2108_v20, %v12733_v41  ;;  %14608 = vst [vmem:[#allocation70_spill] sm:$0xff] %v12750_v5 }
 0x37d   : > { %9037 = vmatprep.mubr.msk.bf16.mxu1 %vm1458_vm2, %v12685_v27 }
 0x384   : > { %9038 = vmatmul.mubr.msk.bf16.gmra.mrb[24].mxu1 %vm1458_vm2, %v12711_v33 }
 0x385   : > { %9041 = vmatprep.mubr.msk.bf16.mxu1 %vm1458_vm2, %v12714_v8  ;;  %v2109_v8 = vor.u32 %v2107_v3, %v14607_v24  ;;  %v10683_v24 = vld [vmem:[#allocation7 + $0x88] sm:$0xff]  }
 0x386   : > { %v10687_v3 = vld [vmem:[#allocation7 + $0xa8] sm:$0xff]  }
 0x387   : > { %v2111_v58 = vsel %vm2065_vm11, %v2109_v8, %v12236_v9  ;;  %v10684_v9 = vld [vmem:[#allocation7 + $0x90] sm:$0xff]   ;;  %v10685_v8 = vld [vmem:[#allocation7 + $0x98] sm:$0xff]  }
 0x388   : > { %v12755_v20 = vmul.bf16 %v2111_v58, %v12750_v5  ;;  %v10692_v58 = vld [vmem:[#allocation7 + $0xd0] sm:$0xff]  }
 0x38c   : > { %9042 = vmatmul.mubr.msk.bf16.gmra.mrb[28].mxu1 %vm1458_vm2, %v12737_v21 }
 0x38d   : > { %9045 = vmatprep.mubr.msk.bf16.mxu1 %vm1458_vm2, %v12740_v62 }
 0x394   : > { %9046 = vmatmul.mubr.msk.bf16.gmra.mrb[32].mxu1 %vm1458_vm2, %v12755_v20 }
 0x395   : > { %9057 = vmatprep.mubr.msk.bf16.mxu1 %vm1458_vm2, %v12294_v47  ;;  %v10686_v47 = vld [vmem:[#allocation7 + $0xa0] sm:$0xff]  }
 0x39c   : > { %9058 = vmatmul.mubr.msk.bf16.vlgmr.msra.gmra.mrb[4].mxu1 %vm1458_vm2, %v12298_v50 }
 0x39d   : > { %9090 = vmatpush3.bf16.msra.mxu1 %v12609_v43  ;;  %9061 = vmatprep.mubr.msk.bf16.mxu1 %vm1458_vm2, %v12329_v38  ;;  %v551_v43 = vadd.s32 256, %v11848_v53 }
 0x39e   : > { %9091 = vmatprep.subr.bf16.mxu1 %v10683_v24 }
 0x39f   : > { %v783_v52 = vand.u32 15, %v551_v43 }
 0x3a1   : > { %9092 = vmatpush3.bf16.msra.mxu1 %v10683_v24  ;;  %vm1019_vm9 = vcmp.ne.s32.totalorder %v783_v52, 0  ;;  %v10693_v24 = vld [vmem:[#allocation7 + $0xd8] sm:$0xff]  }
 0x3a2   : > { %9093 = vmatprep.subr.bf16.mxu1 %v10684_v9  ;;  %v7959_v51 = vsel %vm1019_vm9, 1.0, %v14535_v46 }
 0x3a3   : > { %v12793_v49 = vpack.c.bf16 %v14536_v59, %v7959_v51  ;;  %v14612_v51 = vld [vmem:[#allocation36_spill] sm:$0xff] }
 0x3a4   : > { %9062 = vmatmul.mubr.msk.bf16.gmra.mrb[8].mxu1 %vm1458_vm2, %v12333_v0 }
 0x3a5   : > { %9065 = vmatprep.mubr.msk.bf16.mxu1 %vm1458_vm2, %v12365_v4  ;;  %9094 = vmatpush3.bf16.msra.mxu1 %v10684_v9  ;;  %14609 = vst [vmem:[#allocation71_spill] sm:$0xff] %v12793_v49  ;;  %v12797_v16 = vmul.bf16 %v12266_v39, %v12793_v49  ;;  %v10689_v39 = vld [vmem:[#allocation7 + $0xb8] sm:$0xff]   ;;  %v552_v9 = vadd.s32 264, %v11848_v53 }
 0x3a6   : > { %9095 = vmatprep.subr.bf16.mxu1 %v10685_v8 }
 0x3a9   : > { %9096 = vmatpush3.bf16.msra.mxu1 %v10685_v8  ;;  %v14610_v8 = vld [vmem:[#allocation67_spill] sm:$0xff] }
 0x3aa   : > { %9129 = vmatprep.subr.bf16.mxu1 %v10686_v47 }
 0x3ac   : > { %9066 = vmatmul.mubr.msk.bf16.gmra.mrb[12].mxu1 %vm1458_vm2, %v12370_v29 }
 0x3ad   : > { %9069 = vmatprep.mubr.msk.bf16.mxu1 %vm1458_vm2, %v12400_v31 }
 0x3b4   : > { %9070 = vmatmul.mubr.msk.bf16.gmra.mrb[16].mxu1 %vm1458_vm2, %v12404_v34 }
 0x3b5   : > { %9073 = vmatprep.mubr.msk.bf16.mxu1 %vm1458_vm2, %v12434_v14 }
 0x3bc   : > { %9074 = vmatmul.mubr.msk.bf16.gmra.mrb[20].mxu1 %vm1458_vm2, %v12438_v6 }
 0x3bd   : > { %9077 = vmatprep.mubr.msk.bf16.mxu1 %vm1458_vm2, %v12468_v18 }
 0x3c4   : > { %9078 = vmatmul.mubr.msk.bf16.gmra.mrb[24].mxu1 %vm1458_vm2, %v12472_v7 }
 0x3c5   : > { %9081 = vmatprep.mubr.msk.bf16.mxu1 %vm1458_vm2, %v12496_v42 }
 0x3cc   : > { %9082 = vmatmul.mubr.msk.bf16.gmra.mrb[28].mxu1 %vm1458_vm2, %v12499_v15 }
 0x3cd   : > { %9085 = vmatprep.mubr.msk.bf16.mxu1 %vm1458_vm2, %v12531_v10 }
 0x3d4   : > { %9086 = vmatmul.mubr.msk.bf16.gmra.mrb[32].mxu1 %vm1458_vm2, %v12797_v16 }
 0x3d5   : > { %9097 = vmatprep.mubr.msk.bf16.mxu1 %vm1458_vm2, %v12103_v19  ;;  %v10690_v19 = vld [vmem:[#allocation7 + $0xc0] sm:$0xff]  }
 0x3dc   : > { %9098 = vmatmul.mubr.msk.bf16.vlgmr.msra.gmra.mrb[4].mxu1 %vm1458_vm2, %v12116_v23 }
 0x3dd   : > { %9130 = vmatpush3.bf16.msra.mxu1 %v10686_v47  ;;  %9101 = vmatprep.mubr.msk.bf16.mxu1 %vm1458_vm2, %v12136_v13  ;;  %v790_v47 = vand.u32 15, %v552_v9 }
 0x3de   : > { %9131 = vmatprep.subr.bf16.mxu1 %v10687_v3 }
 0x3df   : > { %vm1146_vm10 = vcmp.ne.s32.totalorder %v790_v47, 15 }
 0x3e0   : > { %v7977_v43 = vsel %vm1146_vm10, 1.0, %v14535_v46 }
 0x3e1   : > { %9132 = vmatpush3.bf16.msra.mxu1 %v10687_v3  ;;  %v12866_v52 = vpack.c.bf16 %v7977_v43, %v14536_v59 }
 0x3e2   : > { %9133 = vmatprep.subr.bf16.mxu1 %v10688_v32 }
 0x3e3   : > { %14611 = vst [vmem:[#allocation67_spill] sm:$0xff] %v12866_v52 }
 0x3e4   : > { %9102 = vmatmul.mubr.msk.bf16.gmra.mrb[8].mxu1 %vm1458_vm2, %v12139_v60 }
 0x3e5   : > { %9105 = vmatprep.mubr.msk.bf16.mxu1 %vm1458_vm2, %v12153_v12  ;;  %9134 = vmatpush3.bf16.msra.mxu1 %v10688_v32  ;;  %v2133_v32 = vsel %vm12513_vm13, %v14612_v51, 0 }
 0x3e6   : > { %9135 = vmatprep.subr.bf16.mxu1 %v10689_v39 }
 0x3e9   : > { %9136 = vmatpush3.bf16.msra.mxu1 %v10689_v39  ;;  %v12872_v39 = vmul.bf16 %v2133_v32, %v12866_v52 }
 0x3ea   : > { %9169 = vmatprep.subr.bf16.mxu1 %v10690_v19 }
 0x3ec   : > { %9106 = vmatmul.mubr.msk.bf16.gmra.mrb[12].mxu1 %vm1458_vm2, %v12157_v63 }
 0x3ed   : > { %9109 = vmatprep.mubr.msk.bf16.mxu1 %vm1458_vm2, %v12169_v54 }
 0x3f4   : > { %9110 = vmatmul.mubr.msk.bf16.gmra.mrb[16].mxu1 %vm1458_vm2, %v12171_v26 }
 0x3f5   : > { %9113 = vmatprep.mubr.msk.bf16.mxu1 %vm1458_vm2, %v12185_v55 }
 0x3fc   : > { %9114 = vmatmul.mubr.msk.bf16.gmra.mrb[20].mxu1 %vm1458_vm2, %v12187_v22 }
 0x3fd   : > { %9117 = vmatprep.mubr.msk.bf16.mxu1 %vm1458_vm2, %v12197_v45 }
 0x404   : > { %9118 = vmatmul.mubr.msk.bf16.gmra.mrb[24].mxu1 %vm1458_vm2, %v12199_v37 }
 0x405   : > { %9121 = vmatprep.mubr.msk.bf16.mxu1 %vm1458_vm2, %v12214_v40 }
 0x40c   : > { %9122 = vmatmul.mubr.msk.bf16.gmra.mrb[28].mxu1 %vm1458_vm2, %v12220_v11 }
 0x40d   : > { %9125 = vmatprep.mubr.msk.bf16.mxu1 %vm1458_vm2, %v12216_v57 }
 0x414   : > { %9126 = vmatmul.mubr.msk.bf16.gmra.mrb[32].mxu1 %vm1458_vm2, %v12183_v25 }
 0x415   : > { %9137 = vmatprep.mubr.msk.bf16.mxu1 %vm1458_vm2, %v12558_v35  ;;  %v10694_v35 = vld [vmem:[#allocation7 + $0xe0] sm:$0xff]  }
 0x41c   : > { %9138 = vmatmul.mubr.msk.bf16.vlgmr.msra.gmra.mrb[4].mxu1 %vm1458_vm2, %v12561_v30 }
 0x41d   : > { %9170 = vmatpush3.bf16.msra.mxu1 %v10690_v19  ;;  %9141 = vmatprep.mubr.msk.bf16.mxu1 %vm1458_vm2, %v12589_v1  ;;  %v10695_v19 = vld [vmem:[#allocation7 + $0xe8] sm:$0xff]  }
 0x41e   : > { %9171 = vmatprep.subr.bf16.mxu1 %v10691_v36 }
 0x421   : > { %9172 = vmatpush3.bf16.msra.mxu1 %v10691_v36  ;;  %v10696_v36 = vld [vmem:[#allocation7 + $0xf0] sm:$0xff]  }
 0x422   : > { %9173 = vmatprep.subr.bf16.mxu1 %v10692_v58 }
 0x424   : > { %9142 = vmatmul.mubr.msk.bf16.gmra.mrb[8].mxu1 %vm1458_vm2, %v12592_v28 }
 0x425   : > { %9145 = vmatprep.mubr.msk.bf16.mxu1 %vm1458_vm2, %v12621_v48  ;;  %9174 = vmatpush3.bf16.msra.mxu1 %v10692_v58  ;;  %v10697_v58 = vld [vmem:[#allocation7 + $0xf8] sm:$0xff]  }
 0x426   : > { %9175 = vmatprep.subr.bf16.mxu1 %v10693_v24 }
 0x429   : > { %9176 = vmatpush3.bf16.msra.mxu1 %v10693_v24 }
 0x42a   : > { %9209 = vmatprep.subr.bf16.mxu1 %v10694_v35 }
 0x42c   : > { %9146 = vmatmul.mubr.msk.bf16.gmra.mrb[12].mxu1 %vm1458_vm2, %v12625_v44 }
 0x42d   : > { %9149 = vmatprep.mubr.msk.bf16.mxu1 %vm1458_vm2, %v12652_v2 }
 0x434   : > { %9150 = vmatmul.mubr.msk.bf16.gmra.mrb[16].mxu1 %vm1458_vm2, %v12655_v61 }
 0x435   : > { %9153 = vmatprep.mubr.msk.bf16.mxu1 %vm1458_vm2, %v12682_v17 }
 0x43c   : > { %9154 = vmatmul.mubr.msk.bf16.gmra.mrb[20].mxu1 %vm1458_vm2, %v12685_v27 }
 0x43d   : > { %9157 = vmatprep.mubr.msk.bf16.mxu1 %vm1458_vm2, %v12711_v33 }
 0x444   : > { %9158 = vmatmul.mubr.msk.bf16.gmra.mrb[24].mxu1 %vm1458_vm2, %v14610_v8 }
 0x445   : > { %9161 = vmatprep.mubr.msk.bf16.mxu1 %vm1458_vm2, %v12737_v21 }
 0x44c   : > { %9162 = vmatmul.mubr.msk.bf16.gmra.mrb[28].mxu1 %vm1458_vm2, %v12740_v62 }
 0x44d   : > { %9165 = vmatprep.mubr.msk.bf16.mxu1 %vm1458_vm2, %v12755_v20 }
 0x454   : > { %9166 = vmatmul.mubr.msk.bf16.gmra.mrb[32].mxu1 %vm1458_vm2, %v12872_v39 }
 0x455   : > { %9177 = vmatprep.mubr.msk.bf16.mxu1 %vm1458_vm2, %v12298_v50  ;;  %v10698_v50 = vld [vmem:[#allocation7 + $0x100] sm:$0xff]  }
 0x45c   : > { %9178 = vmatmul.mubr.msk.bf16.vlgmr.msra.gmra.mrb[4].mxu1 %vm1458_vm2, %v12329_v38  ;;  %v553_v38 = vadd.s32 272, %v11848_v53 }
 0x45d   : > { %9210 = vmatpush3.bf16.msra.mxu1 %v10694_v35  ;;  %9181 = vmatprep.mubr.msk.bf16.mxu1 %vm1458_vm2, %v12333_v0 }
 0x45e   : > { %9211 = vmatprep.subr.bf16.mxu1 %v10695_v19  ;;  %v797_v0 = vand.u32 15, %v553_v38 }
 0x460   : > { %vm1021_vm12 = vcmp.ne.s32.totalorder %v797_v0, 0 }
 0x461   : > { %9212 = vmatpush3.bf16.msra.mxu1 %v10695_v19 }
 0x462   : > { %9213 = vmatprep.subr.bf16.mxu1 %v10696_v36 }
 0x464   : > { %9182 = vmatmul.mubr.msk.bf16.gmra.mrb[8].mxu1 %vm1458_vm2, %v12365_v4  ;;  %v7960_v4 = vsel %vm1021_vm12, 1.0, %v14535_v46 }
 0x465   : > { %9185 = vmatprep.mubr.msk.bf16.mxu1 %vm1458_vm2, %v12370_v29  ;;  %9214 = vmatpush3.bf16.msra.mxu1 %v10696_v36  ;;  %v12909_v29 = vpack.c.bf16 %v14536_v59, %v7960_v4 }
 0x466   : > { %9215 = vmatprep.subr.bf16.mxu1 %v10697_v58 }
 0x467   : > { %14614 = vst [vmem:[#allocation36_spill] sm:$0xff] %v12909_v29 }
 0x469   : > { %9216 = vmatpush3.bf16.msra.mxu1 %v10697_v58 }
 0x46a   : > { %9249 = vmatprep.subr.bf16.mxu1 %v10698_v50 }
 0x46c   : > { %9186 = vmatmul.mubr.msk.bf16.gmra.mrb[12].mxu1 %vm1458_vm2, %v12400_v31  ;;  %v14615_v31 = vld [vmem:[#allocation35_spill] sm:$0xff] }
 0x46d   : > { %9189 = vmatprep.mubr.msk.bf16.mxu1 %vm1458_vm2, %v12404_v34  ;;  %v10770_v34 = vld [vmem:[#allocation10 + $0x220] sm:$0xff]  }
 0x474   : > { %9190 = vmatmul.mubr.msk.bf16.gmra.mrb[16].mxu1 %vm1458_vm2, %v12434_v14  ;;  %v2046_v14 = vsel %vm12276_vm7, %v14615_v31, 0 }
 0x475   : > { %9193 = vmatprep.mubr.msk.bf16.mxu1 %vm1458_vm2, %v12438_v6  ;;  %v2064_v6 = vmul.bf16 %v2046_v14, %v12909_v29 }
 0x47c   : > { %9194 = vmatmul.mubr.msk.bf16.gmra.mrb[20].mxu1 %vm1458_vm2, %v12468_v18  ;;  %v10699_v18 = vld [vmem:[#allocation7 + $0x108] sm:$0xff]  }
 0x47d   : > { %9197 = vmatprep.mubr.msk.bf16.mxu1 %vm1458_vm2, %v12472_v7  ;;  %v10700_v7 = vld [vmem:[#allocation7 + $0x110] sm:$0xff]  }
 0x484   : > { %9198 = vmatmul.mubr.msk.bf16.gmra.mrb[24].mxu1 %vm1458_vm2, %v12496_v42  ;;  %v10701_v42 = vld [vmem:[#allocation7 + $0x118] sm:$0xff]  }
 0x485   : > { %9201 = vmatprep.mubr.msk.bf16.mxu1 %vm1458_vm2, %v12499_v15 }
 0x48c   : > { %9202 = vmatmul.mubr.msk.bf16.gmra.mrb[28].mxu1 %vm1458_vm2, %v12531_v10 }
 0x48d   : > { %9205 = vmatprep.mubr.msk.bf16.mxu1 %vm1458_vm2, %v12797_v16 }
 0x494   : > { %9206 = vmatmul.mubr.msk.bf16.gmra.mrb[32].mxu1 %vm1458_vm2, %v2064_v6 }
 0x495   : > { %9217 = vmatprep.mubr.msk.bf16.mxu1 %vm1458_vm2, %v12116_v23  ;;  %v14617_v23 = vmov 0  }
 0x49c   : > { %9218 = vmatmul.mubr.msk.bf16.vlgmr.msra.gmra.mrb[4].mxu1 %vm1458_vm2, %v12136_v13  ;;  %v554_v13 = vadd.s32 280, %v11848_v53 }
 0x49d   : > { %9250 = vmatpush3.bf16.msra.mxu1 %v10698_v50  ;;  %9221 = vmatprep.mubr.msk.bf16.mxu1 %vm1458_vm2, %v12139_v60 }
 0x49e   : > { %9251 = vmatprep.subr.bf16.mxu1 %v10699_v18  ;;  %v804_v60 = vand.u32 15, %v554_v13 }
 0x4a0   : > { %vm1148_vm14 = vcmp.ne.s32.totalorder %v804_v60, 15 }
 0x4a1   : > { %9252 = vmatpush3.bf16.msra.mxu1 %v10699_v18 }
 0x4a2   : > { %9253 = vmatprep.subr.bf16.mxu1 %v10700_v7 }
 0x4a4   : > { %9222 = vmatmul.mubr.msk.bf16.gmra.mrb[8].mxu1 %vm1458_vm2, %v12153_v12  ;;  %v7978_v12 = vsel %vm1148_vm14, 1.0, %v14535_v46 }
 0x4a5   : > { %9225 = vmatprep.mubr.msk.bf16.mxu1 %vm1458_vm2, %v12157_v63  ;;  %9254 = vmatpush3.bf16.msra.mxu1 %v10700_v7  ;;  %v12978_v63 = vpack.c.bf16 %v7978_v12, %v14536_v59 }
 0x4a6   : > { %9255 = vmatprep.subr.bf16.mxu1 %v10701_v42 }
 0x4a7   : > { %14618 = vst [vmem:[#allocation35_spill] sm:$0xff] %v12978_v63 }
 0x4a9   : > { %9256 = vmatpush3.bf16.msra.mxu1 %v10701_v42 }
 0x4ac   : > { %9226 = vmatmul.mubr.msk.bf16.gmra.mrb[12].mxu1 %vm1458_vm2, %v12169_v54  ;;  %v14467_v54 = vmul.bf16 0, %v12978_v63 }
 0x4ad   : > { %9229 = vmatprep.mubr.msk.bf16.mxu1 %vm1458_vm2, %v12171_v26 }
 0x4b4   : > { %9230 = vmatmul.mubr.msk.bf16.gmra.mrb[16].mxu1 %vm1458_vm2, %v12185_v55 }
 0x4b5   : > { %9233 = vmatprep.mubr.msk.bf16.mxu1 %vm1458_vm2, %v12187_v22 }
 0x4bc   : > { %9234 = vmatmul.mubr.msk.bf16.gmra.mrb[20].mxu1 %vm1458_vm2, %v12197_v45 }
 0x4bd   : > { %9237 = vmatprep.mubr.msk.bf16.mxu1 %vm1458_vm2, %v12199_v37 }
 0x4c4   : > { %9238 = vmatmul.mubr.msk.bf16.gmra.mrb[24].mxu1 %vm1458_vm2, %v12214_v40 }
 0x4c5   : > { %9241 = vmatprep.mubr.msk.bf16.mxu1 %vm1458_vm2, %v12220_v11 }
 0x4cc   : > { %9242 = vmatmul.mubr.msk.bf16.gmra.mrb[28].mxu1 %vm1458_vm2, %v12216_v57 }
 0x4cd   : > { %9245 = vmatprep.mubr.msk.bf16.mxu1 %vm1458_vm2, %v12183_v25 }
 0x4d4   : > { %9246 = vmatmul.mubr.bf16.gmra.mrb[32].mxu1 %v14617_v23 }
 0x4d5   : > { %9257 = vmatprep.mubr.msk.bf16.mxu1 %vm1458_vm2, %v12561_v30 }
 0x4dc   : > { %9258 = vmatmul.mubr.msk.bf16.vlgmr.msra.gmra.mrb[4].mxu1 %vm1458_vm2, %v12589_v1 }
 0x4dd   : > { %9261 = vmatprep.mubr.msk.bf16.mxu1 %vm1458_vm2, %v12592_v28 }
 0x4e4   : > { %9262 = vmatmul.mubr.msk.bf16.gmra.mrb[8].mxu1 %vm1458_vm2, %v12621_v48 }
 0x4e5   : > { %9265 = vmatprep.mubr.msk.bf16.mxu1 %vm1458_vm2, %v12625_v44 }
 0x4ec   : > { %9266 = vmatmul.mubr.msk.bf16.gmra.mrb[12].mxu1 %vm1458_vm2, %v12652_v2 }
 0x4ed   : > { %9269 = vmatprep.mubr.msk.bf16.mxu1 %vm1458_vm2, %v12655_v61 }
 0x4f4   : > { %9270 = vmatmul.mubr.msk.bf16.gmra.mrb[16].mxu1 %vm1458_vm2, %v12682_v17  ;;  %v13000_v17 = vld [vmem:[%s14357_s5] ss:$0 sm:$0xff] }
 0x4f5   : > { %9273 = vmatprep.mubr.msk.bf16.mxu1 %vm1458_vm2, %v12685_v27 }
 0x4fc   : > { %9274 = vmatmul.mubr.msk.bf16.gmra.mrb[20].mxu1 %vm1458_vm2, %v12711_v33 }
 0x4fd   : > { %9277 = vmatprep.mubr.msk.bf16.mxu1 %vm1458_vm2, %v14610_v8 }
 0x504   : > { %9278 = vmatmul.mubr.msk.bf16.gmra.mrb[24].mxu1 %vm1458_vm2, %v12737_v21 }
 0x505   : > { %9281 = vmatprep.mubr.msk.bf16.mxu1 %vm1458_vm2, %v12740_v62 }
 0x50c   : > { %9282 = vmatmul.mubr.msk.bf16.gmra.mrb[28].mxu1 %vm1458_vm2, %v12755_v20 }
 0x50d   : > { %9285 = vmatprep.mubr.msk.bf16.mxu1 %vm1458_vm2, %v12872_v39 }
 0x514   : > { %9286 = vmatmul.mubr.msk.bf16.gmra.mrb[32].mxu1 %vm1458_vm2, %v14467_v54 }
 0x515   : > { %9340 = vmatprep.mubr.bf16.mxu1 %v14617_v23 }
 0x5af   : > { %v9259_v26 = vpop.f32.mrb[4].mxu1 }
 0x5b0   : > { %v4105_v25 = vpop.f32.mrb[5].mxu1  ;;  %v13030_v32 = vadd.f32 %v9259_v26, %v13000_v17 }
 0x5b1   : > { %v9260_v55 = vpop.f32.mrb[6].mxu1  ;;  %v13015_v24 = vadd.f32 %v13000_v17, %v4105_v25 }
 0x5b2   : > { %v4108_v22 = vpop.f32.mrb[7].mxu1  ;;  %v13023_v8 = vadd.f32 %v9260_v55, %v13000_v17 }
 0x5b3   : > { %v13003_v33 = vadd.f32 %v13000_v17, %v4108_v22 }
 0x5b4   : > { %v9878_v36 = vpack.c.bf16 %v13023_v8, %v13030_v32 }
 0x5b5   : > { %v9874_v47 = vpack.c.bf16 %v13003_v33, %v13015_v24 }
 0x5b7   : > { %v9263_v45 = vpop.f32.mrb[8].mxu1 }
 0x5b8   : > { %v4121_v37 = vpop.f32.mrb[9].mxu1  ;;  %v13062_v60 = vadd.f32 %v9263_v45, %v13000_v17 }
 0x5b9   : > { %v9264_v40 = vpop.f32.mrb[10].mxu1  ;;  %v13047_v31 = vadd.f32 %v13000_v17, %v4121_v37 }
 0x5ba   : > { %v4124_v57 = vpop.f32.mrb[11].mxu1  ;;  %v13055_v18 = vadd.f32 %v9264_v40, %v13000_v17 }
 0x5bb   : > { %v13035_v58 = vadd.f32 %v13000_v17, %v4124_v57 }
 0x5bc   : > { %v9886_v25 = vpack.c.bf16 %v13055_v18, %v13062_v60 }
 0x5bd   : > { %v9882_v7 = vpack.c.bf16 %v13035_v58, %v13047_v31 }
 0x5bf   : > { %v12987_v11 = vpop.f32.mrb[12].mxu1 }
 0x5c0   : > { %v4137_v15 = vpop.f32.mrb[13].mxu1 }
 0x5c1   : > { %v9268_v10 = vpop.f32.mrb[14].mxu1  ;;  %v13079_v57 = vadd.f32 %v13000_v17, %v4137_v15  ;;  %v13095_v15 = vadd.f32 %v12987_v11, %v13000_v17 }
 0x5c2   : > { %v4140_v30 = vpop.f32.mrb[15].mxu1 }
 0x5c3   : > { %v13067_v55 = vadd.f32 %v13000_v17, %v4140_v30 }
 0x5c7   : > { %v12989_v1 = vpop.f32.mrb[16].mxu1 }
 0x5c8   : > { %v12991_v28 = vpop.f32.mrb[17].mxu1 }
 0x5c9   : > { %v12993_v48 = vpop.f32.mrb[18].mxu1 }
 0x5ca   : > { %v12995_v44 = vpop.f32.mrb[19].mxu1 }
 0x5cf   : > { %v9275_v2 = vpop.f32.mrb[20].mxu1 }
 0x5d0   : > { %v4169_v61 = vpop.f32.mrb[21].mxu1  ;;  %v13018_v35 = vadd.f32 %v9275_v2, %v13000_v17 }
 0x5d1   : > { %v9276_v27 = vpop.f32.mrb[22].mxu1  ;;  %v13006_v62 = vadd.f32 %v13000_v17, %v4169_v61  ;;  %v13087_v61 = vadd.f32 %v9268_v10, %v13000_v17 }
 0x5d2   : > { %v4172_v21 = vpop.f32.mrb[23].mxu1  ;;  %v13009_v20 = vadd.f32 %v9276_v27, %v13000_v17  ;;  %v9890_v27 = vpack.c.bf16 %v13067_v55, %v13079_v57 }
 0x5d3   : > { %v13012_v16 = vadd.f32 %v13000_v17, %v4172_v21  ;;  %v9894_v10 = vpack.c.bf16 %v13087_v61, %v13095_v15 }
 0x5d4   : > { %v9876_v51 = vpack.c.bf16 %v13009_v20, %v13018_v35 }
 0x5d5   : > { %v9872_v9 = vpack.c.bf16 %v13012_v16, %v13006_v62 }
 0x5d7   : > { %v9279_v43 = vpop.f32.mrb[24].mxu1  ;;  %9873 = vmatprep.subr.bf16.mxu0 %v9872_v9 }
 0x5d8   : > { %v4185_v39 = vpop.f32.mrb[25].mxu1  ;;  %9875 = vmatpush3.bf16.msra.mxu0 %v9874_v47  ;;  %v13050_v14 = vadd.f32 %v9279_v43, %v13000_v17 }
 0x5d9   : > { %v9280_v19 = vpop.f32.mrb[26].mxu1  ;;  %9877 = vmatprep.subr.bf16.mxu0 %v9876_v51  ;;  %v13038_v38 = vadd.f32 %v13000_v17, %v4185_v39  ;;  %v13101_v51 = vadd.f32 %v13000_v17, %v12995_v44 }
 0x5da   : > { %v4188_v50 = vpop.f32.mrb[27].mxu1  ;;  %v13041_v0 = vadd.f32 %v9280_v19, %v13000_v17 }
 0x5db   : > { %v13044_v4 = vadd.f32 %v13000_v17, %v4188_v50  ;;  %v13114_v50 = vadd.f32 %v13000_v17, %v12991_v28 }
 0x5dc   : > { %9879 = vmatpush3.bf16.msra.mxu0 %v9878_v36  ;;  %v9884_v13 = vpack.c.bf16 %v13041_v0, %v13050_v14 }
 0x5dd   : > { %v9880_v6 = vpack.c.bf16 %v13044_v4, %v13038_v38 }
 0x5df   : > { %v9283_v42 = vpop.f32.mrb[28].mxu1  ;;  %9881 = vmatprep.subr.bf16.mxu0 %v9880_v6 }
 0x5e0   : > { %v4201_v12 = vpop.f32.mrb[29].mxu1  ;;  %9883 = vmatpush3.bf16.msra.mxu0 %v9882_v7  ;;  %v13082_v2 = vadd.f32 %v9283_v42, %v13000_v17  ;;  %v13123_v7 = vadd.f32 %v12993_v48, %v13000_v17  ;;  %v9898_v42 = vpack.c.bf16 %v13101_v51, %v13114_v50  ;;  %v4391_v48 = vmul.f32 %v13003_v33, %v13003_v33 }
 0x5e1   : > { %v9284_v26 = vpop.f32.mrb[30].mxu1  ;;  %9885 = vmatprep.subr.bf16.mxu0 %v9884_v13  ;;  %v13070_v37 = vadd.f32 %v13000_v17, %v4201_v12  ;;  %v4407_v13 = vmul.f32 %v13012_v16, %v13012_v16  ;;  %v13133_v12 = vadd.f32 %v12989_v1, %v13000_v17  ;;  %v4408_v1 = vmul.f32 %v13018_v35, %v13018_v35 }
 0x5e2   : > { %v4204_v22 = vpop.f32.mrb[31].mxu1  ;;  %v13073_v40 = vadd.f32 %v9284_v26, %v13000_v17  ;;  %v4406_v26 = vmul.f32 %v13006_v62, %v13006_v62 }
 0x5e3   : > { %v13076_v45 = vadd.f32 %v13000_v17, %v4204_v22  ;;  %v4409_v22 = vmul.f32 %v13009_v20, %v13009_v20 }
 0x5e4   : > { %9887 = vmatpush3.bf16.msra.mxu0 %v9886_v25  ;;  %v9892_v9 = vpack.c.bf16 %v13073_v40, %v13082_v2  ;;  %v9902_v25 = vpack.c.bf16 %v13123_v7, %v13133_v12 }
 0x5e5   : > { %v9888_v30 = vpack.c.bf16 %v13076_v45, %v13070_v37 }
 0x5e7   : > { %v9287_v21 = vpop.f32.mrb[32].mxu1  ;;  %9889 = vmatprep.subr.bf16.mxu0 %v9888_v30  ;;  %v9904_v30 = vpack.c.bf16 %v4407_v13, %v4406_v26  ;;  %v4412_v26 = vmul.f32 %v13050_v14, %v13050_v14 }
 0x5e8   : > { %v4217_v47 = vpop.f32.mrb[33].mxu1  ;;  %9891 = vmatpush3.bf16.msra.mxu0 %v9890_v27  ;;  %v13117_v6 = vadd.f32 %v9287_v21, %v13000_v17  ;;  %v4390_v27 = vmul.f32 %v13015_v24, %v13015_v24 }
 0x5e9   : > { %v9288_v43 = vpop.f32.mrb[34].mxu1  ;;  %9893 = vmatprep.subr.bf16.mxu0 %v9892_v9  ;;  %v13104_v19 = vadd.f32 %v13000_v17, %v4217_v47  ;;  %v4411_v9 = vmul.f32 %v13044_v4, %v13044_v4  ;;  %v9908_v47 = vpack.c.bf16 %v4409_v22, %v4408_v1  ;;  %v4415_v22 = vmul.f32 %v13076_v45, %v13076_v45 }
 0x5ea   : > { %v4220_v39 = vpop.f32.mrb[35].mxu1  ;;  %v13107_v36 = vadd.f32 %v9288_v43, %v13000_v17  ;;  %v9906_v21 = vpack.c.bf16 %v4391_v48, %v4390_v27  ;;  %v4392_v43 = vmul.f32 %v13030_v32, %v13030_v32  ;;  %v4397_v48 = vmul.f32 %v13055_v18, %v13055_v18 }
 0x5eb   : > { %v13110_v11 = vadd.f32 %v13000_v17, %v4220_v39  ;;  %v4393_v17 = vmul.f32 %v13023_v8, %v13023_v8  ;;  %v4396_v27 = vmul.f32 %v13062_v60, %v13062_v60  ;;  %v4414_v1 = vmul.f32 %v13070_v37, %v13070_v37 }
 0x5ec   : > { %9895 = vmatpush3.bf16.msra.mxu0 %v9894_v10  ;;  %v9900_v28 = vpack.c.bf16 %v13107_v36, %v13117_v6  ;;  %v4410_v10 = vmul.f32 %v13038_v38, %v13038_v38 }
 0x5ed   : > { %v9896_v44 = vpack.c.bf16 %v13110_v11, %v13104_v19  ;;  %v9910_v39 = vpack.c.bf16 %v4393_v17, %v4392_v43  ;;  %v9918_v17 = vpack.c.bf16 %v4397_v48, %v4396_v27  ;;  %v4398_v43 = vmul.f32 %v13079_v57, %v13079_v57 }
 0x5ee   : > { %v9912_v13 = vpack.c.bf16 %v4411_v9, %v4410_v10  ;;  %v4417_v9 = vmul.f32 %v13073_v40, %v13073_v40  ;;  %v4416_v10 = vmul.f32 %v13082_v2, %v13082_v2  ;;  %v4402_v27 = vmul.f32 %v13114_v50, %v13114_v50 }
 0x5ef   : > { %9897 = vmatprep.subr.bf16.mxu0 %v9896_v44  ;;  %v4395_v44 = vmul.f32 %v13035_v58, %v13035_v58 }
 0x5f0   : > { %9899 = vmatpush3.bf16.msra.mxu0 %v9898_v42  ;;  %v4413_v42 = vmul.f32 %v13041_v0, %v13041_v0 }
 0x5f1   : > { %9901 = vmatprep.subr.bf16.mxu0 %v9900_v28  ;;  %v4394_v28 = vmul.f32 %v13047_v31, %v13047_v31 }
 0x5f4   : > { %9903 = vmatpush3.bf16.msra.mxu0 %v9902_v25  ;;  %v9914_v25 = vpack.c.bf16 %v4395_v44, %v4394_v28  ;;  %v4400_v28 = vmul.f32 %v13095_v15, %v13095_v15 }
 0x5f5   : > { %9905 = vmatprep.subr.bf16.mxu0 %v9904_v30  ;;  %v9916_v30 = vpack.c.bf16 %v4413_v42, %v4412_v26  ;;  %v4419_v42 = vmul.f32 %v13110_v11, %v13110_v11  ;;  %v4418_v26 = vmul.f32 %v13104_v19, %v13104_v19 }
 0x5f7   : > { %4385 = vmatmul.mubr.f32.vlgmr.msra.gmra.mrb[2].mxu0 %v14536_v59 }
 0x5f8   : > { %9907 = vmatpush3.bf16.msra.mxu0 %v9906_v21  ;;  %4486 = vmatprep.mubr.f32.mxu0 %v14536_v59  ;;  %v4399_v21 = vmul.f32 %v13067_v55, %v13067_v55 }
 0x5f9   : > { %9909 = vmatprep.subr.bf16.mxu0 %v9908_v47  ;;  %v9920_v47 = vpack.c.bf16 %v4415_v22, %v4414_v1  ;;  %v4421_v22 = vmul.f32 %v13107_v36, %v13107_v36  ;;  %v4420_v1 = vmul.f32 %v13117_v6, %v13117_v6 }
 0x5fa   : > { %v9922_v44 = vpack.c.bf16 %v4399_v21, %v4398_v43 }
 0x5fc   : > { %9911 = vmatpush3.bf16.msra.mxu0 %v9910_v39  ;;  %v4401_v39 = vmul.f32 %v13087_v61, %v13087_v61 }
 0x5fd   : > { %9913 = vmatprep.subr.bf16.mxu0 %v9912_v13  ;;  %v9924_v13 = vpack.c.bf16 %v4417_v9, %v4416_v10  ;;  %v9932_v9 = vpack.c.bf16 %v4421_v22, %v4420_v1  ;;  %v14619_v10 = vmov 0.0|0.0   ;;  %v4311_v1 = vld [vmem:[#allocation8 + $0x48] sm:$0xff] }
 0x5fe   : > { %v9926_v48 = vpack.c.bf16 %v4401_v39, %v4400_v28  ;;  %v4302_v39 = vld [vmem:[#allocation8] sm:$0xff]  ;;  %v4305_v28 = vld [vmem:[#allocation8 + $0x18] sm:$0xff] }
 0x600   : > { %9915 = vmatpush3.bf16.msra.mxu0 %v9914_v25  ;;  %v4403_v25 = vmul.f32 %v13101_v51, %v13101_v51 }
 0x601   : > { %9917 = vmatprep.subr.bf16.mxu0 %v9916_v30  ;;  %v9928_v30 = vpack.c.bf16 %v4419_v42, %v4418_v26  ;;  %v4304_v42 = vld [vmem:[#allocation8 + $0x10] sm:$0xff] }
 0x602   : > { %v9930_v21 = vpack.c.bf16 %v4403_v25, %v4402_v27  ;;  %v9940_v26 = vpack.c.bf16 %v4305_v28, %v4304_v42  ;;  %v4307_v25 = vld [vmem:[#allocation8 + $0x28] sm:$0xff]  ;;  %v4316_v42 = vld [vmem:[#allocation8 + $0x70] sm:$0xff] }
 0x604   : > { %9919 = vmatpush3.bf16.msra.mxu0 %v9918_v17  ;;  %v4405_v17 = vmul.f32 %v13123_v7, %v13123_v7 }
 0x605   : > { %9921 = vmatprep.subr.bf16.mxu0 %v9920_v47  ;;  %v4404_v47 = vmul.f32 %v13133_v12, %v13133_v12 }
 0x607   : > { %v9934_v43 = vpack.c.bf16 %v4405_v17, %v4404_v47 }
 0x608   : > { %9923 = vmatpush3.bf16.msra.mxu0 %v9922_v44  ;;  %v4303_v44 = vld [vmem:[#allocation8 + $0x8] sm:$0xff] }
 0x609   : > { %9925 = vmatprep.subr.bf16.mxu0 %v9924_v13  ;;  %v9937_v13 = vpack.c.bf16 %v4303_v44, %v4302_v39  ;;  %v4315_v39 = vld [vmem:[#allocation8 + $0x68] sm:$0xff] }
 0x60c   : > { %9927 = vmatpush3.bf16.msra.mxu0 %v9926_v48  ;;  %v4306_v48 = vld [vmem:[#allocation8 + $0x20] sm:$0xff] }
 0x60d   : > { %9929 = vmatprep.subr.bf16.mxu0 %v9928_v30  ;;  %v9943_v22 = vpack.c.bf16 %v4307_v25, %v4306_v48  ;;  %v4308_v30 = vld [vmem:[#allocation8 + $0x30] sm:$0xff] }
 0x610   : > { %9931 = vmatpush3.bf16.msra.mxu0 %v9930_v21  ;;  %v4312_v21 = vld [vmem:[#allocation8 + $0x50] sm:$0xff] }
 0x611   : > { %9933 = vmatprep.subr.bf16.mxu0 %v9932_v9  ;;  %v4313_v9 = vld [vmem:[#allocation8 + $0x58] sm:$0xff] }
 0x612   : > { %v9952_v47 = vpack.c.bf16 %v4313_v9, %v4312_v21  ;;  %v10702_v21 = vld [vmem:[#allocation10 + $0x40] sm:$0xff]   ;;  %v10704_v9 = vld [vmem:[#allocation10 + $0x50] sm:$0xff]  }
 0x613   : > { %9324 = vmatprep.subr.bf16.mxu1 %v10702_v21 }
 0x614   : > { %9935 = vmatpush3.bf16.msra.mxu0 %v9934_v43  ;;  %v4314_v43 = vld [vmem:[#allocation8 + $0x60] sm:$0xff]  ;;  %9325 = vmatpush3.bf16.msra.mxu1 %v10702_v21 }
 0x615   : > { %9936 = vmatprep.subr.bf16.mxu0 %v14619_v10  ;;  %v9955_v44 = vpack.c.bf16 %v4315_v39, %v4314_v43  ;;  %v10706_v43 = vld [vmem:[#allocation10 + $0x58] sm:$0xff]   ;;  %v10707_v39 = vld [vmem:[#allocation10 + $0x8] sm:$0xff]  }
 0x617   : > { %4487 = vmatmul.mubr.f32.vlgmr.msra.gmra.mrb[4].mxu0 %v14536_v59  ;;  %v4309_v59 = vld [vmem:[#allocation8 + $0x38] sm:$0xff] }
 0x618   : > { %9321 = vmatprep.mubr.msk.f32.mxu0 %vm11275_vm0, %v14535_v46  ;;  %9938 = vmatpush3.bf16.msra.mxu0 %v9937_v13  ;;  %v9946_v27 = vpack.c.bf16 %v4309_v59, %v4308_v30  ;;  %v4310_v46 = vld [vmem:[#allocation8 + $0x40] sm:$0xff]  ;;  %v4317_v13 = vld [vmem:[#allocation8 + $0x78] sm:$0xff] }
 0x619   : > { %9939 = vmatprep.subr.bf16.mxu0 %v14619_v10  ;;  %v9949_v17 = vpack.c.bf16 %v4311_v1, %v4310_v46  ;;  %v9958_v28 = vpack.c.bf16 %v4317_v13, %v4316_v42  ;;  %v14620_v1 = vld [vmem:[#allocation34_spill] sm:$0xff]  ;;  %v10709_v42 = vld [vmem:[#allocation10 + $0x10] sm:$0xff]   ;;  %v10710_v13 = vld [vmem:[#allocation10 + $0x68] sm:$0xff]  }
 0x61c   : > { %9941 = vmatpush3.bf16.msra.mxu0 %v9940_v26 }
 0x61d   : > { %9942 = vmatprep.subr.bf16.mxu0 %v14619_v10 }
 0x620   : > { %9944 = vmatpush3.bf16.msra.mxu0 %v9943_v22 }
 0x621   : > { %9945 = vmatprep.subr.bf16.mxu0 %v14619_v10 }
 0x624   : > { %9947 = vmatpush3.bf16.msra.mxu0 %v9946_v27 }
 0x625   : > { %9948 = vmatprep.subr.bf16.mxu0 %v14619_v10 }
 0x628   : > { %9950 = vmatpush3.bf16.msra.mxu0 %v9949_v17  ;;  %v14621_v17 = vmul.bf16 0, %v14620_v1 }
 0x629   : > { %9951 = vmatprep.subr.bf16.mxu0 %v14619_v10 }
 0x62c   : > { %9953 = vmatpush3.bf16.msra.mxu0 %v9952_v47  ;;  %v10705_v47 = vld [vmem:[#allocation10] sm:$0xff]  }
 0x62d   : > { %9954 = vmatprep.subr.bf16.mxu0 %v14619_v10 }
 0x630   : > { %9956 = vmatpush3.bf16.msra.mxu0 %v9955_v44  ;;  %v10708_v44 = vld [vmem:[#allocation10 + $0x60] sm:$0xff]  }
 0x631   : > { %9957 = vmatprep.subr.bf16.mxu0 %v14619_v10  ;;  %v10703_v10 = vld [vmem:[#allocation10 + $0x48] sm:$0xff]  }
 0x632   : > { %9326 = vmatprep.subr.bf16.mxu1 %v10703_v10 }
 0x633   : > { %9327 = vmatpush3.bf16.msra.mxu1 %v10703_v10 }
 0x634   : > { %9959 = vmatpush3.bf16.msra.mxu0 %v9958_v28  ;;  %9328 = vmatprep.subr.bf16.mxu1 %v10704_v9  ;;  %v10711_v28 = vld [vmem:[#allocation10 + $0x18] sm:$0xff]  }
 0x635   : > { %9372 = vmatprep.subr.bf16.mxu0 %v10705_v47 }
 0x637   : > { %9329 = vmatpush3.bf16.msra.mxu1 %v10704_v9 }
 0x638   : > { %9330 = vmatprep.subr.bf16.mxu1 %v10706_v43 }
 0x63b   : > { %9331 = vmatpush3.bf16.msra.mxu1 %v10706_v43 }
 0x63c   : > { %9332 = vmatprep.subr.bf16.mxu1 %v10708_v44 }
 0x63f   : > { %9333 = vmatpush3.bf16.msra.mxu1 %v10708_v44  ;;  %v14622_v44 = vsub.s32 0, %v11848_v53 }
 0x640   : > { %9334 = vmatprep.subr.bf16.mxu1 %v10710_v13 }
 0x643   : > { %9335 = vmatpush3.bf16.msra.mxu1 %v10710_v13 }
 0x6ca   : > { %v8619_v26 = vpop.f32.mrb[2].mxu0 }
 0x6cb   : > { %v8620_v48 = vpop.f32.mrb[3].mxu0 }
 0x6cc   : > { %v8621_v25 = vadd.f32 %v8620_v48, %v8619_v26  ;;  %v10712_v26 = vld [vmem:[#allocation10 + $0x70] sm:$0xff]   ;;  %v10713_v48 = vld [vmem:[#allocation10 + $0x20] sm:$0xff]  }
 0x6cd   : > { %9336 = vmatprep.subr.bf16.mxu1 %v10712_v26 }
 0x6ce   : > { %9337 = vmatpush3.bf16.msra.mxu1 %v10712_v26  ;;  %v14623_v26 = vsub.s32 1, %v11848_v53 }
 0x6ea   : > { %v8654_v22 = vpop.f32.mrb[4].mxu0 }
 0x6eb   : > { %v8655_v30 = vpop.f32.mrb[5].mxu0 }
 0x6ec   : > { %v8656_v59 = vadd.f32 %v8655_v30, %v8654_v22  ;;  %v10715_v22 = vld [vmem:[#allocation10 + $0x28] sm:$0xff]   ;;  %v10716_v30 = vld [vmem:[#allocation10 + $0x30] sm:$0xff]  }
 0x6ee   : > { %v4493_v27 = vrot.slane %v8656_v59, 7  ;;  %v10717_v59 = vld [vmem:[#allocation10 + $0x38] sm:$0xff]  }
 0x6f0   : > { %v4495_v46 = vsel %vm1456_vm1, %v8621_v25, %v4493_v27  ;;  %v10714_v25 = vld [vmem:[#allocation10 + $0x78] sm:$0xff]   ;;  %v13215_v27 = vld [vmem:[#allocation10 + $0x80] sm:$0xff]  }
 0x6f1   : > { %9322 = vmatmul.mubr.f32.vlgmr.msra.gmra.mrb[6].mxu0 %v4495_v46  ;;  %9338 = vmatprep.subr.bf16.mxu1 %v10714_v25 }
 0x6f2   : > { %9388 = vmatprep.mubr.bf16.mxu0 %v14621_v17  ;;  %9373 = vmatpush3.bf16.msra.mxu0 %v10705_v47 }
 0x6f3   : > { %9374 = vmatprep.subr.bf16.mxu0 %v10707_v39  ;;  %9339 = vmatpush3.bf16.msra.mxu1 %v10714_v25 }
 0x6f6   : > { %9375 = vmatpush3.bf16.msra.mxu0 %v10707_v39  ;;  %v8193_v39 = vld [vmem:[%s14359_s7] ss:$0 sm:$0xff] }
 0x6f7   : > { %9376 = vmatprep.subr.bf16.mxu0 %v10709_v42 }
 0x6fa   : > { %9377 = vmatpush3.bf16.msra.mxu0 %v10709_v42 }
 0x6fb   : > { %9378 = vmatprep.subr.bf16.mxu0 %v10711_v28 }
 0x6fe   : > { %9379 = vmatpush3.bf16.msra.mxu0 %v10711_v28 }
 0x6ff   : > { %9380 = vmatprep.subr.bf16.mxu0 %v10713_v48 }
 0x702   : > { %9381 = vmatpush3.bf16.msra.mxu0 %v10713_v48 }
 0x703   : > { %9382 = vmatprep.subr.bf16.mxu0 %v10715_v22 }
 0x706   : > { %9383 = vmatpush3.bf16.msra.mxu0 %v10715_v22 }
 0x707   : > { %9384 = vmatprep.subr.bf16.mxu0 %v10716_v30 }
 0x70a   : > { %9385 = vmatpush3.bf16.msra.mxu0 %v10716_v30 }
 0x70b   : > { %9386 = vmatprep.subr.bf16.mxu0 %v10717_v59 }
 0x70e   : > { %9387 = vmatpush3.bf16.msra.mxu0 %v10717_v59 }
 0x70f   : > { %9420 = vmatprep.subr.bf16.mxu0 %v13215_v27 }
 0x7c4   : > { %v4562_v46 = vpop.f32.mrb[6].mxu0 }
 0x7c5   : > { %v4566_v1 = vmul.f32 0.0009765625, %v4562_v46  ;;  %v9323_v17 = vpop.f32.mrb[7].mxu0 }
 0x7c7   : > { %v4567_v21 = vmul.f32 %v4566_v1, %v4566_v1  ;;  %v13223_v42 = vrot.slane %v4566_v1, %v14622_v44 }
 0x7c9   : > { %v4569_v10 = vrot.slane %v4567_v21, 7  ;;  %v4578_v28 = vsub.f32 %v13015_v24, %v13223_v42  ;;  %v4579_v25 = vsub.f32 %v13003_v33, %v13223_v42  ;;  %v4580_v22 = vsub.f32 %v13030_v32, %v13223_v42 }
 0x7ca   : > { %v4581_v30 = vsub.f32 %v13023_v8, %v13223_v42  ;;  %v4582_v59 = vsub.f32 %v13047_v31, %v13223_v42  ;;  %v4583_v46 = vsub.f32 %v13035_v58, %v13223_v42  ;;  %v4584_v53 = vsub.f32 %v13062_v60, %v13223_v42 }
 0x7cb   : > { %v4571_v9 = vsub.f32 %v4566_v1, %v4569_v10  ;;  %v4585_v24 = vsub.f32 %v13055_v18, %v13223_v42  ;;  %v4586_v33 = vsub.f32 %v13079_v57, %v13223_v42  ;;  %v4587_v32 = vsub.f32 %v13067_v55, %v13223_v42 }
 0x7cc   : > { %v4608_v8 = vsub.f32 %v13117_v6, %v13223_v42  ;;  %v4609_v31 = vsub.f32 %v13107_v36, %v13223_v42  ;;  %v4588_v58 = vsub.f32 %v13095_v15, %v13223_v42  ;;  %v4589_v60 = vsub.f32 %v13087_v61, %v13223_v42 }
 0x7cd   : > { %v4572_v47 = vadd.f32 1e-06, %v4571_v9  ;;  %v4590_v18 = vsub.f32 %v13114_v50, %v13223_v42  ;;  %v4591_v57 = vsub.f32 %v13101_v51, %v13223_v42  ;;  %v4592_v55 = vsub.f32 %v13133_v12, %v13223_v42  ;;  %v13275_v51 = vld [vmem:[%s14624_s19] ss:$0 sm:$0xff] }
 0x7ce   : > { %v4593_v6 = vsub.f32 %v13123_v7, %v13223_v42  ;;  %v4594_v15 = vsub.f32 %v13006_v62, %v13223_v42  ;;  %v4595_v7 = vsub.f32 %v13012_v16, %v13223_v42  ;;  %v4596_v12 = vsub.f32 %v13018_v35, %v13223_v42 }
 0x7cf   : > { %10908 = vrsqrt.f32 %v4572_v47  ;;  %v4597_v62 = vsub.f32 %v13009_v20, %v13223_v42  ;;  %v4598_v10 = vsub.f32 %v13038_v38, %v13223_v42  ;;  %v4599_v9 = vsub.f32 %v13044_v4, %v13223_v42 }
 0x7d0   : > { %v4600_v47 = vsub.f32 %v13050_v14, %v13223_v42  ;;  %v4601_v16 = vsub.f32 %v13041_v0, %v13223_v42  ;;  %v4602_v35 = vsub.f32 %v13070_v37, %v13223_v42  ;;  %v4603_v20 = vsub.f32 %v13076_v45, %v13223_v42 }
 0x7d9   : > { %v10909_v43 = vpop.eup %10908 }
 0x7da   : > { %v4616_v13 = vmul.f32 %v10909_v43, %v8193_v39 }
 0x7dc   : > { %v13229_v48 = vrot.slane %v4616_v13, %v14623_v26 }
 0x7de   : > { %v4651_v36 = vmul.f32 %v13229_v48, %v4608_v8  ;;  %v4652_v1 = vmul.f32 %v13229_v48, %v4609_v31  ;;  %v4621_v61 = vmul.f32 %v13229_v48, %v4578_v28  ;;  %v4622_v50 = vmul.f32 %v13229_v48, %v4579_v25 }
 0x7df   : > { %v4623_v17 = vmul.f32 %v13229_v48, %v4580_v22  ;;  %v4624_v21 = vmul.f32 %v13229_v48, %v4581_v30  ;;  %v4625_v43 = vmul.f32 %v13229_v48, %v4582_v59  ;;  %v4626_v39 = vmul.f32 %v13229_v48, %v4583_v46 }
 0x7e0   : > { %v4627_v44 = vmul.f32 %v13229_v48, %v4584_v53  ;;  %v13300_v13 = vadd.f32 %v13275_v51, %v4621_v61  ;;  %v13303_v28 = vadd.f32 %v13275_v51, %v4622_v50  ;;  %v4628_v30 = vmul.f32 %v13229_v48, %v4585_v24 }
 0x7e1   : > { %v13306_v26 = vadd.f32 %v13275_v51, %v4623_v17  ;;  %v13314_v59 = vadd.f32 %v13275_v51, %v4624_v21  ;;  %v4629_v53 = vmul.f32 %v13229_v48, %v4586_v33  ;;  %v4630_v8 = vmul.f32 %v13229_v48, %v4587_v32 }
 0x7e2   : > { %v13321_v31 = vadd.f32 %v13275_v51, %v4625_v43  ;;  %v4631_v61 = vmul.f32 %v13229_v48, %v4588_v58  ;;  %v13325_v50 = vadd.f32 %v13275_v51, %v4626_v39  ;;  %v13328_v24 = vadd.f32 %v13275_v51, %v4651_v36 }
 0x7e3   : > { %v13331_v17 = vadd.f32 %v13275_v51, %v4652_v1  ;;  %v13334_v21 = vadd.f32 %v13275_v51, %v4627_v44  ;;  %v8195_v33 = vmul.f32 -1.442695, %v13300_v13  ;;  %v8196_v32 = vmul.f32 -1.442695, %v13303_v28 }
 0x7e4   : > { %v8197_v43 = vmul.f32 -1.442695, %v13306_v26  ;;  %v4632_v39 = vmul.f32 %v13229_v48, %v4589_v60  ;;  %v13343_v36 = vadd.f32 %v13275_v51, %v4628_v30  ;;  %v8198_v1 = vmul.f32 -1.442695, %v13314_v59 }
 0x7e5   : > { %v4633_v54 = vmul.f32 %v13229_v48, %v4590_v18  ;;  %v13348_v44 = vadd.f32 %v13275_v51, %v4629_v53  ;;  %10910 = vpow2.f32 %v8195_v33  ;;  %v8199_v46 = vmul.f32 -1.442695, %v13321_v31 }
 0x7e6   : > { %v4634_v22 = vmul.f32 %v13229_v48, %v4591_v57  ;;  %v13353_v25 = vadd.f32 %v13275_v51, %v4630_v8  ;;  %10912 = vpow2.f32 %v8196_v32  ;;  %v8200_v60 = vmul.f32 -1.442695, %v13325_v50 }
 0x7e7   : > { %v4635_v30 = vmul.f32 %v13229_v48, %v4592_v55  ;;  %v13358_v58 = vadd.f32 %v13275_v51, %v4631_v61  ;;  %10914 = vpow2.f32 %v8197_v43  ;;  %v8201_v18 = vmul.f32 -1.442695, %v13334_v21 }
 0x7e8   : > { %v4636_v53 = vmul.f32 %v13229_v48, %v4593_v6  ;;  %v13363_v33 = vadd.f32 %v13275_v51, %v4632_v39  ;;  %10916 = vpow2.f32 %v8198_v1  ;;  %v8202_v57 = vmul.f32 -1.442695, %v13343_v36 }
 0x7e9   : > { %v4637_v8 = vmul.f32 %v13229_v48, %v4594_v15  ;;  %v13368_v32 = vadd.f32 %v13275_v51, %v4633_v54  ;;  %10918 = vpow2.f32 %v8199_v46  ;;  %v8203_v55 = vmul.f32 -1.442695, %v13348_v44 }
 0x7ea   : > { %v4638_v61 = vmul.f32 %v13229_v48, %v4595_v7  ;;  %v13373_v43 = vadd.f32 %v13275_v51, %v4634_v22  ;;  %10920 = vpow2.f32 %v8200_v60  ;;  %v8204_v6 = vmul.f32 -1.442695, %v13353_v25 }
 0x7eb   : > { %v4639_v39 = vmul.f32 %v13229_v48, %v4596_v12  ;;  %v13378_v1 = vadd.f32 %v13275_v51, %v4635_v30  ;;  %10922 = vpow2.f32 %v8201_v18  ;;  %v8205_v54 = vmul.f32 -1.442695, %v13358_v58 }
 0x7ec   : > { %v4640_v15 = vmul.f32 %v13229_v48, %v4597_v62  ;;  %v13383_v46 = vadd.f32 %v13275_v51, %v4636_v53  ;;  %10924 = vpow2.f32 %v8202_v57  ;;  %v8206_v7 = vmul.f32 -1.442695, %v13363_v33 }
 0x7ed   : > { %v4641_v22 = vmul.f32 %v13229_v48, %v4598_v10  ;;  %v13391_v12 = vadd.f32 %v13275_v51, %v4637_v8  ;;  %10926 = vpow2.f32 %v8203_v55  ;;  %v8207_v60 = vmul.f32 -1.442695, %v13368_v32 }
 0x7ee   : > { %v4642_v62 = vmul.f32 %v13229_v48, %v4599_v9  ;;  %v13399_v30 = vadd.f32 %v13275_v51, %v4638_v61  ;;  %10928 = vpow2.f32 %v8204_v6  ;;  %v8208_v18 = vmul.f32 -1.442695, %v13373_v43 }
 0x7ef   : > { %v13402_v38 = vpop.eup %10910  ;;  %v4643_v10 = vmul.f32 %v13229_v48, %v4600_v47  ;;  %v13409_v53 = vadd.f32 %v13275_v51, %v4639_v39  ;;  %10930 = vpow2.f32 %v8205_v54  ;;  %v8209_v4 = vmul.f32 -1.442695, %v13378_v1 }
 0x7f0   : > { %v13412_v9 = vpop.eup %10912  ;;  %v4644_v57 = vmul.f32 %v13229_v48, %v4601_v16  ;;  %v13419_v8 = vadd.f32 %v13275_v51, %v4640_v15  ;;  %10932 = vpow2.f32 %v8206_v7  ;;  %v8210_v14 = vmul.f32 -1.442695, %v13383_v46 }
 0x7f1   : > { %v13422_v47 = vpop.eup %10914  ;;  %v4645_v55 = vmul.f32 %v13229_v48, %v4602_v35  ;;  %v13429_v61 = vadd.f32 %v13275_v51, %v4641_v22  ;;  %10934 = vpow2.f32 %v8207_v60  ;;  %v8211_v0 = vmul.f32 -1.442695, %v13391_v12 }
 0x7f2   : > { %v13432_v16 = vpop.eup %10916  ;;  %v4646_v6 = vmul.f32 %v13229_v48, %v4603_v20  ;;  %v13439_v39 = vadd.f32 %v13275_v51, %v4642_v62  ;;  %10936 = vpow2.f32 %v8208_v18  ;;  %v8212_v37 = vmul.f32 -1.442695, %v13399_v30 }
 0x7f3   : > { %v13442_v35 = vpop.eup %10918  ;;  %v14625_v54 = vsub.f32 %v13082_v2, %v13223_v42  ;;  %v13449_v7 = vadd.f32 %v13275_v51, %v4643_v10  ;;  %10938 = vpow2.f32 %v8209_v4  ;;  %v8213_v45 = vmul.f32 -1.442695, %v13409_v53 }
 0x7f4   : > { %v13452_v20 = vpop.eup %10920  ;;  %v14626_v22 = vsub.f32 %v13073_v40, %v13223_v42  ;;  %v13459_v62 = vadd.f32 %v13275_v51, %v4644_v57  ;;  %10940 = vpow2.f32 %v8210_v14  ;;  %v8214_v2 = vmul.f32 -1.442695, %v13419_v8 }
 0x7f5   : > { %v4647_v15 = vmul.f32 %v13229_v48, %v14625_v54  ;;  %v10923_v18 = vpop.eup %10922  ;;  %v14627_v10 = vsub.f32 %v13104_v19, %v13223_v42  ;;  %v13467_v54 = vadd.f32 %v13275_v51, %v4645_v55  ;;  %10942 = vpow2.f32 %v8211_v0 }
 0x7f6   : > { %v4648_v60 = vmul.f32 %v13229_v48, %v14626_v22  ;;  %v8215_v40 = vmul.f32 -1.442695, %v13429_v61  ;;  %v10925_v63 = vpop.eup %10924  ;;  %v14628_v57 = vsub.f32 %v13110_v11, %v13223_v42  ;;  %v13475_v22 = vadd.f32 %v13275_v51, %v4646_v6 }
 0x7f7   : > { %v4649_v4 = vmul.f32 %v13229_v48, %v14627_v10  ;;  %10944 = vpow2.f32 %v8212_v37  ;;  %v8216_v19 = vmul.f32 -1.442695, %v13439_v39  ;;  %v10927_v23 = vpop.eup %10926  ;;  %v13479_v10 = vadd.f32 %v13275_v51, %v4647_v15 }
 0x7f8   : > { %v4650_v14 = vmul.f32 %v13229_v48, %v14628_v57  ;;  %14629 = vst [vmem:[#allocation38_spill] sm:$0xff] %v13475_v22  ;;  %10946 = vpow2.f32 %v8213_v45  ;;  %v8217_v55 = vmul.f32 -1.442695, %v13449_v7  ;;  %v10929_v0 = vpop.eup %10928  ;;  %v13483_v29 = vadd.f32 %v13275_v51, %v4648_v60 }
 0x7f9   : > { %14630 = vst [vmem:[#allocation34_spill] sm:$0xff] %v13479_v10  ;;  %10948 = vpow2.f32 %v8214_v2  ;;  %v8218_v11 = vmul.f32 -1.442695, %v13459_v62  ;;  %v10931_v42 = vpop.eup %10930  ;;  %v13487_v48 = vadd.f32 %v13275_v51, %v4649_v4  ;;  %v8219_v6 = vmul.f32 -1.442695, %v13467_v54 }
 0x7fa   : > { %14631 = vst [vmem:[#allocation72_spill] sm:$0xff] %v13483_v29  ;;  %10950 = vpow2.f32 %v8215_v40  ;;  %v10933_v37 = vpop.eup %10932  ;;  %v13491_v15 = vadd.f32 %v13275_v51, %v4650_v14  ;;  %v8220_v45 = vmul.f32 -1.442695, %v13475_v22  ;;  %v8221_v60 = vmul.f32 -1.442695, %v13479_v10 }
 0x7fb   : > { %14632 = vst [vmem:[#allocation73_spill] sm:$0xff] %v13487_v48  ;;  %10952 = vpow2.f32 %v8216_v19  ;;  %v10935_v57 = vpop.eup %10934  ;;  %v8222_v52 = vmul.f32 -1.442695, %v13483_v29  ;;  %v8223_v40 = vmul.f32 -1.442695, %v13487_v48  ;;  %v4791_v48 = vadd.f32 1.0, %v13442_v35 }
 0x7fc   : > { %14633 = vst [vmem:[#allocation74_spill] sm:$0xff] %v13491_v15  ;;  %10954 = vpow2.f32 %v8217_v55  ;;  %v10937_v2 = vpop.eup %10936  ;;  %v8224_v51 = vmul.f32 -1.442695, %v13491_v15  ;;  %v8225_v19 = vmul.f32 -1.442695, %v13328_v24  ;;  %v4796_v10 = vadd.f32 1.0, %v10929_v0 }
 0x7fd   : > { %10956 = vpow2.f32 %v8218_v11  ;;  %v10939_v4 = vpop.eup %10938  ;;  %v8226_v55 = vmul.f32 -1.442695, %v13331_v17  ;;  %v4787_v11 = vadd.f32 1.0, %v13402_v38  ;;  %v4792_v38 = vadd.f32 1.0, %v13452_v20 }
 0x7fe   : > { %10958 = vpow2.f32 %v8219_v6  ;;  %v10941_v49 = vpop.eup %10940  ;;  %v4788_v6 = vadd.f32 1.0, %v13412_v9  ;;  %v4793_v9 = vadd.f32 1.0, %v10923_v18  ;;  %v4798_v18 = vadd.f32 1.0, %v10933_v37 }
 0x7ff   : > { %10960 = vpow2.f32 %v8220_v45  ;;  %v10943_v14 = vpop.eup %10942  ;;  %v4789_v45 = vadd.f32 1.0, %v13422_v47 }
 0x800   : > { %10962 = vpow2.f32 %v8221_v60  ;;  %v4803_v22 = vadd.f32 1.0, %v10943_v14 }
 0x801   : > { %v10945_v5 = vpop.eup %10944  ;;  %10964 = vpow2.f32 %v8222_v52  ;;  %v4790_v52 = vadd.f32 1.0, %v13432_v16 }
 0x802   : > { %v10947_v41 = vpop.eup %10946  ;;  %10966 = vpow2.f32 %v8223_v40 }
 0x803   : > { %v10949_v56 = vpop.eup %10948  ;;  %10968 = vpow2.f32 %v8224_v51 }
 0x804   : > { %v13502_v3 = vpop.eup %10950  ;;  %10970 = vpow2.f32 %v8225_v19  ;;  %v4794_v19 = vadd.f32 1.0, %v10925_v63  ;;  %v4799_v63 = vadd.f32 1.0, %v10935_v57  ;;  %v4804_v57 = vadd.f32 1.0, %v10945_v5 }
 0x805   : > { %v13505_v60 = vpop.eup %10952  ;;  %10972 = vpow2.f32 %v8226_v55  ;;  %v4795_v55 = vadd.f32 1.0, %v10927_v23  ;;  %v4800_v23 = vadd.f32 1.0, %v10937_v2 }
 0x806   : > { %v10955_v15 = vpop.eup %10954  ;;  %10974 = vrcp.f32 %v4787_v11  ;;  %v4797_v11 = vadd.f32 1.0, %v10931_v42 }
 0x807   : > { %v10957_v40 = vpop.eup %10956  ;;  %10976 = vrcp.f32 %v4788_v6 }
 0x808   : > { %v10959_v51 = vpop.eup %10958  ;;  %10978 = vrcp.f32 %v4789_v45 }
 0x809   : > { %v13510_v29 = vpop.eup %10960  ;;  %10980 = vrcp.f32 %v4790_v52  ;;  %v4801_v52 = vadd.f32 1.0, %v10939_v4 }
 0x80a   : > { %v13512_v47 = vpop.eup %10962  ;;  %10982 = vrcp.f32 %v4791_v48 }
 0x80b   : > { %v13514_v16 = vpop.eup %10964  ;;  %10984 = vrcp.f32 %v4792_v38  ;;  %v4802_v38 = vadd.f32 1.0, %v10941_v49 }
 0x80c   : > { %v13516_v35 = vpop.eup %10966  ;;  %10986 = vrcp.f32 %v4793_v9 }
 0x80d   : > { %v13518_v20 = vpop.eup %10968  ;;  %10988 = vrcp.f32 %v4794_v19 }
 0x80e   : > { %v13520_v6 = vpop.eup %10970  ;;  %10990 = vrcp.f32 %v4795_v55 }
 0x80f   : > { %v13522_v45 = vpop.eup %10972  ;;  %10992 = vrcp.f32 %v4796_v10 }
 0x810   : > { %v10975_v48 = vpop.eup %10974  ;;  %10994 = vrcp.f32 %v4797_v11  ;;  %v4805_v11 = vadd.f32 1.0, %v10947_v41  ;;  %v4809_v41 = vadd.f32 1.0, %v10955_v15 }
 0x811   : > { %v10977_v0 = vpop.eup %10976  ;;  %10996 = vrcp.f32 %v4798_v18  ;;  %v4883_v42 = vmul.f32 %v10975_v48, %v13300_v13  ;;  %v4806_v18 = vadd.f32 1.0, %v10949_v56  ;;  %v4810_v48 = vadd.f32 1.0, %v10957_v40 }
 0x812   : > { %v10979_v9 = vpop.eup %10978  ;;  %10998 = vrcp.f32 %v4799_v63  ;;  %v4884_v37 = vmul.f32 %v10977_v0, %v13303_v28 }
 0x813   : > { %v10981_v19 = vpop.eup %10980  ;;  %11000 = vrcp.f32 %v4800_v23  ;;  %v4885_v55 = vmul.f32 %v10979_v9, %v13306_v26  ;;  %v4808_v23 = vadd.f32 1.0, %v13505_v60 }
 0x814   : > { %v10983_v2 = vpop.eup %10982  ;;  %11002 = vrcp.f32 %v4801_v52  ;;  %v4886_v10 = vmul.f32 %v10981_v19, %v13314_v59  ;;  %v13528_v4 = vpack.c.bf16 %v4884_v37, %v4883_v42  ;;  %v4807_v59 = vadd.f32 1.0, %v13502_v3 }
 0x815   : > { %v10985_v49 = vpop.eup %10984  ;;  %11004 = vrcp.f32 %v4802_v38  ;;  %v4887_v13 = vmul.f32 %v10983_v2, %v13321_v31  ;;  %v4811_v31 = vadd.f32 1.0, %v10959_v51  ;;  %v4812_v38 = vadd.f32 1.0, %v13510_v29 }
 0x816   : > { %v10987_v14 = vpop.eup %10986  ;;  %11006 = vrcp.f32 %v4803_v22  ;;  %v4888_v28 = vmul.f32 %v10985_v49, %v13325_v50  ;;  %9341 = vmatmul.mubr.bf16.vlgmr.msra.gmra.mrb[36].mxu1 %v13528_v4  ;;  %v13533_v5 = vpack.c.bf16 %v4886_v10, %v4885_v55  ;;  %v4933_v26 = vshrl.u32 %v13528_v4, 16  ;;  %v14634_v10 = vld [vmem:[#allocation37_spill] sm:$0xff] }
 0x817   : > { %v10989_v63 = vpop.eup %10988  ;;  %11008 = vrcp.f32 %v4804_v57  ;;  %v4936_v22 = vshll.u32 %v13528_v4, 16  ;;  %v4889_v0 = vmul.f32 %v10987_v14, %v13334_v21  ;;  %v13556_v57 = vadd.f32 1.0, %v13512_v47  ;;  %v10719_v47 = vld [vmem:[#allocation10 + $0x88] sm:$0xff]  }
 0x818   : > { %v10991_v56 = vpop.eup %10990  ;;  %9344 = vmatprep.mubr.bf16.mxu1 %v13533_v5  ;;  %v4935_v50 = vrot.slane %v4933_v26, 7  ;;  %11010 = vrcp.f32 %v4805_v11  ;;  %v4890_v3 = vmul.f32 %v10989_v63, %v13343_v36  ;;  %v4940_v60 = vshrl.u32 %v13533_v5, 16 }
 0x819   : > { %v10993_v52 = vpop.eup %10992  ;;  %11012 = vrcp.f32 %v4806_v18  ;;  %v13546_v40 = vpack.c.bf16 %v4888_v28, %v4887_v13  ;;  %v4891_v9 = vmul.f32 %v10991_v56, %v13348_v44  ;;  %v4943_v36 = vshll.u32 %v13533_v5, 16 }
 0x81a   : > { %v10995_v15 = vpop.eup %10994  ;;  %v4938_v51 = vor.u32 %v4936_v22, %v4935_v50  ;;  %v4892_v37 = vmul.f32 %v10993_v52, %v13353_v25  ;;  %v4942_v21 = vrot.slane %v4940_v60, 7  ;;  %v13559_v29 = vadd.f32 1.0, %v13514_v16 }
 0x81b   : > { %v10997_v42 = vpop.eup %10996  ;;  %v4817_v55 = vadd.f32 1.0, %v13520_v6  ;;  %11014 = vrcp.f32 %v4807_v59  ;;  %v13564_v25 = vpack.c.bf16 %v4890_v3, %v4889_v0  ;;  %v4893_v16 = vmul.f32 %v10995_v15, %v13358_v58  ;;  %v14635_v58 = vld [vmem:[#allocation39_spill] sm:$0xff] }
 0x81c   : > { %v10999_v19 = vpop.eup %10998  ;;  %v5076_v2 = vsel %vm12276_vm7, 0, %v4938_v51  ;;  %v4945_v11 = vor.u32 %v4943_v36, %v4942_v21  ;;  %11016 = vrcp.f32 %v4808_v23  ;;  %v4894_v6 = vmul.f32 %v10997_v42, %v13363_v33 }
 0x81d   : > { %v11001_v44 = vpop.eup %11000  ;;  %v13567_v49 = vmul.bf16 %v5076_v2, %v14634_v10  ;;  %v4948_v13 = vshrl.u32 %v13546_v40, 16  ;;  %v4818_v28 = vadd.f32 1.0, %v13522_v45  ;;  %11018 = vrcp.f32 %v4809_v41 }
 0x81e   : > { %v11003_v18 = vpop.eup %11002  ;;  %9345 = vmatmul.mubr.bf16.gmra.mrb[40].mxu1 %v13546_v40  ;;  %v4946_v63 = vsel %vm1898_vm6, %v4935_v50, %v4945_v11  ;;  %v13579_v59 = vpack.c.bf16 %v4892_v37, %v4891_v9  ;;  %11020 = vrcp.f32 %v4810_v48  ;;  %v4951_v45 = vshll.u32 %v13546_v40, 16  ;;  %v10720_v48 = vld [vmem:[#allocation10 + $0x90] sm:$0xff]  }
 0x81f   : > { %v11005_v14 = vpop.eup %11004  ;;  %9348 = vmatprep.mubr.bf16.mxu1 %v13564_v25  ;;  %9389 = vmatmul.mubr.bf16.vlgmr.msra.gmra.mrb[8].mxu0 %v13567_v49  ;;  %v13583_v33 = vmul.bf16 %v4946_v63, %v14635_v58  ;;  %v4950_v56 = vrot.slane %v4948_v13, 7  ;;  %11022 = vrcp.f32 %v4811_v31  ;;  %v4895_v52 = vmul.f32 %v10999_v19, %v13368_v32  ;;  %v14636_v19 = vld [vmem:[#allocation40_spill] sm:$0xff]  ;;  %v10722_v58 = vld [vmem:[#allocation10 + $0xa0] sm:$0xff]  }
 0x820   : > { %v11007_v23 = vpop.eup %11006  ;;  %9421 = vmatpush3.bf16.msra.mxu0 %v13215_v27  ;;  %v4896_v50 = vmul.f32 %v11001_v44, %v13373_v43  ;;  %v4956_v0 = vshrl.u32 %v13564_v25, 16  ;;  %v4897_v27 = vmul.f32 %v11003_v18, %v13378_v1  ;;  %v4898_v3 = vmul.f32 %v11005_v14, %v13383_v46  ;;  %v10721_v44 = vld [vmem:[#allocation10 + $0x98] sm:$0xff]  }
 0x821   : > { %v11009_v41 = vpop.eup %11008  ;;  %9422 = vmatprep.subr.bf16.mxu0 %v10719_v47  ;;  %9392 = vmatprep.mubr.bf16.mxu0 %v13583_v33  ;;  %v13594_v15 = vpack.c.bf16 %v4894_v6, %v4893_v16  ;;  %v4953_v51 = vor.u32 %v4951_v45, %v4950_v56  ;;  %11024 = vrcp.f32 %v4812_v38  ;;  %v4899_v32 = vmul.f32 %v11007_v23, %v13391_v12  ;;  %v14637_v14 = vld [vmem:[#allocation41_spill] sm:$0xff] }
 0x822   : > { %v11011_v31 = vpop.eup %11010  ;;  %v4958_v43 = vrot.slane %v4956_v0, 7  ;;  %v4959_v42 = vshll.u32 %v13564_v25, 16  ;;  %11026 = vrcp.f32 %v4817_v55  ;;  %v4900_v1 = vmul.f32 %v11009_v41, %v13399_v30 }
 0x823   : > { %v11013_v9 = vpop.eup %11012  ;;  %v4954_v46 = vsel %vm1898_vm6, %v4942_v21, %v4953_v51  ;;  %v4964_v37 = vshrl.u32 %v13579_v59, 16  ;;  %11028 = vrcp.f32 %v4818_v28  ;;  %v13610_v38 = vpack.c.bf16 %v4896_v50, %v4895_v52 }
 0x824   : > { %9423 = vmatpush3.bf16.msra.mxu0 %v10719_v47  ;;  %v13606_v2 = vmul.bf16 %v4954_v46, %v14636_v19  ;;  %v4961_v12 = vor.u32 %v4959_v42, %v4958_v43  ;;  %v13613_v55 = vpack.c.bf16 %v4898_v3, %v4897_v27  ;;  %v4967_v21 = vshll.u32 %v13579_v59, 16  ;;  %v14638_v19 = vld [vmem:[#allocation42_spill] sm:$0xff] }
 0x825   : > { %9424 = vmatprep.subr.bf16.mxu0 %v10720_v48  ;;  %v4966_v30 = vrot.slane %v4964_v37, 7  ;;  %v4972_v10 = vshrl.u32 %v13594_v15, 16  ;;  %v11015_v11 = vpop.eup %11014  ;;  %11030 = vrcp.f32 %v13556_v57  ;;  %v4901_v47 = vmul.f32 %v11011_v31, %v13409_v53 }
 0x826   : > { %9349 = vmatmul.mubr.bf16.gmra.mrb[44].mxu1 %v13579_v59  ;;  %v4902_v18 = vmul.f32 %v11013_v9, %v13419_v8  ;;  %v4962_v16 = vsel %vm1898_vm6, %v4950_v56, %v4961_v12  ;;  %v11017_v6 = vpop.eup %11016  ;;  %v4975_v53 = vshll.u32 %v13594_v15, 16  ;;  %11032 = vrcp.f32 %v13559_v29 }
 0x827   : > { %9352 = vmatprep.mubr.bf16.mxu1 %v13594_v15  ;;  %9393 = vmatmul.mubr.bf16.gmra.mrb[12].mxu0 %v13606_v2  ;;  %v13626_v28 = vmul.bf16 %v4962_v16, %v14637_v14  ;;  %v4969_v63 = vor.u32 %v4967_v21, %v4966_v30  ;;  %v4974_v57 = vrot.slane %v4972_v10, 7  ;;  %v11019_v8 = vpop.eup %11018  ;;  %v4980_v23 = vshrl.u32 %v13610_v38, 16 }
 0x828   : > { %9425 = vmatpush3.bf16.msra.mxu0 %v10720_v48  ;;  %v11021_v56 = vpop.eup %11020  ;;  %v13639_v50 = vpack.c.bf16 %v4900_v1, %v4899_v32  ;;  %v14495_v48 = vshrl.u32 %v13613_v55, 16  ;;  %v4815_v3 = vadd.f32 1.0, %v13516_v35  ;;  %v13643_v29 = vpack.c.bf16 %v4902_v18, %v4901_v47 }
 0x829   : > { %9426 = vmatprep.subr.bf16.mxu0 %v10721_v44  ;;  %9396 = vmatprep.mubr.bf16.mxu0 %v13626_v28  ;;  %v4970_v41 = vsel %vm1898_vm6, %v4958_v43, %v4969_v63  ;;  %v4977_v52 = vor.u32 %v4975_v53, %v4974_v57  ;;  %v11023_v27 = vpop.eup %11022  ;;  %v4982_v51 = vrot.slane %v4980_v23, 7  ;;  %v4816_v31 = vadd.f32 1.0, %v13518_v20  ;;  %v10723_v20 = vld [vmem:[#allocation10 + $0xa8] sm:$0xff]  }
 0x82a   : > { %v4983_v43 = vshll.u32 %v13610_v38, 16  ;;  %v4990_v32 = vrot.slane %v14495_v48, 7  ;;  %v4903_v46 = vmul.f32 %v11015_v11, %v13429_v61  ;;  %v4904_v35 = vmul.f32 %v11017_v6, %v13439_v39 }
 0x82b   : > { %v4978_v9 = vsel %vm1898_vm6, %v4966_v30, %v4977_v52  ;;  %v11025_v1 = vpop.eup %11024  ;;  %v13655_v12 = vmul.bf16 %v4970_v41, %v14638_v19  ;;  %v4991_v47 = vshll.u32 %v13613_v55, 16  ;;  %v4905_v30 = vmul.f32 %v11019_v8, %v13449_v7 }
 0x82c   : > { %9427 = vmatpush3.bf16.msra.mxu0 %v10721_v44  ;;  %v11027_v18 = vpop.eup %11026  ;;  %v14639_v44 = vld [vmem:[#allocation43_spill] sm:$0xff]  ;;  %v4985_v61 = vor.u32 %v4983_v43, %v4982_v51  ;;  %v14482_v39 = vshrl.u32 %v13639_v50, 16  ;;  %v4906_v6 = vmul.f32 %v11021_v56, %v13459_v62  ;;  %v14481_v63 = vshrl.u32 %v13643_v29, 16  ;;  %v10724_v62 = vld [vmem:[#allocation10 + $0xb0] sm:$0xff]  }
 0x82d   : > { %9428 = vmatprep.subr.bf16.mxu0 %v10722_v58  ;;  %v13661_v16 = vmul.bf16 %v4978_v9, %v14639_v44  ;;  %v11029_v11 = vpop.eup %11028  ;;  %v4913_v14 = vmul.f32 %v11027_v18, %v13328_v24  ;;  %v4993_v7 = vor.u32 %v4991_v47, %v4990_v32  ;;  %11034 = vrcp.f32 %v4815_v3  ;;  %v14640_v44 = vld [vmem:[#allocation44_spill] sm:$0xff] }
 0x82e   : > { %9353 = vmatmul.mubr.bf16.gmra.mrb[48].mxu1 %v13610_v38  ;;  %v4914_v8 = vmul.f32 %v11029_v11, %v13331_v17  ;;  %11036 = vrcp.f32 %v4816_v31  ;;  %v4986_v56 = vsel %vm1898_vm6, %v4974_v57, %v4985_v61  ;;  %v13678_v52 = vpack.c.bf16 %v4904_v35, %v4903_v46  ;;  %v10725_v35 = vld [vmem:[#allocation10 + $0xb8] sm:$0xff]   ;;  %v14641_v61 = vld [vmem:[#allocation38_spill] sm:$0xff] }
 0x82f   : > { %9356 = vmatprep.mubr.bf16.mxu1 %v13613_v55  ;;  %9397 = vmatmul.mubr.bf16.gmra.mrb[16].mxu0 %v13655_v12  ;;  %v11031_v41 = vpop.eup %11030  ;;  %v4998_v9 = vrot.slane %v14482_v39, 7  ;;  %v4994_v3 = vsel %vm1898_vm6, %v4982_v51, %v4993_v7  ;;  %v13683_v17 = vpack.c.bf16 %v4906_v6, %v4905_v30  ;;  %v14494_v31 = vshll.u32 %v13639_v50, 16  ;;  %v14642_v51 = vld [vmem:[#allocation45_spill] sm:$0xff] }
 0x830   : > { %9400 = vmatprep.mubr.bf16.mxu0 %v13661_v16  ;;  %9429 = vmatpush3.bf16.msra.mxu0 %v10722_v58  ;;  %v13675_v24 = vpack.c.bf16 %v4914_v8, %v4913_v14  ;;  %v11033_v19 = vpop.eup %11032  ;;  %v5006_v58 = vrot.slane %v14481_v63, 7  ;;  %v4907_v18 = vmul.f32 %v11023_v27, %v13467_v54  ;;  %v13690_v57 = vmul.bf16 %v4986_v56, %v14640_v44  ;;  %v14643_v54 = vld [vmem:[#allocation34_spill] sm:$0xff]  ;;  %v14644_v14 = vld [vmem:[#allocation72_spill] sm:$0xff]  ;;  %v14645_v63 = vld [vmem:[#allocation73_spill] sm:$0xff] }
 0x831   : > { %9430 = vmatprep.subr.bf16.mxu0 %v10723_v20  ;;  %v14483_v46 = vshll.u32 %v13643_v29, 16  ;;  %v4908_v11 = vmul.f32 %v11025_v1, %v14641_v61  ;;  %v13696_v30 = vmul.bf16 %v4994_v3, %v14642_v51  ;;  %v5001_v6 = vor.u32 %v14494_v31, %v4998_v9  ;;  %v13709_v56 = vld [vmem:[#allocation10 + $0xc0] sm:$0xff]  }
 0x832   : > { %v4909_v27 = vmul.f32 %v11031_v41, %v14643_v54  ;;  %v4910_v7 = vmul.f32 %v11033_v19, %v14644_v14  ;;  %v14484_v8 = vshrl.u32 %v13683_v17, 16 }
 0x833   : > { %v5009_v1 = vor.u32 %v14483_v46, %v5006_v58  ;;  %v5002_v41 = vsel %vm1898_vm6, %v4990_v32, %v5001_v6  ;;  %v13712_v44 = vpack.c.bf16 %v4908_v11, %v4907_v18  ;;  %v14646_v46 = vld [vmem:[#allocation46_spill] sm:$0xff]  ;;  %v14490_v18 = vshll.u32 %v13683_v17, 16 }
 0x834   : > { %9431 = vmatpush3.bf16.msra.mxu0 %v10723_v20  ;;  %v14485_v20 = vshrl.u32 %v13678_v52, 16  ;;  %v13717_v54 = vpack.c.bf16 %v4910_v7, %v4909_v27  ;;  %v5022_v14 = vrot.slane %v14484_v8, 7  ;;  %v13724_v32 = vmul.bf16 %v5002_v41, %v14646_v46  ;;  %v14647_v11 = vld [vmem:[#allocation74_spill] sm:$0xff] }
 0x835   : > { %9432 = vmatprep.subr.bf16.mxu0 %v10724_v62  ;;  %v5010_v51 = vsel %vm1898_vm6, %v4998_v9, %v5009_v1  ;;  %v14648_v9 = vld [vmem:[#allocation47_spill] sm:$0xff] }
 0x836   : > { %9357 = vmatmul.mubr.bf16.gmra.mrb[52].mxu1 %v13639_v50  ;;  %v5014_v19 = vrot.slane %v14485_v20, 7  ;;  %v13731_v27 = vmul.bf16 %v5010_v51, %v14648_v9  ;;  %v14486_v46 = vshrl.u32 %v13717_v54, 16  ;;  %v14649_v9 = vld [vmem:[#allocation48_spill] sm:$0xff]  ;;  %v14489_v20 = vshll.u32 %v13717_v54, 16 }
 0x837   : > { %9360 = vmatprep.mubr.bf16.mxu1 %v13643_v29  ;;  %9401 = vmatmul.mubr.bf16.gmra.mrb[20].mxu0 %v13690_v57  ;;  %v11035_v3 = vpop.eup %11034 }
 0x838   : > { %9404 = vmatprep.mubr.bf16.mxu0 %v13696_v30  ;;  %9433 = vmatpush3.bf16.msra.mxu0 %v10724_v62  ;;  %v11037_v61 = vpop.eup %11036  ;;  %v14491_v62 = vshll.u32 %v13678_v52, 16  ;;  %v4911_v39 = vmul.f32 %v11035_v3, %v14645_v63  ;;  %v5025_v63 = vor.u32 %v14490_v18, %v5022_v14  ;;  %v5038_v51 = vrot.slane %v14486_v46, 7  ;;  %v14651_v18 = vld [vmem:[#allocation50_spill] sm:$0xff] }
 0x839   : > { %9434 = vmatprep.subr.bf16.mxu0 %v10725_v35  ;;  %v4912_v6 = vmul.f32 %v11037_v61, %v14647_v11  ;;  %v14488_v11 = vshll.u32 %v13712_v44, 16 }
 0x83a   : > { %v5017_v7 = vor.u32 %v14491_v62, %v5014_v19  ;;  %v5026_v61 = vsel %vm1898_vm6, %v5014_v19, %v5025_v63  ;;  %v5055_v63 = vshll.u32 %v13675_v24, 16 }
 0x83b   : > { %v13743_v3 = vpack.c.bf16 %v4912_v6, %v4911_v39 }
 0x83c   : > { %9435 = vmatpush3.bf16.msra.mxu0 %v10725_v35  ;;  %v14487_v35 = vshrl.u32 %v13712_v44, 16  ;;  %v5018_v1 = vsel %vm1898_vm6, %v5006_v58, %v5017_v7  ;;  %v14650_v58 = vld [vmem:[#allocation49_spill] sm:$0xff]  ;;  %v5041_v7 = vor.u32 %v14489_v20, %v5038_v51 }
 0x83d   : > { %9468 = vmatprep.subr.bf16.mxu0 %v13709_v56  ;;  %v13752_v8 = vmul.bf16 %v5018_v1, %v14649_v9  ;;  %v13757_v39 = vmul.bf16 %v5026_v61, %v14650_v58  ;;  %v14492_v19 = vshrl.u32 %v13743_v3, 16  ;;  %v13771_v9 = vrot.slane %v5055_v63, 1 }
 0x83e   : > { %9361 = vmatmul.mubr.bf16.gmra.mrb[56].mxu1 %v13678_v52  ;;  %v5030_v41 = vrot.slane %v14487_v35, 7  ;;  %v5052_v58 = vshrl.u32 %v13675_v24, 16  ;;  %v14493_v35 = vshll.u32 %v13743_v3, 16 }
 0x83f   : > { %9364 = vmatprep.mubr.bf16.mxu1 %v13683_v17  ;;  %9405 = vmatmul.mubr.bf16.gmra.mrb[24].mxu0 %v13724_v32  ;;  %v5046_v61 = vrot.slane %v14492_v19, 7 }
 0x840   : > { %9408 = vmatprep.mubr.bf16.mxu0 %v13731_v27  ;;  %v5033_v6 = vor.u32 %v14488_v11, %v5030_v41  ;;  %v5042_v46 = vsel %vm1898_vm6, %v5030_v41, %v5041_v7  ;;  %v13776_v11 = vrot.slane %v5052_v58, 7  ;;  %v13779_v20 = vor.u32 %v13771_v9, %v5052_v58  ;;  %v14725_v58 = vld [vmem:[#allocation20_spill] sm:$0xff] }
 0x841   : > { %v5049_v19 = vor.u32 %v14493_v35, %v5046_v61  ;;  %v5095_v7 = vrot.slane %v4936_v22, 1  ;;  %v14654_v35 = vld [vmem:[#allocation53_spill] sm:$0xff]  ;;  %v14655_v22 = vld [vmem:[#allocation54_spill] sm:$0xff] }
 0x842   : > { %v5034_v1 = vsel %vm1898_vm6, %v5022_v14, %v5033_v6  ;;  %v14652_v14 = vld [vmem:[#allocation51_spill] sm:$0xff]  ;;  %v5057_v41 = vor.u32 %v5055_v63, %v13776_v11 }
 0x843   : > { %v13782_v62 = vmul.bf16 %v5034_v1, %v14651_v18  ;;  %v13786_v6 = vmul.bf16 %v5042_v46, %v14652_v14  ;;  %v5050_v1 = vsel %vm1898_vm6, %v5038_v51, %v5049_v19  ;;  %v5097_v46 = vrot.slane %v4943_v36, 1 }
 0x844   : > { %v13796_v18 = vsel %vm1898_vm6, %v5046_v61, %v5057_v41  ;;  %v5159_v14 = vsel %vm12513_vm13, 0, %v5095_v7  ;;  %v13804_v63 = vmul.bf16 %v5050_v1, %v14654_v35  ;;  %v5096_v31 = vor.u32 %v5095_v7, %v4933_v26  ;;  %v14656_v41 = vld [vmem:[#allocation55_spill] sm:$0xff]  ;;  %v14657_v1 = vld [vmem:[#allocation56_spill] sm:$0xff] }
 0x845   : > { %v5161_v48 = vmul.bf16 %v5159_v14, %v14655_v22  ;;  %v5099_v61 = vor.u32 %v5097_v46, %v4940_v60  ;;  %v5100_v36 = vrot.slane %v4951_v45, 1  ;;  %v5103_v35 = vrot.slane %v4959_v42, 1  ;;  %v10727_v7 = vld [vmem:[#allocation10 + $0xc8] sm:$0xff]   ;;  %v14658_v22 = vld [vmem:[#allocation57_spill] sm:$0xff] }
 0x846   : > { %9365 = vmatmul.mubr.bf16.gmra.mrb[60].mxu1 %v13712_v44  ;;  %v5098_v51 = vsel %vm2065_vm11, %v5096_v31, %v5097_v46  ;;  %v5106_v42 = vrot.slane %v4967_v21, 1 }
 0x847   : > { %9368 = vmatprep.mubr.bf16.mxu1 %v13717_v54  ;;  %9409 = vmatmul.mubr.bf16.gmra.mrb[28].mxu0 %v13752_v8  ;;  %v5101_v19 = vsel %vm2065_vm11, %v5099_v61, %v5100_v36  ;;  %v13819_v26 = vmul.bf16 %v5098_v51, %v14656_v41  ;;  %v5102_v60 = vor.u32 %v5100_v36, %v4948_v13  ;;  %v5109_v13 = vrot.slane %v4975_v53, 1 }
 0x848   : > { %9412 = vmatprep.mubr.bf16.mxu0 %v13757_v39  ;;  %v13822_v14 = vmul.bf16 %v5101_v19, %v14657_v1  ;;  %v5105_v45 = vor.u32 %v5103_v35, %v4956_v0  ;;  %v10729_v0 = vld [vmem:[#allocation10 + $0xd8] sm:$0xff]   ;;  %v5108_v21 = vor.u32 %v5106_v42, %v4964_v37  ;;  %v5112_v53 = vrot.slane %v4983_v43, 1  ;;  %v10730_v19 = vld [vmem:[#allocation10 + $0xe0] sm:$0xff]  }
 0x849   : > { %v5104_v31 = vsel %vm2065_vm11, %v5102_v60, %v5103_v35  ;;  %v5111_v51 = vor.u32 %v5109_v13, %v4972_v10  ;;  %v5115_v37 = vrot.slane %v4991_v47, 1  ;;  %v10731_v10 = vld [vmem:[#allocation10 + $0xe8] sm:$0xff]   ;;  %v14661_v60 = vld [vmem:[#allocation60_spill] sm:$0xff]  ;;  %v14663_v47 = vshll.u32 %v13639_v50, 16 }
 0x84a   : > { %v5107_v46 = vsel %vm2065_vm11, %v5105_v45, %v5106_v42  ;;  %v13838_v61 = vmul.bf16 %v5104_v31, %v14658_v22  ;;  %v5110_v35 = vsel %vm2065_vm11, %v5108_v21, %v5109_v13  ;;  %v5114_v43 = vor.u32 %v5112_v53, %v4980_v23 }
 0x84b   : > { %v5113_v41 = vsel %vm2065_vm11, %v5111_v51, %v5112_v53  ;;  %v14662_v42 = vshrl.u32 %v13613_v55, 16  ;;  %v5118_v31 = vrot.slane %v14663_v47, 1  ;;  %v10733_v51 = vld [vmem:[#allocation10 + $0xf8] sm:$0xff]   ;;  %v14666_v53 = vld [vmem:[#allocation62_spill] sm:$0xff]  ;;  %v14670_v47 = vshll.u32 %v13683_v17, 16 }
 0x84c   : > { %v13859_v45 = vmul.bf16 %v5113_v41, %v14661_v60  ;;  %v5116_v13 = vsel %vm2065_vm11, %v5114_v43, %v5115_v37  ;;  %v10734_v43 = vld [vmem:[#allocation10 + $0x100] sm:$0xff]  }
 0x84e   : > { %9369 = vmatmul.mubr.bf16.gmra.mrb[64].mxu1 %v13743_v3 }
 0x84f   : > { %9413 = vmatmul.mubr.bf16.gmra.mrb[32].mxu0 %v13782_v62 }
 0x850   : > { %9416 = vmatprep.mubr.bf16.mxu0 %v13786_v6 }
 0x857   : > { %9417 = vmatmul.mubr.bf16.gmra.mrb[36].mxu0 %v13804_v63 }
 0x858   : > { %9436 = vmatprep.mubr.bf16.mxu0 %v5161_v48  ;;  %v10728_v48 = vld [vmem:[#allocation10 + $0xd0] sm:$0xff]  }
 0x85f   : > { %9437 = vmatmul.mubr.bf16.vlgmr.msra.gmra.mrb[8].mxu0 %v13819_v26 }
 0x860   : > { %9469 = vmatpush3.bf16.msra.mxu0 %v13709_v56  ;;  %9440 = vmatprep.mubr.bf16.mxu0 %v13822_v14  ;;  %v14659_v56 = vld [vmem:[#allocation58_spill] sm:$0xff] }
 0x861   : > { %9470 = vmatprep.subr.bf16.mxu0 %v10727_v7  ;;  %v13841_v36 = vmul.bf16 %v5107_v46, %v14659_v56  ;;  %v10732_v46 = vld [vmem:[#allocation10 + $0xf0] sm:$0xff]   ;;  %v14665_v56 = vld [vmem:[#allocation61_spill] sm:$0xff] }
 0x862   : > { %v13874_v21 = vmul.bf16 %v5116_v13, %v14665_v56  ;;  %v14671_v13 = vld [vmem:[#allocation63_spill] sm:$0xff] }
 0x864   : > { %9471 = vmatpush3.bf16.msra.mxu0 %v10727_v7  ;;  %v14660_v7 = vld [vmem:[#allocation59_spill] sm:$0xff] }
 0x865   : > { %9472 = vmatprep.subr.bf16.mxu0 %v10728_v48  ;;  %v13856_v1 = vmul.bf16 %v5110_v35, %v14660_v7  ;;  %v14667_v35 = vshrl.u32 %v13639_v50, 16 }
 0x867   : > { %9441 = vmatmul.mubr.bf16.gmra.mrb[12].mxu0 %v13838_v61  ;;  %v5120_v41 = vor.u32 %v5118_v31, %v14667_v35 }
 0x868   : > { %9444 = vmatprep.mubr.bf16.mxu0 %v13841_v36  ;;  %9473 = vmatpush3.bf16.msra.mxu0 %v10728_v48  ;;  %v5117_v48 = vor.u32 %v5115_v37, %v14662_v42  ;;  %v14668_v37 = vshrl.u32 %v13643_v29, 16 }
 0x869   : > { %9474 = vmatprep.subr.bf16.mxu0 %v10729_v0 }
 0x86a   : > { %v5119_v22 = vsel %vm2065_vm11, %v5117_v48, %v5118_v31  ;;  %v5127_v31 = vrot.slane %v14670_v47, 1 }
 0x86c   : > { %9475 = vmatpush3.bf16.msra.mxu0 %v10729_v0  ;;  %v14664_v0 = vshll.u32 %v13643_v29, 16 }
 0x86d   : > { %9476 = vmatprep.subr.bf16.mxu0 %v10730_v19 }
 0x86e   : > { %v5121_v23 = vrot.slane %v14664_v0, 1  ;;  %v14672_v0 = vld [vmem:[#allocation64_spill] sm:$0xff] }
 0x86f   : > { %9445 = vmatmul.mubr.bf16.gmra.mrb[16].mxu0 %v13856_v1 }
 0x870   : > { %9448 = vmatprep.mubr.bf16.mxu0 %v13859_v45  ;;  %9477 = vmatpush3.bf16.msra.mxu0 %v10730_v19  ;;  %v13877_v19 = vmul.bf16 %v5119_v22, %v14666_v53  ;;  %v5123_v7 = vor.u32 %v5121_v23, %v14668_v37  ;;  %v5122_v42 = vsel %vm2065_vm11, %v5120_v41, %v5121_v23  ;;  %v14674_v23 = vshrl.u32 %v13683_v17, 16 }
 0x871   : > { %9478 = vmatprep.subr.bf16.mxu0 %v10731_v10  ;;  %v13892_v22 = vmul.bf16 %v5122_v42, %v14671_v13  ;;  %v14675_v41 = vshll.u32 %v13712_v44, 16 }
 0x872   : > { %v5129_v35 = vor.u32 %v5127_v31, %v14674_v23  ;;  %v14680_v23 = vshrl.u32 %v13717_v54, 16 }
 0x874   : > { %9479 = vmatpush3.bf16.msra.mxu0 %v10731_v10  ;;  %v14669_v10 = vshll.u32 %v13678_v52, 16 }
 0x875   : > { %9480 = vmatprep.subr.bf16.mxu0 %v10732_v46 }
 0x876   : > { %v5124_v60 = vrot.slane %v14669_v10, 1  ;;  %v14676_v10 = vshll.u32 %v13717_v54, 16 }
 0x877   : > { %9449 = vmatmul.mubr.bf16.gmra.mrb[20].mxu0 %v13874_v21 }
 0x878   : > { %9452 = vmatprep.mubr.bf16.mxu0 %v13877_v19  ;;  %9481 = vmatpush3.bf16.msra.mxu0 %v10732_v46  ;;  %v5125_v48 = vsel %vm2065_vm11, %v5123_v7, %v5124_v60  ;;  %v14673_v46 = vshrl.u32 %v13678_v52, 16  ;;  %v5133_v42 = vrot.slane %v14676_v10, 1  ;;  %v14682_v10 = vld [vmem:[#allocation68_spill] sm:$0xff] }
 0x879   : > { %9482 = vmatprep.subr.bf16.mxu0 %v10733_v51  ;;  %v13895_v56 = vmul.bf16 %v5125_v48, %v14672_v0  ;;  %v14677_v48 = vld [vmem:[#allocation65_spill] sm:$0xff]  ;;  %v14679_v0 = vshrl.u32 %v13712_v44, 16 }
 0x87a   : > { %v5126_v53 = vor.u32 %v5124_v60, %v14673_v46  ;;  %v14678_v60 = vld [vmem:[#allocation66_spill] sm:$0xff] }
 0x87c   : > { %9483 = vmatpush3.bf16.msra.mxu0 %v10733_v51  ;;  %v5130_v51 = vrot.slane %v14675_v41, 1  ;;  %v5128_v37 = vsel %vm2065_vm11, %v5126_v53, %v5127_v31  ;;  %v5135_v41 = vor.u32 %v5133_v42, %v14680_v23  ;;  %v14681_v31 = vshll.u32 %v13743_v3, 16 }
 0x87d   : > { %9516 = vmatprep.subr.bf16.mxu0 %v10734_v43  ;;  %v13910_v47 = vmul.bf16 %v5128_v37, %v14677_v48  ;;  %v14683_v48 = vld [vmem:[#allocation69_spill] sm:$0xff] }
 0x87e   : > { %v5131_v7 = vsel %vm2065_vm11, %v5129_v35, %v5130_v51  ;;  %v5132_v46 = vor.u32 %v5130_v51, %v14679_v0  ;;  %v5136_v53 = vrot.slane %v14681_v31, 1  ;;  %v14684_v51 = vshrl.u32 %v13743_v3, 16  ;;  %v14685_v31 = vld [vmem:[#allocation70_spill] sm:$0xff] }
 0x87f   : > { %9453 = vmatmul.mubr.bf16.gmra.mrb[24].mxu0 %v13892_v22  ;;  %v13913_v13 = vmul.bf16 %v5131_v7, %v14678_v60 }
 0x880   : > { %9456 = vmatprep.mubr.bf16.mxu0 %v13895_v56  ;;  %v5134_v35 = vsel %vm2065_vm11, %v5132_v46, %v5133_v42  ;;  %v5137_v37 = vsel %vm2065_vm11, %v5135_v41, %v5136_v53  ;;  %v5138_v0 = vor.u32 %v5136_v53, %v14684_v51  ;;  %v10735_v46 = vld [vmem:[#allocation10 + $0x108] sm:$0xff]   ;;  %v10736_v41 = vld [vmem:[#allocation10 + $0x110] sm:$0xff]   ;;  %v10737_v53 = vld [vmem:[#allocation10 + $0x118] sm:$0xff]  }
 0x881   : > { %v13926_v7 = vmul.bf16 %v5134_v35, %v14682_v10  ;;  %v13929_v60 = vmul.bf16 %v5137_v37, %v14683_v48  ;;  %v10741_v35 = vld [vmem:[#allocation10 + $0x138] sm:$0xff]   ;;  %v10742_v37 = vld [vmem:[#allocation10 + $0x140] sm:$0xff]   ;;  %v14686_v10 = vld [vmem:[#allocation71_spill] sm:$0xff] }
 0x882   : > { %v5140_v23 = vsel %vm2065_vm11, %v5138_v0, %v13771_v9  ;;  %v10738_v9 = vld [vmem:[#allocation10 + $0x120] sm:$0xff]   ;;  %v13958_v48 = vmul.bf16 %v13796_v18, %v14686_v10  ;;  %v10743_v51 = vld [vmem:[#allocation10 + $0x148] sm:$0xff]   ;;  %v10744_v0 = vld [vmem:[#allocation10 + $0x150] sm:$0xff]  }
 0x883   : > { %v13938_v42 = vmul.bf16 %v5140_v23, %v14685_v31  ;;  %v10745_v23 = vld [vmem:[#allocation10 + $0x158] sm:$0xff]  }
 0x884   : > { %v10749_v10 = vld [vmem:[#allocation10 + $0x178] sm:$0xff]  }
 0x887   : > { %9457 = vmatmul.mubr.bf16.gmra.mrb[28].mxu0 %v13910_v47 }
 0x888   : > { %9460 = vmatprep.mubr.bf16.mxu0 %v13913_v13 }
 0x88f   : > { %9461 = vmatmul.mubr.bf16.gmra.mrb[32].mxu0 %v13926_v7 }
 0x890   : > { %9464 = vmatprep.mubr.bf16.mxu0 %v13929_v60 }
 0x897   : > { %9465 = vmatmul.mubr.bf16.gmra.mrb[36].mxu0 %v13938_v42 }
 0x898   : > { %9484 = vmatprep.mubr.bf16.mxu0 %v13567_v49  ;;  %v10739_v49 = vld [vmem:[#allocation10 + $0x128] sm:$0xff]  }
 0x89f   : > { %9485 = vmatmul.mubr.bf16.vlgmr.msra.gmra.mrb[8].mxu0 %v13583_v33 }
 0x8a0   : > { %9517 = vmatpush3.bf16.msra.mxu0 %v10734_v43  ;;  %9488 = vmatprep.mubr.bf16.mxu0 %v13606_v2  ;;  %v10740_v43 = vld [vmem:[#allocation10 + $0x130] sm:$0xff]  }
 0x8a1   : > { %9518 = vmatprep.subr.bf16.mxu0 %v10735_v46 }
 0x8a4   : > { %9519 = vmatpush3.bf16.msra.mxu0 %v10735_v46 }
 0x8a5   : > { %9520 = vmatprep.subr.bf16.mxu0 %v10736_v41 }
 0x8a7   : > { %9489 = vmatmul.mubr.bf16.gmra.mrb[12].mxu0 %v13626_v28 }
 0x8a8   : > { %9492 = vmatprep.mubr.bf16.mxu0 %v13655_v12  ;;  %9521 = vmatpush3.bf16.msra.mxu0 %v10736_v41 }
 0x8a9   : > { %9522 = vmatprep.subr.bf16.mxu0 %v10737_v53 }
 0x8ac   : > { %9523 = vmatpush3.bf16.msra.mxu0 %v10737_v53  ;;  %v10747_v53 = vld [vmem:[#allocation10 + $0x168] sm:$0xff]  }
 0x8ad   : > { %9524 = vmatprep.subr.bf16.mxu0 %v10738_v9 }
 0x8af   : > { %9493 = vmatmul.mubr.bf16.gmra.mrb[16].mxu0 %v13661_v16 }
 0x8b0   : > { %9496 = vmatprep.mubr.bf16.mxu0 %v13690_v57  ;;  %9525 = vmatpush3.bf16.msra.mxu0 %v10738_v9 }
 0x8b1   : > { %9526 = vmatprep.subr.bf16.mxu0 %v10739_v49 }
 0x8b4   : > { %9527 = vmatpush3.bf16.msra.mxu0 %v10739_v49  ;;  %v10748_v49 = vld [vmem:[#allocation10 + $0x170] sm:$0xff]  }
 0x8b5   : > { %9528 = vmatprep.subr.bf16.mxu0 %v10740_v43 }
 0x8b7   : > { %9497 = vmatmul.mubr.bf16.gmra.mrb[20].mxu0 %v13696_v30 }
 0x8b8   : > { %9500 = vmatprep.mubr.bf16.mxu0 %v13724_v32  ;;  %9529 = vmatpush3.bf16.msra.mxu0 %v10740_v43 }
 0x8b9   : > { %9530 = vmatprep.subr.bf16.mxu0 %v10741_v35 }
 0x8bc   : > { %9531 = vmatpush3.bf16.msra.mxu0 %v10741_v35 }
 0x8bd   : > { %9564 = vmatprep.subr.bf16.mxu0 %v10742_v37 }
 0x8bf   : > { %9501 = vmatmul.mubr.bf16.gmra.mrb[24].mxu0 %v13731_v27 }
 0x8c0   : > { %9504 = vmatprep.mubr.bf16.mxu0 %v13752_v8 }
 0x8c7   : > { %9505 = vmatmul.mubr.bf16.gmra.mrb[28].mxu0 %v13757_v39 }
 0x8c8   : > { %9508 = vmatprep.mubr.bf16.mxu0 %v13782_v62 }
 0x8cf   : > { %9509 = vmatmul.mubr.bf16.gmra.mrb[32].mxu0 %v13786_v6 }
 0x8d0   : > { %9512 = vmatprep.mubr.bf16.mxu0 %v13804_v63 }
 0x8d7   : > { %9513 = vmatmul.mubr.bf16.gmra.mrb[36].mxu0 %v13958_v48 }
 0x8d8   : > { %9532 = vmatprep.mubr.bf16.mxu0 %v13528_v4  ;;  %v10746_v4 = vld [vmem:[#allocation10 + $0x160] sm:$0xff]  }
 0x8df   : > { %9533 = vmatmul.mubr.bf16.vlgmr.msra.gmra.mrb[8].mxu0 %v13533_v5 }
 0x8e0   : > { %9565 = vmatpush3.bf16.msra.mxu0 %v10742_v37  ;;  %9536 = vmatprep.mubr.bf16.mxu0 %v13546_v40 }
 0x8e1   : > { %9566 = vmatprep.subr.bf16.mxu0 %v10743_v51 }
 0x8e4   : > { %9567 = vmatpush3.bf16.msra.mxu0 %v10743_v51 }
 0x8e5   : > { %9568 = vmatprep.subr.bf16.mxu0 %v10744_v0 }
 0x8e7   : > { %9537 = vmatmul.mubr.bf16.gmra.mrb[12].mxu0 %v13564_v25 }
 0x8e8   : > { %9540 = vmatprep.mubr.bf16.mxu0 %v13579_v59  ;;  %9569 = vmatpush3.bf16.msra.mxu0 %v10744_v0  ;;  %v10750_v0 = vld [vmem:[#allocation10 + $0x180] sm:$0xff]  }
 0x8e9   : > { %v13966_v18 = vpop.f32.mrb[36].mxu1  ;;  %9570 = vmatprep.subr.bf16.mxu0 %v10745_v23 }
 0x8ea   : > { %v13968_v31 = vpop.f32.mrb[37].mxu1 }
 0x8eb   : > { %v13970_v46 = vpop.f32.mrb[38].mxu1 }
 0x8ec   : > { %v13972_v41 = vpop.f32.mrb[39].mxu1  ;;  %9571 = vmatpush3.bf16.msra.mxu0 %v10745_v23 }
 0x8ed   : > { %9572 = vmatprep.subr.bf16.mxu0 %v10746_v4 }
 0x8ef   : > { %9541 = vmatmul.mubr.bf16.gmra.mrb[16].mxu0 %v13594_v15 }
 0x8f0   : > { %9544 = vmatprep.mubr.bf16.mxu0 %v13610_v38  ;;  %9573 = vmatpush3.bf16.msra.mxu0 %v10746_v4 }
 0x8f1   : > { %v13976_v9 = vpop.f32.mrb[40].mxu1  ;;  %9574 = vmatprep.subr.bf16.mxu0 %v10747_v53 }
 0x8f2   : > { %v13978_v43 = vpop.f32.mrb[41].mxu1 }
 0x8f3   : > { %14687 = vst [vmem:[#allocation37_spill] sm:$0xff] %v13978_v43  ;;  %v13980_v35 = vpop.f32.mrb[42].mxu1 }
 0x8f4   : > { %14688 = vst [vmem:[#allocation39_spill] sm:$0xff] %v13980_v35  ;;  %v13982_v37 = vpop.f32.mrb[43].mxu1  ;;  %9575 = vmatpush3.bf16.msra.mxu0 %v10747_v53  ;;  %v10751_v35 = vld [vmem:[#allocation10 + $0x188] sm:$0xff]  }
 0x8f5   : > { %14689 = vst [vmem:[#allocation40_spill] sm:$0xff] %v13982_v37  ;;  %9576 = vmatprep.subr.bf16.mxu0 %v10748_v49 }
 0x8f7   : > { %9545 = vmatmul.mubr.bf16.gmra.mrb[20].mxu0 %v13613_v55 }
 0x8f8   : > { %9548 = vmatprep.mubr.bf16.mxu0 %v13639_v50  ;;  %9577 = vmatpush3.bf16.msra.mxu0 %v10748_v49 }
 0x8f9   : > { %v13986_v51 = vpop.f32.mrb[44].mxu1  ;;  %9578 = vmatprep.subr.bf16.mxu0 %v10749_v10 }
 0x8fa   : > { %14690 = vst [vmem:[#allocation41_spill] sm:$0xff] %v13986_v51  ;;  %v13988_v23 = vpop.f32.mrb[45].mxu1 }
 0x8fb   : > { %14691 = vst [vmem:[#allocation42_spill] sm:$0xff] %v13988_v23  ;;  %v13990_v4 = vpop.f32.mrb[46].mxu1 }
 0x8fc   : > { %14692 = vst [vmem:[#allocation43_spill] sm:$0xff] %v13990_v4  ;;  %v13992_v43 = vpop.f32.mrb[47].mxu1  ;;  %9579 = vmatpush3.bf16.msra.mxu0 %v10749_v10 }
 0x8fd   : > { %14693 = vst [vmem:[#allocation44_spill] sm:$0xff] %v13992_v43  ;;  %9612 = vmatprep.subr.bf16.mxu0 %v10750_v0 }
 0x8ff   : > { %9549 = vmatmul.mubr.bf16.gmra.mrb[24].mxu0 %v13643_v29 }
 0x900   : > { %9552 = vmatprep.mubr.bf16.mxu0 %v13678_v52 }
 0x901   : > { %v13996_v53 = vpop.f32.mrb[48].mxu1 }
 0x902   : > { %14694 = vst [vmem:[#allocation38_spill] sm:$0xff] %v13996_v53  ;;  %v13998_v37 = vpop.f32.mrb[49].mxu1 }
 0x903   : > { %14695 = vst [vmem:[#allocation45_spill] sm:$0xff] %v13998_v37  ;;  %v14000_v49 = vpop.f32.mrb[50].mxu1 }
 0x904   : > { %14696 = vst [vmem:[#allocation34_spill] sm:$0xff] %v14000_v49  ;;  %v14002_v51 = vpop.f32.mrb[51].mxu1 }
 0x905   : > { %14697 = vst [vmem:[#allocation72_spill] sm:$0xff] %v14002_v51 }
 0x907   : > { %9553 = vmatmul.mubr.bf16.gmra.mrb[28].mxu0 %v13683_v17 }
 0x908   : > { %9556 = vmatprep.mubr.bf16.mxu0 %v13712_v44 }
 0x909   : > { %v14006_v4 = vpop.f32.mrb[52].mxu1 }
 0x90a   : > { %14698 = vst [vmem:[#allocation73_spill] sm:$0xff] %v14006_v4  ;;  %v14008_v10 = vpop.f32.mrb[53].mxu1 }
 0x90b   : > { %14699 = vst [vmem:[#allocation46_spill] sm:$0xff] %v14008_v10  ;;  %v14010_v43 = vpop.f32.mrb[54].mxu1 }
 0x90c   : > { %14700 = vst [vmem:[#allocation74_spill] sm:$0xff] %v14010_v43  ;;  %v14012_v23 = vpop.f32.mrb[55].mxu1 }
 0x90d   : > { %14701 = vst [vmem:[#allocation47_spill] sm:$0xff] %v14012_v23 }
 0x90f   : > { %9557 = vmatmul.mubr.bf16.gmra.mrb[32].mxu0 %v13717_v54 }
 0x910   : > { %9560 = vmatprep.mubr.bf16.mxu0 %v13743_v3 }
 0x911   : > { %v14016_v37 = vpop.f32.mrb[56].mxu1 }
 0x912   : > { %v14018_v49 = vpop.f32.mrb[57].mxu1 }
 0x913   : > { %14702 = vst [vmem:[#allocation48_spill] sm:$0xff] %v14018_v49  ;;  %v14020_v51 = vpop.f32.mrb[58].mxu1 }
 0x914   : > { %14703 = vst [vmem:[#allocation49_spill] sm:$0xff] %v14020_v51  ;;  %v14022_v53 = vpop.f32.mrb[59].mxu1 }
 0x915   : > { %14704 = vst [vmem:[#allocation50_spill] sm:$0xff] %v14022_v53  ;;  %v10752_v53 = vld [vmem:[#allocation10 + $0x190] sm:$0xff]  }
 0x917   : > { %9561 = vmatmul.mubr.bf16.gmra.mrb[36].mxu0 %v13675_v24 }
 0x918   : > { %9580 = vmatprep.mubr.bf16.mxu0 %v13819_v26 }
 0x919   : > { %v14026_v10 = vpop.f32.mrb[60].mxu1 }
 0x91a   : > { %14705 = vst [vmem:[#allocation51_spill] sm:$0xff] %v14026_v10  ;;  %v14028_v43 = vpop.f32.mrb[61].mxu1 }
 0x91b   : > { %v14030_v23 = vpop.f32.mrb[62].mxu1 }
 0x91c   : > { %14706 = vst [vmem:[#allocation52_spill] sm:$0xff] %v14030_v23  ;;  %v14032_v4 = vpop.f32.mrb[63].mxu1  ;;  %v10753_v23 = vld [vmem:[#allocation10 + $0x198] sm:$0xff]  }
 0x91f   : > { %9581 = vmatmul.mubr.bf16.vlgmr.msra.gmra.mrb[8].mxu0 %v13822_v14 }
 0x920   : > { %9613 = vmatpush3.bf16.msra.mxu0 %v10750_v0  ;;  %9584 = vmatprep.mubr.bf16.mxu0 %v13838_v61  ;;  %v10754_v0 = vld [vmem:[#allocation10 + $0x1a0] sm:$0xff]  }
 0x921   : > { %v14036_v51 = vpop.f32.mrb[64].mxu1  ;;  %9614 = vmatprep.subr.bf16.mxu0 %v10751_v35 }
 0x922   : > { %14707 = vst [vmem:[#allocation53_spill] sm:$0xff] %v14036_v51  ;;  %v14038_v49 = vpop.f32.mrb[65].mxu1  ;;  %v10755_v51 = vld [vmem:[#allocation10 + $0x1a8] sm:$0xff]  }
 0x923   : > { %v14040_v26 = vpop.f32.mrb[66].mxu1 }
 0x924   : > { %14708 = vst [vmem:[#allocation54_spill] sm:$0xff] %v14040_v26  ;;  %v14042_v10 = vpop.f32.mrb[67].mxu1  ;;  %9615 = vmatpush3.bf16.msra.mxu0 %v10751_v35  ;;  %v10757_v35 = vld [vmem:[#allocation10 + $0x1b8] sm:$0xff]  }
 0x925   : > { %14709 = vst [vmem:[#allocation55_spill] sm:$0xff] %v14042_v10  ;;  %9616 = vmatprep.subr.bf16.mxu0 %v10752_v53  ;;  %v10756_v10 = vld [vmem:[#allocation10 + $0x1b0] sm:$0xff]   ;;  %v10761_v26 = vld [vmem:[#allocation10 + $0x1d8] sm:$0xff]  }
 0x927   : > { %9585 = vmatmul.mubr.bf16.gmra.mrb[12].mxu0 %v13841_v36 }
 0x928   : > { %9588 = vmatprep.mubr.bf16.mxu0 %v13856_v1  ;;  %9617 = vmatpush3.bf16.msra.mxu0 %v10752_v53  ;;  %v10758_v53 = vld [vmem:[#allocation10 + $0x1c0] sm:$0xff]  }
 0x929   : > { %9618 = vmatprep.subr.bf16.mxu0 %v10753_v23 }
 0x92c   : > { %9619 = vmatpush3.bf16.msra.mxu0 %v10753_v23  ;;  %v14710_v23 = vld [vmem:[#allocation67_spill] sm:$0xff] }
 0x92d   : > { %9620 = vmatprep.subr.bf16.mxu0 %v10754_v0 }
 0x92f   : > { %9589 = vmatmul.mubr.bf16.gmra.mrb[16].mxu0 %v13859_v45 }
 0x930   : > { %9592 = vmatprep.mubr.bf16.mxu0 %v13874_v21  ;;  %9621 = vmatpush3.bf16.msra.mxu0 %v10754_v0  ;;  %v10759_v0 = vld [vmem:[#allocation10 + $0x1c8] sm:$0xff]  }
 0x931   : > { %9622 = vmatprep.subr.bf16.mxu0 %v10755_v51 }
 0x934   : > { %9623 = vmatpush3.bf16.msra.mxu0 %v10755_v51  ;;  %v5160_v51 = vsel %vm12513_vm13, %v13779_v20, 0  ;;  %v10762_v20 = vld [vmem:[#allocation10 + $0x1e0] sm:$0xff]  }
 0x935   : > { %9624 = vmatprep.subr.bf16.mxu0 %v10756_v10 }
 0x937   : > { %9593 = vmatmul.mubr.bf16.gmra.mrb[20].mxu0 %v13877_v19 }
 0x938   : > { %9596 = vmatprep.mubr.bf16.mxu0 %v13892_v22  ;;  %9625 = vmatpush3.bf16.msra.mxu0 %v10756_v10  ;;  %v14060_v10 = vmul.bf16 %v5160_v51, %v14710_v23 }
 0x939   : > { %9626 = vmatprep.subr.bf16.mxu0 %v10757_v35 }
 0x93c   : > { %9627 = vmatpush3.bf16.msra.mxu0 %v10757_v35  ;;  %v10760_v35 = vld [vmem:[#allocation10 + $0x1d0] sm:$0xff]  }
 0x93d   : > { %9660 = vmatprep.subr.bf16.mxu0 %v10758_v53 }
 0x93f   : > { %9597 = vmatmul.mubr.bf16.gmra.mrb[24].mxu0 %v13895_v56 }
 0x940   : > { %9600 = vmatprep.mubr.bf16.mxu0 %v13910_v47 }
 0x947   : > { %9601 = vmatmul.mubr.bf16.gmra.mrb[28].mxu0 %v13913_v13 }
 0x948   : > { %9604 = vmatprep.mubr.bf16.mxu0 %v13926_v7 }
 0x94f   : > { %9605 = vmatmul.mubr.bf16.gmra.mrb[32].mxu0 %v13929_v60 }
 0x950   : > { %9608 = vmatprep.mubr.bf16.mxu0 %v13938_v42 }
 0x957   : > { %9609 = vmatmul.mubr.bf16.gmra.mrb[36].mxu0 %v14060_v10 }
 0x958   : > { %9628 = vmatprep.mubr.bf16.mxu0 %v13583_v33  ;;  %v10763_v33 = vld [vmem:[#allocation10 + $0x1e8] sm:$0xff]  }
 0x95f   : > { %9629 = vmatmul.mubr.bf16.vlgmr.msra.gmra.mrb[8].mxu0 %v13606_v2  ;;  %v10764_v2 = vld [vmem:[#allocation10 + $0x1f0] sm:$0xff]  }
 0x960   : > { %9661 = vmatpush3.bf16.msra.mxu0 %v10758_v53  ;;  %9632 = vmatprep.mubr.bf16.mxu0 %v13626_v28  ;;  %v10765_v28 = vld [vmem:[#allocation10 + $0x1f8] sm:$0xff]  }
 0x961   : > { %9662 = vmatprep.subr.bf16.mxu0 %v10759_v0 }
 0x964   : > { %9663 = vmatpush3.bf16.msra.mxu0 %v10759_v0 }
 0x965   : > { %9664 = vmatprep.subr.bf16.mxu0 %v10760_v35 }
 0x967   : > { %9633 = vmatmul.mubr.bf16.gmra.mrb[12].mxu0 %v13655_v12  ;;  %v10766_v12 = vld [vmem:[#allocation10 + $0x200] sm:$0xff]  }
 0x968   : > { %9636 = vmatprep.mubr.bf16.mxu0 %v13661_v16  ;;  %9665 = vmatpush3.bf16.msra.mxu0 %v10760_v35  ;;  %v5077_v16 = vsel %vm12276_vm7, %v13776_v11, 0  ;;  %v14722_v11 = vld [vmem:[#allocation31_spill] sm:$0xff] }
 0x969   : > { %9666 = vmatprep.subr.bf16.mxu0 %v10761_v26 }
 0x96c   : > { %9667 = vmatpush3.bf16.msra.mxu0 %v10761_v26 }
 0x96d   : > { %9668 = vmatprep.subr.bf16.mxu0 %v10762_v20 }
 0x96f   : > { %9637 = vmatmul.mubr.bf16.gmra.mrb[16].mxu0 %v13690_v57  ;;  %v14711_v57 = vld [vmem:[#allocation36_spill] sm:$0xff] }
 0x970   : > { %9640 = vmatprep.mubr.bf16.mxu0 %v13696_v30  ;;  %9669 = vmatpush3.bf16.msra.mxu0 %v10762_v20  ;;  %v5094_v30 = vmul.bf16 %v5077_v16, %v14711_v57  ;;  %v14735_v20 = vld [vmem:[#allocation39_spill] sm:$0xff] }
 0x971   : > { %9670 = vmatprep.subr.bf16.mxu0 %v10763_v33 }
 0x974   : > { %9671 = vmatpush3.bf16.msra.mxu0 %v10763_v33 }
 0x975   : > { %9672 = vmatprep.subr.bf16.mxu0 %v10764_v2 }
 0x977   : > { %9641 = vmatmul.mubr.bf16.gmra.mrb[20].mxu0 %v13724_v32  ;;  %v10769_v32 = vld [vmem:[#allocation10 + $0x218] sm:$0xff]  }
 0x978   : > { %9644 = vmatprep.mubr.bf16.mxu0 %v13731_v27  ;;  %9673 = vmatpush3.bf16.msra.mxu0 %v10764_v2  ;;  %v14720_v27 = vld [vmem:[#allocation27_spill] sm:$0xff] }
 0x979   : > { %9674 = vmatprep.subr.bf16.mxu0 %v10765_v28 }
 0x97c   : > { %9675 = vmatpush3.bf16.msra.mxu0 %v10765_v28 }
 0x97d   : > { %9708 = vmatprep.subr.bf16.mxu0 %v10766_v12 }
 0x97f   : > { %9645 = vmatmul.mubr.bf16.gmra.mrb[24].mxu0 %v13752_v8  ;;  %v10767_v8 = vld [vmem:[#allocation10 + $0x208] sm:$0xff]  }
 0x980   : > { %9648 = vmatprep.mubr.bf16.mxu0 %v13757_v39  ;;  %v14723_v39 = vld [vmem:[#allocation33_spill] sm:$0xff] }
 0x987   : > { %9649 = vmatmul.mubr.bf16.gmra.mrb[28].mxu0 %v13782_v62  ;;  %v10768_v62 = vld [vmem:[#allocation10 + $0x210] sm:$0xff]  }
 0x988   : > { %9652 = vmatprep.mubr.bf16.mxu0 %v13786_v6  ;;  %v14724_v6 = vld [vmem:[#allocation18_spill] sm:$0xff] }
 0x98f   : > { %9653 = vmatmul.mubr.bf16.gmra.mrb[32].mxu0 %v13804_v63  ;;  %v14726_v63 = vld [vmem:[#allocation22_spill] sm:$0xff] }
 0x990   : > { %9656 = vmatprep.mubr.bf16.mxu0 %v13958_v48 }
 0x997   : > { %9657 = vmatmul.mubr.bf16.gmra.mrb[36].mxu0 %v5094_v30 }
 0x998   : > { %9676 = vmatprep.mubr.bf16.mxu0 %v13533_v5  ;;  %v10771_v5 = vld [vmem:[#allocation10 + $0x228] sm:$0xff]  }
 0x99f   : > { %9677 = vmatmul.mubr.bf16.vlgmr.msra.gmra.mrb[8].mxu0 %v13546_v40  ;;  %v10772_v40 = vld [vmem:[#allocation10 + $0x230] sm:$0xff]  }
 0x9a0   : > { %9709 = vmatpush3.bf16.msra.mxu0 %v10766_v12  ;;  %9680 = vmatprep.mubr.bf16.mxu0 %v13564_v25  ;;  %v10773_v25 = vld [vmem:[#allocation10 + $0x238] sm:$0xff]  }
 0x9a1   : > { %9710 = vmatprep.subr.bf16.mxu0 %v10767_v8 }
 0x9a4   : > { %9711 = vmatpush3.bf16.msra.mxu0 %v10767_v8 }
 0x9a5   : > { %9712 = vmatprep.subr.bf16.mxu0 %v10768_v62 }
 0x9a7   : > { %9681 = vmatmul.mubr.bf16.gmra.mrb[12].mxu0 %v13579_v59  ;;  %v10774_v59 = vld [vmem:[%s14712_s14] sm:$0xff]  }
 0x9a8   : > { %9684 = vmatprep.mubr.bf16.mxu0 %v13594_v15  ;;  %9713 = vmatpush3.bf16.msra.mxu0 %v10768_v62  ;;  %v14713_v15 = vmov 0  }
 0x9a9   : > { %9714 = vmatprep.subr.bf16.mxu0 %v10769_v32 }
 0x9ac   : > { %9715 = vmatpush3.bf16.msra.mxu0 %v10769_v32 }
 0x9ad   : > { %9716 = vmatprep.subr.bf16.mxu0 %v10770_v34 }
 0x9af   : > { %9685 = vmatmul.mubr.bf16.gmra.mrb[16].mxu0 %v13610_v38  ;;  %v10775_v38 = vld [vmem:[%s14712_s14 + $0x8] sm:$0xff]  }
 0x9b0   : > { %9688 = vmatprep.mubr.bf16.mxu0 %v13613_v55  ;;  %9717 = vmatpush3.bf16.msra.mxu0 %v10770_v34  ;;  %v10776_v55 = vld [vmem:[%s14712_s14 + $0x10] sm:$0xff]  }
 0x9b1   : > { %9718 = vmatprep.subr.bf16.mxu0 %v10771_v5 }
 0x9b4   : > { %9719 = vmatpush3.bf16.msra.mxu0 %v10771_v5  ;;  %v14737_v5 = vld [vmem:[#allocation41_spill] sm:$0xff] }
 0x9b5   : > { %9720 = vmatprep.subr.bf16.mxu0 %v10772_v40 }
 0x9b7   : > { %9689 = vmatmul.mubr.bf16.gmra.mrb[20].mxu0 %v13639_v50  ;;  %v10777_v50 = vld [vmem:[%s14712_s14 + $0x18] sm:$0xff]  }
 0x9b8   : > { %9692 = vmatprep.mubr.bf16.mxu0 %v13643_v29  ;;  %9721 = vmatpush3.bf16.msra.mxu0 %v10772_v40  ;;  %v14714_v29 = vld [vmem:[#allocation35_spill] sm:$0xff] }
 0x9b9   : > { %9722 = vmatprep.subr.bf16.mxu0 %v10773_v25 }
 0x9bc   : > { %9723 = vmatpush3.bf16.msra.mxu0 %v10773_v25 }
 0x9bd   : > { %9756 = vmatprep.subr.bf16.mxu0 %v10774_v59 }
 0x9bf   : > { %9693 = vmatmul.mubr.bf16.gmra.mrb[24].mxu0 %v13678_v52  ;;  %v14716_v52 = vld [vmem:[#allocation19_spill] sm:$0xff] }
 0x9c0   : > { %9696 = vmatprep.mubr.bf16.mxu0 %v13683_v17  ;;  %v14717_v17 = vld [vmem:[#allocation21_spill] sm:$0xff] }
 0x9c7   : > { %9697 = vmatmul.mubr.bf16.gmra.mrb[28].mxu0 %v13712_v44  ;;  %v14718_v44 = vld [vmem:[#allocation23_spill] sm:$0xff] }
 0x9c8   : > { %9700 = vmatprep.mubr.bf16.mxu0 %v13717_v54  ;;  %v14719_v54 = vld [vmem:[#allocation25_spill] sm:$0xff] }
 0x9cf   : > { %9701 = vmatmul.mubr.bf16.gmra.mrb[32].mxu0 %v13743_v3  ;;  %v14721_v3 = vld [vmem:[#allocation29_spill] sm:$0xff] }
 0x9d0   : > { %9704 = vmatprep.mubr.bf16.mxu0 %v13675_v24  ;;  %v14715_v24 = vmul.bf16 0, %v14714_v29 }
 0x9d7   : > { %9705 = vmatmul.mubr.bf16.gmra.mrb[36].mxu0 %v14713_v15  ;;  %v14738_v15 = vld [vmem:[#allocation42_spill] sm:$0xff] }
 0x9d8   : > { %9724 = vmatprep.mubr.bf16.mxu0 %v13822_v14  ;;  %v14727_v14 = vld [vmem:[#allocation24_spill] sm:$0xff] }
 0x9df   : > { %9725 = vmatmul.mubr.bf16.vlgmr.msra.gmra.mrb[8].mxu0 %v13838_v61  ;;  %v14728_v61 = vld [vmem:[#allocation26_spill] sm:$0xff] }
 0x9e0   : > { %9757 = vmatpush3.bf16.msra.mxu0 %v10774_v59  ;;  %9728 = vmatprep.mubr.bf16.mxu0 %v13841_v36  ;;  %v14729_v36 = vld [vmem:[#allocation28_spill] sm:$0xff] }
 0x9e1   : > { %9758 = vmatprep.subr.bf16.mxu0 %v10775_v38 }
 0x9e4   : > { %9759 = vmatpush3.bf16.msra.mxu0 %v10775_v38 }
 0x9e5   : > { %9760 = vmatprep.subr.bf16.mxu0 %v10776_v55 }
 0x9e7   : > { %9729 = vmatmul.mubr.bf16.gmra.mrb[12].mxu0 %v13856_v1  ;;  %v14730_v1 = vld [vmem:[#allocation30_spill] sm:$0xff] }
 0x9e8   : > { %9732 = vmatprep.mubr.bf16.mxu0 %v13859_v45  ;;  %9761 = vmatpush3.bf16.msra.mxu0 %v10776_v55  ;;  %v14731_v45 = vld [vmem:[#allocation32_spill] sm:$0xff] }
 0x9e9   : > { %9762 = vmatprep.subr.bf16.mxu0 %v10777_v50 }
 0x9ec   : > { %9763 = vmatpush3.bf16.msra.mxu0 %v10777_v50  ;;  %v14739_v50 = vld [vmem:[#allocation43_spill] sm:$0xff] }
 0x9ef   : > { %9733 = vmatmul.mubr.bf16.gmra.mrb[16].mxu0 %v13874_v21  ;;  %v14162_v21 = vld [vmem:[%s14732_s11] ss:$0 sm:$0xff]  ;;  %s11192_s11 = sshll.u32 %s11278_s15, 4  ;;  %s11193_s11 = int_to_ptr.vmem [resolvable:$false] %s11192_s11 }
 0x9f0   : > { %9736 = vmatprep.mubr.bf16.mxu0 %v13877_v19  ;;  %v9966_v19 = vadd.f32 %v13970_v46, %v14162_v21  ;;  %v9972_v53 = vadd.f32 %v13976_v9, %v14162_v21  ;;  %v9978_v33 = vadd.f32 %v14735_v20, %v14162_v21  ;;  %v14736_v9 = vld [vmem:[#allocation40_spill] sm:$0xff]  ;;  %v9984_v40 = vadd.f32 %v14737_v5, %v14162_v21  ;;  %s11194_s19 = scalar_lea.vmem %s11193_s11, 8192  ;;  %p11195_p12 = scmp.lt.s32.totalorder %s14305_s22, %s11193_s11 }
 0x9f1   : > { %v9981_v2 = vadd.f32 %v14162_v21, %v14736_v9  ;;  %v9987_v38 = vadd.f32 %v14162_v21, %v14738_v15  ;;  %v9990_v29 = vadd.f32 %v14739_v50, %v14162_v21  ;;  %v14747_v9 = vld [vmem:[#allocation74_spill] sm:$0xff]  ;;  %p11196_p1 = scmp.lt.s32.totalorder %s11194_s19, %s11188_s25 }
 0x9f3   : > { %p11197_p2 = por %p11196_p1, %p11195_p12 }
 0x9f5   : > { %p11198_p13 = pnand %p11197_p2, %p11191_p7 }
 0x9f7   : > { %9737 = vmatmul.mubr.bf16.gmra.mrb[20].mxu0 %v13892_v22  ;;  %v9969_v22 = vadd.f32 %v14162_v21, %v13972_v41 }
 0x9f8   : > { %9740 = vmatprep.mubr.bf16.mxu0 %v13895_v56  ;;  %v14171_v56 = vld [vmem:[%s14733_s23] ss:$0 sm:$0xff] }
 0x9f9   : > { %v9967_v48 = vadd.f32 %v9966_v19, %v14171_v56  ;;  %v9970_v41 = vadd.f32 %v9969_v22, %v14171_v56  ;;  %v9973_v28 = vadd.f32 %v9972_v53, %v14171_v56  ;;  %v9979_v8 = vadd.f32 %v9978_v33, %v14171_v56  ;;  %v14743_v22 = vld [vmem:[#allocation34_spill] sm:$0xff] }
 0x9fa   : > { %v9982_v34 = vadd.f32 %v9981_v2, %v14171_v56  ;;  %v10014_v2 = vadd.f32 %v14747_v9, %v14162_v21 }
 0x9ff   : > { %9741 = vmatmul.mubr.bf16.gmra.mrb[24].mxu0 %v13910_v47  ;;  %v9960_v47 = vadd.f32 %v13966_v18, %v14162_v21 }
 0xa00   : > { %9744 = vmatprep.mubr.bf16.mxu0 %v13913_v13  ;;  %v9963_v13 = vadd.f32 %v14162_v21, %v13968_v31 }
 0xa07   : > { %9745 = vmatmul.mubr.bf16.gmra.mrb[28].mxu0 %v13926_v7 }
 0xa08   : > { %9748 = vmatprep.mubr.bf16.mxu0 %v13929_v60 }
 0xa0f   : > { %9749 = vmatmul.mubr.bf16.gmra.mrb[32].mxu0 %v13938_v42 }
 0xa10   : > { %9752 = vmatprep.mubr.bf16.mxu0 %v14060_v10  ;;  %v14734_v10 = vld [vmem:[#allocation37_spill] sm:$0xff] }
 0xa11   : > { %v9975_v31 = vadd.f32 %v14162_v21, %v14734_v10 }
 0xa13   : > { %v9976_v16 = vadd.f32 %v9975_v31, %v14171_v56 }
 0xa17   : > { %9753 = vmatmul.mubr.bf16.gmra.mrb[36].mxu0 %v14715_v24  ;;  %v14740_v24 = vld [vmem:[#allocation44_spill] sm:$0xff] }
 0xa18   : > { %9764 = vmatprep.mubr.msk.bf16.mxu0 %vm1458_vm2, %v14716_v52  ;;  %v9993_v52 = vadd.f32 %v14162_v21, %v14740_v24 }
 0xa1f   : > { %9765 = vmatmul.mubr.msk.bf16.vlgmr.msra.gmra.mrb[8].mxu0 %vm1458_vm2, %v14717_v17  ;;  %v9985_v17 = vadd.f32 %v9984_v40, %v14171_v56 }
 0xa20   : > { %9768 = vmatprep.mubr.msk.bf16.mxu0 %vm1458_vm2, %v14718_v44 }
 0xa27   : > { %9769 = vmatmul.mubr.msk.bf16.gmra.mrb[12].mxu0 %vm1458_vm2, %v14719_v54  ;;  %v9988_v54 = vadd.f32 %v9987_v38, %v14171_v56  ;;  %v14749_v38 = vld [vmem:[#allocation48_spill] sm:$0xff] }
 0xa28   : > { %9772 = vmatprep.mubr.msk.bf16.mxu0 %vm1458_vm2, %v14720_v27 }
 0xa2f   : > { %9773 = vmatmul.mubr.msk.bf16.gmra.mrb[16].mxu0 %vm1458_vm2, %v14721_v3 }
 0xa30   : > { %9776 = vmatprep.mubr.msk.bf16.mxu0 %vm1458_vm2, %v14722_v11  ;;  %v9991_v11 = vadd.f32 %v9990_v29, %v14171_v56  ;;  %v14750_v29 = vld [vmem:[#allocation49_spill] sm:$0xff] }
 0xa31   : > { %v10026_v24 = vadd.f32 %v14750_v29, %v14162_v21 }
 0xa37   : > { %9777 = vmatmul.mubr.msk.bf16.gmra.mrb[20].mxu0 %vm1458_vm2, %v14723_v39 }
 0xa38   : > { %9780 = vmatprep.mubr.msk.bf16.mxu0 %vm1458_vm2, %v14724_v6 }
 0xa3f   : > { %9781 = vmatmul.mubr.msk.bf16.gmra.mrb[24].mxu0 %vm1458_vm2, %v14725_v58  ;;  %v9994_v58 = vadd.f32 %v9993_v52, %v14171_v56  ;;  %v14751_v52 = vld [vmem:[#allocation50_spill] sm:$0xff] }
 0xa40   : > { %9784 = vmatprep.mubr.msk.bf16.mxu0 %vm1458_vm2, %v14726_v63  ;;  %v14741_v63 = vld [vmem:[#allocation38_spill] sm:$0xff] }
 0xa47   : > { %9785 = vmatmul.mubr.msk.bf16.gmra.mrb[28].mxu0 %vm1458_vm2, %v14727_v14  ;;  %v9996_v14 = vadd.f32 %v14741_v63, %v14162_v21  ;;  %v14752_v63 = vld [vmem:[#allocation51_spill] sm:$0xff] }
 0xa48   : > { %9788 = vmatprep.mubr.msk.bf16.mxu0 %vm1458_vm2, %v14728_v61 }
 0xa4f   : > { %9789 = vmatmul.mubr.msk.bf16.gmra.mrb[32].mxu0 %vm1458_vm2, %v14729_v36 }
 0xa50   : > { %9792 = vmatprep.mubr.msk.bf16.mxu0 %vm1458_vm2, %v14730_v1  ;;  %v14742_v1 = vld [vmem:[#allocation45_spill] sm:$0xff] }
 0xa57   : > { %9793 = vmatmul.mubr.msk.bf16.gmra.mrb[36].mxu0 %vm1458_vm2, %v14731_v45  ;;  %v9999_v45 = vadd.f32 %v14162_v21, %v14742_v1  ;;  %v10035_v1 = vadd.f32 %v14162_v21, %v14028_v43 }
 0xaf2   : > { %v9766_v7 = vpop.f32.mrb[8].mxu0 }
 0xaf3   : > { %v9961_v60 = vadd.f32 %v9960_v47, %v9766_v7  ;;  %v7610_v42 = vpop.f32.mrb[9].mxu0  ;;  %v10002_v47 = vadd.f32 %v14743_v22, %v14162_v21 }
 0xaf4   : > { %v9964_v46 = vadd.f32 %v9963_v13, %v7610_v42  ;;  %v9767_v26 = vpop.f32.mrb[10].mxu0  ;;  %v14744_v13 = vld [vmem:[#allocation72_spill] sm:$0xff] }
 0xaf5   : > { %v9962_v51 = vadd.f32 %v9961_v60, %v14171_v56  ;;  %v9968_v23 = vadd.f32 %v9967_v48, %v9767_v26  ;;  %v7613_v18 = vpop.f32.mrb[11].mxu0  ;;  %v10005_v7 = vadd.f32 %v14162_v21, %v14744_v13  ;;  %v9997_v60 = vadd.f32 %v9996_v14, %v14171_v56 }
 0xaf6   : > { %v9965_v0 = vadd.f32 %v9964_v46, %v14171_v56  ;;  %v9971_v35 = vadd.f32 %v9970_v41, %v7613_v18  ;;  %v10000_v48 = vadd.f32 %v9999_v45, %v14171_v56  ;;  %v10003_v41 = vadd.f32 %v10002_v47, %v14171_v56  ;;  %v14745_v18 = vld [vmem:[#allocation73_spill] sm:$0xff] }
 0xaf7   : > { %7771 = vst [vmem:[%s14189_s16 + $0x10] sm:$0xff] %v9962_v51  ;;  %7772 = vst [vmem:[%s14189_s16 + $0x18] sm:$0xff] %v9968_v23  ;;  %v10006_v23 = vadd.f32 %v10005_v7, %v14171_v56  ;;  %v10008_v10 = vadd.f32 %v14745_v18, %v14162_v21  ;;  %v10032_v14 = vadd.f32 %v14752_v63, %v14162_v21 }
 0xaf8   : > { %7769 = vst [vmem:[%s14189_s16] sm:$0xff] %v9965_v0  ;;  %7770 = vst [vmem:[%s14189_s16 + $0x8] sm:$0xff] %v9971_v35  ;;  %v14746_v35 = vld [vmem:[#allocation46_spill] sm:$0xff]  ;;  %v10041_v47 = vadd.f32 %v14162_v21, %v14032_v4  ;;  %v14754_v4 = vld [vmem:[#allocation53_spill] sm:$0xff]  ;;  %v10047_v18 = vadd.f32 %v14162_v21, %v14038_v49 }
 0xaf9   : > { %v10011_v20 = vadd.f32 %v14162_v21, %v14746_v35  ;;  %v10033_v13 = vadd.f32 %v10032_v14, %v14171_v56  ;;  %v14756_v35 = vld [vmem:[#allocation55_spill] sm:$0xff] }
 0xafa   : > { %v9770_v12 = vpop.f32.mrb[12].mxu0 }
 0xafb   : > { %v9974_v57 = vadd.f32 %v9973_v28, %v9770_v12  ;;  %v7626_v30 = vpop.f32.mrb[13].mxu0  ;;  %v14748_v28 = vld [vmem:[#allocation47_spill] sm:$0xff] }
 0xafc   : > { %v9977_v62 = vadd.f32 %v9976_v16, %v7626_v30  ;;  %v9771_v32 = vpop.f32.mrb[14].mxu0  ;;  %v10017_v12 = vadd.f32 %v14162_v21, %v14748_v28  ;;  %v10009_v16 = vadd.f32 %v10008_v10, %v14171_v56  ;;  %v10012_v30 = vadd.f32 %v10011_v20, %v14171_v56 }
 0xafd   : > { %7775 = vst [vmem:[%s14189_s16 + $0x30] sm:$0xff] %v9974_v57  ;;  %v9980_v25 = vadd.f32 %v9979_v8, %v9771_v32  ;;  %v7629_v59 = vpop.f32.mrb[15].mxu0  ;;  %v10015_v32 = vadd.f32 %v10014_v2, %v14171_v56  ;;  %v10053_v20 = vadd.f32 %v14162_v21, %v14756_v35  ;;  %v10048_v2 = vadd.f32 %v10047_v18, %v14171_v56 }
 0xafe   : > { %7773 = vst [vmem:[%s14189_s16 + $0x20] sm:$0xff] %v9977_v62  ;;  %v9983_v55 = vadd.f32 %v9982_v34, %v7629_v59  ;;  %v10018_v40 = vadd.f32 %v10017_v12, %v14171_v56 }
 0xaff   : > { %7776 = vst [vmem:[%s14189_s16 + $0x38] sm:$0xff] %v9980_v25  ;;  %v10020_v25 = vadd.f32 %v14016_v37, %v14162_v21 }
 0xb00   : > { %7774 = vst [vmem:[%s14189_s16 + $0x28] sm:$0xff] %v9983_v55  ;;  %v10023_v55 = vadd.f32 %v14162_v21, %v14749_v38 }
 0xb01   : > { %v10021_v37 = vadd.f32 %v10020_v25, %v14171_v56 }
 0xb02   : > { %v9774_v44 = vpop.f32.mrb[16].mxu0 }
 0xb03   : > { %v9986_v27 = vadd.f32 %v9985_v17, %v9774_v44  ;;  %v7642_v3 = vpop.f32.mrb[17].mxu0  ;;  %v10029_v17 = vadd.f32 %v14162_v21, %v14751_v52 }
 0xb04   : > { %v9989_v39 = vadd.f32 %v9988_v54, %v7642_v3  ;;  %v9775_v6 = vpop.f32.mrb[18].mxu0  ;;  %v10024_v54 = vadd.f32 %v10023_v55, %v14171_v56 }
 0xb05   : > { %7779 = vst [vmem:[%s14189_s16 + $0x50] sm:$0xff] %v9986_v27  ;;  %v9992_v61 = vadd.f32 %v9991_v11, %v9775_v6  ;;  %v7645_v36 = vpop.f32.mrb[19].mxu0  ;;  %v10027_v11 = vadd.f32 %v10026_v24, %v14171_v56 }
 0xb06   : > { %7777 = vst [vmem:[%s14189_s16 + $0x40] sm:$0xff] %v9989_v39  ;;  %v9995_v19 = vadd.f32 %v9994_v58, %v7645_v36  ;;  %v10030_v58 = vadd.f32 %v10029_v17, %v14171_v56 }
 0xb07   : > { %7780 = vst [vmem:[%s14189_s16 + $0x58] sm:$0xff] %v9992_v61 }
 0xb08   : > { %7778 = vst [vmem:[%s14189_s16 + $0x48] sm:$0xff] %v9995_v19  ;;  %v14753_v19 = vld [vmem:[#allocation52_spill] sm:$0xff] }
 0xb09   : > { %v10038_v22 = vadd.f32 %v14753_v19, %v14162_v21 }
 0xb0a   : > { %v9778_v42 = vpop.f32.mrb[20].mxu0 }
 0xb0b   : > { %v9998_v46 = vadd.f32 %v9997_v60, %v9778_v42  ;;  %v7658_v26 = vpop.f32.mrb[21].mxu0  ;;  %v10036_v60 = vadd.f32 %v10035_v1, %v14171_v56 }
 0xb0c   : > { %v10001_v53 = vadd.f32 %v10000_v48, %v7658_v26  ;;  %v9779_v51 = vpop.f32.mrb[22].mxu0  ;;  %v10039_v48 = vadd.f32 %v10038_v22, %v14171_v56 }
 0xb0d   : > { %7783 = vst [vmem:[%s14189_s16 + $0x70] sm:$0xff] %v9998_v46  ;;  %v10004_v31 = vadd.f32 %v10003_v41, %v9779_v51  ;;  %v7661_v0 = vpop.f32.mrb[23].mxu0  ;;  %v10042_v41 = vadd.f32 %v10041_v47, %v14171_v56 }
 0xb0e   : > { %7781 = vst [vmem:[%s14189_s16 + $0x60] sm:$0xff] %v10001_v53  ;;  %v10007_v33 = vadd.f32 %v10006_v23, %v7661_v0  ;;  %v10044_v53 = vadd.f32 %v14754_v4, %v14162_v21 }
 0xb0f   : > { %7784 = vst [vmem:[%s14189_s16 + $0x78] sm:$0xff] %v10004_v31  ;;  %v14755_v31 = vld [vmem:[#allocation54_spill] sm:$0xff] }
 0xb10   : > { %7782 = vst [vmem:[%s14189_s16 + $0x68] sm:$0xff] %v10007_v33  ;;  %v10050_v0 = vadd.f32 %v14755_v31, %v14162_v21  ;;  %v10045_v33 = vadd.f32 %v10044_v53, %v14171_v56  ;;  %v10054_v21 = vadd.f32 %v10053_v20, %v14171_v56 }
 0xb12   : > { %v9782_v57 = vpop.f32.mrb[24].mxu0  ;;  %v10051_v12 = vadd.f32 %v10050_v0, %v14171_v56 }
 0xb13   : > { %v10010_v8 = vadd.f32 %v10009_v16, %v9782_v57  ;;  %v7674_v62 = vpop.f32.mrb[25].mxu0 }
 0xb14   : > { %v10013_v34 = vadd.f32 %v10012_v30, %v7674_v62  ;;  %v9783_v5 = vpop.f32.mrb[26].mxu0 }
 0xb15   : > { %7787 = vst [vmem:[%s14189_s16 + $0x90] sm:$0xff] %v10010_v8  ;;  %v10016_v59 = vadd.f32 %v10015_v32, %v9783_v5  ;;  %v7677_v15 = vpop.f32.mrb[27].mxu0 }
 0xb16   : > { %7785 = vst [vmem:[%s14189_s16 + $0x80] sm:$0xff] %v10013_v34  ;;  %v10019_v50 = vadd.f32 %v10018_v40, %v7677_v15 }
 0xb17   : > { %7788 = vst [vmem:[%s14189_s16 + $0x98] sm:$0xff] %v10016_v59 }
 0xb18   : > { %7786 = vst [vmem:[%s14189_s16 + $0x88] sm:$0xff] %v10019_v50 }
 0xb1a   : > { %v9786_v44 = vpop.f32.mrb[28].mxu0 }
 0xb1b   : > { %v10022_v27 = vadd.f32 %v10021_v37, %v9786_v44  ;;  %v7690_v3 = vpop.f32.mrb[29].mxu0 }
 0xb1c   : > { %v10025_v39 = vadd.f32 %v10024_v54, %v7690_v3  ;;  %v9787_v6 = vpop.f32.mrb[30].mxu0 }
 0xb1d   : > { %7791 = vst [vmem:[%s14189_s16 + $0xb0] sm:$0xff] %v10022_v27  ;;  %v10028_v61 = vadd.f32 %v10027_v11, %v9787_v6  ;;  %v7693_v36 = vpop.f32.mrb[31].mxu0 }
 0xb1e   : > { %7789 = vst [vmem:[%s14189_s16 + $0xa0] sm:$0xff] %v10025_v39  ;;  %v10031_v45 = vadd.f32 %v10030_v58, %v7693_v36 }
 0xb1f   : > { %7792 = vst [vmem:[%s14189_s16 + $0xb8] sm:$0xff] %v10028_v61 }
 0xb20   : > { %7790 = vst [vmem:[%s14189_s16 + $0xa8] sm:$0xff] %v10031_v45 }
 0xb22   : > { %v9790_v7 = vpop.f32.mrb[32].mxu0 }
 0xb23   : > { %v10034_v42 = vadd.f32 %v10033_v13, %v9790_v7  ;;  %v7706_v43 = vpop.f32.mrb[33].mxu0 }
 0xb24   : > { %v10037_v46 = vadd.f32 %v10036_v60, %v7706_v43  ;;  %v9791_v26 = vpop.f32.mrb[34].mxu0 }
 0xb25   : > { %7795 = vst [vmem:[%s14189_s16 + $0xd0] sm:$0xff] %v10034_v42  ;;  %v10040_v51 = vadd.f32 %v10039_v48, %v9791_v26  ;;  %v7709_v23 = vpop.f32.mrb[35].mxu0 }
 0xb26   : > { %7793 = vst [vmem:[%s14189_s16 + $0xc0] sm:$0xff] %v10037_v46  ;;  %v10043_v10 = vadd.f32 %v10042_v41, %v7709_v23 }
 0xb27   : > { %7796 = vst [vmem:[%s14189_s16 + $0xd8] sm:$0xff] %v10040_v51 }
 0xb28   : > { %7794 = vst [vmem:[%s14189_s16 + $0xc8] sm:$0xff] %v10043_v10 }
 0xb2a   : > { %v9794_v9 = vpop.f32.mrb[36].mxu0 }
 0xb2b   : > { %v10046_v49 = vadd.f32 %v10045_v33, %v9794_v9  ;;  %v7722_v28 = vpop.f32.mrb[37].mxu0 }
 0xb2c   : > { %v10049_v16 = vadd.f32 %v10048_v2, %v7722_v28  ;;  %v9795_v57 = vpop.f32.mrb[38].mxu0 }
 0xb2d   : > { %7799 = vst [vmem:[%s14189_s16 + $0xf0] sm:$0xff] %v10046_v49  ;;  %v10052_v30 = vadd.f32 %v10051_v12, %v9795_v57  ;;  %v7725_v8 = vpop.f32.mrb[39].mxu0 }
 0xb2e   : > { %7797 = vst [vmem:[%s14189_s16 + $0xe0] sm:$0xff] %v10049_v16  ;;  %v10055_v62 = vadd.f32 %v10054_v21, %v7725_v8 }
 0xb2f   : > { %7800 = vst [vmem:[%s14189_s16 + $0xf8] sm:$0xff] %v10052_v30 }
 0xb30   : > { %7798 = vst [vmem:[%s14189_s16 + $0xe8] sm:$0xff] %v10055_v62 }
 0xb31   : > { %11201 = shalt.err (!%p11198_p13)
}
 0xb32   : > { %s11202_s8 = scalar_lea.hbm %s14303_s30, 4096  ;;  %s11206_s21 = scalar_lea.hbm %s14757_s17, 8192 }
 0xb33   : > { %p11203_p9 = scmp.ne.s32.totalorder %s14303_s30, %s11202_s8  ;;  %p11207_p4 = scmp.lt.u32.totalorder %s14303_s30, %s14757_s17 }
 0xb34   : > { %p11208_p8 = scmp.lt.u32.totalorder %s11206_s21, %s11202_s8  ;;  %p11210_p3 = scmp.lt.u32.totalorder %s11202_s8, %s14303_s30 }
 0xb35   : > { %p11204_p0 = pnand %p11203_p9, %p11516_p10 }
 0xb36   : > { %p11209_p6 = por %p11208_p8, %p11207_p4 }
 0xb37   : > { %p11205_p11 = pneg %p11204_p0 }
 0xb38   : > { %p11211_p5 = por %p11210_p3, %p11209_p6 }
 0xb3a   : > { %p11212_p7 = pnand %p11211_p5, %p11205_p11 }
 0xb3c   : > { %11215 = shalt.err (!%p11212_p7)
}
 0xb3d   : > { %s11279_s25 = smov 128   ;;  %s11280_s15 = smov 8  }
 0xb3e   : > { %10586 = dma.vmem_to_hbm [thread:$0]  (%p11516_p10), %s14305_s22, 4096, %s14303_s30, %s7802_s29, %s11279_s25, %s11279_s25, %s11280_s15  }
 0xb3f PF: > { %s14758_s11 = sld [smem:[#allocation16_spill]]  ;;  %s14759_s19 = sld [smem:[#allocation17_spill]] }
 0xb40   : > { %p14761_p1 = scmp.ge.s32.totalorder %s11262_s28, 2 }
 0xb45   : > { %s7830_s23 = sand.u32 1, %s14758_s11   ;;  %p14760_p12 = scmp.ne.s32.totalorder %s14759_s19, 0 }
 0xb46   : > { %s7831_s8 = scalar_lea.sflag [#allocation4], %s7830_s23 }
 0xb47   : > { %p10606_p2 = pnand %p14761_p1, %p14760_p12 }
 0xb49   : > { %11245 = dma.done.wait (!%p10606_p2), %s7831_s8, 4096  }
 0xb4a   : > { %11247 = vsyncadd (!%p10606_p2), %s7831_s8, 4294963200  ;;  %p28_p13 = scmp.ge.s32.totalorder %s11506_s13, 4   ;;  %s14762_s25 = smov %s11254_s26 }
 0xb4b   : > { %s14763_s26 = smov %s11258_s27  ;;  %s14764_s27 = smov %s11522_s12 }
 0xb4c   : > { %s14765_s28 = smov %s11506_s13  ;;  %30 = sbr.rel (!%p28_p13) target bundleno = 13 (0xd), region = 149 }
 0xb53   :  { %7836 = vsyncpa [#allocation3], 1 }
 0xb54   :  { %7838 = vsyncpa [#allocation3 + $0x1], 1 }
 0xb55   :  { %7839 = vsyncpa [#allocation6], 1 }
 0xb56   :  { %7840 = vsyncpa [#allocation9], 1 }
 0xb57   :  { %7841 = vsyncpa [#allocation4], 1 }
 0xb58   :  { %7843 = vsyncpa [#allocation4 + $0x1], 1 }

// kernel: tpu_custom_call.1
= control target key start
LH: loop header
LB: loop body
LE: loop exit
PB: predicated region body
PF: predicated region fallthrough
CT: control target
= control target key end

     0   :  { %s14352_s0 = inlined_call_operand.hbm [shape: f32[2,16,16,64], index: 0, kind: input, shape index: {}]   ;;  %s14353_s1 = inlined_call_operand.hbm [shape: f32[64,64], index: 1, kind: input, shape index: {}]   ;;  %s14354_s2 = inlined_call_operand.vmem [shape: f32[1,64], index: 2, kind: input, shape index: {}]   ;;  %s14355_s3 = inlined_call_operand.vmem [shape: f32[1,64], index: 3, kind: input, shape index: {}]   ;;  %s14356_s4 = inlined_call_operand.hbm [shape: bf16[9,64,128], index: 4, kind: input, shape index: {}]   ;;  %s14357_s5 = inlined_call_operand.vmem [shape: f32[1,128], index: 5, kind: input, shape index: {}]   ;;  %s14358_s6 = inlined_call_operand.hbm [shape: f32[128,128], index: 6, kind: input, shape index: {}]   ;;  %s14359_s7 = inlined_call_operand.vmem [shape: f32[1,128], index: 7, kind: input, shape index: {}]   ;;  %s14360_s8 = inlined_call_operand.vmem [shape: f32[1,128], index: 8, kind: input, shape index: {}]   ;;  %s14361_s9 = inlined_call_operand.hbm [shape: bf16[9,128,128], index: 9, kind: input, shape index: {}]   ;;  %s14362_s10 = inlined_call_operand.vmem [shape: f32[1,128], index: 10, kind: input, shape index: {}]   ;;  %s14363_s11 = inlined_call_operand.vmem [shape: bf16[64,128], index: 11, kind: input, shape index: {}]   ;;  %s14364_s12 = inlined_call_operand.vmem [shape: f32[1,128], index: 12, kind: input, shape index: {}]   ;;  %s14365_s13 = inlined_call_operand.hbm [shape: f32[2,16,16,128], index: 13, kind: output, shape index: {}]  }
   0x1   :  { %14496 = sst [smem:[#allocation75_spill]] %s14360_s8 }
   0x2   :  { %14497 = sst [smem:[#allocation76_spill]] %s14362_s10 }
   0x3   :  { %14498 = sst [smem:[#allocation77_spill]] %s14363_s11 }
   0x4   :  { %14499 = sst [smem:[#allocation78_spill]] %s14364_s12 }
   0x5   :  { %14500 = sst [smem:[#allocation79_spill]] %s14365_s13 }
   0x6   :  { %18 = vsyncpa [#allocation3], 0 }
   0x7   :  { %20 = vsyncpa [#allocation3 + $0x1], 0 }
   0x8   :  { %21 = vsyncpa [#allocation6], 0 }
   0x9   :  { %22 = vsyncpa [#allocation9], 0 }
   0xa   :  { %23 = vsyncpa [#allocation4], 0 }
   0xb   :  { %25 = vsyncpa [#allocation4 + $0x1], 0  ;;  %s11351_s25 = smov 0   ;;  %s11353_s26 = smov 0  }
   0xc   :  { %s11355_s27 = smov 0   ;;  %s11357_s28 = smov 0  }
   0xd LB: > { %14501 = sst [smem:[#allocation16_spill]] %s11250_s25  ;;  %s11372_s29 = sadd.s32 4294967295, %s11262_s28   ;;  %s11262_s28 = sphi %s11357_s28, %s14765_s28   ;;  %s11258_s27 = sphi %s11355_s27, %s14764_s27   ;;  %s11254_s26 = sphi %s11353_s26, %s14763_s26   ;;  %s11250_s25 = sphi %s11351_s25, %s14762_s25  }
   0xe   : > { %s7926_s30 = sadd.s32 4294967294, %s11262_s28   ;;  %p51_p0 = scmp.ne.s32.totalorder %s11254_s26, %s11250_s25 }
   0xf   : > { %p14369_p1 = scmp.eq.s32.totalorder %s11372_s29, 0  ;;  %p333_p3 = scmp.eq.s32.totalorder %s7926_s30, 1 }
  0x10   : > { %p7927_p5 = scmp.ge.s32.totalorder %s11262_s28, 1  ;;  %p340_p7 = scmp.lt.s32.totalorder %s11262_s28, 3 }
  0x11   : > { %p11381_p4 = por %p14369_p1, %p51_p0  ;;  %p11386_p6 = por %p333_p3, %p51_p0 }
  0x12   : > { %p11391_p8 = pnand %p7927_p5, %p340_p7  ;;  %s11264_s17 = smov [#allocation5]  }
  0x13   : > { %s14502_s14 = scalar_select %p11381_p4, 1, 0 }
  0x14   : > { %s14503_s15 = scalar_select %p11386_p6, 1, 0 }
  0x15   : > { %s14505_s16 = scalar_select %p11391_p8, 1, 0 }
  0x16   : > { %14504 = sst [smem:[#allocation17_spill]] %s14503_s15  ;;  %s352_s18 = sshll.u32 %s11264_s17, 4  ;;  %s11395_s18 = int_to_ptr.vmem [resolvable:$true] %s352_s18 }
  0x17   : > { %p10588_p9 = pneg %p11391_p8  ;;  %s11265_s20 = smov [#allocation8]  }
  0x18   : > { %s387_s21 = sshll.u32 %s11265_s20, 4  ;;  %s11266_s22 = smov [#allocation7]   ;;  %s11406_s21 = int_to_ptr.vmem [resolvable:$true] %s387_s21 }
  0x19   : > { %p11402_p11 = pnand %p10588_p9, %p14369_p1  ;;  %s11408_s23 = sshll.u32 %s11266_s22, 4  ;;  %s372_s23 = int_to_ptr.vmem [resolvable:$true] %s11408_s23 }
  0x1a   : > { %s11046_s17 = scalar_lea.hbm %s14353_s1, 1024 }
  0x1b   : > { %p11047_p12 = scmp.ne.s32.totalorder %s14353_s1, %s11046_s17  ;;  %p11418_p13 = pneg %p11402_p11 }
  0x1c   : > { %p11053_p5 = scmp.lt.u32.totalorder %s11046_s17, %s14353_s1 }
  0x1d   : > { %p11049_p0 = pnand %p11418_p13, %p11047_p12 }
  0x1f   : > { %p11050_p3 = pneg %p11049_p0 }
  0x21   : > { %p11055_p7 = pnand %p11053_p5, %p11050_p3 }
  0x23   : > { %11058 = shalt.err (!%p11055_p7)
}
  0x24   : > { %s11059_s25 = scalar_lea.vmem %s11395_s18, 1024  ;;  %p11067_p2 = scmp.lt.s32.totalorder %s11395_s18, %s11395_s18 }
  0x25   : > { %p11060_p9 = scmp.ne.s32.totalorder %s11395_s18, %s11059_s25  ;;  %p11068_p6 = scmp.lt.s32.totalorder %s11059_s25, %s11059_s25 }
  0x27   : > { %p11062_p10 = pnand %p11060_p9, %p11418_p13  ;;  %p11069_p12 = por %p11068_p6, %p11067_p2 }
  0x29   : > { %p11063_p1 = pneg %p11062_p10 }
  0x2b   : > { %p11070_p0 = pnand %p11069_p12, %p11063_p1 }
  0x2d   : > { %11073 = shalt.err (!%p11070_p0)
}
  0x2e   : > { %s14373_s15 = smov 128   ;;  %s14374_s24 = smov 8  }
  0x2f   : > { %10591 = dma.hbm_to_vmem [thread:$0]  (!%p11402_p11), %s14353_s1, 1024, %s11395_s18, [#allocation6], %s14373_s15, %s14373_s15, %s14374_s24  }
  0x30   : > { %s11074_s25 = scalar_lea.hbm %s14358_s6, 2048 }
  0x31   : > { %p11075_p1 = scmp.ne.s32.totalorder %s14358_s6, %s11074_s25  ;;  %p11081_p10 = scmp.lt.u32.totalorder %s11074_s25, %s14358_s6 }
  0x33   : > { %p11077_p2 = pnand %p11075_p1, %p11418_p13 }
  0x35   : > { %p11078_p6 = pneg %p11077_p2 }
  0x37   : > { %p11083_p3 = pnand %p11081_p10, %p11078_p6 }
  0x39   : > { %11086 = shalt.err (!%p11083_p3)
}
  0x3a   : > { %s11087_s18 = scalar_lea.vmem %s11406_s21, 2048  ;;  %p11095_p12 = scmp.lt.s32.totalorder %s11406_s21, %s11406_s21 }
  0x3b   : > { %p11088_p5 = scmp.ne.s32.totalorder %s11406_s21, %s11087_s18  ;;  %p11096_p0 = scmp.lt.s32.totalorder %s11087_s18, %s11087_s18 }
  0x3d   : > { %p11090_p7 = pnand %p11088_p5, %p11418_p13  ;;  %p11097_p1 = por %p11096_p0, %p11095_p12 }
  0x3f   : > { %p11091_p9 = pneg %p11090_p7 }
  0x41   : > { %p11098_p2 = pnand %p11097_p1, %p11091_p9 }
  0x43   : > { %11101 = shalt.err (!%p11098_p2)
}
  0x44   : > { %10597 = dma.hbm_to_vmem [thread:$0]  (!%p11402_p11), %s14358_s6, 2048, %s11406_s21, [#allocation9], %s14373_s15, %s14373_s15, %s14374_s24  }
  0x45   : > { %s11102_s30 = scalar_lea.hbm %s14356_s4, 4608 }
  0x46   : > { %p11103_p6 = scmp.ne.s32.totalorder %s14356_s4, %s11102_s30  ;;  %p11109_p5 = scmp.lt.u32.totalorder %s11102_s30, %s14356_s4 }
  0x48   : > { %p11105_p10 = pnand %p11103_p6, %p11418_p13 }
  0x4a   : > { %p11106_p3 = pneg %p11105_p10 }
  0x4c   : > { %p11111_p7 = pnand %p11109_p5, %p11106_p3 }
  0x4e   : > { %11114 = shalt.err (!%p11111_p7)
}
  0x4f   : > { %s11115_s18 = scalar_lea.vmem %s372_s23, 4608  ;;  %p11123_p1 = scmp.lt.s32.totalorder %s372_s23, %s372_s23 }
  0x50   : > { %p11116_p9 = scmp.ne.s32.totalorder %s372_s23, %s11115_s18  ;;  %p11124_p2 = scmp.lt.s32.totalorder %s11115_s18, %s11115_s18 }
  0x52   : > { %p11118_p12 = pnand %p11116_p9, %p11418_p13  ;;  %p11125_p4 = por %p11124_p2, %p11123_p1 }
  0x54   : > { %p11119_p0 = pneg %p11118_p12 }
  0x56   : > { %p11126_p8 = pnand %p11125_p4, %p11119_p0 }
  0x58   : > { %11129 = shalt.err (!%p11126_p8)
}
  0x59   : > { %s11269_s21 = smov 64   ;;  %s11270_s8 = smov 4  }
  0x5a   : > { %10594 = dma.hbm_to_vmem [thread:$0]  (!%p11402_p11), %s14356_s4, 4608, %s372_s23, [#allocation6], %s11269_s21, %s11269_s21, %s11270_s8  }
  0x5b   : > { %s11271_s12 = smov [#allocation10]   ;;  %s11130_s22 = scalar_lea.hbm %s14361_s9, 9216 }
  0x5c   : > { %s406_s30 = sshll.u32 %s11271_s12, 4  ;;  %p11131_p4 = scmp.ne.s32.totalorder %s14361_s9, %s11130_s22  ;;  %s407_s30 = int_to_ptr.vmem [resolvable:$true] %s406_s30 }
  0x5d   : > { %p11137_p10 = scmp.lt.u32.totalorder %s11130_s22, %s14361_s9 }
  0x5e   : > { %p11133_p8 = pnand %p11131_p4, %p11418_p13 }
  0x60   : > { %p11134_p6 = pneg %p11133_p8 }
  0x62   : > { %p11139_p3 = pnand %p11137_p10, %p11134_p6 }
  0x64   : > { %11142 = shalt.err (!%p11139_p3)
}
  0x65   : > { %s11143_s23 = scalar_lea.vmem %s407_s30, 9216  ;;  %p11151_p12 = scmp.lt.s32.totalorder %s407_s30, %s407_s30 }
  0x66   : > { %p11144_p5 = scmp.ne.s32.totalorder %s407_s30, %s11143_s23  ;;  %p11152_p0 = scmp.lt.s32.totalorder %s11143_s23, %s11143_s23 }
  0x68   : > { %p11146_p7 = pnand %p11144_p5, %p11418_p13  ;;  %p11153_p1 = por %p11152_p0, %p11151_p12 }
  0x6a   : > { %p11147_p9 = pneg %p11146_p7 }
  0x6c   : > { %p11154_p2 = pnand %p11153_p1, %p11147_p9 }
  0x6e   : > { %11157 = shalt.err (!%p11154_p2)
}
  0x6f   : > { %10600 = dma.hbm_to_vmem [thread:$0]  (!%p11402_p11), %s14361_s9, 9216, %s407_s30, [#allocation9], %s11269_s21, %s11269_s21, %s11270_s8  }
  0x70   : > { %s11506_s13 = sadd.s32 1, %s11262_s28   ;;  %s38_s15 = sadd.s32 1, %s11258_s27 }
  0x71   : > { %s35_s19 = ssub.s32 %s11262_s28, %s11506_s13  ;;  %p45_p13 = scmp.ne.s32.totalorder %s11258_s27, %s11254_s26 }
  0x72   : > { %p36_p4 = scmp.eq.s32.totalorder %s35_s19, 0  ;;  %p46_p8 = scmp.eq.s32.totalorder %s11262_s28, 0 }
  0x73   : > { %p14508_p6 = scmp.eq.s32.totalorder %s11372_s29, 1  ;;  %p10613_p3 = scmp.lt.s32.totalorder %s11262_s28, 2 }
  0x74   : > { %s11522_s12 = scalar_select %p36_p4, %s11258_s27, %s38_s15  }
  0x75   : > { %p11516_p10 = por %p14508_p6, %p45_p13  ;;  %p47_p5 = por %p46_p8, %p45_p13 }
  0x76   : > { %s429_s17 = sand.u32 1, %s11258_s27   ;;  %s8326_s21 = sshll.u32 %s11262_s28, 12 }
  0x77   : > { %s7933_s20 = sshll.u32 %s429_s17, 8  ;;  %s11529_s22 = scalar_lea.hbm %s14352_s0, %s8326_s21 }
  0x78   : > { %s433_s25 = scalar_lea.vmem [#allocation2], %s7933_s20  ;;  %p11533_p11 = pnand %p10613_p3, %p47_p5 }
  0x79   : > { %s440_s18 = sshll.u32 %s433_s25, 4  ;;  %s11537_s10 = scalar_lea.sflag [#allocation3], %s429_s17  ;;  %s11531_s18 = int_to_ptr.vmem [resolvable:$true] %s440_s18 }
  0x7a   : > { %s11158_s11 = scalar_lea.hbm %s11529_s22, 4096  ;;  %p11160_p9 = pneg %p11533_p11 }
  0x7b   : > { %p11159_p7 = scmp.ne.s32.totalorder %s11529_s22, %s11158_s11  ;;  %s11163_s20 = scalar_lea.hbm %s14352_s0, 8192 }
  0x7c   : > { %p11164_p1 = scmp.lt.u32.totalorder %s11529_s22, %s14352_s0  ;;  %p11165_p2 = scmp.lt.u32.totalorder %s11163_s20, %s11158_s11 }
  0x7d   : > { %p11161_p12 = pnand %p11160_p9, %p11159_p7  ;;  %p11167_p4 = scmp.lt.u32.totalorder %s11158_s11, %s11529_s22 }
  0x7e   : > { %p11166_p13 = por %p11165_p2, %p11164_p1 }
  0x7f   : > { %p11162_p0 = pneg %p11161_p12 }
  0x80   : > { %p11168_p8 = por %p11167_p4, %p11166_p13 }
  0x82   : > { %p11169_p6 = pnand %p11168_p8, %p11162_p0 }
  0x84   : > { %11172 = shalt.err (!%p11169_p6)
}
  0x85   : > { %s11173_s17 = scalar_lea.vmem %s11531_s18, 4096  ;;  %s11272_s30 = smov [#allocation2]  }
  0x86   : > { %p11174_p3 = scmp.ne.s32.totalorder %s11531_s18, %s11173_s17  ;;  %s11178_s25 = sshll.u32 %s11272_s30, 4  ;;  %s11179_s25 = int_to_ptr.vmem [resolvable:$false] %s11178_s25 }
  0x87   : > { %s11180_s15 = scalar_lea.vmem %s11179_s25, 8192  ;;  %p11181_p12 = scmp.lt.s32.totalorder %s11531_s18, %s11179_s25 }
  0x88   : > { %p11176_p5 = pnand %p11174_p3, %p11160_p9  ;;  %p11182_p1 = scmp.lt.s32.totalorder %s11180_s15, %s11173_s17 }
  0x8a   : > { %p11177_p7 = pneg %p11176_p5  ;;  %p11183_p2 = por %p11182_p1, %p11181_p12 }
  0x8c   : > { %p11184_p13 = pnand %p11183_p2, %p11177_p7 }
  0x8e   : > { %11187 = shalt.err (!%p11184_p13)
}
  0x8f   : > { %s14511_s11 = smov 8   ;;  %s14512_s19 = smov 128  }
  0x90   : > { %10604 = dma.hbm_to_vmem [thread:$0]  (!%p11533_p11), %s11529_s22, 4096, %s11531_s18, %s11537_s10, %s14512_s19, %s14512_s19, %s14511_s11  }
  0x91   : > { %p14513_p9 = scmp.ne.s32.totalorder %s14505_s16, 0 }
  0x93   : > { %452 = sbr.rel (%p14513_p9) target bundleno = 2879 (0xb3f), region = 72 }
  0x9a   : > { %s11571_s20 = sand.u32 1, %s11254_s26   ;;  %p14514_p0 = scmp.ne.s32.totalorder %s14502_s14, 0 }
  0x9b   : > { %s7937_s21 = sshll.u32 %s11571_s20, 8  ;;  %s455_s8 = scalar_lea.sflag [#allocation3], %s11571_s20 }
  0x9c   : > { %s11577_s23 = scalar_lea.vmem [#allocation2], %s7937_s21 }
  0x9d   : > { %11233 = dma.done.wait (%p14514_p0), %s455_s8, 4096  }
  0x9e   : > { %11235 = vsyncadd (%p14514_p0), %s455_s8, 4294963200  ;;  %p14515_p11 = scmp.eq.s32.totalorder %s11372_s29, 0 }
  0xa0   : > { %11237 = dma.done.wait (%p14515_p11), [#allocation6], 5632   ;;  %p14516_p4 = pmov %p14515_p11 }
  0xa2   : > { %11239 = vsyncadd (%p14516_p4), [#allocation6], 4294961664  ;;  %p14517_p8 = pmov %p14516_p4 }
  0xa3   : > { %p14518_p6 = pmov %p14516_p4 }
  0xa4   : > { %11241 = dma.done.wait (%p14517_p8), [#allocation9], 11264  }
  0xa5   : > { %11243 = vsyncadd (%p14518_p6), [#allocation9], 4294956032  ;;  %v14381_v0 = vmov 1.0   ;;  %v11593_v1 = vld [vmem:[%s11577_s23 + $0x80] sm:$0xff]  ;;  %v11596_v2 = vld [vmem:[%s11577_s23 + $0x88] sm:$0xff]  ;;  %vm11275_vm0 = vmmov 0  }
  0xa6   : > { %1345 = vmatprep.mubr.f32.mxu1 %v14381_v0  ;;  %v11600_v3 = vpack.c.bf16 %v11596_v2, %v11593_v1  ;;  %v11603_v4 = vld [vmem:[%s11577_s23] sm:$0xff]  ;;  %v11606_v5 = vld [vmem:[%s11577_s23 + $0x8] sm:$0xff]  ;;  %v11609_v6 = vld [vmem:[%s11577_s23 + $0x90] sm:$0xff]  ;;  %v1367_v48 = vmul.f32 %v11593_v1, %v11593_v1  ;;  %v1368_v49 = vmul.f32 %v11596_v2, %v11596_v2  ;;  %vm1456_vm1 = vcmask 1040384   ;;  %s14624_s19 = sld [smem:[#allocation75_spill]]  ;;  %s14712_s14 = sld [smem:[#allocation77_spill]] }
  0xa7   : > { %v11613_v7 = vpack.c.bf16 %v11606_v5, %v11603_v4  ;;  %v11616_v8 = vld [vmem:[%s11577_s23 + $0x98] sm:$0xff]  ;;  %v11619_v9 = vld [vmem:[%s11577_s23 + $0x10] sm:$0xff]  ;;  %v11630_v12 = vld [vmem:[%s11577_s23 + $0xa0] sm:$0xff]  ;;  %v1351_v50 = vmul.f32 %v11603_v4, %v11603_v4  ;;  %v1352_v51 = vmul.f32 %v11606_v5, %v11606_v5  ;;  %v1369_v54 = vmul.f32 %v11609_v6, %v11609_v6  ;;  %s14732_s11 = sld [smem:[#allocation76_spill]]  ;;  %s14189_s16 = scalar_lea.vmem [#allocation11], %s7937_s21 }
  0xa8   : > { %14519 = vst [vmem:[#allocation18_spill] sm:$0xff] %v11600_v3  ;;  %v11622_v10 = vld [vmem:[%s11577_s23 + $0x18] sm:$0xff]  ;;  %9797 = vmatprep.subr.bf16.mxu1 %v11600_v3  ;;  %v11627_v11 = vpack.c.bf16 %v11616_v8, %v11609_v6  ;;  %v11633_v13 = vld [vmem:[%s11577_s23 + $0xa8] sm:$0xff]  ;;  %v11646_v16 = vld [vmem:[%s11577_s23 + $0x20] sm:$0xff]  ;;  %v9828_v53 = vpack.c.bf16 %v1368_v49, %v1367_v48  ;;  %v1370_v55 = vmul.f32 %v11616_v8, %v11616_v8  ;;  %vm1458_vm2 = vcmask 523264   ;;  %s8327_s21 = sshll.u32 %s11372_s29, 12 }
  0xa9   : > { %14520 = vst [vmem:[#allocation19_spill] sm:$0xff] %v11613_v7  ;;  %9799 = vmatpush3.bf16.msra.mxu1 %v11613_v7  ;;  %v11638_v14 = vpack.c.bf16 %v11622_v10, %v11619_v9  ;;  %v11643_v15 = vpack.c.bf16 %v11633_v13, %v11630_v12  ;;  %v11649_v17 = vld [vmem:[%s11577_s23 + $0x28] sm:$0xff]  ;;  %v11652_v18 = vld [vmem:[%s11577_s23 + $0xb0] sm:$0xff]  ;;  %v11655_v19 = vld [vmem:[%s11577_s23 + $0xb8] sm:$0xff]  ;;  %v1353_v56 = vmul.f32 %v11619_v9, %v11619_v9  ;;  %vm1898_vm6 = vsmask.f32 256 }
  0xaa   : > { %14521 = vst [vmem:[#allocation20_spill] sm:$0xff] %v11627_v11  ;;  %9801 = vmatprep.subr.bf16.mxu1 %v11627_v11  ;;  %v11660_v20 = vpack.c.bf16 %v11649_v17, %v11646_v16  ;;  %v11665_v21 = vpack.c.bf16 %v11655_v19, %v11652_v18  ;;  %v11668_v22 = vld [vmem:[%s11577_s23 + $0x30] sm:$0xff]  ;;  %v11671_v23 = vld [vmem:[%s11577_s23 + $0x38] sm:$0xff]  ;;  %v11674_v24 = vld [vmem:[%s11577_s23 + $0xc0] sm:$0xff]  ;;  %v1354_v57 = vmul.f32 %v11622_v10, %v11622_v10  ;;  %s7815_s22 = sshll.u32 %s14189_s16, 4  ;;  %s14757_s17 = sld [smem:[#allocation79_spill]]  ;;  %s14305_s22 = int_to_ptr.vmem [resolvable:$true] %s7815_s22 }
  0xab   : > { %14522 = vst [vmem:[#allocation21_spill] sm:$0xff] %v11638_v14  ;;  %14523 = vst [vmem:[#allocation22_spill] sm:$0xff] %v11643_v15  ;;  %v11677_v25 = vld [vmem:[%s11577_s23 + $0xc8] sm:$0xff]  ;;  %v11680_v26 = vld [vmem:[%s11577_s23 + $0x40] sm:$0xff]  ;;  %v11688_v28 = vpack.c.bf16 %v11671_v23, %v11668_v22  ;;  %v9830_v58 = vpack.c.bf16 %v1352_v51, %v1351_v50  ;;  %v9832_v59 = vpack.c.bf16 %v1370_v55, %v1369_v54  ;;  %s7802_s29 = scalar_lea.sflag [#allocation4], %s11571_s20  ;;  %s11188_s25 = scalar_lea.vmem %s14305_s22, 4096 }
  0xac   : > { %14524 = vst [vmem:[#allocation23_spill] sm:$0xff] %v11660_v20  ;;  %14525 = vst [vmem:[#allocation24_spill] sm:$0xff] %v11665_v21  ;;  %v11683_v27 = vld [vmem:[%s11577_s23 + $0x48] sm:$0xff]  ;;  %v11691_v29 = vld [vmem:[%s11577_s23 + $0xd0] sm:$0xff]  ;;  %v11699_v31 = vpack.c.bf16 %v11677_v25, %v11674_v24  ;;  %v1371_v60 = vmul.f32 %v11630_v12, %v11630_v12  ;;  %v1372_v61 = vmul.f32 %v11633_v13, %v11633_v13  ;;  %p11189_p3 = scmp.ne.s32.totalorder %s14305_s22, %s11188_s25  ;;  %s11278_s15 = smov [#allocation11]  }
  0xad   : > { %9803 = vmatpush3.bf16.msra.mxu1 %v11638_v14  ;;  %14526 = vst [vmem:[#allocation25_spill] sm:$0xff] %v11688_v28  ;;  %v11694_v30 = vld [vmem:[%s11577_s23 + $0xd8] sm:$0xff]  ;;  %v11702_v32 = vld [vmem:[%s11577_s23 + $0x50] sm:$0xff]  ;;  %v11710_v34 = vpack.c.bf16 %v11683_v27, %v11680_v26  ;;  %v11713_v35 = vld [vmem:[%s11577_s23 + $0xe0] sm:$0xff]  ;;  %v1355_v62 = vmul.f32 %v11646_v16, %v11646_v16  ;;  %v1356_v63 = vmul.f32 %v11649_v17, %v11649_v17 }
  0xae   : > { %9805 = vmatprep.subr.bf16.mxu1 %v11643_v15  ;;  %14527 = vst [vmem:[#allocation26_spill] sm:$0xff] %v11699_v31  ;;  %v11705_v33 = vld [vmem:[%s11577_s23 + $0x58] sm:$0xff]  ;;  %v11716_v36 = vld [vmem:[%s11577_s23 + $0xe8] sm:$0xff]  ;;  %v11721_v37 = vpack.c.bf16 %v11694_v30, %v11691_v29  ;;  %v11724_v38 = vld [vmem:[%s11577_s23 + $0x60] sm:$0xff]  ;;  %v9834_v48 = vpack.c.bf16 %v1354_v57, %v1353_v56  ;;  %v9836_v49 = vpack.c.bf16 %v1372_v61, %v1371_v60  ;;  %p11190_p5 = pnand %p11189_p3, %p11516_p10 }
  0xaf   : > { %14528 = vst [vmem:[#allocation27_spill] sm:$0xff] %v11710_v34  ;;  %v11727_v39 = vld [vmem:[%s11577_s23 + $0x68] sm:$0xff]  ;;  %v11732_v40 = vpack.c.bf16 %v11705_v33, %v11702_v32  ;;  %v11735_v41 = vld [vmem:[%s11577_s23 + $0xf0] sm:$0xff]  ;;  %v11738_v42 = vld [vmem:[%s11577_s23 + $0xf8] sm:$0xff]  ;;  %v11743_v43 = vpack.c.bf16 %v11716_v36, %v11713_v35  ;;  %v1373_v50 = vmul.f32 %v11652_v18, %v11652_v18  ;;  %v1374_v51 = vmul.f32 %v11655_v19, %v11655_v19 }
  0xb0   : > { %14529 = vst [vmem:[#allocation28_spill] sm:$0xff] %v11721_v37  ;;  %v11746_v44 = vld [vmem:[%s11577_s23 + $0x70] sm:$0xff]  ;;  %v11749_v45 = vld [vmem:[%s11577_s23 + $0x78] sm:$0xff]  ;;  %v11754_v46 = vpack.c.bf16 %v11727_v39, %v11724_v38  ;;  %v11759_v47 = vpack.c.bf16 %v11738_v42, %v11735_v41  ;;  %v1358_v54 = vmul.f32 %v11671_v23, %v11671_v23  ;;  %v9838_v55 = vpack.c.bf16 %v1356_v63, %v1355_v62  ;;  %vm12276_vm7 = vmand %vm1456_vm1, %vm1898_vm6  ;;  %s14303_s30 = scalar_lea.hbm %s14757_s17, %s8327_s21  ;;  %p11191_p7 = pneg %p11190_p5 }
  0xb1   : > { %9807 = vmatpush3.bf16.msra.mxu1 %v11660_v20  ;;  %14530 = vst [vmem:[#allocation29_spill] sm:$0xff] %v11732_v40  ;;  %14531 = vst [vmem:[#allocation30_spill] sm:$0xff] %v11743_v43  ;;  %v11772_v52 = vpack.c.bf16 %v11749_v45, %v11746_v44  ;;  %v9840_v56 = vpack.c.bf16 %v1374_v51, %v1373_v50  ;;  %v1375_v57 = vmul.f32 %v11674_v24, %v11674_v24 }
  0xb2   : > { %9809 = vmatprep.subr.bf16.mxu1 %v11665_v21  ;;  %14532 = vst [vmem:[#allocation31_spill] sm:$0xff] %v11754_v46  ;;  %14533 = vst [vmem:[#allocation32_spill] sm:$0xff] %v11759_v47  ;;  %v1359_v18 = vmul.f32 %v11680_v26, %v11680_v26  ;;  %v1360_v19 = vmul.f32 %v11683_v27, %v11683_v27  ;;  %v1377_v61 = vmul.f32 %v11691_v29, %v11691_v29 }
  0xb3   : > { %14534 = vst [vmem:[#allocation33_spill] sm:$0xff] %v11772_v52  ;;  %v1378_v62 = vmul.f32 %v11694_v30, %v11694_v30  ;;  %v1361_v24 = vmul.f32 %v11702_v32, %v11702_v32  ;;  %v1380_v50 = vmul.f32 %v11716_v36, %v11716_v36  ;;  %v1363_v29 = vmul.f32 %v11724_v38, %v11724_v38 }
  0xb4   : > { %v9846_v63 = vpack.c.bf16 %v1360_v19, %v1359_v18  ;;  %v1364_v30 = vmul.f32 %v11727_v39, %v11727_v39  ;;  %v1366_v36 = vmul.f32 %v11749_v45, %v11749_v45  ;;  %v1271_v18 = vld [vmem:[#allocation5] sm:$0xff]  ;;  %v1272_v19 = vld [vmem:[#allocation5 + $0x8] sm:$0xff] }
  0xb5   : > { %9811 = vmatpush3.bf16.msra.mxu1 %v11688_v28  ;;  %v11045_v28 = vld [vmem:[%s11577_s23 + $0xe8] sm:$0xff] }
  0xb6   : > { %9813 = vmatprep.subr.bf16.mxu1 %v11699_v31 }
  0xb9   : > { %9815 = vmatpush3.bf16.msra.mxu1 %v11710_v34 }
  0xba   : > { %9817 = vmatprep.subr.bf16.mxu1 %v11721_v37 }
  0xbd   : > { %9819 = vmatpush3.bf16.msra.mxu1 %v11732_v40 }
  0xbe   : > { %9821 = vmatprep.subr.bf16.mxu1 %v11743_v43 }
  0xc1   : > { %9823 = vmatpush3.bf16.msra.mxu1 %v11754_v46 }
  0xc2   : > { %9825 = vmatprep.subr.bf16.mxu1 %v11759_v47 }
  0xc5   : > { %9827 = vmatpush3.bf16.msra.mxu1 %v11772_v52  ;;  %v11043_v52 = vld [vmem:[%s11577_s23 + $0xd8] sm:$0xff] }
  0xc6   : > { %9829 = vmatprep.subr.bf16.mxu1 %v9828_v53  ;;  %v1357_v53 = vmul.f32 %v11668_v22, %v11668_v22 }
  0xc8   : > { %1346 = vmatmul.mubr.f32.vlgmr.msra.gmra.mrb[0].mxu1 %v14381_v0 }
  0xc9   : > { %9831 = vmatpush3.bf16.msra.mxu1 %v9830_v58  ;;  %1447 = vmatprep.mubr.f32.mxu1 %v14381_v0  ;;  %v1376_v58 = vmul.f32 %v11677_v25, %v11677_v25  ;;  %v1362_v25 = vmul.f32 %v11705_v33, %v11705_v33 }
  0xca   : > { %9833 = vmatprep.subr.bf16.mxu1 %v9832_v59  ;;  %v9842_v59 = vpack.c.bf16 %v1358_v54, %v1357_v53  ;;  %v1381_v54 = vmul.f32 %v11735_v41, %v11735_v41 }
  0xcb   : > { %v9844_v60 = vpack.c.bf16 %v1376_v58, %v1375_v57  ;;  %v9850_v51 = vpack.c.bf16 %v1362_v25, %v1361_v24  ;;  %v1275_v25 = vld [vmem:[#allocation5 + $0x20] sm:$0xff] }
  0xcd   : > { %9835 = vmatpush3.bf16.msra.mxu1 %v9834_v48  ;;  %v9848_v48 = vpack.c.bf16 %v1378_v62, %v1377_v61  ;;  %v9861_v61 = vpack.c.bf16 %v1272_v19, %v1271_v18  ;;  %v1274_v62 = vld [vmem:[#allocation5 + $0x18] sm:$0xff]  ;;  %v10667_v18 = vld [vmem:[#allocation7 + $0x28] sm:$0xff]   ;;  %v10668_v19 = vld [vmem:[#allocation7 + $0x30] sm:$0xff]  }
  0xce   : > { %9837 = vmatprep.subr.bf16.mxu1 %v9836_v49  ;;  %v1379_v49 = vmul.f32 %v11713_v35, %v11713_v35  ;;  %v1365_v35 = vmul.f32 %v11746_v44, %v11746_v44 }
  0xd0   : > { %v9852_v53 = vpack.c.bf16 %v1380_v50, %v1379_v49  ;;  %v9858_v58 = vpack.c.bf16 %v1366_v36, %v1365_v35  ;;  %v1277_v49 = vld [vmem:[#allocation5 + $0x30] sm:$0xff]  ;;  %v1278_v50 = vld [vmem:[#allocation5 + $0x38] sm:$0xff] }
  0xd1   : > { %9839 = vmatpush3.bf16.msra.mxu1 %v9838_v55  ;;  %v1382_v55 = vmul.f32 %v11738_v42, %v11738_v42 }
  0xd2   : > { %9841 = vmatprep.subr.bf16.mxu1 %v9840_v56  ;;  %v9854_v56 = vpack.c.bf16 %v1364_v30, %v1363_v29  ;;  %v9870_v29 = vpack.c.bf16 %v1278_v50, %v1277_v49  ;;  %v14383_v30 = vmov 0.0  }
  0xd3   : > { %v9856_v57 = vpack.c.bf16 %v1382_v55, %v1381_v54  ;;  %8926 = vmatprep.mubr.msk.f32.mxu0 %vm11275_vm0, %v14383_v30 }
  0xd5   : > { %9843 = vmatpush3.bf16.msra.mxu1 %v9842_v59  ;;  %v1273_v59 = vld [vmem:[#allocation5 + $0x10] sm:$0xff] }
  0xd6   : > { %9845 = vmatprep.subr.bf16.mxu1 %v9844_v60  ;;  %v14377_v60 = vmov 0.0|0.0   ;;  %v9864_v24 = vpack.c.bf16 %v1274_v62, %v1273_v59  ;;  %v10669_v59 = vld [vmem:[#allocation7 + $0x38] sm:$0xff]   ;;  %v14379_v62 = vmov 0  }
  0xd7   : > { %9860 = vmatprep.subr.bf16.mxu0 %v14377_v60 }
  0xd8   : > { %9862 = vmatpush3.bf16.msra.mxu0 %v9861_v61  ;;  %v11844_v61 = vld [vmem:[#allocation7] sm:$0xff]  }
  0xd9   : > { %9847 = vmatpush3.bf16.msra.mxu1 %v9846_v63  ;;  %9863 = vmatprep.subr.bf16.mxu0 %v14377_v60  ;;  %v1276_v63 = vld [vmem:[#allocation5 + $0x28] sm:$0xff] }
  0xda   : > { %9849 = vmatprep.subr.bf16.mxu1 %v9848_v48  ;;  %v9867_v48 = vpack.c.bf16 %v1276_v63, %v1275_v25 }
  0xdc   : > { %9865 = vmatpush3.bf16.msra.mxu0 %v9864_v24 }
  0xdd   : > { %9851 = vmatpush3.bf16.msra.mxu1 %v9850_v51  ;;  %9866 = vmatprep.subr.bf16.mxu0 %v14377_v60 }
  0xde   : > { %9853 = vmatprep.subr.bf16.mxu1 %v9852_v53 }
  0xe0   : > { %9868 = vmatpush3.bf16.msra.mxu0 %v9867_v48 }
  0xe1   : > { %9855 = vmatpush3.bf16.msra.mxu1 %v9854_v56  ;;  %9869 = vmatprep.subr.bf16.mxu0 %v14377_v60 }
  0xe2   : > { %9857 = vmatprep.subr.bf16.mxu1 %v9856_v57 }
  0xe4   : > { %9871 = vmatpush3.bf16.msra.mxu0 %v9870_v29 }
  0xe5   : > { %9859 = vmatpush3.bf16.msra.mxu1 %v9858_v58  ;;  %v10666_v58 = vld [vmem:[#allocation7 + $0x20] sm:$0xff]  }
  0xe6   : > { %8929 = vmatprep.subr.bf16.mxu1 %v10666_v58 }
  0xe8   : > { %1448 = vmatmul.mubr.f32.vlgmr.msra.gmra.mrb[2].mxu1 %v14381_v0 }
  0xe9   : > { %8930 = vmatpush3.bf16.msra.mxu1 %v10666_v58  ;;  %8937 = vmatprep.mubr.bf16.mxu1 %v14379_v62  ;;  %v11038_v62 = vld [vmem:[%s11577_s23 + $0xb0] sm:$0xff] }
  0xea   : > { %8931 = vmatprep.subr.bf16.mxu1 %v10667_v18 }
  0xed   : > { %8932 = vmatpush3.bf16.msra.mxu1 %v10667_v18 }
  0xee   : > { %8933 = vmatprep.subr.bf16.mxu1 %v10668_v19 }
  0xf1   : > { %8934 = vmatpush3.bf16.msra.mxu1 %v10668_v19 }
  0xf2   : > { %8935 = vmatprep.subr.bf16.mxu1 %v10669_v59 }
  0xf5   : > { %8936 = vmatpush3.bf16.msra.mxu1 %v10669_v59 }
  0xf6   : > { %8969 = vmatprep.subr.bf16.mxu1 %v11844_v61 }
 0x19b   : > { %v8360_v51 = vpop.f32.mrb[0].mxu1 }
 0x19c   : > { %v8361_v53 = vpop.f32.mrb[1].mxu1 }
 0x19d   : > { %v8362_v54 = vadd.f32 %v8361_v53, %v8360_v51  ;;  %v518_v51 = vlaneseq }
 0x19f   : > { %v11848_v53 = vshrl.u32 %v518_v51, 7 }
 0x1bb   : > { %v8395_v55 = vpop.f32.mrb[2].mxu1 }
 0x1bc   : > { %v8396_v35 = vpop.f32.mrb[3].mxu1 }
 0x1bd   : > { %v8397_v36 = vadd.f32 %v8396_v35, %v8395_v55  ;;  %v7980_v55 = vld [vmem:[%s14354_s2] ss:$0 sm:$0xff]  ;;  %v14376_v35 = vsub.s32 0, %v11848_v53 }
 0x1bf   : > { %v1454_v56 = vrot.slane %v8397_v36, 7 }
 0x1c1   : > { %v1457_v57 = vsel %vm1456_vm1, %v8362_v54, %v1454_v56  ;;  %v14375_v56 = vsub.s32 1, %v11848_v53 }
 0x1c2   : > { %8927 = vmatmul.mubr.msk.f32.vlgmr.msra.gmra.mrb[0].mxu0 %vm1458_vm2, %v1457_v57 }
 0x1c3   : > { %4384 = vmatprep.mubr.f32.mxu0 %v14381_v0 }
 0x295   : > { %v1528_v24 = vpop.f32.mrb[0].mxu0 }
 0x296   : > { %v1532_v25 = vmul.f32 0.001953125, %v1528_v24  ;;  %v8928_v63 = vpop.f32.mrb[1].mxu0 }
 0x297   : > { %v11872_v63 = vld [vmem:[%s14355_s3] ss:$0 sm:$0xff] }
 0x298   : > { %v1533_v48 = vmul.f32 %v1532_v25, %v1532_v25  ;;  %v11857_v57 = vrot.slane %v1532_v25, %v14376_v35 }
 0x29a   : > { %v1535_v49 = vrot.slane %v1533_v48, 7  ;;  %v1574_v18 = vsub.f32 %v11735_v41, %v11857_v57  ;;  %v1575_v19 = vsub.f32 %v11738_v42, %v11857_v57  ;;  %v1545_v48 = vsub.f32 %v11606_v5, %v11857_v57 }
 0x29b   : > { %v1549_v5 = vsub.f32 %v11649_v17, %v11857_v57  ;;  %v1555_v17 = vsub.f32 %v11705_v33, %v11857_v57  ;;  %v1559_v33 = vsub.f32 %v11749_v45, %v11857_v57  ;;  %v1573_v20 = vsub.f32 %v11045_v28, %v11857_v57 }
 0x29c   : > { %v1537_v50 = vsub.f32 %v1532_v25, %v1535_v49  ;;  %v1544_v25 = vsub.f32 %v11603_v4, %v11857_v57  ;;  %v1546_v49 = vsub.f32 %v11619_v9, %v11857_v57  ;;  %v1548_v4 = vsub.f32 %v11646_v16, %v11857_v57 }
 0x29d   : > { %v1551_v9 = vsub.f32 %v11671_v23, %v11857_v57  ;;  %v1554_v16 = vsub.f32 %v11702_v32, %v11857_v57  ;;  %v1556_v23 = vsub.f32 %v11724_v38, %v11857_v57  ;;  %v1558_v32 = vsub.f32 %v11746_v44, %v11857_v57 }
 0x29e   : > { %v1538_v29 = vadd.f32 1e-06, %v1537_v50  ;;  %v1560_v38 = vsub.f32 %v11593_v1, %v11857_v57  ;;  %v1562_v44 = vsub.f32 %v11609_v6, %v11857_v57  ;;  %v1563_v1 = vsub.f32 %v11616_v8, %v11857_v57 }
 0x29f   : > { %v1564_v6 = vsub.f32 %v11630_v12, %v11857_v57  ;;  %v1565_v8 = vsub.f32 %v11633_v13, %v11857_v57 }
 0x2a0   : > { %10778 = vrsqrt.f32 %v1538_v29  ;;  %v1547_v29 = vsub.f32 %v11622_v10, %v11857_v57  ;;  %v1553_v10 = vsub.f32 %v11683_v27, %v11857_v57 }
 0x2aa   : > { %v10779_v54 = vpop.eup %10778 }
 0x2ab   : > { %v1582_v36 = vmul.f32 %v10779_v54, %v7980_v55  ;;  %v1550_v54 = vsub.f32 %v11668_v22, %v11857_v57 }
 0x2ad   : > { %v11861_v58 = vrot.slane %v1582_v36, %v14375_v56  ;;  %v1552_v36 = vsub.f32 %v11680_v26, %v11857_v57  ;;  %v1557_v26 = vsub.f32 %v11727_v39, %v11857_v57  ;;  %v1561_v39 = vsub.f32 %v11596_v2, %v11857_v57 }
 0x2af   : > { %v1617_v59 = vmul.f32 %v11861_v58, %v1574_v18  ;;  %v1618_v24 = vmul.f32 %v11861_v58, %v1575_v19  ;;  %v1587_v50 = vmul.f32 %v11861_v58, %v1544_v25  ;;  %v1588_v51 = vmul.f32 %v11861_v58, %v1545_v48 }
 0x2b0   : > { %v1589_v55 = vmul.f32 %v11861_v58, %v1546_v49  ;;  %v1590_v18 = vmul.f32 %v11861_v58, %v1547_v29  ;;  %v1591_v22 = vmul.f32 %v11861_v58, %v1548_v4  ;;  %v1592_v27 = vmul.f32 %v11861_v58, %v1549_v5 }
 0x2b1   : > { %v11879_v41 = vadd.f32 %v11872_v63, %v1617_v59  ;;  %v11882_v42 = vadd.f32 %v11872_v63, %v1618_v24  ;;  %v11910_v19 = vadd.f32 %v11872_v63, %v1587_v50  ;;  %v11918_v59 = vadd.f32 %v11872_v63, %v1588_v51 }
 0x2b2   : > { %v1593_v24 = vmul.f32 %v11861_v58, %v1550_v54  ;;  %v11926_v25 = vadd.f32 %v11872_v63, %v1589_v55  ;;  %v1594_v48 = vmul.f32 %v11861_v58, %v1551_v9  ;;  %v11934_v49 = vadd.f32 %v11872_v63, %v1590_v18 }
 0x2b3   : > { %v1595_v45 = vmul.f32 %v11861_v58, %v1552_v36  ;;  %v11940_v50 = vadd.f32 %v11872_v63, %v1591_v22  ;;  %v7982_v29 = vmul.f32 -1.442695, %v11910_v19  ;;  %v1596_v2 = vmul.f32 %v11861_v58, %v1553_v10 }
 0x2b4   : > { %v11947_v51 = vadd.f32 %v11872_v63, %v1592_v27  ;;  %v7983_v4 = vmul.f32 -1.442695, %v11918_v59  ;;  %v1597_v5 = vmul.f32 %v11861_v58, %v1554_v16  ;;  %v11954_v54 = vadd.f32 %v11872_v63, %v1593_v24 }
 0x2b5   : > { %v7984_v55 = vmul.f32 -1.442695, %v11926_v25  ;;  %v1598_v9 = vmul.f32 %v11861_v58, %v1555_v17  ;;  %v11961_v36 = vadd.f32 %v11872_v63, %v1594_v48  ;;  %v7985_v10 = vmul.f32 -1.442695, %v11934_v49 }
 0x2b6   : > { %v1599_v18 = vmul.f32 %v11861_v58, %v1556_v23  ;;  %v11966_v12 = vadd.f32 %v11872_v63, %v1595_v45  ;;  %10780 = vpow2.f32 %v7982_v29  ;;  %v7986_v16 = vmul.f32 -1.442695, %v11940_v50 }
 0x2b7   : > { %v1600_v22 = vmul.f32 %v11861_v58, %v1557_v26  ;;  %v11971_v27 = vadd.f32 %v11872_v63, %v1596_v2  ;;  %10782 = vpow2.f32 %v7983_v4  ;;  %v7987_v13 = vmul.f32 -1.442695, %v11947_v51 }
 0x2b8   : > { %v1601_v17 = vmul.f32 %v11861_v58, %v1558_v32  ;;  %v11976_v24 = vadd.f32 %v11872_v63, %v1597_v5  ;;  %10784 = vpow2.f32 %v7984_v55  ;;  %v7988_v23 = vmul.f32 -1.442695, %v11954_v54 }
 0x2b9   : > { %v1602_v48 = vmul.f32 %v11861_v58, %v1559_v33  ;;  %v11981_v45 = vadd.f32 %v11872_v63, %v1598_v9  ;;  %10786 = vpow2.f32 %v7985_v10  ;;  %v7989_v26 = vmul.f32 -1.442695, %v11961_v36 }
 0x2ba   : > { %v1603_v29 = vmul.f32 %v11861_v58, %v1560_v38  ;;  %v11986_v2 = vadd.f32 %v11872_v63, %v1599_v18  ;;  %10788 = vpow2.f32 %v7986_v16  ;;  %v7990_v32 = vmul.f32 -1.442695, %v11966_v12 }
 0x2bb   : > { %v1604_v4 = vmul.f32 %v11861_v58, %v1561_v39  ;;  %v11991_v5 = vadd.f32 %v11872_v63, %v1600_v22  ;;  %10790 = vpow2.f32 %v7987_v13  ;;  %v7991_v33 = vmul.f32 -1.442695, %v11971_v27 }
 0x2bc   : > { %v1605_v55 = vmul.f32 %v11861_v58, %v1562_v44  ;;  %v11996_v9 = vadd.f32 %v11872_v63, %v1601_v17  ;;  %10792 = vpow2.f32 %v7988_v23  ;;  %v7992_v38 = vmul.f32 -1.442695, %v11976_v24 }
 0x2bd   : > { %v1606_v10 = vmul.f32 %v11861_v58, %v1563_v1  ;;  %v12001_v18 = vadd.f32 %v11872_v63, %v1602_v48  ;;  %10794 = vpow2.f32 %v7989_v26  ;;  %v7993_v39 = vmul.f32 -1.442695, %v11981_v45 }
 0x2be   : > { %v1607_v16 = vmul.f32 %v11861_v58, %v1564_v6  ;;  %v12006_v22 = vadd.f32 %v11872_v63, %v1603_v29  ;;  %10796 = vpow2.f32 %v7990_v32  ;;  %v7994_v44 = vmul.f32 -1.442695, %v11986_v2 }
 0x2bf   : > { %v1608_v13 = vmul.f32 %v11861_v58, %v1565_v8  ;;  %v12011_v17 = vadd.f32 %v11872_v63, %v1604_v4  ;;  %10798 = vpow2.f32 %v7991_v33  ;;  %v7995_v1 = vmul.f32 -1.442695, %v11991_v5 }
 0x2c0   : > { %v10781_v23 = vpop.eup %10780  ;;  %v12015_v48 = vadd.f32 %v11872_v63, %v1605_v55  ;;  %10800 = vpow2.f32 %v7992_v38  ;;  %v7996_v6 = vmul.f32 -1.442695, %v11996_v9  ;;  %v12019_v29 = vadd.f32 %v11872_v63, %v1606_v10 }
 0x2c1   : > { %v10783_v26 = vpop.eup %10782  ;;  %10802 = vpow2.f32 %v7993_v39  ;;  %v7997_v8 = vmul.f32 -1.442695, %v12001_v18  ;;  %v12023_v4 = vadd.f32 %v11872_v63, %v1607_v16  ;;  %v7998_v33 = vmul.f32 -1.442695, %v12006_v22 }
 0x2c2   : > { %v10785_v32 = vpop.eup %10784  ;;  %10804 = vpow2.f32 %v7994_v44  ;;  %v12027_v38 = vadd.f32 %v11872_v63, %v1608_v13  ;;  %v7999_v56 = vmul.f32 -1.442695, %v12011_v17  ;;  %v8000_v39 = vmul.f32 -1.442695, %v12015_v48 }
 0x2c3   : > { %v10787_v55 = vpop.eup %10786  ;;  %10806 = vpow2.f32 %v7995_v1  ;;  %v8001_v60 = vmul.f32 -1.442695, %v12019_v29  ;;  %v1566_v44 = vsub.f32 %v11038_v62, %v11857_v57  ;;  %v8002_v0 = vmul.f32 -1.442695, %v12023_v4 }
 0x2c4   : > { %v10789_v10 = vpop.eup %10788  ;;  %10808 = vpow2.f32 %v7996_v6  ;;  %v8003_v1 = vmul.f32 -1.442695, %v12027_v38  ;;  %v1753_v47 = vadd.f32 1.0, %v10781_v23  ;;  %v1754_v43 = vadd.f32 1.0, %v10783_v26  ;;  %v11039_v23 = vld [vmem:[%s11577_s23 + $0xb8] sm:$0xff] }
 0x2c5   : > { %v10791_v35 = vpop.eup %10790  ;;  %10810 = vpow2.f32 %v7997_v8  ;;  %v1609_v6 = vmul.f32 %v11861_v58, %v1566_v44  ;;  %v1755_v62 = vadd.f32 1.0, %v10785_v32  ;;  %v1756_v31 = vadd.f32 1.0, %v10787_v55  ;;  %v11040_v32 = vld [vmem:[%s11577_s23 + $0xc0] sm:$0xff] }
 0x2c6   : > { %v10793_v16 = vpop.eup %10792  ;;  %10812 = vpow2.f32 %v7998_v33  ;;  %v1757_v44 = vadd.f32 1.0, %v10789_v10  ;;  %v1758_v26 = vadd.f32 1.0, %v10791_v35  ;;  %v1568_v55 = vsub.f32 %v11040_v32, %v11857_v57  ;;  %v11042_v35 = vld [vmem:[%s11577_s23 + $0xd0] sm:$0xff] }
 0x2c7   : > { %v10795_v13 = vpop.eup %10794  ;;  %10814 = vpow2.f32 %v7999_v56  ;;  %v12040_v21 = vadd.f32 %v11872_v63, %v1609_v6  ;;  %v11041_v6 = vld [vmem:[%s11577_s23 + $0xc8] sm:$0xff] }
 0x2c8   : > { %v10797_v30 = vpop.eup %10796  ;;  %10816 = vpow2.f32 %v8000_v39  ;;  %v1760_v11 = vadd.f32 1.0, %v10795_v13 }
 0x2c9   : > { %v10799_v8 = vpop.eup %10798  ;;  %10818 = vpow2.f32 %v8001_v60  ;;  %v1567_v60 = vsub.f32 %v11039_v23, %v11857_v57  ;;  %v1611_v23 = vmul.f32 %v11861_v58, %v1568_v55 }
 0x2ca   : > { %v10801_v37 = vpop.eup %10800  ;;  %10820 = vpow2.f32 %v8002_v0 }
 0x2cb   : > { %v10803_v33 = vpop.eup %10802  ;;  %10822 = vpow2.f32 %v8003_v1  ;;  %v1759_v1 = vadd.f32 1.0, %v10793_v16  ;;  %v1610_v10 = vmul.f32 %v11861_v58, %v1567_v60  ;;  %v8004_v16 = vmul.f32 -1.442695, %v12040_v21 }
 0x2cc   : > { %v12037_v56 = vpop.eup %10804  ;;  %10824 = vrcp.f32 %v1753_v47  ;;  %v1569_v47 = vsub.f32 %v11041_v6, %v11857_v57  ;;  %v8012_v6 = vmul.f32 -1.442695, %v11879_v41  ;;  %v8013_v60 = vmul.f32 -1.442695, %v11882_v42 }
 0x2cd   : > { %v12042_v39 = vpop.eup %10806  ;;  %10826 = vrcp.f32 %v1754_v43  ;;  %v1570_v43 = vsub.f32 %v11042_v35, %v11857_v57  ;;  %v12072_v35 = vadd.f32 %v11872_v63, %v1610_v10  ;;  %v12079_v46 = vadd.f32 %v11872_v63, %v1611_v23 }
 0x2ce   : > { %v12046_v0 = vpop.eup %10808  ;;  %10828 = vrcp.f32 %v1755_v62  ;;  %v1612_v32 = vmul.f32 %v11861_v58, %v1569_v47  ;;  %v1764_v23 = vadd.f32 1.0, %v10803_v33 }
 0x2cf   : > { %v12050_v15 = vpop.eup %10810  ;;  %10830 = vrcp.f32 %v1756_v31  ;;  %v1613_v13 = vmul.f32 %v11861_v58, %v1570_v43  ;;  %v1762_v43 = vadd.f32 1.0, %v10799_v8  ;;  %v8005_v14 = vmul.f32 -1.442695, %v12072_v35 }
 0x2d0   : > { %v12055_v3 = vpop.eup %10812  ;;  %10832 = vrcp.f32 %v1757_v44  ;;  %v1761_v44 = vadd.f32 1.0, %v10797_v30  ;;  %v12086_v10 = vadd.f32 %v11872_v63, %v1612_v32 }
 0x2d1   : > { %v12061_v62 = vpop.eup %10814  ;;  %10834 = vrcp.f32 %v1758_v26  ;;  %v1571_v26 = vsub.f32 %v11043_v52, %v11857_v57  ;;  %v12091_v52 = vadd.f32 %v11872_v63, %v1613_v13  ;;  %v1616_v13 = vmul.f32 %v11861_v58, %v1573_v20 }
 0x2d2   : > { %v12065_v31 = vpop.eup %10816  ;;  %10836 = vrcp.f32 %v1759_v1  ;;  %v11044_v1 = vld [vmem:[%s11577_s23 + $0xe0] sm:$0xff]  ;;  %v8007_v33 = vmul.f32 -1.442695, %v12086_v10  ;;  %v1765_v20 = vadd.f32 1.0, %v12037_v56  ;;  %s14733_s23 = sld [smem:[#allocation78_spill]] }
 0x2d3   : > { %v12069_v55 = vpop.eup %10818  ;;  %10838 = vrcp.f32 %v1760_v11  ;;  %v1572_v34 = vsub.f32 %v11044_v1, %v11857_v57  ;;  %v1763_v11 = vadd.f32 1.0, %v10801_v37 }
 0x2d4   : > { %v12074_v47 = vpop.eup %10820  ;;  %10840 = vpow2.f32 %v8004_v16  ;;  %v1614_v16 = vmul.f32 %v11861_v58, %v1571_v26 }
 0x2d5   : > { %v12081_v40 = vpop.eup %10822  ;;  %10842 = vpow2.f32 %v8012_v6  ;;  %v1615_v37 = vmul.f32 %v11861_v58, %v1572_v34  ;;  %v8006_v6 = vmul.f32 -1.442695, %v12079_v46 }
 0x2d6   : > { %v10825_v30 = vpop.eup %10824  ;;  %10844 = vpow2.f32 %v8013_v60 }
 0x2d7   : > { %v10827_v8 = vpop.eup %10826  ;;  %10846 = vrcp.f32 %v1761_v44  ;;  %v1849_v32 = vmul.f32 %v10825_v30, %v11910_v19  ;;  %v8008_v44 = vmul.f32 -1.442695, %v12091_v52  ;;  %v10671_v30 = vld [vmem:[#allocation7 + $0x8] sm:$0xff]  }
 0x2d8   : > { %v10829_v1 = vpop.eup %10828  ;;  %10848 = vrcp.f32 %v1762_v43  ;;  %v1850_v28 = vmul.f32 %v10827_v8, %v11918_v59  ;;  %v12107_v59 = vadd.f32 %v11872_v63, %v1614_v16  ;;  %v12119_v8 = vadd.f32 %v11872_v63, %v1616_v13 }
 0x2d9   : > { %v10831_v57 = vpop.eup %10830  ;;  %10850 = vrcp.f32 %v1763_v11  ;;  %v1851_v60 = vmul.f32 %v10829_v1, %v11926_v25  ;;  %v12111_v11 = vadd.f32 %v11872_v63, %v1615_v37  ;;  %v1766_v25 = vadd.f32 1.0, %v12042_v39  ;;  %v10672_v63 = vld [vmem:[#allocation7 + $0x10] sm:$0xff]  }
 0x2da   : > { %v10833_v26 = vpop.eup %10832  ;;  %10852 = vrcp.f32 %v1764_v23  ;;  %v12103_v19 = vpack.c.bf16 %v1850_v28, %v1849_v32  ;;  %v1852_v34 = vmul.f32 %v10831_v57, %v11934_v49  ;;  %v1768_v16 = vadd.f32 1.0, %v12050_v15 }
 0x2db   : > { %v10835_v43 = vpop.eup %10834  ;;  %10854 = vpow2.f32 %v8005_v14  ;;  %v1767_v14 = vadd.f32 1.0, %v12046_v0  ;;  %v1853_v39 = vmul.f32 %v10833_v26, %v11940_v50  ;;  %v8009_v37 = vmul.f32 -1.442695, %v12107_v59 }
 0x2dc   : > { %v10837_v58 = vpop.eup %10836  ;;  %10856 = vpow2.f32 %v8006_v6  ;;  %8938 = vmatmul.mubr.msk.bf16.vlgmr.msra.gmra.mrb[4].mxu1 %vm1458_vm2, %v12103_v19  ;;  %v12116_v23 = vpack.c.bf16 %v1852_v34, %v1851_v60  ;;  %v1854_v32 = vmul.f32 %v10835_v43, %v11947_v51  ;;  %v8010_v15 = vmul.f32 -1.442695, %v12111_v11 }
 0x2dd   : > { %v10839_v49 = vpop.eup %10838  ;;  %10858 = vpow2.f32 %v8007_v33  ;;  %8970 = vmatpush3.bf16.msra.mxu1 %v11844_v61  ;;  %v1855_v61 = vmul.f32 %v10837_v58, %v11954_v54  ;;  %v8011_v57 = vmul.f32 -1.442695, %v12119_v8  ;;  %v1769_v51 = vadd.f32 1.0, %v12055_v3  ;;  %v10673_v33 = vld [vmem:[#allocation7 + $0x18] sm:$0xff]  }
 0x2de   : > { %v12123_v56 = vpop.eup %10840  ;;  %10860 = vpow2.f32 %v8008_v44  ;;  %8941 = vmatprep.mubr.msk.bf16.mxu1 %vm1458_vm2, %v12116_v23  ;;  %8971 = vmatprep.subr.bf16.mxu1 %v10671_v30  ;;  %v1856_v0 = vmul.f32 %v10839_v49, %v11961_v36  ;;  %v12136_v13 = vpack.c.bf16 %v1854_v32, %v1853_v39  ;;  %v1770_v36 = vadd.f32 1.0, %v12061_v62 }
 0x2df   : > { %v10843_v1 = vpop.eup %10842  ;;  %10862 = vrcp.f32 %v1765_v20  ;;  %v1771_v44 = vadd.f32 1.0, %v12065_v31  ;;  %v1772_v3 = vadd.f32 1.0, %v12069_v55  ;;  %v12149_v31 = vld [vmem:[#allocation7 + $0x40] sm:$0xff]   ;;  %v1773_v32 = vadd.f32 1.0, %v12074_v47 }
 0x2e0   : > { %v10845_v6 = vpop.eup %10844  ;;  %10864 = vrcp.f32 %v1766_v25  ;;  %v12139_v60 = vpack.c.bf16 %v1856_v0, %v1855_v61  ;;  %v1783_v43 = vadd.f32 1.0, %v10843_v1 }
 0x2e1   : > { %v10847_v28 = vpop.eup %10846  ;;  %10866 = vrcp.f32 %v1767_v14  ;;  %8972 = vmatpush3.bf16.msra.mxu1 %v10671_v30  ;;  %v1784_v25 = vadd.f32 1.0, %v10845_v6 }
 0x2e2   : > { %v10849_v50 = vpop.eup %10848  ;;  %10868 = vrcp.f32 %v1768_v16  ;;  %8973 = vmatprep.subr.bf16.mxu1 %v10672_v63  ;;  %v1857_v62 = vmul.f32 %v10847_v28, %v11966_v12 }
 0x2e3   : > { %v10851_v54 = vpop.eup %10850  ;;  %10870 = vpow2.f32 %v8009_v37  ;;  %v1858_v20 = vmul.f32 %v10849_v50, %v11971_v27  ;;  %v1775_v37 = vadd.f32 1.0, %v12123_v56 }
 0x2e4   : > { %v10853_v26 = vpop.eup %10852  ;;  %10872 = vpow2.f32 %v8010_v15  ;;  %8942 = vmatmul.mubr.msk.bf16.gmra.mrb[8].mxu1 %vm1458_vm2, %v12136_v13  ;;  %v1859_v49 = vmul.f32 %v10851_v54, %v11976_v24 }
 0x2e5   : > { %v10855_v34 = vpop.eup %10854  ;;  %10874 = vpow2.f32 %v8011_v57  ;;  %8945 = vmatprep.mubr.msk.bf16.mxu1 %vm1458_vm2, %v12139_v60  ;;  %8974 = vmatpush3.bf16.msra.mxu1 %v10672_v63  ;;  %v1860_v55 = vmul.f32 %v10853_v26, %v11981_v45  ;;  %v12153_v12 = vpack.c.bf16 %v1858_v20, %v1857_v62  ;;  %v1774_v45 = vadd.f32 1.0, %v12081_v40 }
 0x2e6   : > { %v10857_v30 = vpop.eup %10856  ;;  %10876 = vrcp.f32 %v1769_v51  ;;  %8975 = vmatprep.subr.bf16.mxu1 %v10673_v33  ;;  %v1776_v0 = vadd.f32 1.0, %v10855_v34 }
 0x2e7   : > { %v10859_v58 = vpop.eup %10858  ;;  %10878 = vrcp.f32 %v1770_v36  ;;  %v12157_v63 = vpack.c.bf16 %v1860_v55, %v1859_v49  ;;  %v1777_v51 = vadd.f32 1.0, %v10857_v30 }
 0x2e8   : > { %v10861_v14 = vpop.eup %10860  ;;  %10880 = vrcp.f32 %v1771_v44 }
 0x2e9   : > { %v10863_v16 = vpop.eup %10862  ;;  %10882 = vrcp.f32 %v1772_v3  ;;  %8976 = vmatpush3.bf16.msra.mxu1 %v10673_v33  ;;  %v1778_v33 = vadd.f32 1.0, %v10859_v58 }
 0x2ea   : > { %v10865_v39 = vpop.eup %10864  ;;  %10884 = vrcp.f32 %v1783_v43  ;;  %9009 = vmatprep.subr.bf16.mxu1 %v12149_v31  ;;  %v1861_v6 = vmul.f32 %v10863_v16, %v11986_v2  ;;  %v1779_v2 = vadd.f32 1.0, %v10861_v14 }
 0x2eb   : > { %v10867_v27 = vpop.eup %10866  ;;  %10886 = vrcp.f32 %v1784_v25  ;;  %v1862_v47 = vmul.f32 %v10865_v39, %v11991_v5 }
 0x2ec   : > { %v10869_v24 = vpop.eup %10868  ;;  %8946 = vmatmul.mubr.msk.bf16.gmra.mrb[12].mxu1 %vm1458_vm2, %v12153_v12  ;;  %10888 = vrcp.f32 %v1773_v32  ;;  %v1863_v28 = vmul.f32 %v10867_v27, %v11996_v9 }
 0x2ed   : > { %v10871_v1 = vpop.eup %10870  ;;  %8949 = vmatprep.mubr.msk.bf16.mxu1 %vm1458_vm2, %v12157_v63  ;;  %v1864_v40 = vmul.f32 %v10869_v24, %v12001_v18  ;;  %10890 = vrcp.f32 %v1774_v45  ;;  %v12169_v54 = vpack.c.bf16 %v1862_v47, %v1861_v6 }
 0x2ee   : > { %v10873_v61 = vpop.eup %10872  ;;  %10892 = vrcp.f32 %v1775_v37  ;;  %v1780_v18 = vadd.f32 1.0, %v10871_v1 }
 0x2ef   : > { %v10875_v15 = vpop.eup %10874  ;;  %10894 = vrcp.f32 %v1776_v0  ;;  %v12171_v26 = vpack.c.bf16 %v1864_v40, %v1863_v28  ;;  %v1781_v44 = vadd.f32 1.0, %v10873_v61  ;;  %v559_v61 = vand.u32 15, %v11848_v53 }
 0x2f0   : > { %v10877_v57 = vpop.eup %10876  ;;  %v1782_v34 = vadd.f32 1.0, %v10875_v15  ;;  %10896 = vrcp.f32 %v1777_v51  ;;  %v521_v15 = vadd.s32 16, %v11848_v53  ;;  %v523_v28 = vadd.s32 32, %v11848_v53 }
 0x2f1   : > { %v10879_v50 = vpop.eup %10878  ;;  %10898 = vrcp.f32 %v1778_v33  ;;  %v1865_v30 = vmul.f32 %v10877_v57, %v12006_v22  ;;  %vm987_vm3 = vcmp.ne.s32.totalorder %v559_v61, 0 }
 0x2f2   : > { %v10881_v56 = vpop.eup %10880  ;;  %v1866_v43 = vmul.f32 %v10879_v50, %v12011_v17  ;;  %10900 = vrcp.f32 %v1779_v2 }
 0x2f3   : > { %v10883_v36 = vpop.eup %10882  ;;  %v1867_v20 = vmul.f32 %v10881_v56, %v12015_v48  ;;  %10902 = vrcp.f32 %v1781_v44  ;;  %v587_v56 = vand.u32 15, %v523_v28  ;;  %v525_v44 = vadd.s32 48, %v11848_v53  ;;  %v10675_v28 = vld [vmem:[#allocation7 + $0x48] sm:$0xff]  }
 0x2f4   : > { %v10885_v5 = vpop.eup %10884  ;;  %8950 = vmatmul.mubr.msk.bf16.gmra.mrb[16].mxu1 %vm1458_vm2, %v12169_v54  ;;  %v1868_v58 = vmul.f32 %v10883_v36, %v12019_v29  ;;  %10904 = vrcp.f32 %v1782_v34  ;;  %v12185_v55 = vpack.c.bf16 %v1866_v43, %v1865_v30  ;;  %v527_v34 = vadd.s32 64, %v11848_v53 }
 0x2f5   : > { %v10887_v9 = vpop.eup %10886  ;;  %v1879_v3 = vmul.f32 %v10885_v5, %v11879_v41  ;;  %8953 = vmatprep.mubr.msk.bf16.mxu1 %vm1458_vm2, %v12171_v26  ;;  %10906 = vrcp.f32 %v1780_v18  ;;  %v14423_v30 = vshll.u32 %v12103_v19, 16  ;;  %vm991_vm5 = vcmp.ne.s32.totalorder %v587_v56, 0 }
 0x2f6   : > { %v1880_v62 = vmul.f32 %v10887_v9, %v11882_v42  ;;  %v10889_v49 = vpop.eup %10888  ;;  %v12187_v22 = vpack.c.bf16 %v1868_v58, %v1867_v20  ;;  %v14420_v20 = vshll.u32 %v12116_v23, 16 }
 0x2f7   : > { %v10891_v41 = vpop.eup %10890  ;;  %v1869_v42 = vmul.f32 %v10889_v49, %v12023_v4 }
 0x2f8   : > { %v12183_v25 = vpack.c.bf16 %v1880_v62, %v1879_v3  ;;  %v10893_v14 = vpop.eup %10892  ;;  %v1870_v48 = vmul.f32 %v10891_v41, %v12027_v38 }
 0x2f9   : > { %v10895_v17 = vpop.eup %10894  ;;  %v1871_v16 = vmul.f32 %v10893_v14, %v12040_v21 }
 0x2fa   : > { %v10897_v29 = vpop.eup %10896  ;;  %v1872_v39 = vmul.f32 %v10895_v17, %v12072_v35  ;;  %v12197_v45 = vpack.c.bf16 %v1870_v48, %v1869_v42  ;;  %v2022_v33 = vshll.u32 %v12183_v25, 16  ;;  %v2019_v2 = vshrl.u32 %v12183_v25, 16 }
 0x2fb   : > { %v10899_v27 = vpop.eup %10898  ;;  %v1873_v21 = vmul.f32 %v10897_v29, %v12079_v46  ;;  %v14535_v46 = vmov 0.0   ;;  %v601_v17 = vand.u32 15, %v525_v44  ;;  %v14410_v42 = vshrl.u32 %v12136_v13, 16 }
 0x2fc   : > { %8954 = vmatmul.mubr.msk.bf16.gmra.mrb[20].mxu1 %vm1458_vm2, %v12185_v55  ;;  %v10901_v32 = vpop.eup %10900  ;;  %v12199_v37 = vpack.c.bf16 %v1872_v39, %v1871_v16  ;;  %v1874_v4 = vmul.f32 %v10899_v27, %v12086_v10  ;;  %v7943_v50 = vsel %vm987_vm3, 1.0, %v14535_v46  ;;  %v14418_v10 = vshrl.u32 %v12103_v19, 16 }
 0x2fd   : > { %8957 = vmatprep.mubr.msk.bf16.mxu1 %vm1458_vm2, %v12187_v22  ;;  %v10903_v24 = vpop.eup %10902  ;;  %v1875_v6 = vmul.f32 %v10901_v32, %v12091_v52  ;;  %v14417_v52 = vshrl.u32 %v12116_v23, 16  ;;  %v12236_v9 = vrot.slane %v2022_v33, 1  ;;  %v12241_v3 = vrot.slane %v2019_v2, 7 }
 0x2fe   : > { %v10905_v1 = vpop.eup %10904  ;;  %v1877_v38 = vmul.f32 %v10903_v24, %v12111_v11  ;;  %v12214_v40 = vpack.c.bf16 %v1874_v4, %v1873_v21  ;;  %v1902_v5 = vrot.slane %v14418_v10, 7  ;;  %v7945_v48 = vsel %vm991_vm5, 1.0, %v14535_v46 }
 0x2ff   : > { %v10907_v0 = vpop.eup %10906  ;;  %v1878_v35 = vmul.f32 %v10905_v1, %v12119_v8  ;;  %v573_v8 = vand.u32 15, %v521_v15  ;;  %v1909_v18 = vrot.slane %v14417_v52, 7  ;;  %14538 = vst [vmem:[#allocation35_spill] sm:$0xff] %v12241_v3  ;;  %v12246_v62 = vor.u32 %v12236_v9, %v2019_v2 }
 0x300   : > { %v1876_v47 = vmul.f32 %v10907_v0, %v12107_v59  ;;  %v14536_v59 = vmov 1.0   ;;  %v2024_v49 = vor.u32 %v2022_v33, %v12241_v3  ;;  %v1905_v14 = vor.u32 %v14423_v30, %v1902_v5 }
 0x301   : > { %v12216_v57 = vpack.c.bf16 %v1878_v35, %v1877_v38  ;;  %v12228_v51 = vpack.c.bf16 %v14536_v59, %v7943_v50  ;;  %vm989_vm4 = vcmp.ne.s32.totalorder %v573_v8, 0  ;;  %14539 = vst [vmem:[#allocation36_spill] sm:$0xff] %v12246_v62  ;;  %v1912_v29 = vor.u32 %v14420_v20, %v1909_v18 }
 0x302   : > { %v12220_v11 = vpack.c.bf16 %v1876_v47, %v1875_v6  ;;  %v7944_v41 = vsel %vm989_vm4, 1.0, %v14535_v46  ;;  %v14409_v16 = vshrl.u32 %v12139_v60, 16  ;;  %v615_v27 = vand.u32 15, %v527_v34 }
 0x303   : > { %14537 = vst [vmem:[#allocation34_spill] sm:$0xff] %v12228_v51  ;;  %v14401_v36 = vshrl.u32 %v12216_v57, 16  ;;  %v14400_v43 = vmul.bf16 0, %v12228_v51  ;;  %v12272_v32 = vpack.c.bf16 %v14536_v59, %v7944_v41  ;;  %v14541_v24 = vmov 0 }
 0x304   : > { %8958 = vmatmul.mubr.msk.bf16.gmra.mrb[24].mxu1 %vm1458_vm2, %v12197_v45  ;;  %v14542_v24 = vsel %vm12276_vm7, 4294967295, %v14541_v24  ;;  %v2045_v1 = vsel %vm12276_vm7, 0, %v1905_v14  ;;  %v12283_v61 = vpack.c.bf16 %v14536_v59, %v7945_v48  ;;  %v1917_v0 = vrot.slane %v14410_v42, 7  ;;  %v10676_v14 = vld [vmem:[#allocation7 + $0x50] sm:$0xff]  }
 0x305   : > { %8961 = vmatprep.mubr.msk.bf16.mxu1 %vm1458_vm2, %v12199_v37  ;;  %v12251_v58 = vrot.slane %v14401_v36, 7  ;;  %14540 = vst [vmem:[#allocation37_spill] sm:$0xff] %v12272_v32  ;;  %14543 = vst [vmem:[#allocation38_spill] sm:$0xff] %v14542_v24  ;;  %v1913_v21 = vsel %vm1898_vm6, %v1902_v5, %v1912_v29  ;;  %vm993_vm8 = vcmp.ne.s32.totalorder %v601_v17, 0  ;;  %v1925_v4 = vrot.slane %v14409_v16, 7  ;;  %v12350_v36 = vld [vmem:[#allocation7 + $0x60] sm:$0xff]  }
 0x306   : > { %14544 = vst [vmem:[#allocation39_spill] sm:$0xff] %v12283_v61  ;;  %v529_v38 = vadd.s32 80, %v11848_v53  ;;  %v14415_v35 = vshll.u32 %v12136_v13, 16  ;;  %vm995_vm9 = vcmp.ne.s32.totalorder %v615_v27, 0  ;;  %v531_v6 = vadd.s32 96, %v11848_v53 }
 0x307   : > { %v12266_v39 = vsel %vm1898_vm6, %v12251_v58, %v2024_v49  ;;  %v12294_v47 = vmul.bf16 %v2045_v1, %v12272_v32  ;;  %v14412_v15 = vshll.u32 %v12139_v60, 16  ;;  %v12298_v50 = vmul.bf16 %v1913_v21, %v12283_v61 }
 0x308   : > { %v7946_v8 = vsel %vm993_vm8, 1.0, %v14535_v46  ;;  %v1920_v56 = vor.u32 %v14415_v35, %v1917_v0  ;;  %v14403_v33 = vshrl.u32 %v12153_v12, 16  ;;  %v7947_v2 = vsel %vm995_vm9, 1.0, %v14535_v46 }
 0x309   : > { %v1928_v5 = vor.u32 %v14412_v15, %v1925_v4  ;;  %v629_v44 = vand.u32 15, %v529_v38  ;;  %v14402_v34 = vshrl.u32 %v12157_v63, 16  ;;  %v643_v49 = vand.u32 15, %v531_v6 }
 0x30a   : > { %v12314_v41 = vpack.c.bf16 %v14536_v59, %v7946_v8  ;;  %v1921_v17 = vsel %vm1898_vm6, %v1909_v18, %v1920_v56  ;;  %v12318_v48 = vpack.c.bf16 %v14536_v59, %v7947_v2  ;;  %v1933_v29 = vrot.slane %v14403_v33, 7  ;;  %v10677_v8 = vld [vmem:[#allocation7 + $0x58] sm:$0xff]  }
 0x30b   : > { %v1929_v27 = vsel %vm1898_vm6, %v1917_v0, %v1928_v5  ;;  %vm997_vm10 = vcmp.ne.s32.totalorder %v629_v44, 0  ;;  %v533_v1 = vadd.s32 112, %v11848_v53  ;;  %v14405_v21 = vshll.u32 %v12153_v12, 16 }
 0x30c   : > { %8962 = vmatmul.mubr.msk.bf16.gmra.mrb[28].mxu1 %vm1458_vm2, %v12214_v40  ;;  %14545 = vst [vmem:[#allocation40_spill] sm:$0xff] %v12314_v41  ;;  %14546 = vst [vmem:[#allocation41_spill] sm:$0xff] %v12318_v48  ;;  %vm999_vm11 = vcmp.ne.s32.totalorder %v643_v49, 0  ;;  %v535_v18 = vadd.s32 128, %v11848_v53  ;;  %v12329_v38 = vmul.bf16 %v1921_v17, %v12314_v41  ;;  %v14404_v6 = vshll.u32 %v12157_v63, 16 }
 0x30d   : > { %8965 = vmatprep.mubr.msk.bf16.mxu1 %vm1458_vm2, %v12220_v11  ;;  %v12333_v0 = vmul.bf16 %v1929_v27, %v12318_v48  ;;  %v7948_v56 = vsel %vm997_vm10, 1.0, %v14535_v46  ;;  %v1936_v2 = vor.u32 %v14405_v21, %v1933_v29  ;;  %v7949_v5 = vsel %vm999_vm11, 1.0, %v14535_v46 }
 0x30e   : > { %v657_v49 = vand.u32 15, %v533_v1  ;;  %v14406_v17 = vshrl.u32 %v12171_v26, 16  ;;  %v671_v27 = vand.u32 15, %v535_v18  ;;  %v12354_v33 = vpack.c.bf16 %v14536_v59, %v7949_v5 }
 0x30f   : > { %v537_v18 = vadd.s32 144, %v11848_v53  ;;  %v539_v21 = vadd.s32 160, %v11848_v53  ;;  %v541_v15 = vadd.s32 176, %v11848_v53  ;;  %v545_v20 = vadd.s32 208, %v11848_v53 }
 0x310   : > { %14548 = vst [vmem:[#allocation43_spill] sm:$0xff] %v12354_v33  ;;  %vm1001_vm12 = vcmp.ne.s32.totalorder %v657_v49, 0  ;;  %vm1003_vm13 = vcmp.ne.s32.totalorder %v671_v27, 0  ;;  %v14414_v49 = vshrl.u32 %v12185_v55, 16  ;;  %v14555_v7 = vshrl.u32 %v12214_v40, 16 }
 0x311   : > { %v7950_v5 = vsel %vm1001_vm12, 1.0, %v14535_v46  ;;  %v685_v27 = vand.u32 15, %v537_v18  ;;  %vm2065_vm11 = vsmask.f32 7424  ;;  %vm2130_vm12 = vcmask 1047552  }
 0x312   : > { %v1965_v42 = vrot.slane %v14414_v49, 7  ;;  %v14421_v49 = vshrl.u32 %v12199_v37, 16  ;;  %v542_v51 = vadd.s32 184, %v11848_v53  ;;  %v546_v3 = vadd.s32 216, %v11848_v53 }
 0x313   : > { %vm1005_vm14 = vcmp.ne.s32.totalorder %v685_v27, 0  ;;  %v14422_v27 = vshrl.u32 %v12197_v45, 16  ;;  %v550_v62 = vadd.s32 248, %v11848_v53 }
 0x314   : > { %8966 = vmatmul.mubr.msk.bf16.gmra.mrb[32].mxu1 %vm1458_vm2, %v12216_v57 }
 0x315   : > { %8977 = vmatprep.mubr.msk.bf16.mxu1 %vm1458_vm2, %v14400_v43  ;;  %v12348_v43 = vpack.c.bf16 %v14536_v59, %v7948_v56  ;;  %v14408_v56 = vshll.u32 %v12169_v54, 16  ;;  %v1981_v10 = vrot.slane %v14422_v27, 7  ;;  %v14429_v27 = vshrl.u32 %v12220_v11, 16 }
 0x317   : > { %14547 = vst [vmem:[#allocation42_spill] sm:$0xff] %v12348_v43 }
 0x31c   : > { %8978 = vmatmul.mubr.msk.bf16.vlgmr.msra.gmra.mrb[4].mxu1 %vm1458_vm2, %v12294_v47 }
 0x31d   : > { %9010 = vmatpush3.bf16.msra.mxu1 %v12149_v31  ;;  %8981 = vmatprep.mubr.msk.bf16.mxu1 %vm1458_vm2, %v12298_v50  ;;  %v1941_v31 = vrot.slane %v14402_v34, 7  ;;  %v1937_v34 = vsel %vm1898_vm6, %v1925_v4, %v1936_v2  ;;  %v14411_v2 = vshll.u32 %v12171_v26, 16 }
 0x31e   : > { %9011 = vmatprep.subr.bf16.mxu1 %v10675_v28  ;;  %v12365_v4 = vmul.bf16 %v1937_v34, %v12348_v43  ;;  %v7951_v34 = vsel %vm1003_vm13, 1.0, %v14535_v46  ;;  %vm12513_vm13 = vmand %vm2130_vm12, %vm2065_vm11 }
 0x31f   : > { %v1944_v44 = vor.u32 %v14404_v6, %v1941_v31  ;;  %v12389_v16 = vpack.c.bf16 %v14536_v59, %v7951_v34 }
 0x321   : > { %9012 = vmatpush3.bf16.msra.mxu1 %v10675_v28  ;;  %v14407_v28 = vshrl.u32 %v12169_v54, 16  ;;  %v1945_v6 = vsel %vm1898_vm6, %v1933_v29, %v1944_v44  ;;  %14550 = vst [vmem:[#allocation45_spill] sm:$0xff] %v12389_v16 }
 0x322   : > { %9013 = vmatprep.subr.bf16.mxu1 %v10676_v14  ;;  %v12370_v29 = vmul.bf16 %v1945_v6, %v12354_v33  ;;  %v699_v6 = vand.u32 15, %v539_v21  ;;  %v14416_v21 = vshll.u32 %v12185_v55, 16 }
 0x323   : > { %v1949_v1 = vrot.slane %v14407_v28, 7  ;;  %v12385_v28 = vpack.c.bf16 %v14536_v59, %v7950_v5  ;;  %v543_v5 = vadd.s32 192, %v11848_v53 }
 0x324   : > { %8982 = vmatmul.mubr.msk.bf16.gmra.mrb[8].mxu1 %vm1458_vm2, %v12329_v38  ;;  %vm1007_vm15 = vcmp.ne.s32.totalorder %v699_v6, 0 }
 0x325   : > { %8985 = vmatprep.mubr.msk.bf16.mxu1 %vm1458_vm2, %v12333_v0  ;;  %9014 = vmatpush3.bf16.msra.mxu1 %v10676_v14  ;;  %v1957_v14 = vrot.slane %v14406_v17, 7  ;;  %v1952_v44 = vor.u32 %v14408_v56, %v1949_v1  ;;  %v14413_v17 = vshrl.u32 %v12187_v22, 16  ;;  %14549 = vst [vmem:[#allocation44_spill] sm:$0xff] %v12385_v28  ;;  %v7953_v6 = vsel %vm1007_vm15, 1.0, %v14535_v46 }
 0x326   : > { %9015 = vmatprep.subr.bf16.mxu1 %v10677_v8  ;;  %v12423_v52 = vpack.c.bf16 %v14536_v59, %v7953_v6 }
 0x327   : > { %v1953_v56 = vsel %vm1898_vm6, %v1941_v31, %v1952_v44  ;;  %v1973_v18 = vrot.slane %v14413_v17, 7  ;;  %v14419_v44 = vshll.u32 %v12187_v22, 16  ;;  %v713_v17 = vand.u32 15, %v541_v15 }
 0x328   : > { %v12400_v31 = vmul.bf16 %v1953_v56, %v12385_v28  ;;  %14552 = vst [vmem:[#allocation47_spill] sm:$0xff] %v12423_v52  ;;  %v1989_v15 = vrot.slane %v14421_v49, 7  ;;  %v741_v49 = vand.u32 15, %v545_v20  ;;  %v2005_v20 = vrot.slane %v14429_v27, 7 }
 0x329   : > { %9016 = vmatpush3.bf16.msra.mxu1 %v10677_v8  ;;  %v1960_v8 = vor.u32 %v14411_v2, %v1957_v14  ;;  %v1976_v56 = vor.u32 %v14419_v44, %v1973_v18  ;;  %vm1009_vm3 = vcmp.ne.s32.totalorder %v713_v17, 0 }
 0x32a   : > { %9049 = vmatprep.subr.bf16.mxu1 %v12350_v36  ;;  %vm1013_vm5 = vcmp.ne.s32.totalorder %v741_v49, 0 }
 0x32b   : > { %v1961_v2 = vsel %vm1898_vm6, %v1949_v1, %v1960_v8  ;;  %v7952_v1 = vsel %vm1005_vm14, 1.0, %v14535_v46  ;;  %v1968_v8 = vor.u32 %v14416_v21, %v1965_v42  ;;  %v1977_v44 = vsel %vm1898_vm6, %v1965_v42, %v1976_v56 }
 0x32c   : > { %8986 = vmatmul.mubr.msk.bf16.gmra.mrb[12].mxu1 %vm1458_vm2, %v12365_v4  ;;  %v12404_v34 = vmul.bf16 %v1961_v2, %v12389_v16  ;;  %v727_v2 = vand.u32 15, %v543_v5  ;;  %v12419_v35 = vpack.c.bf16 %v14536_v59, %v7952_v1  ;;  %v14424_v5 = vshll.u32 %v12197_v45, 16 }
 0x32d   : > { %8989 = vmatprep.mubr.msk.bf16.mxu1 %vm1458_vm2, %v12370_v29  ;;  %v1969_v21 = vsel %vm1898_vm6, %v1957_v14, %v1968_v8  ;;  %v547_v1 = vadd.s32 224, %v11848_v53  ;;  %v14427_v8 = vshll.u32 %v12199_v37, 16  ;;  %v12438_v6 = vmul.bf16 %v1977_v44, %v12423_v52 }
 0x32e   : > { %14551 = vst [vmem:[#allocation46_spill] sm:$0xff] %v12419_v35  ;;  %vm1011_vm4 = vcmp.ne.s32.totalorder %v727_v2, 0  ;;  %v12434_v14 = vmul.bf16 %v1969_v21, %v12419_v35  ;;  %v7954_v42 = vsel %vm1009_vm3, 1.0, %v14535_v46  ;;  %v1984_v17 = vor.u32 %v14424_v5, %v1981_v10 }
 0x32f   : > { %v7955_v2 = vsel %vm1011_vm4, 1.0, %v14535_v46  ;;  %v1992_v21 = vor.u32 %v14427_v8, %v1989_v15  ;;  %v755_v44 = vand.u32 15, %v547_v1  ;;  %v12453_v30 = vpack.c.bf16 %v14536_v59, %v7954_v42 }
 0x330   : > { %v1985_v5 = vsel %vm1898_vm6, %v1973_v18, %v1984_v17  ;;  %v12457_v56 = vpack.c.bf16 %v14536_v59, %v7955_v2  ;;  %v1997_v52 = vrot.slane %v14555_v7, 7  ;;  %v549_v35 = vadd.s32 240, %v11848_v53 }
 0x331   : > { %14553 = vst [vmem:[#allocation48_spill] sm:$0xff] %v12453_v30  ;;  %v1993_v8 = vsel %vm1898_vm6, %v1981_v10, %v1992_v21  ;;  %v14430_v1 = vshll.u32 %v12214_v40, 16  ;;  %vm1015_vm8 = vcmp.ne.s32.totalorder %v755_v44, 0  ;;  %v520_v42 = vadd.s32 8, %v11848_v53 }
 0x332   : > { %14554 = vst [vmem:[#allocation49_spill] sm:$0xff] %v12457_v56  ;;  %v12468_v18 = vmul.bf16 %v1985_v5, %v12453_v30  ;;  %v14433_v17 = vshll.u32 %v12220_v11, 16  ;;  %v12472_v7 = vmul.bf16 %v1993_v8, %v12457_v56  ;;  %v7956_v10 = vsel %vm1013_vm5, 1.0, %v14535_v46 }
 0x333   : > { %v2000_v49 = vor.u32 %v14430_v1, %v1997_v52  ;;  %v7957_v2 = vsel %vm1015_vm8, 1.0, %v14535_v46  ;;  %v769_v5 = vand.u32 15, %v549_v35  ;;  %v566_v44 = vand.u32 15, %v520_v42 }
 0x334   : > { %8990 = vmatmul.mubr.msk.bf16.gmra.mrb[16].mxu1 %vm1458_vm2, %v12400_v31  ;;  %v2008_v21 = vor.u32 %v14433_v17, %v2005_v20  ;;  %v12485_v8 = vpack.c.bf16 %v14536_v59, %v7956_v10  ;;  %v12489_v1 = vpack.c.bf16 %v14536_v59, %v7957_v2  ;;  %v522_v30 = vadd.s32 24, %v11848_v53 }
 0x335   : > { %8993 = vmatprep.mubr.msk.bf16.mxu1 %vm1458_vm2, %v12404_v34  ;;  %v2001_v27 = vsel %vm1898_vm6, %v1989_v15, %v2000_v49  ;;  %vm1017_vm9 = vcmp.ne.s32.totalorder %v769_v5, 0  ;;  %v14434_v17 = vshll.u32 %v12216_v57, 16  ;;  %vm1114_vm10 = vcmp.ne.s32.totalorder %v566_v44, 15 }
 0x336   : > { %14556 = vst [vmem:[#allocation50_spill] sm:$0xff] %v12485_v8  ;;  %14557 = vst [vmem:[#allocation51_spill] sm:$0xff] %v12489_v1  ;;  %v2009_v56 = vsel %vm1898_vm6, %v1997_v52, %v2008_v21  ;;  %v524_v35 = vadd.s32 40, %v11848_v53  ;;  %v12496_v42 = vmul.bf16 %v2001_v27, %v12485_v8  ;;  %v7958_v10 = vsel %vm1017_vm9, 1.0, %v14535_v46 }
 0x337   : > { %v12499_v15 = vmul.bf16 %v2009_v56, %v12489_v1  ;;  %v2016_v52 = vor.u32 %v14434_v17, %v12251_v58  ;;  %v7961_v49 = vsel %vm1114_vm10, 1.0, %v14535_v46  ;;  %v14558_v2 = vshll.u32 %v12103_v19, 16 }
 0x338   : > { %v580_v21 = vand.u32 15, %v522_v30  ;;  %v14559_v56 = vmov 0  ;;  %v594_v5 = vand.u32 15, %v524_v35  ;;  %v12518_v58 = vpack.c.bf16 %v14536_v59, %v7958_v10 }
 0x339   : > { %v2066_v27 = vrot.slane %v14558_v2, 1  ;;  %v14560_v56 = vsel %vm12513_vm13, 4294967295, %v14559_v56  ;;  %v2017_v44 = vsel %vm1898_vm6, %v2005_v20, %v2016_v52  ;;  %v12522_v17 = vpack.c.bf16 %v7961_v49, %v14536_v59 }
 0x33a   : > { %14561 = vst [vmem:[#allocation52_spill] sm:$0xff] %v14560_v56  ;;  %14562 = vst [vmem:[#allocation53_spill] sm:$0xff] %v12518_v58  ;;  %v14564_v2 = vshll.u32 %v12116_v23, 16  ;;  %vm1116_vm14 = vcmp.ne.s32.totalorder %v580_v21, 15  ;;  %v526_v8 = vadd.s32 56, %v11848_v53  ;;  %vm1118_vm15 = vcmp.ne.s32.totalorder %v594_v5, 15 }
 0x33b   : > { %14563 = vst [vmem:[#allocation54_spill] sm:$0xff] %v12522_v17  ;;  %v2132_v1 = vsel %vm12513_vm13, 0, %v2066_v27  ;;  %v528_v35 = vadd.s32 72, %v11848_v53  ;;  %v12531_v10 = vmul.bf16 %v2017_v44, %v12518_v58  ;;  %v14565_v20 = vshrl.u32 %v12103_v19, 16 }
 0x33c   : > { %8994 = vmatmul.mubr.msk.bf16.gmra.mrb[20].mxu1 %vm1458_vm2, %v12434_v14  ;;  %v2068_v30 = vrot.slane %v14564_v2, 1  ;;  %v2134_v49 = vmul.bf16 %v2132_v1, %v12522_v17  ;;  %v7962_v16 = vsel %vm1116_vm14, 1.0, %v14535_v46  ;;  %v7963_v21 = vsel %vm1118_vm15, 1.0, %v14535_v46 }
 0x33d   : > { %8997 = vmatprep.mubr.msk.bf16.mxu1 %vm1458_vm2, %v12438_v6  ;;  %v2067_v52 = vor.u32 %v2066_v27, %v14565_v20  ;;  %v14566_v2 = vshrl.u32 %v12116_v23, 16  ;;  %v608_v28 = vand.u32 15, %v526_v8  ;;  %v622_v44 = vand.u32 15, %v528_v35 }
 0x33e   : > { %v12544_v58 = vpack.c.bf16 %v7962_v16, %v14536_v59  ;;  %v14568_v27 = vshll.u32 %v12136_v13, 16  ;;  %v12550_v17 = vpack.c.bf16 %v7963_v21, %v14536_v59  ;;  %v532_v16 = vadd.s32 104, %v11848_v53 }
 0x33f   : > { %v2070_v5 = vor.u32 %v2068_v30, %v14566_v2  ;;  %v2069_v20 = vsel %vm2065_vm11, %v2067_v52, %v2068_v30  ;;  %vm1120_vm3 = vcmp.ne.s32.totalorder %v608_v28, 15  ;;  %v14570_v2 = vshll.u32 %v12139_v60, 16 }
 0x340   : > { %14567 = vst [vmem:[#allocation55_spill] sm:$0xff] %v12544_v58  ;;  %v2071_v1 = vrot.slane %v14568_v27, 1  ;;  %14569 = vst [vmem:[#allocation56_spill] sm:$0xff] %v12550_v17  ;;  %vm1122_vm4 = vcmp.ne.s32.totalorder %v622_v44, 15  ;;  %v12558_v35 = vmul.bf16 %v2069_v20, %v12544_v58  ;;  %v10679_v27 = vld [vmem:[#allocation7 + $0x68] sm:$0xff]   ;;  %v7964_v52 = vsel %vm1120_vm3, 1.0, %v14535_v46 }
 0x341   : > { %v2074_v8 = vrot.slane %v14570_v2, 1  ;;  %v14571_v21 = vshrl.u32 %v12136_v13, 16  ;;  %v14572_v44 = vshrl.u32 %v12139_v60, 16  ;;  %v12575_v20 = vpack.c.bf16 %v7964_v52, %v14536_v59 }
 0x342   : > { %v2072_v33 = vsel %vm2065_vm11, %v2070_v5, %v2071_v1  ;;  %v7965_v5 = vsel %vm1122_vm4, 1.0, %v14535_v46  ;;  %v536_v52 = vadd.s32 136, %v11848_v53 }
 0x343   : > { %v12561_v30 = vmul.bf16 %v2072_v33, %v12550_v17  ;;  %v2073_v28 = vor.u32 %v2071_v1, %v14571_v21  ;;  %v2076_v2 = vor.u32 %v2074_v8, %v14572_v44  ;;  %v650_v33 = vand.u32 15, %v532_v16  ;;  %14573 = vst [vmem:[#allocation57_spill] sm:$0xff] %v12575_v20  ;;  %v10680_v17 = vld [vmem:[#allocation7 + $0x70] sm:$0xff]  }
 0x344   : > { %8998 = vmatmul.mubr.msk.bf16.gmra.mrb[24].mxu1 %vm1458_vm2, %v12468_v18  ;;  %v14574_v1 = vshll.u32 %v12153_v12, 16  ;;  %v12581_v48 = vpack.c.bf16 %v7965_v5, %v14536_v59  ;;  %v534_v16 = vadd.s32 120, %v11848_v53 }
 0x345   : > { %9001 = vmatprep.mubr.msk.bf16.mxu1 %vm1458_vm2, %v12472_v7  ;;  %v2075_v58 = vsel %vm2065_vm11, %v2073_v28, %v2074_v8  ;;  %vm1126_vm8 = vcmp.ne.s32.totalorder %v650_v33, 15  ;;  %v10681_v8 = vld [vmem:[#allocation7 + $0x78] sm:$0xff]   ;;  %v14578_v33 = vshrl.u32 %v12157_v63, 16 }
 0x346   : > { %v2077_v21 = vrot.slane %v14574_v1, 1  ;;  %14575 = vst [vmem:[#allocation58_spill] sm:$0xff] %v12581_v48  ;;  %v12589_v1 = vmul.bf16 %v2075_v58, %v12575_v20  ;;  %v664_v58 = vand.u32 15, %v534_v16  ;;  %v678_v20 = vand.u32 15, %v536_v52 }
 0x347   : > { %v14582_v52 = vshll.u32 %v12171_v26, 16 }
 0x348   : > { %vm1128_vm9 = vcmp.ne.s32.totalorder %v664_v58, 15  ;;  %vm1130_vm10 = vcmp.ne.s32.totalorder %v678_v20, 15 }
 0x349   : > { %v7969_v20 = vsel %vm1130_vm10, 1.0, %v14535_v46 }
 0x34c   : > { %9002 = vmatmul.mubr.msk.bf16.gmra.mrb[28].mxu1 %vm1458_vm2, %v12496_v42 }
 0x34d   : > { %9005 = vmatprep.mubr.msk.bf16.mxu1 %vm1458_vm2, %v12499_v15 }
 0x354   : > { %9006 = vmatmul.mubr.msk.bf16.gmra.mrb[32].mxu1 %vm1458_vm2, %v12531_v10 }
 0x355   : > { %9017 = vmatprep.mubr.msk.bf16.mxu1 %vm1458_vm2, %v2134_v49  ;;  %v530_v49 = vadd.s32 88, %v11848_v53 }
 0x357   : > { %v636_v43 = vand.u32 15, %v530_v49  ;;  %v2078_v49 = vsel %vm2065_vm11, %v2076_v2, %v2077_v21 }
 0x358   : > { %v12592_v28 = vmul.bf16 %v2078_v49, %v12581_v48  ;;  %v14580_v48 = vshll.u32 %v12169_v54, 16 }
 0x359   : > { %vm1124_vm5 = vcmp.ne.s32.totalorder %v636_v43, 15  ;;  %v14577_v43 = vshrl.u32 %v12153_v12, 16 }
 0x35a   : > { %v7966_v5 = vsel %vm1124_vm5, 1.0, %v14535_v46 }
 0x35b   : > { %v2079_v2 = vor.u32 %v2077_v21, %v14577_v43  ;;  %v12605_v49 = vpack.c.bf16 %v7966_v5, %v14536_v59  ;;  %v2083_v21 = vrot.slane %v14580_v48, 1  ;;  %v12609_v43 = vld [vmem:[#allocation7 + $0x80] sm:$0xff]   ;;  %v538_v5 = vadd.s32 152, %v11848_v53 }
 0x35c   : > { %9018 = vmatmul.mubr.msk.bf16.vlgmr.msra.gmra.mrb[4].mxu1 %vm1458_vm2, %v12558_v35 }
 0x35d   : > { %9050 = vmatpush3.bf16.msra.mxu1 %v12350_v36  ;;  %9021 = vmatprep.mubr.msk.bf16.mxu1 %vm1458_vm2, %v12561_v30  ;;  %v14576_v36 = vshll.u32 %v12157_v63, 16  ;;  %14579 = vst [vmem:[#allocation59_spill] sm:$0xff] %v12605_v49 }
 0x35e   : > { %9051 = vmatprep.subr.bf16.mxu1 %v10679_v27 }
 0x35f   : > { %v2080_v44 = vrot.slane %v14576_v36, 1 }
 0x361   : > { %9052 = vmatpush3.bf16.msra.mxu1 %v10679_v27  ;;  %v7967_v27 = vsel %vm1126_vm8, 1.0, %v14535_v46  ;;  %v2082_v36 = vor.u32 %v2080_v44, %v14578_v33  ;;  %v2081_v41 = vsel %vm2065_vm11, %v2079_v2, %v2080_v44  ;;  %v540_v33 = vadd.s32 168, %v11848_v53 }
 0x362   : > { %9053 = vmatprep.subr.bf16.mxu1 %v10680_v17  ;;  %v12613_v61 = vpack.c.bf16 %v7967_v27, %v14536_v59  ;;  %v12621_v48 = vmul.bf16 %v2081_v41, %v12605_v49  ;;  %v7968_v2 = vsel %vm1128_vm9, 1.0, %v14535_v46  ;;  %v14583_v27 = vshrl.u32 %v12169_v54, 16 }
 0x363   : > { %v2084_v16 = vsel %vm2065_vm11, %v2082_v36, %v2083_v21  ;;  %v692_v41 = vand.u32 15, %v538_v5  ;;  %v14588_v5 = vshll.u32 %v12187_v22, 16 }
 0x364   : > { %9022 = vmatmul.mubr.msk.bf16.gmra.mrb[8].mxu1 %vm1458_vm2, %v12589_v1  ;;  %14581 = vst [vmem:[#allocation60_spill] sm:$0xff] %v12613_v61  ;;  %v12625_v44 = vmul.bf16 %v2084_v16, %v12613_v61  ;;  %v2085_v36 = vor.u32 %v2083_v21, %v14583_v27  ;;  %v12638_v16 = vpack.c.bf16 %v7968_v2, %v14536_v59  ;;  %v14586_v61 = vshll.u32 %v12185_v55, 16 }
 0x365   : > { %9025 = vmatprep.mubr.msk.bf16.mxu1 %vm1458_vm2, %v12592_v28  ;;  %9054 = vmatpush3.bf16.msra.mxu1 %v10680_v17  ;;  %v2086_v17 = vrot.slane %v14582_v52, 1  ;;  %v706_v52 = vand.u32 15, %v540_v33  ;;  %v12644_v27 = vpack.c.bf16 %v7969_v20, %v14536_v59  ;;  %vm1132_vm12 = vcmp.ne.s32.totalorder %v692_v41, 15 }
 0x366   : > { %9055 = vmatprep.subr.bf16.mxu1 %v10681_v8  ;;  %14585 = vst [vmem:[#allocation61_spill] sm:$0xff] %v12638_v16  ;;  %v2089_v49 = vrot.slane %v14586_v61, 1  ;;  %v544_v33 = vadd.s32 200, %v11848_v53  ;;  %v14590_v41 = vshrl.u32 %v12187_v22, 16 }
 0x367   : > { %v2087_v21 = vsel %vm2065_vm11, %v2085_v36, %v2086_v17  ;;  %14587 = vst [vmem:[#allocation62_spill] sm:$0xff] %v12644_v27  ;;  %vm1134_vm14 = vcmp.ne.s32.totalorder %v706_v52, 15  ;;  %v14589_v36 = vshrl.u32 %v12185_v55, 16 }
 0x368   : > { %v12652_v2 = vmul.bf16 %v2087_v21, %v12638_v16  ;;  %v734_v21 = vand.u32 15, %v544_v33  ;;  %v548_v33 = vadd.s32 232, %v11848_v53 }
 0x369   : > { %9056 = vmatpush3.bf16.msra.mxu1 %v10681_v8  ;;  %v14584_v8 = vshrl.u32 %v12171_v26, 16  ;;  %v2091_v20 = vor.u32 %v2089_v49, %v14589_v36 }
 0x36a   : > { %9089 = vmatprep.subr.bf16.mxu1 %v12609_v43  ;;  %vm1138_vm3 = vcmp.ne.s32.totalorder %v734_v21, 15 }
 0x36b   : > { %v2088_v58 = vor.u32 %v2086_v17, %v14584_v8  ;;  %v2092_v8 = vrot.slane %v14588_v5, 1  ;;  %v7970_v17 = vsel %vm1132_vm12, 1.0, %v14535_v46  ;;  %v720_v5 = vand.u32 15, %v542_v51 }
 0x36c   : > { %9026 = vmatmul.mubr.msk.bf16.gmra.mrb[12].mxu1 %vm1458_vm2, %v12621_v48  ;;  %v14594_v51 = vshll.u32 %v12199_v37, 16 }
 0x36d   : > { %9029 = vmatprep.mubr.msk.bf16.mxu1 %vm1458_vm2, %v12625_v44  ;;  %v2090_v32 = vsel %vm2065_vm11, %v2088_v58, %v2089_v49  ;;  %v7971_v58 = vsel %vm1134_vm14, 1.0, %v14535_v46  ;;  %v2094_v52 = vor.u32 %v2092_v8, %v14590_v41  ;;  %v2093_v49 = vsel %vm2065_vm11, %v2091_v20, %v2092_v8 }
 0x36e   : > { %v12655_v61 = vmul.bf16 %v2090_v32, %v12644_v27  ;;  %v12668_v32 = vpack.c.bf16 %v7970_v17, %v14536_v59  ;;  %v14592_v27 = vshll.u32 %v12197_v45, 16  ;;  %v12674_v36 = vpack.c.bf16 %v7971_v58, %v14536_v59 }
 0x36f   : > { %vm1136_vm15 = vcmp.ne.s32.totalorder %v720_v5, 15  ;;  %v2098_v41 = vrot.slane %v14594_v51, 1  ;;  %v14595_v20 = vshrl.u32 %v12197_v45, 16  ;;  %v14596_v5 = vshrl.u32 %v12199_v37, 16 }
 0x370   : > { %14591 = vst [vmem:[#allocation63_spill] sm:$0xff] %v12668_v32  ;;  %v2095_v16 = vrot.slane %v14592_v27, 1  ;;  %14593 = vst [vmem:[#allocation64_spill] sm:$0xff] %v12674_v36  ;;  %v12682_v17 = vmul.bf16 %v2093_v49, %v12668_v32  ;;  %v7972_v8 = vsel %vm1136_vm15, 1.0, %v14535_v46  ;;  %v748_v51 = vand.u32 15, %v546_v3 }
 0x371   : > { %v2100_v21 = vor.u32 %v2098_v41, %v14596_v5  ;;  %v762_v49 = vand.u32 15, %v548_v33  ;;  %v14600_v3 = vshll.u32 %v12220_v11, 16 }
 0x372   : > { %v2096_v24 = vsel %vm2065_vm11, %v2094_v52, %v2095_v16  ;;  %v2097_v58 = vor.u32 %v2095_v16, %v14595_v20  ;;  %v7973_v52 = vsel %vm1138_vm3, 1.0, %v14535_v46  ;;  %vm1140_vm4 = vcmp.ne.s32.totalorder %v748_v51, 15 }
 0x373   : > { %v12685_v27 = vmul.bf16 %v2096_v24, %v12674_v36  ;;  %v12698_v24 = vpack.c.bf16 %v7972_v8, %v14536_v59  ;;  %v14598_v36 = vshll.u32 %v12214_v40, 16  ;;  %v12704_v20 = vpack.c.bf16 %v7973_v52, %v14536_v59 }
 0x374   : > { %9030 = vmatmul.mubr.msk.bf16.gmra.mrb[16].mxu1 %vm1458_vm2, %v12652_v2  ;;  %v2099_v16 = vsel %vm2065_vm11, %v2097_v58, %v2098_v41  ;;  %v2104_v5 = vrot.slane %v14600_v3, 1  ;;  %vm1142_vm5 = vcmp.ne.s32.totalorder %v762_v49, 15  ;;  %v14602_v41 = vshrl.u32 %v12214_v40, 16 }
 0x375   : > { %9033 = vmatprep.mubr.msk.bf16.mxu1 %vm1458_vm2, %v12655_v61  ;;  %14597 = vst [vmem:[#allocation65_spill] sm:$0xff] %v12698_v24  ;;  %v2101_v32 = vrot.slane %v14598_v36, 1  ;;  %14599 = vst [vmem:[#allocation66_spill] sm:$0xff] %v12704_v20  ;;  %v12711_v33 = vmul.bf16 %v2099_v16, %v12698_v24  ;;  %v7974_v36 = vsel %vm1140_vm4, 1.0, %v14535_v46  ;;  %v7975_v52 = vsel %vm1142_vm5, 1.0, %v14535_v46 }
 0x376   : > { %v776_v49 = vand.u32 15, %v550_v62  ;;  %v14605_v16 = vshll.u32 %v12216_v57, 16  ;;  %v14607_v24 = vshrl.u32 %v12216_v57, 16 }
 0x377   : > { %v2102_v56 = vsel %vm2065_vm11, %v2100_v21, %v2101_v32  ;;  %v2103_v58 = vor.u32 %v2101_v32, %v14602_v41  ;;  %v14603_v21 = vshrl.u32 %v12220_v11, 16  ;;  %v12733_v41 = vpack.c.bf16 %v7975_v52, %v14536_v59 }
 0x378   : > { %v12714_v8 = vmul.bf16 %v2102_v56, %v12704_v20  ;;  %v12727_v56 = vpack.c.bf16 %v7974_v36, %v14536_v59  ;;  %v2107_v3 = vrot.slane %v14605_v16, 1  ;;  %vm1144_vm8 = vcmp.ne.s32.totalorder %v776_v49, 15 }
 0x379   : > { %v2106_v51 = vor.u32 %v2104_v5, %v14603_v21  ;;  %v2105_v32 = vsel %vm2065_vm11, %v2103_v58, %v2104_v5  ;;  %14606 = vst [vmem:[#allocation69_spill] sm:$0xff] %v12733_v41  ;;  %v7976_v36 = vsel %vm1144_vm8, 1.0, %v14535_v46 }
 0x37a   : > { %14601 = vst [vmem:[#allocation67_spill] sm:$0xff] %v12714_v8  ;;  %14604 = vst [vmem:[#allocation68_spill] sm:$0xff] %v12727_v56  ;;  %v12737_v21 = vmul.bf16 %v2105_v32, %v12727_v56  ;;  %v12750_v5 = vpack.c.bf16 %v7976_v36, %v14536_v59  ;;  %v10688_v32 = vld [vmem:[#allocation7 + $0xb0] sm:$0xff]   ;;  %v10691_v36 = vld [vmem:[#allocation7 + $0xc8] sm:$0xff]  }
 0x37b   : > { %v2108_v20 = vsel %vm2065_vm11, %v2106_v51, %v2107_v3 }
 0x37c   : > { %9034 = vmatmul.mubr.msk.bf16.gmra.mrb[20].mxu1 %vm1458_vm2, %v12682_v17  ;;  %v12740_v62 = vmul.bf16 %v2108_v20, %v12733_v41  ;;  %14608 = vst [vmem:[#allocation70_spill] sm:$0xff] %v12750_v5 }
 0x37d   : > { %9037 = vmatprep.mubr.msk.bf16.mxu1 %vm1458_vm2, %v12685_v27 }
 0x384   : > { %9038 = vmatmul.mubr.msk.bf16.gmra.mrb[24].mxu1 %vm1458_vm2, %v12711_v33 }
 0x385   : > { %9041 = vmatprep.mubr.msk.bf16.mxu1 %vm1458_vm2, %v12714_v8  ;;  %v2109_v8 = vor.u32 %v2107_v3, %v14607_v24  ;;  %v10683_v24 = vld [vmem:[#allocation7 + $0x88] sm:$0xff]  }
 0x386   : > { %v10687_v3 = vld [vmem:[#allocation7 + $0xa8] sm:$0xff]  }
 0x387   : > { %v2111_v58 = vsel %vm2065_vm11, %v2109_v8, %v12236_v9  ;;  %v10684_v9 = vld [vmem:[#allocation7 + $0x90] sm:$0xff]   ;;  %v10685_v8 = vld [vmem:[#allocation7 + $0x98] sm:$0xff]  }
 0x388   : > { %v12755_v20 = vmul.bf16 %v2111_v58, %v12750_v5  ;;  %v10692_v58 = vld [vmem:[#allocation7 + $0xd0] sm:$0xff]  }
 0x38c   : > { %9042 = vmatmul.mubr.msk.bf16.gmra.mrb[28].mxu1 %vm1458_vm2, %v12737_v21 }
 0x38d   : > { %9045 = vmatprep.mubr.msk.bf16.mxu1 %vm1458_vm2, %v12740_v62 }
 0x394   : > { %9046 = vmatmul.mubr.msk.bf16.gmra.mrb[32].mxu1 %vm1458_vm2, %v12755_v20 }
 0x395   : > { %9057 = vmatprep.mubr.msk.bf16.mxu1 %vm1458_vm2, %v12294_v47  ;;  %v10686_v47 = vld [vmem:[#allocation7 + $0xa0] sm:$0xff]  }
 0x39c   : > { %9058 = vmatmul.mubr.msk.bf16.vlgmr.msra.gmra.mrb[4].mxu1 %vm1458_vm2, %v12298_v50 }
 0x39d   : > { %9090 = vmatpush3.bf16.msra.mxu1 %v12609_v43  ;;  %9061 = vmatprep.mubr.msk.bf16.mxu1 %vm1458_vm2, %v12329_v38  ;;  %v551_v43 = vadd.s32 256, %v11848_v53 }
 0x39e   : > { %9091 = vmatprep.subr.bf16.mxu1 %v10683_v24 }
 0x39f   : > { %v783_v52 = vand.u32 15, %v551_v43 }
 0x3a1   : > { %9092 = vmatpush3.bf16.msra.mxu1 %v10683_v24  ;;  %vm1019_vm9 = vcmp.ne.s32.totalorder %v783_v52, 0  ;;  %v10693_v24 = vld [vmem:[#allocation7 + $0xd8] sm:$0xff]  }
 0x3a2   : > { %9093 = vmatprep.subr.bf16.mxu1 %v10684_v9  ;;  %v7959_v51 = vsel %vm1019_vm9, 1.0, %v14535_v46 }
 0x3a3   : > { %v12793_v49 = vpack.c.bf16 %v14536_v59, %v7959_v51  ;;  %v14612_v51 = vld [vmem:[#allocation36_spill] sm:$0xff] }
 0x3a4   : > { %9062 = vmatmul.mubr.msk.bf16.gmra.mrb[8].mxu1 %vm1458_vm2, %v12333_v0 }
 0x3a5   : > { %9065 = vmatprep.mubr.msk.bf16.mxu1 %vm1458_vm2, %v12365_v4  ;;  %9094 = vmatpush3.bf16.msra.mxu1 %v10684_v9  ;;  %14609 = vst [vmem:[#allocation71_spill] sm:$0xff] %v12793_v49  ;;  %v12797_v16 = vmul.bf16 %v12266_v39, %v12793_v49  ;;  %v10689_v39 = vld [vmem:[#allocation7 + $0xb8] sm:$0xff]   ;;  %v552_v9 = vadd.s32 264, %v11848_v53 }
 0x3a6   : > { %9095 = vmatprep.subr.bf16.mxu1 %v10685_v8 }
 0x3a9   : > { %9096 = vmatpush3.bf16.msra.mxu1 %v10685_v8  ;;  %v14610_v8 = vld [vmem:[#allocation67_spill] sm:$0xff] }
 0x3aa   : > { %9129 = vmatprep.subr.bf16.mxu1 %v10686_v47 }
 0x3ac   : > { %9066 = vmatmul.mubr.msk.bf16.gmra.mrb[12].mxu1 %vm1458_vm2, %v12370_v29 }
 0x3ad   : > { %9069 = vmatprep.mubr.msk.bf16.mxu1 %vm1458_vm2, %v12400_v31 }
 0x3b4   : > { %9070 = vmatmul.mubr.msk.bf16.gmra.mrb[16].mxu1 %vm1458_vm2, %v12404_v34 }
 0x3b5   : > { %9073 = vmatprep.mubr.msk.bf16.mxu1 %vm1458_vm2, %v12434_v14 }
 0x3bc   : > { %9074 = vmatmul.mubr.msk.bf16.gmra.mrb[20].mxu1 %vm1458_vm2, %v12438_v6 }
 0x3bd   : > { %9077 = vmatprep.mubr.msk.bf16.mxu1 %vm1458_vm2, %v12468_v18 }
 0x3c4   : > { %9078 = vmatmul.mubr.msk.bf16.gmra.mrb[24].mxu1 %vm1458_vm2, %v12472_v7 }
 0x3c5   : > { %9081 = vmatprep.mubr.msk.bf16.mxu1 %vm1458_vm2, %v12496_v42 }
 0x3cc   : > { %9082 = vmatmul.mubr.msk.bf16.gmra.mrb[28].mxu1 %vm1458_vm2, %v12499_v15 }
 0x3cd   : > { %9085 = vmatprep.mubr.msk.bf16.mxu1 %vm1458_vm2, %v12531_v10 }
 0x3d4   : > { %9086 = vmatmul.mubr.msk.bf16.gmra.mrb[32].mxu1 %vm1458_vm2, %v12797_v16 }
 0x3d5   : > { %9097 = vmatprep.mubr.msk.bf16.mxu1 %vm1458_vm2, %v12103_v19  ;;  %v10690_v19 = vld [vmem:[#allocation7 + $0xc0] sm:$0xff]  }
 0x3dc   : > { %9098 = vmatmul.mubr.msk.bf16.vlgmr.msra.gmra.mrb[4].mxu1 %vm1458_vm2, %v12116_v23 }
 0x3dd   : > { %9130 = vmatpush3.bf16.msra.mxu1 %v10686_v47  ;;  %9101 = vmatprep.mubr.msk.bf16.mxu1 %vm1458_vm2, %v12136_v13  ;;  %v790_v47 = vand.u32 15, %v552_v9 }
 0x3de   : > { %9131 = vmatprep.subr.bf16.mxu1 %v10687_v3 }
 0x3df   : > { %vm1146_vm10 = vcmp.ne.s32.totalorder %v790_v47, 15 }
 0x3e0   : > { %v7977_v43 = vsel %vm1146_vm10, 1.0, %v14535_v46 }
 0x3e1   : > { %9132 = vmatpush3.bf16.msra.mxu1 %v10687_v3  ;;  %v12866_v52 = vpack.c.bf16 %v7977_v43, %v14536_v59 }
 0x3e2   : > { %9133 = vmatprep.subr.bf16.mxu1 %v10688_v32 }
 0x3e3   : > { %14611 = vst [vmem:[#allocation67_spill] sm:$0xff] %v12866_v52 }
 0x3e4   : > { %9102 = vmatmul.mubr.msk.bf16.gmra.mrb[8].mxu1 %vm1458_vm2, %v12139_v60 }
 0x3e5   : > { %9105 = vmatprep.mubr.msk.bf16.mxu1 %vm1458_vm2, %v12153_v12  ;;  %9134 = vmatpush3.bf16.msra.mxu1 %v10688_v32  ;;  %v2133_v32 = vsel %vm12513_vm13, %v14612_v51, 0 }
 0x3e6   : > { %9135 = vmatprep.subr.bf16.mxu1 %v10689_v39 }
 0x3e9   : > { %9136 = vmatpush3.bf16.msra.mxu1 %v10689_v39  ;;  %v12872_v39 = vmul.bf16 %v2133_v32, %v12866_v52 }
 0x3ea   : > { %9169 = vmatprep.subr.bf16.mxu1 %v10690_v19 }
 0x3ec   : > { %9106 = vmatmul.mubr.msk.bf16.gmra.mrb[12].mxu1 %vm1458_vm2, %v12157_v63 }
 0x3ed   : > { %9109 = vmatprep.mubr.msk.bf16.mxu1 %vm1458_vm2, %v12169_v54 }
 0x3f4   : > { %9110 = vmatmul.mubr.msk.bf16.gmra.mrb[16].mxu1 %vm1458_vm2, %v12171_v26 }
 0x3f5   : > { %9113 = vmatprep.mubr.msk.bf16.mxu1 %vm1458_vm2, %v12185_v55 }
 0x3fc   : > { %9114 = vmatmul.mubr.msk.bf16.gmra.mrb[20].mxu1 %vm1458_vm2, %v12187_v22 }
 0x3fd   : > { %9117 = vmatprep.mubr.msk.bf16.mxu1 %vm1458_vm2, %v12197_v45 }
 0x404   : > { %9118 = vmatmul.mubr.msk.bf16.gmra.mrb[24].mxu1 %vm1458_vm2, %v12199_v37 }
 0x405   : > { %9121 = vmatprep.mubr.msk.bf16.mxu1 %vm1458_vm2, %v12214_v40 }
 0x40c   : > { %9122 = vmatmul.mubr.msk.bf16.gmra.mrb[28].mxu1 %vm1458_vm2, %v12220_v11 }
 0x40d   : > { %9125 = vmatprep.mubr.msk.bf16.mxu1 %vm1458_vm2, %v12216_v57 }
 0x414   : > { %9126 = vmatmul.mubr.msk.bf16.gmra.mrb[32].mxu1 %vm1458_vm2, %v12183_v25 }
 0x415   : > { %9137 = vmatprep.mubr.msk.bf16.mxu1 %vm1458_vm2, %v12558_v35  ;;  %v10694_v35 = vld [vmem:[#allocation7 + $0xe0] sm:$0xff]  }
 0x41c   : > { %9138 = vmatmul.mubr.msk.bf16.vlgmr.msra.gmra.mrb[4].mxu1 %vm1458_vm2, %v12561_v30 }
 0x41d   : > { %9170 = vmatpush3.bf16.msra.mxu1 %v10690_v19  ;;  %9141 = vmatprep.mubr.msk.bf16.mxu1 %vm1458_vm2, %v12589_v1  ;;  %v10695_v19 = vld [vmem:[#allocation7 + $0xe8] sm:$0xff]  }
 0x41e   : > { %9171 = vmatprep.subr.bf16.mxu1 %v10691_v36 }
 0x421   : > { %9172 = vmatpush3.bf16.msra.mxu1 %v10691_v36  ;;  %v10696_v36 = vld [vmem:[#allocation7 + $0xf0] sm:$0xff]  }
 0x422   : > { %9173 = vmatprep.subr.bf16.mxu1 %v10692_v58 }
 0x424   : > { %9142 = vmatmul.mubr.msk.bf16.gmra.mrb[8].mxu1 %vm1458_vm2, %v12592_v28 }
 0x425   : > { %9145 = vmatprep.mubr.msk.bf16.mxu1 %vm1458_vm2, %v12621_v48  ;;  %9174 = vmatpush3.bf16.msra.mxu1 %v10692_v58  ;;  %v10697_v58 = vld [vmem:[#allocation7 + $0xf8] sm:$0xff]  }
 0x426   : > { %9175 = vmatprep.subr.bf16.mxu1 %v10693_v24 }
 0x429   : > { %9176 = vmatpush3.bf16.msra.mxu1 %v10693_v24 }
 0x42a   : > { %9209 = vmatprep.subr.bf16.mxu1 %v10694_v35 }
 0x42c   : > { %9146 = vmatmul.mubr.msk.bf16.gmra.mrb[12].mxu1 %vm1458_vm2, %v12625_v44 }
 0x42d   : > { %9149 = vmatprep.mubr.msk.bf16.mxu1 %vm1458_vm2, %v12652_v2 }
 0x434   : > { %9150 = vmatmul.mubr.msk.bf16.gmra.mrb[16].mxu1 %vm1458_vm2, %v12655_v61 }
 0x435   : > { %9153 = vmatprep.mubr.msk.bf16.mxu1 %vm1458_vm2, %v12682_v17 }
 0x43c   : > { %9154 = vmatmul.mubr.msk.bf16.gmra.mrb[20].mxu1 %vm1458_vm2, %v12685_v27 }
 0x43d   : > { %9157 = vmatprep.mubr.msk.bf16.mxu1 %vm1458_vm2, %v12711_v33 }
 0x444   : > { %9158 = vmatmul.mubr.msk.bf16.gmra.mrb[24].mxu1 %vm1458_vm2, %v14610_v8 }
 0x445   : > { %9161 = vmatprep.mubr.msk.bf16.mxu1 %vm1458_vm2, %v12737_v21 }
 0x44c   : > { %9162 = vmatmul.mubr.msk.bf16.gmra.mrb[28].mxu1 %vm1458_vm2, %v12740_v62 }
 0x44d   : > { %9165 = vmatprep.mubr.msk.bf16.mxu1 %vm1458_vm2, %v12755_v20 }
 0x454   : > { %9166 = vmatmul.mubr.msk.bf16.gmra.mrb[32].mxu1 %vm1458_vm2, %v12872_v39 }
 0x455   : > { %9177 = vmatprep.mubr.msk.bf16.mxu1 %vm1458_vm2, %v12298_v50  ;;  %v10698_v50 = vld [vmem:[#allocation7 + $0x100] sm:$0xff]  }
 0x45c   : > { %9178 = vmatmul.mubr.msk.bf16.vlgmr.msra.gmra.mrb[4].mxu1 %vm1458_vm2, %v12329_v38  ;;  %v553_v38 = vadd.s32 272, %v11848_v53 }
 0x45d   : > { %9210 = vmatpush3.bf16.msra.mxu1 %v10694_v35  ;;  %9181 = vmatprep.mubr.msk.bf16.mxu1 %vm1458_vm2, %v12333_v0 }
 0x45e   : > { %9211 = vmatprep.subr.bf16.mxu1 %v10695_v19  ;;  %v797_v0 = vand.u32 15, %v553_v38 }
 0x460   : > { %vm1021_vm12 = vcmp.ne.s32.totalorder %v797_v0, 0 }
 0x461   : > { %9212 = vmatpush3.bf16.msra.mxu1 %v10695_v19 }
 0x462   : > { %9213 = vmatprep.subr.bf16.mxu1 %v10696_v36 }
 0x464   : > { %9182 = vmatmul.mubr.msk.bf16.gmra.mrb[8].mxu1 %vm1458_vm2, %v12365_v4  ;;  %v7960_v4 = vsel %vm1021_vm12, 1.0, %v14535_v46 }
 0x465   : > { %9185 = vmatprep.mubr.msk.bf16.mxu1 %vm1458_vm2, %v12370_v29  ;;  %9214 = vmatpush3.bf16.msra.mxu1 %v10696_v36  ;;  %v12909_v29 = vpack.c.bf16 %v14536_v59, %v7960_v4 }
 0x466   : > { %9215 = vmatprep.subr.bf16.mxu1 %v10697_v58 }
 0x467   : > { %14614 = vst [vmem:[#allocation36_spill] sm:$0xff] %v12909_v29 }
 0x469   : > { %9216 = vmatpush3.bf16.msra.mxu1 %v10697_v58 }
 0x46a   : > { %9249 = vmatprep.subr.bf16.mxu1 %v10698_v50 }
 0x46c   : > { %9186 = vmatmul.mubr.msk.bf16.gmra.mrb[12].mxu1 %vm1458_vm2, %v12400_v31  ;;  %v14615_v31 = vld [vmem:[#allocation35_spill] sm:$0xff] }
 0x46d   : > { %9189 = vmatprep.mubr.msk.bf16.mxu1 %vm1458_vm2, %v12404_v34  ;;  %v10770_v34 = vld [vmem:[#allocation10 + $0x220] sm:$0xff]  }
 0x474   : > { %9190 = vmatmul.mubr.msk.bf16.gmra.mrb[16].mxu1 %vm1458_vm2, %v12434_v14  ;;  %v2046_v14 = vsel %vm12276_vm7, %v14615_v31, 0 }
 0x475   : > { %9193 = vmatprep.mubr.msk.bf16.mxu1 %vm1458_vm2, %v12438_v6  ;;  %v2064_v6 = vmul.bf16 %v2046_v14, %v12909_v29 }
 0x47c   : > { %9194 = vmatmul.mubr.msk.bf16.gmra.mrb[20].mxu1 %vm1458_vm2, %v12468_v18  ;;  %v10699_v18 = vld [vmem:[#allocation7 + $0x108] sm:$0xff]  }
 0x47d   : > { %9197 = vmatprep.mubr.msk.bf16.mxu1 %vm1458_vm2, %v12472_v7  ;;  %v10700_v7 = vld [vmem:[#allocation7 + $0x110] sm:$0xff]  }
 0x484   : > { %9198 = vmatmul.mubr.msk.bf16.gmra.mrb[24].mxu1 %vm1458_vm2, %v12496_v42  ;;  %v10701_v42 = vld [vmem:[#allocation7 + $0x118] sm:$0xff]  }
 0x485   : > { %9201 = vmatprep.mubr.msk.bf16.mxu1 %vm1458_vm2, %v12499_v15 }
 0x48c   : > { %9202 = vmatmul.mubr.msk.bf16.gmra.mrb[28].mxu1 %vm1458_vm2, %v12531_v10 }
 0x48d   : > { %9205 = vmatprep.mubr.msk.bf16.mxu1 %vm1458_vm2, %v12797_v16 }
 0x494   : > { %9206 = vmatmul.mubr.msk.bf16.gmra.mrb[32].mxu1 %vm1458_vm2, %v2064_v6 }
 0x495   : > { %9217 = vmatprep.mubr.msk.bf16.mxu1 %vm1458_vm2, %v12116_v23  ;;  %v14617_v23 = vmov 0  }
 0x49c   : > { %9218 = vmatmul.mubr.msk.bf16.vlgmr.msra.gmra.mrb[4].mxu1 %vm1458_vm2, %v12136_v13  ;;  %v554_v13 = vadd.s32 280, %v11848_v53 }
 0x49d   : > { %9250 = vmatpush3.bf16.msra.mxu1 %v10698_v50  ;;  %9221 = vmatprep.mubr.msk.bf16.mxu1 %vm1458_vm2, %v12139_v60 }
 0x49e   : > { %9251 = vmatprep.subr.bf16.mxu1 %v10699_v18  ;;  %v804_v60 = vand.u32 15, %v554_v13 }
 0x4a0   : > { %vm1148_vm14 = vcmp.ne.s32.totalorder %v804_v60, 15 }
 0x4a1   : > { %9252 = vmatpush3.bf16.msra.mxu1 %v10699_v18 }
 0x4a2   : > { %9253 = vmatprep.subr.bf16.mxu1 %v10700_v7 }
 0x4a4   : > { %9222 = vmatmul.mubr.msk.bf16.gmra.mrb[8].mxu1 %vm1458_vm2, %v12153_v12  ;;  %v7978_v12 = vsel %vm1148_vm14, 1.0, %v14535_v46 }
 0x4a5   : > { %9225 = vmatprep.mubr.msk.bf16.mxu1 %vm1458_vm2, %v12157_v63  ;;  %9254 = vmatpush3.bf16.msra.mxu1 %v10700_v7  ;;  %v12978_v63 = vpack.c.bf16 %v7978_v12, %v14536_v59 }
 0x4a6   : > { %9255 = vmatprep.subr.bf16.mxu1 %v10701_v42 }
 0x4a7   : > { %14618 = vst [vmem:[#allocation35_spill] sm:$0xff] %v12978_v63 }
 0x4a9   : > { %9256 = vmatpush3.bf16.msra.mxu1 %v10701_v42 }
 0x4ac   : > { %9226 = vmatmul.mubr.msk.bf16.gmra.mrb[12].mxu1 %vm1458_vm2, %v12169_v54  ;;  %v14467_v54 = vmul.bf16 0, %v12978_v63 }
 0x4ad   : > { %9229 = vmatprep.mubr.msk.bf16.mxu1 %vm1458_vm2, %v12171_v26 }
 0x4b4   : > { %9230 = vmatmul.mubr.msk.bf16.gmra.mrb[16].mxu1 %vm1458_vm2, %v12185_v55 }
 0x4b5   : > { %9233 = vmatprep.mubr.msk.bf16.mxu1 %vm1458_vm2, %v12187_v22 }
 0x4bc   : > { %9234 = vmatmul.mubr.msk.bf16.gmra.mrb[20].mxu1 %vm1458_vm2, %v12197_v45 }
 0x4bd   : > { %9237 = vmatprep.mubr.msk.bf16.mxu1 %vm1458_vm2, %v12199_v37 }
 0x4c4   : > { %9238 = vmatmul.mubr.msk.bf16.gmra.mrb[24].mxu1 %vm1458_vm2, %v12214_v40 }
 0x4c5   : > { %9241 = vmatprep.mubr.msk.bf16.mxu1 %vm1458_vm2, %v12220_v11 }
 0x4cc   : > { %9242 = vmatmul.mubr.msk.bf16.gmra.mrb[28].mxu1 %vm1458_vm2, %v12216_v57 }
 0x4cd   : > { %9245 = vmatprep.mubr.msk.bf16.mxu1 %vm1458_vm2, %v12183_v25 }
 0x4d4   : > { %9246 = vmatmul.mubr.bf16.gmra.mrb[32].mxu1 %v14617_v23 }
 0x4d5   : > { %9257 = vmatprep.mubr.msk.bf16.mxu1 %vm1458_vm2, %v12561_v30 }
 0x4dc   : > { %9258 = vmatmul.mubr.msk.bf16.vlgmr.msra.gmra.mrb[4].mxu1 %vm1458_vm2, %v12589_v1 }
 0x4dd   : > { %9261 = vmatprep.mubr.msk.bf16.mxu1 %vm1458_vm2, %v12592_v28 }
 0x4e4   : > { %9262 = vmatmul.mubr.msk.bf16.gmra.mrb[8].mxu1 %vm1458_vm2, %v12621_v48 }
 0x4e5   : > { %9265 = vmatprep.mubr.msk.bf16.mxu1 %vm1458_vm2, %v12625_v44 }
 0x4ec   : > { %9266 = vmatmul.mubr.msk.bf16.gmra.mrb[12].mxu1 %vm1458_vm2, %v12652_v2 }
 0x4ed   : > { %9269 = vmatprep.mubr.msk.bf16.mxu1 %vm1458_vm2, %v12655_v61 }
 0x4f4   : > { %9270 = vmatmul.mubr.msk.bf16.gmra.mrb[16].mxu1 %vm1458_vm2, %v12682_v17  ;;  %v13000_v17 = vld [vmem:[%s14357_s5] ss:$0 sm:$0xff] }
 0x4f5   : > { %9273 = vmatprep.mubr.msk.bf16.mxu1 %vm1458_vm2, %v12685_v27 }
 0x4fc   : > { %9274 = vmatmul.mubr.msk.bf16.gmra.mrb[20].mxu1 %vm1458_vm2, %v12711_v33 }
 0x4fd   : > { %9277 = vmatprep.mubr.msk.bf16.mxu1 %vm1458_vm2, %v14610_v8 }
 0x504   : > { %9278 = vmatmul.mubr.msk.bf16.gmra.mrb[24].mxu1 %vm1458_vm2, %v12737_v21 }
 0x505   : > { %9281 = vmatprep.mubr.msk.bf16.mxu1 %vm1458_vm2, %v12740_v62 }
 0x50c   : > { %9282 = vmatmul.mubr.msk.bf16.gmra.mrb[28].mxu1 %vm1458_vm2, %v12755_v20 }
 0x50d   : > { %9285 = vmatprep.mubr.msk.bf16.mxu1 %vm1458_vm2, %v12872_v39 }
 0x514   : > { %9286 = vmatmul.mubr.msk.bf16.gmra.mrb[32].mxu1 %vm1458_vm2, %v14467_v54 }
 0x515   : > { %9340 = vmatprep.mubr.bf16.mxu1 %v14617_v23 }
 0x5af   : > { %v9259_v26 = vpop.f32.mrb[4].mxu1 }
 0x5b0   : > { %v4105_v25 = vpop.f32.mrb[5].mxu1  ;;  %v13030_v32 = vadd.f32 %v9259_v26, %v13000_v17 }
 0x5b1   : > { %v9260_v55 = vpop.f32.mrb[6].mxu1  ;;  %v13015_v24 = vadd.f32 %v13000_v17, %v4105_v25 }
 0x5b2   : > { %v4108_v22 = vpop.f32.mrb[7].mxu1  ;;  %v13023_v8 = vadd.f32 %v9260_v55, %v13000_v17 }
 0x5b3   : > { %v13003_v33 = vadd.f32 %v13000_v17, %v4108_v22 }
 0x5b4   : > { %v9878_v36 = vpack.c.bf16 %v13023_v8, %v13030_v32 }
 0x5b5   : > { %v9874_v47 = vpack.c.bf16 %v13003_v33, %v13015_v24 }
 0x5b7   : > { %v9263_v45 = vpop.f32.mrb[8].mxu1 }
 0x5b8   : > { %v4121_v37 = vpop.f32.mrb[9].mxu1  ;;  %v13062_v60 = vadd.f32 %v9263_v45, %v13000_v17 }
 0x5b9   : > { %v9264_v40 = vpop.f32.mrb[10].mxu1  ;;  %v13047_v31 = vadd.f32 %v13000_v17, %v4121_v37 }
 0x5ba   : > { %v4124_v57 = vpop.f32.mrb[11].mxu1  ;;  %v13055_v18 = vadd.f32 %v9264_v40, %v13000_v17 }
 0x5bb   : > { %v13035_v58 = vadd.f32 %v13000_v17, %v4124_v57 }
 0x5bc   : > { %v9886_v25 = vpack.c.bf16 %v13055_v18, %v13062_v60 }
 0x5bd   : > { %v9882_v7 = vpack.c.bf16 %v13035_v58, %v13047_v31 }
 0x5bf   : > { %v12987_v11 = vpop.f32.mrb[12].mxu1 }
 0x5c0   : > { %v4137_v15 = vpop.f32.mrb[13].mxu1 }
 0x5c1   : > { %v9268_v10 = vpop.f32.mrb[14].mxu1  ;;  %v13079_v57 = vadd.f32 %v13000_v17, %v4137_v15  ;;  %v13095_v15 = vadd.f32 %v12987_v11, %v13000_v17 }
 0x5c2   : > { %v4140_v30 = vpop.f32.mrb[15].mxu1 }
 0x5c3   : > { %v13067_v55 = vadd.f32 %v13000_v17, %v4140_v30 }
 0x5c7   : > { %v12989_v1 = vpop.f32.mrb[16].mxu1 }
 0x5c8   : > { %v12991_v28 = vpop.f32.mrb[17].mxu1 }
 0x5c9   : > { %v12993_v48 = vpop.f32.mrb[18].mxu1 }
 0x5ca   : > { %v12995_v44 = vpop.f32.mrb[19].mxu1 }
 0x5cf   : > { %v9275_v2 = vpop.f32.mrb[20].mxu1 }
 0x5d0   : > { %v4169_v61 = vpop.f32.mrb[21].mxu1  ;;  %v13018_v35 = vadd.f32 %v9275_v2, %v13000_v17 }
 0x5d1   : > { %v9276_v27 = vpop.f32.mrb[22].mxu1  ;;  %v13006_v62 = vadd.f32 %v13000_v17, %v4169_v61  ;;  %v13087_v61 = vadd.f32 %v9268_v10, %v13000_v17 }
 0x5d2   : > { %v4172_v21 = vpop.f32.mrb[23].mxu1  ;;  %v13009_v20 = vadd.f32 %v9276_v27, %v13000_v17  ;;  %v9890_v27 = vpack.c.bf16 %v13067_v55, %v13079_v57 }
 0x5d3   : > { %v13012_v16 = vadd.f32 %v13000_v17, %v4172_v21  ;;  %v9894_v10 = vpack.c.bf16 %v13087_v61, %v13095_v15 }
 0x5d4   : > { %v9876_v51 = vpack.c.bf16 %v13009_v20, %v13018_v35 }
 0x5d5   : > { %v9872_v9 = vpack.c.bf16 %v13012_v16, %v13006_v62 }
 0x5d7   : > { %v9279_v43 = vpop.f32.mrb[24].mxu1  ;;  %9873 = vmatprep.subr.bf16.mxu0 %v9872_v9 }
 0x5d8   : > { %v4185_v39 = vpop.f32.mrb[25].mxu1  ;;  %9875 = vmatpush3.bf16.msra.mxu0 %v9874_v47  ;;  %v13050_v14 = vadd.f32 %v9279_v43, %v13000_v17 }
 0x5d9   : > { %v9280_v19 = vpop.f32.mrb[26].mxu1  ;;  %9877 = vmatprep.subr.bf16.mxu0 %v9876_v51  ;;  %v13038_v38 = vadd.f32 %v13000_v17, %v4185_v39  ;;  %v13101_v51 = vadd.f32 %v13000_v17, %v12995_v44 }
 0x5da   : > { %v4188_v50 = vpop.f32.mrb[27].mxu1  ;;  %v13041_v0 = vadd.f32 %v9280_v19, %v13000_v17 }
 0x5db   : > { %v13044_v4 = vadd.f32 %v13000_v17, %v4188_v50  ;;  %v13114_v50 = vadd.f32 %v13000_v17, %v12991_v28 }
 0x5dc   : > { %9879 = vmatpush3.bf16.msra.mxu0 %v9878_v36  ;;  %v9884_v13 = vpack.c.bf16 %v13041_v0, %v13050_v14 }
 0x5dd   : > { %v9880_v6 = vpack.c.bf16 %v13044_v4, %v13038_v38 }
 0x5df   : > { %v9283_v42 = vpop.f32.mrb[28].mxu1  ;;  %9881 = vmatprep.subr.bf16.mxu0 %v9880_v6 }
 0x5e0   : > { %v4201_v12 = vpop.f32.mrb[29].mxu1  ;;  %9883 = vmatpush3.bf16.msra.mxu0 %v9882_v7  ;;  %v13082_v2 = vadd.f32 %v9283_v42, %v13000_v17  ;;  %v13123_v7 = vadd.f32 %v12993_v48, %v13000_v17  ;;  %v9898_v42 = vpack.c.bf16 %v13101_v51, %v13114_v50  ;;  %v4391_v48 = vmul.f32 %v13003_v33, %v13003_v33 }
 0x5e1   : > { %v9284_v26 = vpop.f32.mrb[30].mxu1  ;;  %9885 = vmatprep.subr.bf16.mxu0 %v9884_v13  ;;  %v13070_v37 = vadd.f32 %v13000_v17, %v4201_v12  ;;  %v4407_v13 = vmul.f32 %v13012_v16, %v13012_v16  ;;  %v13133_v12 = vadd.f32 %v12989_v1, %v13000_v17  ;;  %v4408_v1 = vmul.f32 %v13018_v35, %v13018_v35 }
 0x5e2   : > { %v4204_v22 = vpop.f32.mrb[31].mxu1  ;;  %v13073_v40 = vadd.f32 %v9284_v26, %v13000_v17  ;;  %v4406_v26 = vmul.f32 %v13006_v62, %v13006_v62 }
 0x5e3   : > { %v13076_v45 = vadd.f32 %v13000_v17, %v4204_v22  ;;  %v4409_v22 = vmul.f32 %v13009_v20, %v13009_v20 }
 0x5e4   : > { %9887 = vmatpush3.bf16.msra.mxu0 %v9886_v25  ;;  %v9892_v9 = vpack.c.bf16 %v13073_v40, %v13082_v2  ;;  %v9902_v25 = vpack.c.bf16 %v13123_v7, %v13133_v12 }
 0x5e5   : > { %v9888_v30 = vpack.c.bf16 %v13076_v45, %v13070_v37 }
 0x5e7   : > { %v9287_v21 = vpop.f32.mrb[32].mxu1  ;;  %9889 = vmatprep.subr.bf16.mxu0 %v9888_v30  ;;  %v9904_v30 = vpack.c.bf16 %v4407_v13, %v4406_v26  ;;  %v4412_v26 = vmul.f32 %v13050_v14, %v13050_v14 }
 0x5e8   : > { %v4217_v47 = vpop.f32.mrb[33].mxu1  ;;  %9891 = vmatpush3.bf16.msra.mxu0 %v9890_v27  ;;  %v13117_v6 = vadd.f32 %v9287_v21, %v13000_v17  ;;  %v4390_v27 = vmul.f32 %v13015_v24, %v13015_v24 }
 0x5e9   : > { %v9288_v43 = vpop.f32.mrb[34].mxu1  ;;  %9893 = vmatprep.subr.bf16.mxu0 %v9892_v9  ;;  %v13104_v19 = vadd.f32 %v13000_v17, %v4217_v47  ;;  %v4411_v9 = vmul.f32 %v13044_v4, %v13044_v4  ;;  %v9908_v47 = vpack.c.bf16 %v4409_v22, %v4408_v1  ;;  %v4415_v22 = vmul.f32 %v13076_v45, %v13076_v45 }
 0x5ea   : > { %v4220_v39 = vpop.f32.mrb[35].mxu1  ;;  %v13107_v36 = vadd.f32 %v9288_v43, %v13000_v17  ;;  %v9906_v21 = vpack.c.bf16 %v4391_v48, %v4390_v27  ;;  %v4392_v43 = vmul.f32 %v13030_v32, %v13030_v32  ;;  %v4397_v48 = vmul.f32 %v13055_v18, %v13055_v18 }
 0x5eb   : > { %v13110_v11 = vadd.f32 %v13000_v17, %v4220_v39  ;;  %v4393_v17 = vmul.f32 %v13023_v8, %v13023_v8  ;;  %v4396_v27 = vmul.f32 %v13062_v60, %v13062_v60  ;;  %v4414_v1 = vmul.f32 %v13070_v37, %v13070_v37 }
 0x5ec   : > { %9895 = vmatpush3.bf16.msra.mxu0 %v9894_v10  ;;  %v9900_v28 = vpack.c.bf16 %v13107_v36, %v13117_v6  ;;  %v4410_v10 = vmul.f32 %v13038_v38, %v13038_v38 }
 0x5ed   : > { %v9896_v44 = vpack.c.bf16 %v13110_v11, %v13104_v19  ;;  %v9910_v39 = vpack.c.bf16 %v4393_v17, %v4392_v43  ;;  %v9918_v17 = vpack.c.bf16 %v4397_v48, %v4396_v27  ;;  %v4398_v43 = vmul.f32 %v13079_v57, %v13079_v57 }
 0x5ee   : > { %v9912_v13 = vpack.c.bf16 %v4411_v9, %v4410_v10  ;;  %v4417_v9 = vmul.f32 %v13073_v40, %v13073_v40  ;;  %v4416_v10 = vmul.f32 %v13082_v2, %v13082_v2  ;;  %v4402_v27 = vmul.f32 %v13114_v50, %v13114_v50 }
 0x5ef   : > { %9897 = vmatprep.subr.bf16.mxu0 %v9896_v44  ;;  %v4395_v44 = vmul.f32 %v13035_v58, %v13035_v58 }
 0x5f0   : > { %9899 = vmatpush3.bf16.msra.mxu0 %v9898_v42  ;;  %v4413_v42 = vmul.f32 %v13041_v0, %v13041_v0 }
 0x5f1   : > { %9901 = vmatprep.subr.bf16.mxu0 %v9900_v28  ;;  %v4394_v28 = vmul.f32 %v13047_v31, %v13047_v31 }
 0x5f4   : > { %9903 = vmatpush3.bf16.msra.mxu0 %v9902_v25  ;;  %v9914_v25 = vpack.c.bf16 %v4395_v44, %v4394_v28  ;;  %v4400_v28 = vmul.f32 %v13095_v15, %v13095_v15 }
 0x5f5   : > { %9905 = vmatprep.subr.bf16.mxu0 %v9904_v30  ;;  %v9916_v30 = vpack.c.bf16 %v4413_v42, %v4412_v26  ;;  %v4419_v42 = vmul.f32 %v13110_v11, %v13110_v11  ;;  %v4418_v26 = vmul.f32 %v13104_v19, %v13104_v19 }
 0x5f7   : > { %4385 = vmatmul.mubr.f32.vlgmr.msra.gmra.mrb[2].mxu0 %v14536_v59 }
 0x5f8   : > { %9907 = vmatpush3.bf16.msra.mxu0 %v9906_v21  ;;  %4486 = vmatprep.mubr.f32.mxu0 %v14536_v59  ;;  %v4399_v21 = vmul.f32 %v13067_v55, %v13067_v55 }
 0x5f9   : > { %9909 = vmatprep.subr.bf16.mxu0 %v9908_v47  ;;  %v9920_v47 = vpack.c.bf16 %v4415_v22, %v4414_v1  ;;  %v4421_v22 = vmul.f32 %v13107_v36, %v13107_v36  ;;  %v4420_v1 = vmul.f32 %v13117_v6, %v13117_v6 }
 0x5fa   : > { %v9922_v44 = vpack.c.bf16 %v4399_v21, %v4398_v43 }
 0x5fc   : > { %9911 = vmatpush3.bf16.msra.mxu0 %v9910_v39  ;;  %v4401_v39 = vmul.f32 %v13087_v61, %v13087_v61 }
 0x5fd   : > { %9913 = vmatprep.subr.bf16.mxu0 %v9912_v13  ;;  %v9924_v13 = vpack.c.bf16 %v4417_v9, %v4416_v10  ;;  %v9932_v9 = vpack.c.bf16 %v4421_v22, %v4420_v1  ;;  %v14619_v10 = vmov 0.0|0.0   ;;  %v4311_v1 = vld [vmem:[#allocation8 + $0x48] sm:$0xff] }
 0x5fe   : > { %v9926_v48 = vpack.c.bf16 %v4401_v39, %v4400_v28  ;;  %v4302_v39 = vld [vmem:[#allocation8] sm:$0xff]  ;;  %v4305_v28 = vld [vmem:[#allocation8 + $0x18] sm:$0xff] }
 0x600   : > { %9915 = vmatpush3.bf16.msra.mxu0 %v9914_v25  ;;  %v4403_v25 = vmul.f32 %v13101_v51, %v13101_v51 }
 0x601   : > { %9917 = vmatprep.subr.bf16.mxu0 %v9916_v30  ;;  %v9928_v30 = vpack.c.bf16 %v4419_v42, %v4418_v26  ;;  %v4304_v42 = vld [vmem:[#allocation8 + $0x10] sm:$0xff] }
 0x602   : > { %v9930_v21 = vpack.c.bf16 %v4403_v25, %v4402_v27  ;;  %v9940_v26 = vpack.c.bf16 %v4305_v28, %v4304_v42  ;;  %v4307_v25 = vld [vmem:[#allocation8 + $0x28] sm:$0xff]  ;;  %v4316_v42 = vld [vmem:[#allocation8 + $0x70] sm:$0xff] }
 0x604   : > { %9919 = vmatpush3.bf16.msra.mxu0 %v9918_v17  ;;  %v4405_v17 = vmul.f32 %v13123_v7, %v13123_v7 }
 0x605   : > { %9921 = vmatprep.subr.bf16.mxu0 %v9920_v47  ;;  %v4404_v47 = vmul.f32 %v13133_v12, %v13133_v12 }
 0x607   : > { %v9934_v43 = vpack.c.bf16 %v4405_v17, %v4404_v47 }
 0x608   : > { %9923 = vmatpush3.bf16.msra.mxu0 %v9922_v44  ;;  %v4303_v44 = vld [vmem:[#allocation8 + $0x8] sm:$0xff] }
 0x609   : > { %9925 = vmatprep.subr.bf16.mxu0 %v9924_v13  ;;  %v9937_v13 = vpack.c.bf16 %v4303_v44, %v4302_v39  ;;  %v4315_v39 = vld [vmem:[#allocation8 + $0x68] sm:$0xff] }
 0x60c   : > { %9927 = vmatpush3.bf16.msra.mxu0 %v9926_v48  ;;  %v4306_v48 = vld [vmem:[#allocation8 + $0x20] sm:$0xff] }
 0x60d   : > { %9929 = vmatprep.subr.bf16.mxu0 %v9928_v30  ;;  %v9943_v22 = vpack.c.bf16 %v4307_v25, %v4306_v48  ;;  %v4308_v30 = vld [vmem:[#allocation8 + $0x30] sm:$0xff] }
 0x610   : > { %9931 = vmatpush3.bf16.msra.mxu0 %v9930_v21  ;;  %v4312_v21 = vld [vmem:[#allocation8 + $0x50] sm:$0xff] }
 0x611   : > { %9933 = vmatprep.subr.bf16.mxu0 %v9932_v9  ;;  %v4313_v9 = vld [vmem:[#allocation8 + $0x58] sm:$0xff] }
 0x612   : > { %v9952_v47 = vpack.c.bf16 %v4313_v9, %v4312_v21  ;;  %v10702_v21 = vld [vmem:[#allocation10 + $0x40] sm:$0xff]   ;;  %v10704_v9 = vld [vmem:[#allocation10 + $0x50] sm:$0xff]  }
 0x613   : > { %9324 = vmatprep.subr.bf16.mxu1 %v10702_v21 }
 0x614   : > { %9935 = vmatpush3.bf16.msra.mxu0 %v9934_v43  ;;  %v4314_v43 = vld [vmem:[#allocation8 + $0x60] sm:$0xff]  ;;  %9325 = vmatpush3.bf16.msra.mxu1 %v10702_v21 }
 0x615   : > { %9936 = vmatprep.subr.bf16.mxu0 %v14619_v10  ;;  %v9955_v44 = vpack.c.bf16 %v4315_v39, %v4314_v43  ;;  %v10706_v43 = vld [vmem:[#allocation10 + $0x58] sm:$0xff]   ;;  %v10707_v39 = vld [vmem:[#allocation10 + $0x8] sm:$0xff]  }
 0x617   : > { %4487 = vmatmul.mubr.f32.vlgmr.msra.gmra.mrb[4].mxu0 %v14536_v59  ;;  %v4309_v59 = vld [vmem:[#allocation8 + $0x38] sm:$0xff] }
 0x618   : > { %9321 = vmatprep.mubr.msk.f32.mxu0 %vm11275_vm0, %v14535_v46  ;;  %9938 = vmatpush3.bf16.msra.mxu0 %v9937_v13  ;;  %v9946_v27 = vpack.c.bf16 %v4309_v59, %v4308_v30  ;;  %v4310_v46 = vld [vmem:[#allocation8 + $0x40] sm:$0xff]  ;;  %v4317_v13 = vld [vmem:[#allocation8 + $0x78] sm:$0xff] }
 0x619   : > { %9939 = vmatprep.subr.bf16.mxu0 %v14619_v10  ;;  %v9949_v17 = vpack.c.bf16 %v4311_v1, %v4310_v46  ;;  %v9958_v28 = vpack.c.bf16 %v4317_v13, %v4316_v42  ;;  %v14620_v1 = vld [vmem:[#allocation34_spill] sm:$0xff]  ;;  %v10709_v42 = vld [vmem:[#allocation10 + $0x10] sm:$0xff]   ;;  %v10710_v13 = vld [vmem:[#allocation10 + $0x68] sm:$0xff]  }
 0x61c   : > { %9941 = vmatpush3.bf16.msra.mxu0 %v9940_v26 }
 0x61d   : > { %9942 = vmatprep.subr.bf16.mxu0 %v14619_v10 }
 0x620   : > { %9944 = vmatpush3.bf16.msra.mxu0 %v9943_v22 }
 0x621   : > { %9945 = vmatprep.subr.bf16.mxu0 %v14619_v10 }
 0x624   : > { %9947 = vmatpush3.bf16.msra.mxu0 %v9946_v27 }
 0x625   : > { %9948 = vmatprep.subr.bf16.mxu0 %v14619_v10 }
 0x628   : > { %9950 = vmatpush3.bf16.msra.mxu0 %v9949_v17  ;;  %v14621_v17 = vmul.bf16 0, %v14620_v1 }
 0x629   : > { %9951 = vmatprep.subr.bf16.mxu0 %v14619_v10 }
 0x62c   : > { %9953 = vmatpush3.bf16.msra.mxu0 %v9952_v47  ;;  %v10705_v47 = vld [vmem:[#allocation10] sm:$0xff]  }
 0x62d   : > { %9954 = vmatprep.subr.bf16.mxu0 %v14619_v10 }
 0x630   : > { %9956 = vmatpush3.bf16.msra.mxu0 %v9955_v44  ;;  %v10708_v44 = vld [vmem:[#allocation10 + $0x60] sm:$0xff]  }
 0x631   : > { %9957 = vmatprep.subr.bf16.mxu0 %v14619_v10  ;;  %v10703_v10 = vld [vmem:[#allocation10 + $0x48] sm:$0xff]  }
 0x632   : > { %9326 = vmatprep.subr.bf16.mxu1 %v10703_v10 }
 0x633   : > { %9327 = vmatpush3.bf16.msra.mxu1 %v10703_v10 }
 0x634   : > { %9959 = vmatpush3.bf16.msra.mxu0 %v9958_v28  ;;  %9328 = vmatprep.subr.bf16.mxu1 %v10704_v9  ;;  %v10711_v28 = vld [vmem:[#allocation10 + $0x18] sm:$0xff]  }
 0x635   : > { %9372 = vmatprep.subr.bf16.mxu0 %v10705_v47 }
 0x637   : > { %9329 = vmatpush3.bf16.msra.mxu1 %v10704_v9 }
 0x638   : > { %9330 = vmatprep.subr.bf16.mxu1 %v10706_v43 }
 0x63b   : > { %9331 = vmatpush3.bf16.msra.mxu1 %v10706_v43 }
 0x63c   : > { %9332 = vmatprep.subr.bf16.mxu1 %v10708_v44 }
 0x63f   : > { %9333 = vmatpush3.bf16.msra.mxu1 %v10708_v44  ;;  %v14622_v44 = vsub.s32 0, %v11848_v53 }
 0x640   : > { %9334 = vmatprep.subr.bf16.mxu1 %v10710_v13 }
 0x643   : > { %9335 = vmatpush3.bf16.msra.mxu1 %v10710_v13 }
 0x6ca   : > { %v8619_v26 = vpop.f32.mrb[2].mxu0 }
 0x6cb   : > { %v8620_v48 = vpop.f32.mrb[3].mxu0 }
 0x6cc   : > { %v8621_v25 = vadd.f32 %v8620_v48, %v8619_v26  ;;  %v10712_v26 = vld [vmem:[#allocation10 + $0x70] sm:$0xff]   ;;  %v10713_v48 = vld [vmem:[#allocation10 + $0x20] sm:$0xff]  }
 0x6cd   : > { %9336 = vmatprep.subr.bf16.mxu1 %v10712_v26 }
 0x6ce   : > { %9337 = vmatpush3.bf16.msra.mxu1 %v10712_v26  ;;  %v14623_v26 = vsub.s32 1, %v11848_v53 }
 0x6ea   : > { %v8654_v22 = vpop.f32.mrb[4].mxu0 }
 0x6eb   : > { %v8655_v30 = vpop.f32.mrb[5].mxu0 }
 0x6ec   : > { %v8656_v59 = vadd.f32 %v8655_v30, %v8654_v22  ;;  %v10715_v22 = vld [vmem:[#allocation10 + $0x28] sm:$0xff]   ;;  %v10716_v30 = vld [vmem:[#allocation10 + $0x30] sm:$0xff]  }
 0x6ee   : > { %v4493_v27 = vrot.slane %v8656_v59, 7  ;;  %v10717_v59 = vld [vmem:[#allocation10 + $0x38] sm:$0xff]  }
 0x6f0   : > { %v4495_v46 = vsel %vm1456_vm1, %v8621_v25, %v4493_v27  ;;  %v10714_v25 = vld [vmem:[#allocation10 + $0x78] sm:$0xff]   ;;  %v13215_v27 = vld [vmem:[#allocation10 + $0x80] sm:$0xff]  }
 0x6f1   : > { %9322 = vmatmul.mubr.f32.vlgmr.msra.gmra.mrb[6].mxu0 %v4495_v46  ;;  %9338 = vmatprep.subr.bf16.mxu1 %v10714_v25 }
 0x6f2   : > { %9388 = vmatprep.mubr.bf16.mxu0 %v14621_v17  ;;  %9373 = vmatpush3.bf16.msra.mxu0 %v10705_v47 }
 0x6f3   : > { %9374 = vmatprep.subr.bf16.mxu0 %v10707_v39  ;;  %9339 = vmatpush3.bf16.msra.mxu1 %v10714_v25 }
 0x6f6   : > { %9375 = vmatpush3.bf16.msra.mxu0 %v10707_v39  ;;  %v8193_v39 = vld [vmem:[%s14359_s7] ss:$0 sm:$0xff] }
 0x6f7   : > { %9376 = vmatprep.subr.bf16.mxu0 %v10709_v42 }
 0x6fa   : > { %9377 = vmatpush3.bf16.msra.mxu0 %v10709_v42 }
 0x6fb   : > { %9378 = vmatprep.subr.bf16.mxu0 %v10711_v28 }
 0x6fe   : > { %9379 = vmatpush3.bf16.msra.mxu0 %v10711_v28 }
 0x6ff   : > { %9380 = vmatprep.subr.bf16.mxu0 %v10713_v48 }
 0x702   : > { %9381 = vmatpush3.bf16.msra.mxu0 %v10713_v48 }
 0x703   : > { %9382 = vmatprep.subr.bf16.mxu0 %v10715_v22 }
 0x706   : > { %9383 = vmatpush3.bf16.msra.mxu0 %v10715_v22 }
 0x707   : > { %9384 = vmatprep.subr.bf16.mxu0 %v10716_v30 }
 0x70a   : > { %9385 = vmatpush3.bf16.msra.mxu0 %v10716_v30 }
 0x70b   : > { %9386 = vmatprep.subr.bf16.mxu0 %v10717_v59 }
 0x70e   : > { %9387 = vmatpush3.bf16.msra.mxu0 %v10717_v59 }
 0x70f   : > { %9420 = vmatprep.subr.bf16.mxu0 %v13215_v27 }
 0x7c4   : > { %v4562_v46 = vpop.f32.mrb[6].mxu0 }
 0x7c5   : > { %v4566_v1 = vmul.f32 0.0009765625, %v4562_v46  ;;  %v9323_v17 = vpop.f32.mrb[7].mxu0 }
 0x7c7   : > { %v4567_v21 = vmul.f32 %v4566_v1, %v4566_v1  ;;  %v13223_v42 = vrot.slane %v4566_v1, %v14622_v44 }
 0x7c9   : > { %v4569_v10 = vrot.slane %v4567_v21, 7  ;;  %v4578_v28 = vsub.f32 %v13015_v24, %v13223_v42  ;;  %v4579_v25 = vsub.f32 %v13003_v33, %v13223_v42  ;;  %v4580_v22 = vsub.f32 %v13030_v32, %v13223_v42 }
 0x7ca   : > { %v4581_v30 = vsub.f32 %v13023_v8, %v13223_v42  ;;  %v4582_v59 = vsub.f32 %v13047_v31, %v13223_v42  ;;  %v4583_v46 = vsub.f32 %v13035_v58, %v13223_v42  ;;  %v4584_v53 = vsub.f32 %v13062_v60, %v13223_v42 }
 0x7cb   : > { %v4571_v9 = vsub.f32 %v4566_v1, %v4569_v10  ;;  %v4585_v24 = vsub.f32 %v13055_v18, %v13223_v42  ;;  %v4586_v33 = vsub.f32 %v13079_v57, %v13223_v42  ;;  %v4587_v32 = vsub.f32 %v13067_v55, %v13223_v42 }
 0x7cc   : > { %v4608_v8 = vsub.f32 %v13117_v6, %v13223_v42  ;;  %v4609_v31 = vsub.f32 %v13107_v36, %v13223_v42  ;;  %v4588_v58 = vsub.f32 %v13095_v15, %v13223_v42  ;;  %v4589_v60 = vsub.f32 %v13087_v61, %v13223_v42 }
 0x7cd   : > { %v4572_v47 = vadd.f32 1e-06, %v4571_v9  ;;  %v4590_v18 = vsub.f32 %v13114_v50, %v13223_v42  ;;  %v4591_v57 = vsub.f32 %v13101_v51, %v13223_v42  ;;  %v4592_v55 = vsub.f32 %v13133_v12, %v13223_v42  ;;  %v13275_v51 = vld [vmem:[%s14624_s19] ss:$0 sm:$0xff] }
 0x7ce   : > { %v4593_v6 = vsub.f32 %v13123_v7, %v13223_v42  ;;  %v4594_v15 = vsub.f32 %v13006_v62, %v13223_v42  ;;  %v4595_v7 = vsub.f32 %v13012_v16, %v13223_v42  ;;  %v4596_v12 = vsub.f32 %v13018_v35, %v13223_v42 }
 0x7cf   : > { %10908 = vrsqrt.f32 %v4572_v47  ;;  %v4597_v62 = vsub.f32 %v13009_v20, %v13223_v42  ;;  %v4598_v10 = vsub.f32 %v13038_v38, %v13223_v42  ;;  %v4599_v9 = vsub.f32 %v13044_v4, %v13223_v42 }
 0x7d0   : > { %v4600_v47 = vsub.f32 %v13050_v14, %v13223_v42  ;;  %v4601_v16 = vsub.f32 %v13041_v0, %v13223_v42  ;;  %v4602_v35 = vsub.f32 %v13070_v37, %v13223_v42  ;;  %v4603_v20 = vsub.f32 %v13076_v45, %v13223_v42 }
 0x7d9   : > { %v10909_v43 = vpop.eup %10908 }
 0x7da   : > { %v4616_v13 = vmul.f32 %v10909_v43, %v8193_v39 }
 0x7dc   : > { %v13229_v48 = vrot.slane %v4616_v13, %v14623_v26 }
 0x7de   : > { %v4651_v36 = vmul.f32 %v13229_v48, %v4608_v8  ;;  %v4652_v1 = vmul.f32 %v13229_v48, %v4609_v31  ;;  %v4621_v61 = vmul.f32 %v13229_v48, %v4578_v28  ;;  %v4622_v50 = vmul.f32 %v13229_v48, %v4579_v25 }
 0x7df   : > { %v4623_v17 = vmul.f32 %v13229_v48, %v4580_v22  ;;  %v4624_v21 = vmul.f32 %v13229_v48, %v4581_v30  ;;  %v4625_v43 = vmul.f32 %v13229_v48, %v4582_v59  ;;  %v4626_v39 = vmul.f32 %v13229_v48, %v4583_v46 }
 0x7e0   : > { %v4627_v44 = vmul.f32 %v13229_v48, %v4584_v53  ;;  %v13300_v13 = vadd.f32 %v13275_v51, %v4621_v61  ;;  %v13303_v28 = vadd.f32 %v13275_v51, %v4622_v50  ;;  %v4628_v30 = vmul.f32 %v13229_v48, %v4585_v24 }
 0x7e1   : > { %v13306_v26 = vadd.f32 %v13275_v51, %v4623_v17  ;;  %v13314_v59 = vadd.f32 %v13275_v51, %v4624_v21  ;;  %v4629_v53 = vmul.f32 %v13229_v48, %v4586_v33  ;;  %v4630_v8 = vmul.f32 %v13229_v48, %v4587_v32 }
 0x7e2   : > { %v13321_v31 = vadd.f32 %v13275_v51, %v4625_v43  ;;  %v4631_v61 = vmul.f32 %v13229_v48, %v4588_v58  ;;  %v13325_v50 = vadd.f32 %v13275_v51, %v4626_v39  ;;  %v13328_v24 = vadd.f32 %v13275_v51, %v4651_v36 }
 0x7e3   : > { %v13331_v17 = vadd.f32 %v13275_v51, %v4652_v1  ;;  %v13334_v21 = vadd.f32 %v13275_v51, %v4627_v44  ;;  %v8195_v33 = vmul.f32 -1.442695, %v13300_v13  ;;  %v8196_v32 = vmul.f32 -1.442695, %v13303_v28 }
 0x7e4   : > { %v8197_v43 = vmul.f32 -1.442695, %v13306_v26  ;;  %v4632_v39 = vmul.f32 %v13229_v48, %v4589_v60  ;;  %v13343_v36 = vadd.f32 %v13275_v51, %v4628_v30  ;;  %v8198_v1 = vmul.f32 -1.442695, %v13314_v59 }
 0x7e5   : > { %v4633_v54 = vmul.f32 %v13229_v48, %v4590_v18  ;;  %v13348_v44 = vadd.f32 %v13275_v51, %v4629_v53  ;;  %10910 = vpow2.f32 %v8195_v33  ;;  %v8199_v46 = vmul.f32 -1.442695, %v13321_v31 }
 0x7e6   : > { %v4634_v22 = vmul.f32 %v13229_v48, %v4591_v57  ;;  %v13353_v25 = vadd.f32 %v13275_v51, %v4630_v8  ;;  %10912 = vpow2.f32 %v8196_v32  ;;  %v8200_v60 = vmul.f32 -1.442695, %v13325_v50 }
 0x7e7   : > { %v4635_v30 = vmul.f32 %v13229_v48, %v4592_v55  ;;  %v13358_v58 = vadd.f32 %v13275_v51, %v4631_v61  ;;  %10914 = vpow2.f32 %v8197_v43  ;;  %v8201_v18 = vmul.f32 -1.442695, %v13334_v21 }
 0x7e8   : > { %v4636_v53 = vmul.f32 %v13229_v48, %v4593_v6  ;;  %v13363_v33 = vadd.f32 %v13275_v51, %v4632_v39  ;;  %10916 = vpow2.f32 %v8198_v1  ;;  %v8202_v57 = vmul.f32 -1.442695, %v13343_v36 }
 0x7e9   : > { %v4637_v8 = vmul.f32 %v13229_v48, %v4594_v15  ;;  %v13368_v32 = vadd.f32 %v13275_v51, %v4633_v54  ;;  %10918 = vpow2.f32 %v8199_v46  ;;  %v8203_v55 = vmul.f32 -1.442695, %v13348_v44 }
 0x7ea   : > { %v4638_v61 = vmul.f32 %v13229_v48, %v4595_v7  ;;  %v13373_v43 = vadd.f32 %v13275_v51, %v4634_v22  ;;  %10920 = vpow2.f32 %v8200_v60  ;;  %v8204_v6 = vmul.f32 -1.442695, %v13353_v25 }
 0x7eb   : > { %v4639_v39 = vmul.f32 %v13229_v48, %v4596_v12  ;;  %v13378_v1 = vadd.f32 %v13275_v51, %v4635_v30  ;;  %10922 = vpow2.f32 %v8201_v18  ;;  %v8205_v54 = vmul.f32 -1.442695, %v13358_v58 }
 0x7ec   : > { %v4640_v15 = vmul.f32 %v13229_v48, %v4597_v62  ;;  %v13383_v46 = vadd.f32 %v13275_v51, %v4636_v53  ;;  %10924 = vpow2.f32 %v8202_v57  ;;  %v8206_v7 = vmul.f32 -1.442695, %v13363_v33 }
 0x7ed   : > { %v4641_v22 = vmul.f32 %v13229_v48, %v4598_v10  ;;  %v13391_v12 = vadd.f32 %v13275_v51, %v4637_v8  ;;  %10926 = vpow2.f32 %v8203_v55  ;;  %v8207_v60 = vmul.f32 -1.442695, %v13368_v32 }
 0x7ee   : > { %v4642_v62 = vmul.f32 %v13229_v48, %v4599_v9  ;;  %v13399_v30 = vadd.f32 %v13275_v51, %v4638_v61  ;;  %10928 = vpow2.f32 %v8204_v6  ;;  %v8208_v18 = vmul.f32 -1.442695, %v13373_v43 }
 0x7ef   : > { %v13402_v38 = vpop.eup %10910  ;;  %v4643_v10 = vmul.f32 %v13229_v48, %v4600_v47  ;;  %v13409_v53 = vadd.f32 %v13275_v51, %v4639_v39  ;;  %10930 = vpow2.f32 %v8205_v54  ;;  %v8209_v4 = vmul.f32 -1.442695, %v13378_v1 }
 0x7f0   : > { %v13412_v9 = vpop.eup %10912  ;;  %v4644_v57 = vmul.f32 %v13229_v48, %v4601_v16  ;;  %v13419_v8 = vadd.f32 %v13275_v51, %v4640_v15  ;;  %10932 = vpow2.f32 %v8206_v7  ;;  %v8210_v14 = vmul.f32 -1.442695, %v13383_v46 }
 0x7f1   : > { %v13422_v47 = vpop.eup %10914  ;;  %v4645_v55 = vmul.f32 %v13229_v48, %v4602_v35  ;;  %v13429_v61 = vadd.f32 %v13275_v51, %v4641_v22  ;;  %10934 = vpow2.f32 %v8207_v60  ;;  %v8211_v0 = vmul.f32 -1.442695, %v13391_v12 }
 0x7f2   : > { %v13432_v16 = vpop.eup %10916  ;;  %v4646_v6 = vmul.f32 %v13229_v48, %v4603_v20  ;;  %v13439_v39 = vadd.f32 %v13275_v51, %v4642_v62  ;;  %10936 = vpow2.f32 %v8208_v18  ;;  %v8212_v37 = vmul.f32 -1.442695, %v13399_v30 }
 0x7f3   : > { %v13442_v35 = vpop.eup %10918  ;;  %v14625_v54 = vsub.f32 %v13082_v2, %v13223_v42  ;;  %v13449_v7 = vadd.f32 %v13275_v51, %v4643_v10  ;;  %10938 = vpow2.f32 %v8209_v4  ;;  %v8213_v45 = vmul.f32 -1.442695, %v13409_v53 }
 0x7f4   : > { %v13452_v20 = vpop.eup %10920  ;;  %v14626_v22 = vsub.f32 %v13073_v40, %v13223_v42  ;;  %v13459_v62 = vadd.f32 %v13275_v51, %v4644_v57  ;;  %10940 = vpow2.f32 %v8210_v14  ;;  %v8214_v2 = vmul.f32 -1.442695, %v13419_v8 }
 0x7f5   : > { %v4647_v15 = vmul.f32 %v13229_v48, %v14625_v54  ;;  %v10923_v18 = vpop.eup %10922  ;;  %v14627_v10 = vsub.f32 %v13104_v19, %v13223_v42  ;;  %v13467_v54 = vadd.f32 %v13275_v51, %v4645_v55  ;;  %10942 = vpow2.f32 %v8211_v0 }
 0x7f6   : > { %v4648_v60 = vmul.f32 %v13229_v48, %v14626_v22  ;;  %v8215_v40 = vmul.f32 -1.442695, %v13429_v61  ;;  %v10925_v63 = vpop.eup %10924  ;;  %v14628_v57 = vsub.f32 %v13110_v11, %v13223_v42  ;;  %v13475_v22 = vadd.f32 %v13275_v51, %v4646_v6 }
 0x7f7   : > { %v4649_v4 = vmul.f32 %v13229_v48, %v14627_v10  ;;  %10944 = vpow2.f32 %v8212_v37  ;;  %v8216_v19 = vmul.f32 -1.442695, %v13439_v39  ;;  %v10927_v23 = vpop.eup %10926  ;;  %v13479_v10 = vadd.f32 %v13275_v51, %v4647_v15 }
 0x7f8   : > { %v4650_v14 = vmul.f32 %v13229_v48, %v14628_v57  ;;  %14629 = vst [vmem:[#allocation38_spill] sm:$0xff] %v13475_v22  ;;  %10946 = vpow2.f32 %v8213_v45  ;;  %v8217_v55 = vmul.f32 -1.442695, %v13449_v7  ;;  %v10929_v0 = vpop.eup %10928  ;;  %v13483_v29 = vadd.f32 %v13275_v51, %v4648_v60 }
 0x7f9   : > { %14630 = vst [vmem:[#allocation34_spill] sm:$0xff] %v13479_v10  ;;  %10948 = vpow2.f32 %v8214_v2  ;;  %v8218_v11 = vmul.f32 -1.442695, %v13459_v62  ;;  %v10931_v42 = vpop.eup %10930  ;;  %v13487_v48 = vadd.f32 %v13275_v51, %v4649_v4  ;;  %v8219_v6 = vmul.f32 -1.442695, %v13467_v54 }
 0x7fa   : > { %14631 = vst [vmem:[#allocation72_spill] sm:$0xff] %v13483_v29  ;;  %10950 = vpow2.f32 %v8215_v40  ;;  %v10933_v37 = vpop.eup %10932  ;;  %v13491_v15 = vadd.f32 %v13275_v51, %v4650_v14  ;;  %v8220_v45 = vmul.f32 -1.442695, %v13475_v22  ;;  %v8221_v60 = vmul.f32 -1.442695, %v13479_v10 }
 0x7fb   : > { %14632 = vst [vmem:[#allocation73_spill] sm:$0xff] %v13487_v48  ;;  %10952 = vpow2.f32 %v8216_v19  ;;  %v10935_v57 = vpop.eup %10934  ;;  %v8222_v52 = vmul.f32 -1.442695, %v13483_v29  ;;  %v8223_v40 = vmul.f32 -1.442695, %v13487_v48  ;;  %v4791_v48 = vadd.f32 1.0, %v13442_v35 }
 0x7fc   : > { %14633 = vst [vmem:[#allocation74_spill] sm:$0xff] %v13491_v15  ;;  %10954 = vpow2.f32 %v8217_v55  ;;  %v10937_v2 = vpop.eup %10936  ;;  %v8224_v51 = vmul.f32 -1.442695, %v13491_v15  ;;  %v8225_v19 = vmul.f32 -1.442695, %v13328_v24  ;;  %v4796_v10 = vadd.f32 1.0, %v10929_v0 }
 0x7fd   : > { %10956 = vpow2.f32 %v8218_v11  ;;  %v10939_v4 = vpop.eup %10938  ;;  %v8226_v55 = vmul.f32 -1.442695, %v13331_v17  ;;  %v4787_v11 = vadd.f32 1.0, %v13402_v38  ;;  %v4792_v38 = vadd.f32 1.0, %v13452_v20 }
 0x7fe   : > { %10958 = vpow2.f32 %v8219_v6  ;;  %v10941_v49 = vpop.eup %10940  ;;  %v4788_v6 = vadd.f32 1.0, %v13412_v9  ;;  %v4793_v9 = vadd.f32 1.0, %v10923_v18  ;;  %v4798_v18 = vadd.f32 1.0, %v10933_v37 }
 0x7ff   : > { %10960 = vpow2.f32 %v8220_v45  ;;  %v10943_v14 = vpop.eup %10942  ;;  %v4789_v45 = vadd.f32 1.0, %v13422_v47 }
 0x800   : > { %10962 = vpow2.f32 %v8221_v60  ;;  %v4803_v22 = vadd.f32 1.0, %v10943_v14 }
 0x801   : > { %v10945_v5 = vpop.eup %10944  ;;  %10964 = vpow2.f32 %v8222_v52  ;;  %v4790_v52 = vadd.f32 1.0, %v13432_v16 }
 0x802   : > { %v10947_v41 = vpop.eup %10946  ;;  %10966 = vpow2.f32 %v8223_v40 }
 0x803   : > { %v10949_v56 = vpop.eup %10948  ;;  %10968 = vpow2.f32 %v8224_v51 }
 0x804   : > { %v13502_v3 = vpop.eup %10950  ;;  %10970 = vpow2.f32 %v8225_v19  ;;  %v4794_v19 = vadd.f32 1.0, %v10925_v63  ;;  %v4799_v63 = vadd.f32 1.0, %v10935_v57  ;;  %v4804_v57 = vadd.f32 1.0, %v10945_v5 }
 0x805   : > { %v13505_v60 = vpop.eup %10952  ;;  %10972 = vpow2.f32 %v8226_v55  ;;  %v4795_v55 = vadd.f32 1.0, %v10927_v23  ;;  %v4800_v23 = vadd.f32 1.0, %v10937_v2 }
 0x806   : > { %v10955_v15 = vpop.eup %10954  ;;  %10974 = vrcp.f32 %v4787_v11  ;;  %v4797_v11 = vadd.f32 1.0, %v10931_v42 }
 0x807   : > { %v10957_v40 = vpop.eup %10956  ;;  %10976 = vrcp.f32 %v4788_v6 }
 0x808   : > { %v10959_v51 = vpop.eup %10958  ;;  %10978 = vrcp.f32 %v4789_v45 }
 0x809   : > { %v13510_v29 = vpop.eup %10960  ;;  %10980 = vrcp.f32 %v4790_v52  ;;  %v4801_v52 = vadd.f32 1.0, %v10939_v4 }
 0x80a   : > { %v13512_v47 = vpop.eup %10962  ;;  %10982 = vrcp.f32 %v4791_v48 }
 0x80b   : > { %v13514_v16 = vpop.eup %10964  ;;  %10984 = vrcp.f32 %v4792_v38  ;;  %v4802_v38 = vadd.f32 1.0, %v10941_v49 }
 0x80c   : > { %v13516_v35 = vpop.eup %10966  ;;  %10986 = vrcp.f32 %v4793_v9 }
 0x80d   : > { %v13518_v20 = vpop.eup %10968  ;;  %10988 = vrcp.f32 %v4794_v19 }
 0x80e   : > { %v13520_v6 = vpop.eup %10970  ;;  %10990 = vrcp.f32 %v4795_v55 }
 0x80f   : > { %v13522_v45 = vpop.eup %10972  ;;  %10992 = vrcp.f32 %v4796_v10 }
 0x810   : > { %v10975_v48 = vpop.eup %10974  ;;  %10994 = vrcp.f32 %v4797_v11  ;;  %v4805_v11 = vadd.f32 1.0, %v10947_v41  ;;  %v4809_v41 = vadd.f32 1.0, %v10955_v15 }
 0x811   : > { %v10977_v0 = vpop.eup %10976  ;;  %10996 = vrcp.f32 %v4798_v18  ;;  %v4883_v42 = vmul.f32 %v10975_v48, %v13300_v13  ;;  %v4806_v18 = vadd.f32 1.0, %v10949_v56  ;;  %v4810_v48 = vadd.f32 1.0, %v10957_v40 }
 0x812   : > { %v10979_v9 = vpop.eup %10978  ;;  %10998 = vrcp.f32 %v4799_v63  ;;  %v4884_v37 = vmul.f32 %v10977_v0, %v13303_v28 }
 0x813   : > { %v10981_v19 = vpop.eup %10980  ;;  %11000 = vrcp.f32 %v4800_v23  ;;  %v4885_v55 = vmul.f32 %v10979_v9, %v13306_v26  ;;  %v4808_v23 = vadd.f32 1.0, %v13505_v60 }
 0x814   : > { %v10983_v2 = vpop.eup %10982  ;;  %11002 = vrcp.f32 %v4801_v52  ;;  %v4886_v10 = vmul.f32 %v10981_v19, %v13314_v59  ;;  %v13528_v4 = vpack.c.bf16 %v4884_v37, %v4883_v42  ;;  %v4807_v59 = vadd.f32 1.0, %v13502_v3 }
 0x815   : > { %v10985_v49 = vpop.eup %10984  ;;  %11004 = vrcp.f32 %v4802_v38  ;;  %v4887_v13 = vmul.f32 %v10983_v2, %v13321_v31  ;;  %v4811_v31 = vadd.f32 1.0, %v10959_v51  ;;  %v4812_v38 = vadd.f32 1.0, %v13510_v29 }
 0x816   : > { %v10987_v14 = vpop.eup %10986  ;;  %11006 = vrcp.f32 %v4803_v22  ;;  %v4888_v28 = vmul.f32 %v10985_v49, %v13325_v50  ;;  %9341 = vmatmul.mubr.bf16.vlgmr.msra.gmra.mrb[36].mxu1 %v13528_v4  ;;  %v13533_v5 = vpack.c.bf16 %v4886_v10, %v4885_v55  ;;  %v4933_v26 = vshrl.u32 %v13528_v4, 16  ;;  %v14634_v10 = vld [vmem:[#allocation37_spill] sm:$0xff] }
 0x817   : > { %v10989_v63 = vpop.eup %10988  ;;  %11008 = vrcp.f32 %v4804_v57  ;;  %v4936_v22 = vshll.u32 %v13528_v4, 16  ;;  %v4889_v0 = vmul.f32 %v10987_v14, %v13334_v21  ;;  %v13556_v57 = vadd.f32 1.0, %v13512_v47  ;;  %v10719_v47 = vld [vmem:[#allocation10 + $0x88] sm:$0xff]  }
 0x818   : > { %v10991_v56 = vpop.eup %10990  ;;  %9344 = vmatprep.mubr.bf16.mxu1 %v13533_v5  ;;  %v4935_v50 = vrot.slane %v4933_v26, 7  ;;  %11010 = vrcp.f32 %v4805_v11  ;;  %v4890_v3 = vmul.f32 %v10989_v63, %v13343_v36  ;;  %v4940_v60 = vshrl.u32 %v13533_v5, 16 }
 0x819   : > { %v10993_v52 = vpop.eup %10992  ;;  %11012 = vrcp.f32 %v4806_v18  ;;  %v13546_v40 = vpack.c.bf16 %v4888_v28, %v4887_v13  ;;  %v4891_v9 = vmul.f32 %v10991_v56, %v13348_v44  ;;  %v4943_v36 = vshll.u32 %v13533_v5, 16 }
 0x81a   : > { %v10995_v15 = vpop.eup %10994  ;;  %v4938_v51 = vor.u32 %v4936_v22, %v4935_v50  ;;  %v4892_v37 = vmul.f32 %v10993_v52, %v13353_v25  ;;  %v4942_v21 = vrot.slane %v4940_v60, 7  ;;  %v13559_v29 = vadd.f32 1.0, %v13514_v16 }
 0x81b   : > { %v10997_v42 = vpop.eup %10996  ;;  %v4817_v55 = vadd.f32 1.0, %v13520_v6  ;;  %11014 = vrcp.f32 %v4807_v59  ;;  %v13564_v25 = vpack.c.bf16 %v4890_v3, %v4889_v0  ;;  %v4893_v16 = vmul.f32 %v10995_v15, %v13358_v58  ;;  %v14635_v58 = vld [vmem:[#allocation39_spill] sm:$0xff] }
 0x81c   : > { %v10999_v19 = vpop.eup %10998  ;;  %v5076_v2 = vsel %vm12276_vm7, 0, %v4938_v51  ;;  %v4945_v11 = vor.u32 %v4943_v36, %v4942_v21  ;;  %11016 = vrcp.f32 %v4808_v23  ;;  %v4894_v6 = vmul.f32 %v10997_v42, %v13363_v33 }
 0x81d   : > { %v11001_v44 = vpop.eup %11000  ;;  %v13567_v49 = vmul.bf16 %v5076_v2, %v14634_v10  ;;  %v4948_v13 = vshrl.u32 %v13546_v40, 16  ;;  %v4818_v28 = vadd.f32 1.0, %v13522_v45  ;;  %11018 = vrcp.f32 %v4809_v41 }
 0x81e   : > { %v11003_v18 = vpop.eup %11002  ;;  %9345 = vmatmul.mubr.bf16.gmra.mrb[40].mxu1 %v13546_v40  ;;  %v4946_v63 = vsel %vm1898_vm6, %v4935_v50, %v4945_v11  ;;  %v13579_v59 = vpack.c.bf16 %v4892_v37, %v4891_v9  ;;  %11020 = vrcp.f32 %v4810_v48  ;;  %v4951_v45 = vshll.u32 %v13546_v40, 16  ;;  %v10720_v48 = vld [vmem:[#allocation10 + $0x90] sm:$0xff]  }
 0x81f   : > { %v11005_v14 = vpop.eup %11004  ;;  %9348 = vmatprep.mubr.bf16.mxu1 %v13564_v25  ;;  %9389 = vmatmul.mubr.bf16.vlgmr.msra.gmra.mrb[8].mxu0 %v13567_v49  ;;  %v13583_v33 = vmul.bf16 %v4946_v63, %v14635_v58  ;;  %v4950_v56 = vrot.slane %v4948_v13, 7  ;;  %11022 = vrcp.f32 %v4811_v31  ;;  %v4895_v52 = vmul.f32 %v10999_v19, %v13368_v32  ;;  %v14636_v19 = vld [vmem:[#allocation40_spill] sm:$0xff]  ;;  %v10722_v58 = vld [vmem:[#allocation10 + $0xa0] sm:$0xff]  }
 0x820   : > { %v11007_v23 = vpop.eup %11006  ;;  %9421 = vmatpush3.bf16.msra.mxu0 %v13215_v27  ;;  %v4896_v50 = vmul.f32 %v11001_v44, %v13373_v43  ;;  %v4956_v0 = vshrl.u32 %v13564_v25, 16  ;;  %v4897_v27 = vmul.f32 %v11003_v18, %v13378_v1  ;;  %v4898_v3 = vmul.f32 %v11005_v14, %v13383_v46  ;;  %v10721_v44 = vld [vmem:[#allocation10 + $0x98] sm:$0xff]  }
 0x821   : > { %v11009_v41 = vpop.eup %11008  ;;  %9422 = vmatprep.subr.bf16.mxu0 %v10719_v47  ;;  %9392 = vmatprep.mubr.bf16.mxu0 %v13583_v33  ;;  %v13594_v15 = vpack.c.bf16 %v4894_v6, %v4893_v16  ;;  %v4953_v51 = vor.u32 %v4951_v45, %v4950_v56  ;;  %11024 = vrcp.f32 %v4812_v38  ;;  %v4899_v32 = vmul.f32 %v11007_v23, %v13391_v12  ;;  %v14637_v14 = vld [vmem:[#allocation41_spill] sm:$0xff] }
 0x822   : > { %v11011_v31 = vpop.eup %11010  ;;  %v4958_v43 = vrot.slane %v4956_v0, 7  ;;  %v4959_v42 = vshll.u32 %v13564_v25, 16  ;;  %11026 = vrcp.f32 %v4817_v55  ;;  %v4900_v1 = vmul.f32 %v11009_v41, %v13399_v30 }
 0x823   : > { %v11013_v9 = vpop.eup %11012  ;;  %v4954_v46 = vsel %vm1898_vm6, %v4942_v21, %v4953_v51  ;;  %v4964_v37 = vshrl.u32 %v13579_v59, 16  ;;  %11028 = vrcp.f32 %v4818_v28  ;;  %v13610_v38 = vpack.c.bf16 %v4896_v50, %v4895_v52 }
 0x824   : > { %9423 = vmatpush3.bf16.msra.mxu0 %v10719_v47  ;;  %v13606_v2 = vmul.bf16 %v4954_v46, %v14636_v19  ;;  %v4961_v12 = vor.u32 %v4959_v42, %v4958_v43  ;;  %v13613_v55 = vpack.c.bf16 %v4898_v3, %v4897_v27  ;;  %v4967_v21 = vshll.u32 %v13579_v59, 16  ;;  %v14638_v19 = vld [vmem:[#allocation42_spill] sm:$0xff] }
 0x825   : > { %9424 = vmatprep.subr.bf16.mxu0 %v10720_v48  ;;  %v4966_v30 = vrot.slane %v4964_v37, 7  ;;  %v4972_v10 = vshrl.u32 %v13594_v15, 16  ;;  %v11015_v11 = vpop.eup %11014  ;;  %11030 = vrcp.f32 %v13556_v57  ;;  %v4901_v47 = vmul.f32 %v11011_v31, %v13409_v53 }
 0x826   : > { %9349 = vmatmul.mubr.bf16.gmra.mrb[44].mxu1 %v13579_v59  ;;  %v4902_v18 = vmul.f32 %v11013_v9, %v13419_v8  ;;  %v4962_v16 = vsel %vm1898_vm6, %v4950_v56, %v4961_v12  ;;  %v11017_v6 = vpop.eup %11016  ;;  %v4975_v53 = vshll.u32 %v13594_v15, 16  ;;  %11032 = vrcp.f32 %v13559_v29 }
 0x827   : > { %9352 = vmatprep.mubr.bf16.mxu1 %v13594_v15  ;;  %9393 = vmatmul.mubr.bf16.gmra.mrb[12].mxu0 %v13606_v2  ;;  %v13626_v28 = vmul.bf16 %v4962_v16, %v14637_v14  ;;  %v4969_v63 = vor.u32 %v4967_v21, %v4966_v30  ;;  %v4974_v57 = vrot.slane %v4972_v10, 7  ;;  %v11019_v8 = vpop.eup %11018  ;;  %v4980_v23 = vshrl.u32 %v13610_v38, 16 }
 0x828   : > { %9425 = vmatpush3.bf16.msra.mxu0 %v10720_v48  ;;  %v11021_v56 = vpop.eup %11020  ;;  %v13639_v50 = vpack.c.bf16 %v4900_v1, %v4899_v32  ;;  %v14495_v48 = vshrl.u32 %v13613_v55, 16  ;;  %v4815_v3 = vadd.f32 1.0, %v13516_v35  ;;  %v13643_v29 = vpack.c.bf16 %v4902_v18, %v4901_v47 }
 0x829   : > { %9426 = vmatprep.subr.bf16.mxu0 %v10721_v44  ;;  %9396 = vmatprep.mubr.bf16.mxu0 %v13626_v28  ;;  %v4970_v41 = vsel %vm1898_vm6, %v4958_v43, %v4969_v63  ;;  %v4977_v52 = vor.u32 %v4975_v53, %v4974_v57  ;;  %v11023_v27 = vpop.eup %11022  ;;  %v4982_v51 = vrot.slane %v4980_v23, 7  ;;  %v4816_v31 = vadd.f32 1.0, %v13518_v20  ;;  %v10723_v20 = vld [vmem:[#allocation10 + $0xa8] sm:$0xff]  }
 0x82a   : > { %v4983_v43 = vshll.u32 %v13610_v38, 16  ;;  %v4990_v32 = vrot.slane %v14495_v48, 7  ;;  %v4903_v46 = vmul.f32 %v11015_v11, %v13429_v61  ;;  %v4904_v35 = vmul.f32 %v11017_v6, %v13439_v39 }
 0x82b   : > { %v4978_v9 = vsel %vm1898_vm6, %v4966_v30, %v4977_v52  ;;  %v11025_v1 = vpop.eup %11024  ;;  %v13655_v12 = vmul.bf16 %v4970_v41, %v14638_v19  ;;  %v4991_v47 = vshll.u32 %v13613_v55, 16  ;;  %v4905_v30 = vmul.f32 %v11019_v8, %v13449_v7 }
 0x82c   : > { %9427 = vmatpush3.bf16.msra.mxu0 %v10721_v44  ;;  %v11027_v18 = vpop.eup %11026  ;;  %v14639_v44 = vld [vmem:[#allocation43_spill] sm:$0xff]  ;;  %v4985_v61 = vor.u32 %v4983_v43, %v4982_v51  ;;  %v14482_v39 = vshrl.u32 %v13639_v50, 16  ;;  %v4906_v6 = vmul.f32 %v11021_v56, %v13459_v62  ;;  %v14481_v63 = vshrl.u32 %v13643_v29, 16  ;;  %v10724_v62 = vld [vmem:[#allocation10 + $0xb0] sm:$0xff]  }
 0x82d   : > { %9428 = vmatprep.subr.bf16.mxu0 %v10722_v58  ;;  %v13661_v16 = vmul.bf16 %v4978_v9, %v14639_v44  ;;  %v11029_v11 = vpop.eup %11028  ;;  %v4913_v14 = vmul.f32 %v11027_v18, %v13328_v24  ;;  %v4993_v7 = vor.u32 %v4991_v47, %v4990_v32  ;;  %11034 = vrcp.f32 %v4815_v3  ;;  %v14640_v44 = vld [vmem:[#allocation44_spill] sm:$0xff] }
 0x82e   : > { %9353 = vmatmul.mubr.bf16.gmra.mrb[48].mxu1 %v13610_v38  ;;  %v4914_v8 = vmul.f32 %v11029_v11, %v13331_v17  ;;  %11036 = vrcp.f32 %v4816_v31  ;;  %v4986_v56 = vsel %vm1898_vm6, %v4974_v57, %v4985_v61  ;;  %v13678_v52 = vpack.c.bf16 %v4904_v35, %v4903_v46  ;;  %v10725_v35 = vld [vmem:[#allocation10 + $0xb8] sm:$0xff]   ;;  %v14641_v61 = vld [vmem:[#allocation38_spill] sm:$0xff] }
 0x82f   : > { %9356 = vmatprep.mubr.bf16.mxu1 %v13613_v55  ;;  %9397 = vmatmul.mubr.bf16.gmra.mrb[16].mxu0 %v13655_v12  ;;  %v11031_v41 = vpop.eup %11030  ;;  %v4998_v9 = vrot.slane %v14482_v39, 7  ;;  %v4994_v3 = vsel %vm1898_vm6, %v4982_v51, %v4993_v7  ;;  %v13683_v17 = vpack.c.bf16 %v4906_v6, %v4905_v30  ;;  %v14494_v31 = vshll.u32 %v13639_v50, 16  ;;  %v14642_v51 = vld [vmem:[#allocation45_spill] sm:$0xff] }
 0x830   : > { %9400 = vmatprep.mubr.bf16.mxu0 %v13661_v16  ;;  %9429 = vmatpush3.bf16.msra.mxu0 %v10722_v58  ;;  %v13675_v24 = vpack.c.bf16 %v4914_v8, %v4913_v14  ;;  %v11033_v19 = vpop.eup %11032  ;;  %v5006_v58 = vrot.slane %v14481_v63, 7  ;;  %v4907_v18 = vmul.f32 %v11023_v27, %v13467_v54  ;;  %v13690_v57 = vmul.bf16 %v4986_v56, %v14640_v44  ;;  %v14643_v54 = vld [vmem:[#allocation34_spill] sm:$0xff]  ;;  %v14644_v14 = vld [vmem:[#allocation72_spill] sm:$0xff]  ;;  %v14645_v63 = vld [vmem:[#allocation73_spill] sm:$0xff] }
 0x831   : > { %9430 = vmatprep.subr.bf16.mxu0 %v10723_v20  ;;  %v14483_v46 = vshll.u32 %v13643_v29, 16  ;;  %v4908_v11 = vmul.f32 %v11025_v1, %v14641_v61  ;;  %v13696_v30 = vmul.bf16 %v4994_v3, %v14642_v51  ;;  %v5001_v6 = vor.u32 %v14494_v31, %v4998_v9  ;;  %v13709_v56 = vld [vmem:[#allocation10 + $0xc0] sm:$0xff]  }
 0x832   : > { %v4909_v27 = vmul.f32 %v11031_v41, %v14643_v54  ;;  %v4910_v7 = vmul.f32 %v11033_v19, %v14644_v14  ;;  %v14484_v8 = vshrl.u32 %v13683_v17, 16 }
 0x833   : > { %v5009_v1 = vor.u32 %v14483_v46, %v5006_v58  ;;  %v5002_v41 = vsel %vm1898_vm6, %v4990_v32, %v5001_v6  ;;  %v13712_v44 = vpack.c.bf16 %v4908_v11, %v4907_v18  ;;  %v14646_v46 = vld [vmem:[#allocation46_spill] sm:$0xff]  ;;  %v14490_v18 = vshll.u32 %v13683_v17, 16 }
 0x834   : > { %9431 = vmatpush3.bf16.msra.mxu0 %v10723_v20  ;;  %v14485_v20 = vshrl.u32 %v13678_v52, 16  ;;  %v13717_v54 = vpack.c.bf16 %v4910_v7, %v4909_v27  ;;  %v5022_v14 = vrot.slane %v14484_v8, 7  ;;  %v13724_v32 = vmul.bf16 %v5002_v41, %v14646_v46  ;;  %v14647_v11 = vld [vmem:[#allocation74_spill] sm:$0xff] }
 0x835   : > { %9432 = vmatprep.subr.bf16.mxu0 %v10724_v62  ;;  %v5010_v51 = vsel %vm1898_vm6, %v4998_v9, %v5009_v1  ;;  %v14648_v9 = vld [vmem:[#allocation47_spill] sm:$0xff] }
 0x836   : > { %9357 = vmatmul.mubr.bf16.gmra.mrb[52].mxu1 %v13639_v50  ;;  %v5014_v19 = vrot.slane %v14485_v20, 7  ;;  %v13731_v27 = vmul.bf16 %v5010_v51, %v14648_v9  ;;  %v14486_v46 = vshrl.u32 %v13717_v54, 16  ;;  %v14649_v9 = vld [vmem:[#allocation48_spill] sm:$0xff]  ;;  %v14489_v20 = vshll.u32 %v13717_v54, 16 }
 0x837   : > { %9360 = vmatprep.mubr.bf16.mxu1 %v13643_v29  ;;  %9401 = vmatmul.mubr.bf16.gmra.mrb[20].mxu0 %v13690_v57  ;;  %v11035_v3 = vpop.eup %11034 }
 0x838   : > { %9404 = vmatprep.mubr.bf16.mxu0 %v13696_v30  ;;  %9433 = vmatpush3.bf16.msra.mxu0 %v10724_v62  ;;  %v11037_v61 = vpop.eup %11036  ;;  %v14491_v62 = vshll.u32 %v13678_v52, 16  ;;  %v4911_v39 = vmul.f32 %v11035_v3, %v14645_v63  ;;  %v5025_v63 = vor.u32 %v14490_v18, %v5022_v14  ;;  %v5038_v51 = vrot.slane %v14486_v46, 7  ;;  %v14651_v18 = vld [vmem:[#allocation50_spill] sm:$0xff] }
 0x839   : > { %9434 = vmatprep.subr.bf16.mxu0 %v10725_v35  ;;  %v4912_v6 = vmul.f32 %v11037_v61, %v14647_v11  ;;  %v14488_v11 = vshll.u32 %v13712_v44, 16 }
 0x83a   : > { %v5017_v7 = vor.u32 %v14491_v62, %v5014_v19  ;;  %v5026_v61 = vsel %vm1898_vm6, %v5014_v19, %v5025_v63  ;;  %v5055_v63 = vshll.u32 %v13675_v24, 16 }
 0x83b   : > { %v13743_v3 = vpack.c.bf16 %v4912_v6, %v4911_v39 }
 0x83c   : > { %9435 = vmatpush3.bf16.msra.mxu0 %v10725_v35  ;;  %v14487_v35 = vshrl.u32 %v13712_v44, 16  ;;  %v5018_v1 = vsel %vm1898_vm6, %v5006_v58, %v5017_v7  ;;  %v14650_v58 = vld [vmem:[#allocation49_spill] sm:$0xff]  ;;  %v5041_v7 = vor.u32 %v14489_v20, %v5038_v51 }
 0x83d   : > { %9468 = vmatprep.subr.bf16.mxu0 %v13709_v56  ;;  %v13752_v8 = vmul.bf16 %v5018_v1, %v14649_v9  ;;  %v13757_v39 = vmul.bf16 %v5026_v61, %v14650_v58  ;;  %v14492_v19 = vshrl.u32 %v13743_v3, 16  ;;  %v13771_v9 = vrot.slane %v5055_v63, 1 }
 0x83e   : > { %9361 = vmatmul.mubr.bf16.gmra.mrb[56].mxu1 %v13678_v52  ;;  %v5030_v41 = vrot.slane %v14487_v35, 7  ;;  %v5052_v58 = vshrl.u32 %v13675_v24, 16  ;;  %v14493_v35 = vshll.u32 %v13743_v3, 16 }
 0x83f   : > { %9364 = vmatprep.mubr.bf16.mxu1 %v13683_v17  ;;  %9405 = vmatmul.mubr.bf16.gmra.mrb[24].mxu0 %v13724_v32  ;;  %v5046_v61 = vrot.slane %v14492_v19, 7 }
 0x840   : > { %9408 = vmatprep.mubr.bf16.mxu0 %v13731_v27  ;;  %v5033_v6 = vor.u32 %v14488_v11, %v5030_v41  ;;  %v5042_v46 = vsel %vm1898_vm6, %v5030_v41, %v5041_v7  ;;  %v13776_v11 = vrot.slane %v5052_v58, 7  ;;  %v13779_v20 = vor.u32 %v13771_v9, %v5052_v58  ;;  %v14725_v58 = vld [vmem:[#allocation20_spill] sm:$0xff] }
 0x841   : > { %v5049_v19 = vor.u32 %v14493_v35, %v5046_v61  ;;  %v5095_v7 = vrot.slane %v4936_v22, 1  ;;  %v14654_v35 = vld [vmem:[#allocation53_spill] sm:$0xff]  ;;  %v14655_v22 = vld [vmem:[#allocation54_spill] sm:$0xff] }
 0x842   : > { %v5034_v1 = vsel %vm1898_vm6, %v5022_v14, %v5033_v6  ;;  %v14652_v14 = vld [vmem:[#allocation51_spill] sm:$0xff]  ;;  %v5057_v41 = vor.u32 %v5055_v63, %v13776_v11 }
 0x843   : > { %v13782_v62 = vmul.bf16 %v5034_v1, %v14651_v18  ;;  %v13786_v6 = vmul.bf16 %v5042_v46, %v14652_v14  ;;  %v5050_v1 = vsel %vm1898_vm6, %v5038_v51, %v5049_v19  ;;  %v5097_v46 = vrot.slane %v4943_v36, 1 }
 0x844   : > { %v13796_v18 = vsel %vm1898_vm6, %v5046_v61, %v5057_v41  ;;  %v5159_v14 = vsel %vm12513_vm13, 0, %v5095_v7  ;;  %v13804_v63 = vmul.bf16 %v5050_v1, %v14654_v35  ;;  %v5096_v31 = vor.u32 %v5095_v7, %v4933_v26  ;;  %v14656_v41 = vld [vmem:[#allocation55_spill] sm:$0xff]  ;;  %v14657_v1 = vld [vmem:[#allocation56_spill] sm:$0xff] }
 0x845   : > { %v5161_v48 = vmul.bf16 %v5159_v14, %v14655_v22  ;;  %v5099_v61 = vor.u32 %v5097_v46, %v4940_v60  ;;  %v5100_v36 = vrot.slane %v4951_v45, 1  ;;  %v5103_v35 = vrot.slane %v4959_v42, 1  ;;  %v10727_v7 = vld [vmem:[#allocation10 + $0xc8] sm:$0xff]   ;;  %v14658_v22 = vld [vmem:[#allocation57_spill] sm:$0xff] }
 0x846   : > { %9365 = vmatmul.mubr.bf16.gmra.mrb[60].mxu1 %v13712_v44  ;;  %v5098_v51 = vsel %vm2065_vm11, %v5096_v31, %v5097_v46  ;;  %v5106_v42 = vrot.slane %v4967_v21, 1 }
 0x847   : > { %9368 = vmatprep.mubr.bf16.mxu1 %v13717_v54  ;;  %9409 = vmatmul.mubr.bf16.gmra.mrb[28].mxu0 %v13752_v8  ;;  %v5101_v19 = vsel %vm2065_vm11, %v5099_v61, %v5100_v36  ;;  %v13819_v26 = vmul.bf16 %v5098_v51, %v14656_v41  ;;  %v5102_v60 = vor.u32 %v5100_v36, %v4948_v13  ;;  %v5109_v13 = vrot.slane %v4975_v53, 1 }
 0x848   : > { %9412 = vmatprep.mubr.bf16.mxu0 %v13757_v39  ;;  %v13822_v14 = vmul.bf16 %v5101_v19, %v14657_v1  ;;  %v5105_v45 = vor.u32 %v5103_v35, %v4956_v0  ;;  %v10729_v0 = vld [vmem:[#allocation10 + $0xd8] sm:$0xff]   ;;  %v5108_v21 = vor.u32 %v5106_v42, %v4964_v37  ;;  %v5112_v53 = vrot.slane %v4983_v43, 1  ;;  %v10730_v19 = vld [vmem:[#allocation10 + $0xe0] sm:$0xff]  }
 0x849   : > { %v5104_v31 = vsel %vm2065_vm11, %v5102_v60, %v5103_v35  ;;  %v5111_v51 = vor.u32 %v5109_v13, %v4972_v10  ;;  %v5115_v37 = vrot.slane %v4991_v47, 1  ;;  %v10731_v10 = vld [vmem:[#allocation10 + $0xe8] sm:$0xff]   ;;  %v14661_v60 = vld [vmem:[#allocation60_spill] sm:$0xff]  ;;  %v14663_v47 = vshll.u32 %v13639_v50, 16 }
 0x84a   : > { %v5107_v46 = vsel %vm2065_vm11, %v5105_v45, %v5106_v42  ;;  %v13838_v61 = vmul.bf16 %v5104_v31, %v14658_v22  ;;  %v5110_v35 = vsel %vm2065_vm11, %v5108_v21, %v5109_v13  ;;  %v5114_v43 = vor.u32 %v5112_v53, %v4980_v23 }
 0x84b   : > { %v5113_v41 = vsel %vm2065_vm11, %v5111_v51, %v5112_v53  ;;  %v14662_v42 = vshrl.u32 %v13613_v55, 16  ;;  %v5118_v31 = vrot.slane %v14663_v47, 1  ;;  %v10733_v51 = vld [vmem:[#allocation10 + $0xf8] sm:$0xff]   ;;  %v14666_v53 = vld [vmem:[#allocation62_spill] sm:$0xff]  ;;  %v14670_v47 = vshll.u32 %v13683_v17, 16 }
 0x84c   : > { %v13859_v45 = vmul.bf16 %v5113_v41, %v14661_v60  ;;  %v5116_v13 = vsel %vm2065_vm11, %v5114_v43, %v5115_v37  ;;  %v10734_v43 = vld [vmem:[#allocation10 + $0x100] sm:$0xff]  }
 0x84e   : > { %9369 = vmatmul.mubr.bf16.gmra.mrb[64].mxu1 %v13743_v3 }
 0x84f   : > { %9413 = vmatmul.mubr.bf16.gmra.mrb[32].mxu0 %v13782_v62 }
 0x850   : > { %9416 = vmatprep.mubr.bf16.mxu0 %v13786_v6 }
 0x857   : > { %9417 = vmatmul.mubr.bf16.gmra.mrb[36].mxu0 %v13804_v63 }
 0x858   : > { %9436 = vmatprep.mubr.bf16.mxu0 %v5161_v48  ;;  %v10728_v48 = vld [vmem:[#allocation10 + $0xd0] sm:$0xff]  }
 0x85f   : > { %9437 = vmatmul.mubr.bf16.vlgmr.msra.gmra.mrb[8].mxu0 %v13819_v26 }
 0x860   : > { %9469 = vmatpush3.bf16.msra.mxu0 %v13709_v56  ;;  %9440 = vmatprep.mubr.bf16.mxu0 %v13822_v14  ;;  %v14659_v56 = vld [vmem:[#allocation58_spill] sm:$0xff] }
 0x861   : > { %9470 = vmatprep.subr.bf16.mxu0 %v10727_v7  ;;  %v13841_v36 = vmul.bf16 %v5107_v46, %v14659_v56  ;;  %v10732_v46 = vld [vmem:[#allocation10 + $0xf0] sm:$0xff]   ;;  %v14665_v56 = vld [vmem:[#allocation61_spill] sm:$0xff] }
 0x862   : > { %v13874_v21 = vmul.bf16 %v5116_v13, %v14665_v56  ;;  %v14671_v13 = vld [vmem:[#allocation63_spill] sm:$0xff] }
 0x864   : > { %9471 = vmatpush3.bf16.msra.mxu0 %v10727_v7  ;;  %v14660_v7 = vld [vmem:[#allocation59_spill] sm:$0xff] }
 0x865   : > { %9472 = vmatprep.subr.bf16.mxu0 %v10728_v48  ;;  %v13856_v1 = vmul.bf16 %v5110_v35, %v14660_v7  ;;  %v14667_v35 = vshrl.u32 %v13639_v50, 16 }
 0x867   : > { %9441 = vmatmul.mubr.bf16.gmra.mrb[12].mxu0 %v13838_v61  ;;  %v5120_v41 = vor.u32 %v5118_v31, %v14667_v35 }
 0x868   : > { %9444 = vmatprep.mubr.bf16.mxu0 %v13841_v36  ;;  %9473 = vmatpush3.bf16.msra.mxu0 %v10728_v48  ;;  %v5117_v48 = vor.u32 %v5115_v37, %v14662_v42  ;;  %v14668_v37 = vshrl.u32 %v13643_v29, 16 }
 0x869   : > { %9474 = vmatprep.subr.bf16.mxu0 %v10729_v0 }
 0x86a   : > { %v5119_v22 = vsel %vm2065_vm11, %v5117_v48, %v5118_v31  ;;  %v5127_v31 = vrot.slane %v14670_v47, 1 }
 0x86c   : > { %9475 = vmatpush3.bf16.msra.mxu0 %v10729_v0  ;;  %v14664_v0 = vshll.u32 %v13643_v29, 16 }
 0x86d   : > { %9476 = vmatprep.subr.bf16.mxu0 %v10730_v19 }
 0x86e   : > { %v5121_v23 = vrot.slane %v14664_v0, 1  ;;  %v14672_v0 = vld [vmem:[#allocation64_spill] sm:$0xff] }
 0x86f   : > { %9445 = vmatmul.mubr.bf16.gmra.mrb[16].mxu0 %v13856_v1 }
 0x870   : > { %9448 = vmatprep.mubr.bf16.mxu0 %v13859_v45  ;;  %9477 = vmatpush3.bf16.msra.mxu0 %v10730_v19  ;;  %v13877_v19 = vmul.bf16 %v5119_v22, %v14666_v53  ;;  %v5123_v7 = vor.u32 %v5121_v23, %v14668_v37  ;;  %v5122_v42 = vsel %vm2065_vm11, %v5120_v41, %v5121_v23  ;;  %v14674_v23 = vshrl.u32 %v13683_v17, 16 }
 0x871   : > { %9478 = vmatprep.subr.bf16.mxu0 %v10731_v10  ;;  %v13892_v22 = vmul.bf16 %v5122_v42, %v14671_v13  ;;  %v14675_v41 = vshll.u32 %v13712_v44, 16 }
 0x872   : > { %v5129_v35 = vor.u32 %v5127_v31, %v14674_v23  ;;  %v14680_v23 = vshrl.u32 %v13717_v54, 16 }
 0x874   : > { %9479 = vmatpush3.bf16.msra.mxu0 %v10731_v10  ;;  %v14669_v10 = vshll.u32 %v13678_v52, 16 }
 0x875   : > { %9480 = vmatprep.subr.bf16.mxu0 %v10732_v46 }
 0x876   : > { %v5124_v60 = vrot.slane %v14669_v10, 1  ;;  %v14676_v10 = vshll.u32 %v13717_v54, 16 }
 0x877   : > { %9449 = vmatmul.mubr.bf16.gmra.mrb[20].mxu0 %v13874_v21 }
 0x878   : > { %9452 = vmatprep.mubr.bf16.mxu0 %v13877_v19  ;;  %9481 = vmatpush3.bf16.msra.mxu0 %v10732_v46  ;;  %v5125_v48 = vsel %vm2065_vm11, %v5123_v7, %v5124_v60  ;;  %v14673_v46 = vshrl.u32 %v13678_v52, 16  ;;  %v5133_v42 = vrot.slane %v14676_v10, 1  ;;  %v14682_v10 = vld [vmem:[#allocation68_spill] sm:$0xff] }
 0x879   : > { %9482 = vmatprep.subr.bf16.mxu0 %v10733_v51  ;;  %v13895_v56 = vmul.bf16 %v5125_v48, %v14672_v0  ;;  %v14677_v48 = vld [vmem:[#allocation65_spill] sm:$0xff]  ;;  %v14679_v0 = vshrl.u32 %v13712_v44, 16 }
 0x87a   : > { %v5126_v53 = vor.u32 %v5124_v60, %v14673_v46  ;;  %v14678_v60 = vld [vmem:[#allocation66_spill] sm:$0xff] }
 0x87c   : > { %9483 = vmatpush3.bf16.msra.mxu0 %v10733_v51  ;;  %v5130_v51 = vrot.slane %v14675_v41, 1  ;;  %v5128_v37 = vsel %vm2065_vm11, %v5126_v53, %v5127_v31  ;;  %v5135_v41 = vor.u32 %v5133_v42, %v14680_v23  ;;  %v14681_v31 = vshll.u32 %v13743_v3, 16 }
 0x87d   : > { %9516 = vmatprep.subr.bf16.mxu0 %v10734_v43  ;;  %v13910_v47 = vmul.bf16 %v5128_v37, %v14677_v48  ;;  %v14683_v48 = vld [vmem:[#allocation69_spill] sm:$0xff] }
 0x87e   : > { %v5131_v7 = vsel %vm2065_vm11, %v5129_v35, %v5130_v51  ;;  %v5132_v46 = vor.u32 %v5130_v51, %v14679_v0  ;;  %v5136_v53 = vrot.slane %v14681_v31, 1  ;;  %v14684_v51 = vshrl.u32 %v13743_v3, 16  ;;  %v14685_v31 = vld [vmem:[#allocation70_spill] sm:$0xff] }
 0x87f   : > { %9453 = vmatmul.mubr.bf16.gmra.mrb[24].mxu0 %v13892_v22  ;;  %v13913_v13 = vmul.bf16 %v5131_v7, %v14678_v60 }
 0x880   : > { %9456 = vmatprep.mubr.bf16.mxu0 %v13895_v56  ;;  %v5134_v35 = vsel %vm2065_vm11, %v5132_v46, %v5133_v42  ;;  %v5137_v37 = vsel %vm2065_vm11, %v5135_v41, %v5136_v53  ;;  %v5138_v0 = vor.u32 %v5136_v53, %v14684_v51  ;;  %v10735_v46 = vld [vmem:[#allocation10 + $0x108] sm:$0xff]   ;;  %v10736_v41 = vld [vmem:[#allocation10 + $0x110] sm:$0xff]   ;;  %v10737_v53 = vld [vmem:[#allocation10 + $0x118] sm:$0xff]  }
 0x881   : > { %v13926_v7 = vmul.bf16 %v5134_v35, %v14682_v10  ;;  %v13929_v60 = vmul.bf16 %v5137_v37, %v14683_v48  ;;  %v10741_v35 = vld [vmem:[#allocation10 + $0x138] sm:$0xff]   ;;  %v10742_v37 = vld [vmem:[#allocation10 + $0x140] sm:$0xff]   ;;  %v14686_v10 = vld [vmem:[#allocation71_spill] sm:$0xff] }
 0x882   : > { %v5140_v23 = vsel %vm2065_vm11, %v5138_v0, %v13771_v9  ;;  %v10738_v9 = vld [vmem:[#allocation10 + $0x120] sm:$0xff]   ;;  %v13958_v48 = vmul.bf16 %v13796_v18, %v14686_v10  ;;  %v10743_v51 = vld [vmem:[#allocation10 + $0x148] sm:$0xff]   ;;  %v10744_v0 = vld [vmem:[#allocation10 + $0x150] sm:$0xff]  }
 0x883   : > { %v13938_v42 = vmul.bf16 %v5140_v23, %v14685_v31  ;;  %v10745_v23 = vld [vmem:[#allocation10 + $0x158] sm:$0xff]  }
 0x884   : > { %v10749_v10 = vld [vmem:[#allocation10 + $0x178] sm:$0xff]  }
 0x887   : > { %9457 = vmatmul.mubr.bf16.gmra.mrb[28].mxu0 %v13910_v47 }
 0x888   : > { %9460 = vmatprep.mubr.bf16.mxu0 %v13913_v13 }
 0x88f   : > { %9461 = vmatmul.mubr.bf16.gmra.mrb[32].mxu0 %v13926_v7 }
 0x890   : > { %9464 = vmatprep.mubr.bf16.mxu0 %v13929_v60 }
 0x897   : > { %9465 = vmatmul.mubr.bf16.gmra.mrb[36].mxu0 %v13938_v42 }
 0x898   : > { %9484 = vmatprep.mubr.bf16.mxu0 %v13567_v49  ;;  %v10739_v49 = vld [vmem:[#allocation10 + $0x128] sm:$0xff]  }
 0x89f   : > { %9485 = vmatmul.mubr.bf16.vlgmr.msra.gmra.mrb[8].mxu0 %v13583_v33 }
 0x8a0   : > { %9517 = vmatpush3.bf16.msra.mxu0 %v10734_v43  ;;  %9488 = vmatprep.mubr.bf16.mxu0 %v13606_v2  ;;  %v10740_v43 = vld [vmem:[#allocation10 + $0x130] sm:$0xff]  }
 0x8a1   : > { %9518 = vmatprep.subr.bf16.mxu0 %v10735_v46 }
 0x8a4   : > { %9519 = vmatpush3.bf16.msra.mxu0 %v10735_v46 }
 0x8a5   : > { %9520 = vmatprep.subr.bf16.mxu0 %v10736_v41 }
 0x8a7   : > { %9489 = vmatmul.mubr.bf16.gmra.mrb[12].mxu0 %v13626_v28 }
 0x8a8   : > { %9492 = vmatprep.mubr.bf16.mxu0 %v13655_v12  ;;  %9521 = vmatpush3.bf16.msra.mxu0 %v10736_v41 }
 0x8a9   : > { %9522 = vmatprep.subr.bf16.mxu0 %v10737_v53 }
 0x8ac   : > { %9523 = vmatpush3.bf16.msra.mxu0 %v10737_v53  ;;  %v10747_v53 = vld [vmem:[#allocation10 + $0x168] sm:$0xff]  }
 0x8ad   : > { %9524 = vmatprep.subr.bf16.mxu0 %v10738_v9 }
 0x8af   : > { %9493 = vmatmul.mubr.bf16.gmra.mrb[16].mxu0 %v13661_v16 }
 0x8b0   : > { %9496 = vmatprep.mubr.bf16.mxu0 %v13690_v57  ;;  %9525 = vmatpush3.bf16.msra.mxu0 %v10738_v9 }
 0x8b1   : > { %9526 = vmatprep.subr.bf16.mxu0 %v10739_v49 }
 0x8b4   : > { %9527 = vmatpush3.bf16.msra.mxu0 %v10739_v49  ;;  %v10748_v49 = vld [vmem:[#allocation10 + $0x170] sm:$0xff]  }
 0x8b5   : > { %9528 = vmatprep.subr.bf16.mxu0 %v10740_v43 }
 0x8b7   : > { %9497 = vmatmul.mubr.bf16.gmra.mrb[20].mxu0 %v13696_v30 }
 0x8b8   : > { %9500 = vmatprep.mubr.bf16.mxu0 %v13724_v32  ;;  %9529 = vmatpush3.bf16.msra.mxu0 %v10740_v43 }
 0x8b9   : > { %9530 = vmatprep.subr.bf16.mxu0 %v10741_v35 }
 0x8bc   : > { %9531 = vmatpush3.bf16.msra.mxu0 %v10741_v35 }
 0x8bd   : > { %9564 = vmatprep.subr.bf16.mxu0 %v10742_v37 }
 0x8bf   : > { %9501 = vmatmul.mubr.bf16.gmra.mrb[24].mxu0 %v13731_v27 }
 0x8c0   : > { %9504 = vmatprep.mubr.bf16.mxu0 %v13752_v8 }
 0x8c7   : > { %9505 = vmatmul.mubr.bf16.gmra.mrb[28].mxu0 %v13757_v39 }
 0x8c8   : > { %9508 = vmatprep.mubr.bf16.mxu0 %v13782_v62 }
 0x8cf   : > { %9509 = vmatmul.mubr.bf16.gmra.mrb[32].mxu0 %v13786_v6 }
 0x8d0   : > { %9512 = vmatprep.mubr.bf16.mxu0 %v13804_v63 }
 0x8d7   : > { %9513 = vmatmul.mubr.bf16.gmra.mrb[36].mxu0 %v13958_v48 }
 0x8d8   : > { %9532 = vmatprep.mubr.bf16.mxu0 %v13528_v4  ;;  %v10746_v4 = vld [vmem:[#allocation10 + $0x160] sm:$0xff]  }
 0x8df   : > { %9533 = vmatmul.mubr.bf16.vlgmr.msra.gmra.mrb[8].mxu0 %v13533_v5 }
 0x8e0   : > { %9565 = vmatpush3.bf16.msra.mxu0 %v10742_v37  ;;  %9536 = vmatprep.mubr.bf16.mxu0 %v13546_v40 }
 0x8e1   : > { %9566 = vmatprep.subr.bf16.mxu0 %v10743_v51 }
 0x8e4   : > { %9567 = vmatpush3.bf16.msra.mxu0 %v10743_v51 }
 0x8e5   : > { %9568 = vmatprep.subr.bf16.mxu0 %v10744_v0 }
 0x8e7   : > { %9537 = vmatmul.mubr.bf16.gmra.mrb[12].mxu0 %v13564_v25 }
 0x8e8   : > { %9540 = vmatprep.mubr.bf16.mxu0 %v13579_v59  ;;  %9569 = vmatpush3.bf16.msra.mxu0 %v10744_v0  ;;  %v10750_v0 = vld [vmem:[#allocation10 + $0x180] sm:$0xff]  }
 0x8e9   : > { %v13966_v18 = vpop.f32.mrb[36].mxu1  ;;  %9570 = vmatprep.subr.bf16.mxu0 %v10745_v23 }
 0x8ea   : > { %v13968_v31 = vpop.f32.mrb[37].mxu1 }
 0x8eb   : > { %v13970_v46 = vpop.f32.mrb[38].mxu1 }
 0x8ec   : > { %v13972_v41 = vpop.f32.mrb[39].mxu1  ;;  %9571 = vmatpush3.bf16.msra.mxu0 %v10745_v23 }
 0x8ed   : > { %9572 = vmatprep.subr.bf16.mxu0 %v10746_v4 }
 0x8ef   : > { %9541 = vmatmul.mubr.bf16.gmra.mrb[16].mxu0 %v13594_v15 }
 0x8f0   : > { %9544 = vmatprep.mubr.bf16.mxu0 %v13610_v38  ;;  %9573 = vmatpush3.bf16.msra.mxu0 %v10746_v4 }
 0x8f1   : > { %v13976_v9 = vpop.f32.mrb[40].mxu1  ;;  %9574 = vmatprep.subr.bf16.mxu0 %v10747_v53 }
 0x8f2   : > { %v13978_v43 = vpop.f32.mrb[41].mxu1 }
 0x8f3   : > { %14687 = vst [vmem:[#allocation37_spill] sm:$0xff] %v13978_v43  ;;  %v13980_v35 = vpop.f32.mrb[42].mxu1 }
 0x8f4   : > { %14688 = vst [vmem:[#allocation39_spill] sm:$0xff] %v13980_v35  ;;  %v13982_v37 = vpop.f32.mrb[43].mxu1  ;;  %9575 = vmatpush3.bf16.msra.mxu0 %v10747_v53  ;;  %v10751_v35 = vld [vmem:[#allocation10 + $0x188] sm:$0xff]  }
 0x8f5   : > { %14689 = vst [vmem:[#allocation40_spill] sm:$0xff] %v13982_v37  ;;  %9576 = vmatprep.subr.bf16.mxu0 %v10748_v49 }
 0x8f7   : > { %9545 = vmatmul.mubr.bf16.gmra.mrb[20].mxu0 %v13613_v55 }
 0x8f8   : > { %9548 = vmatprep.mubr.bf16.mxu0 %v13639_v50  ;;  %9577 = vmatpush3.bf16.msra.mxu0 %v10748_v49 }
 0x8f9   : > { %v13986_v51 = vpop.f32.mrb[44].mxu1  ;;  %9578 = vmatprep.subr.bf16.mxu0 %v10749_v10 }
 0x8fa   : > { %14690 = vst [vmem:[#allocation41_spill] sm:$0xff] %v13986_v51  ;;  %v13988_v23 = vpop.f32.mrb[45].mxu1 }
 0x8fb   : > { %14691 = vst [vmem:[#allocation42_spill] sm:$0xff] %v13988_v23  ;;  %v13990_v4 = vpop.f32.mrb[46].mxu1 }
 0x8fc   : > { %14692 = vst [vmem:[#allocation43_spill] sm:$0xff] %v13990_v4  ;;  %v13992_v43 = vpop.f32.mrb[47].mxu1  ;;  %9579 = vmatpush3.bf16.msra.mxu0 %v10749_v10 }
 0x8fd   : > { %14693 = vst [vmem:[#allocation44_spill] sm:$0xff] %v13992_v43  ;;  %9612 = vmatprep.subr.bf16.mxu0 %v10750_v0 }
 0x8ff   : > { %9549 = vmatmul.mubr.bf16.gmra.mrb[24].mxu0 %v13643_v29 }
 0x900   : > { %9552 = vmatprep.mubr.bf16.mxu0 %v13678_v52 }
 0x901   : > { %v13996_v53 = vpop.f32.mrb[48].mxu1 }
 0x902   : > { %14694 = vst [vmem:[#allocation38_spill] sm:$0xff] %v13996_v53  ;;  %v13998_v37 = vpop.f32.mrb[49].mxu1 }
 0x903   : > { %14695 = vst [vmem:[#allocation45_spill] sm:$0xff] %v13998_v37  ;;  %v14000_v49 = vpop.f32.mrb[50].mxu1 }
 0x904   : > { %14696 = vst [vmem:[#allocation34_spill] sm:$0xff] %v14000_v49  ;;  %v14002_v51 = vpop.f32.mrb[51].mxu1 }
 0x905   : > { %14697 = vst [vmem:[#allocation72_spill] sm:$0xff] %v14002_v51 }
 0x907   : > { %9553 = vmatmul.mubr.bf16.gmra.mrb[28].mxu0 %v13683_v17 }
 0x908   : > { %9556 = vmatprep.mubr.bf16.mxu0 %v13712_v44 }
 0x909   : > { %v14006_v4 = vpop.f32.mrb[52].mxu1 }
 0x90a   : > { %14698 = vst [vmem:[#allocation73_spill] sm:$0xff] %v14006_v4  ;;  %v14008_v10 = vpop.f32.mrb[53].mxu1 }
 0x90b   : > { %14699 = vst [vmem:[#allocation46_spill] sm:$0xff] %v14008_v10  ;;  %v14010_v43 = vpop.f32.mrb[54].mxu1 }
 0x90c   : > { %14700 = vst [vmem:[#allocation74_spill] sm:$0xff] %v14010_v43  ;;  %v14012_v23 = vpop.f32.mrb[55].mxu1 }
 0x90d   : > { %14701 = vst [vmem:[#allocation47_spill] sm:$0xff] %v14012_v23 }
 0x90f   : > { %9557 = vmatmul.mubr.bf16.gmra.mrb[32].mxu0 %v13717_v54 }
 0x910   : > { %9560 = vmatprep.mubr.bf16.mxu0 %v13743_v3 }
 0x911   : > { %v14016_v37 = vpop.f32.mrb[56].mxu1 }
 0x912   : > { %v14018_v49 = vpop.f32.mrb[57].mxu1 }
 0x913   : > { %14702 = vst [vmem:[#allocation48_spill] sm:$0xff] %v14018_v49  ;;  %v14020_v51 = vpop.f32.mrb[58].mxu1 }
 0x914   : > { %14703 = vst [vmem:[#allocation49_spill] sm:$0xff] %v14020_v51  ;;  %v14022_v53 = vpop.f32.mrb[59].mxu1 }
 0x915   : > { %14704 = vst [vmem:[#allocation50_spill] sm:$0xff] %v14022_v53  ;;  %v10752_v53 = vld [vmem:[#allocation10 + $0x190] sm:$0xff]  }
 0x917   : > { %9561 = vmatmul.mubr.bf16.gmra.mrb[36].mxu0 %v13675_v24 }
 0x918   : > { %9580 = vmatprep.mubr.bf16.mxu0 %v13819_v26 }
 0x919   : > { %v14026_v10 = vpop.f32.mrb[60].mxu1 }
 0x91a   : > { %14705 = vst [vmem:[#allocation51_spill] sm:$0xff] %v14026_v10  ;;  %v14028_v43 = vpop.f32.mrb[61].mxu1 }
 0x91b   : > { %v14030_v23 = vpop.f32.mrb[62].mxu1 }
 0x91c   : > { %14706 = vst [vmem:[#allocation52_spill] sm:$0xff] %v14030_v23  ;;  %v14032_v4 = vpop.f32.mrb[63].mxu1  ;;  %v10753_v23 = vld [vmem:[#allocation10 + $0x198] sm:$0xff]  }
 0x91f   : > { %9581 = vmatmul.mubr.bf16.vlgmr.msra.gmra.mrb[8].mxu0 %v13822_v14 }
 0x920   : > { %9613 = vmatpush3.bf16.msra.mxu0 %v10750_v0  ;;  %9584 = vmatprep.mubr.bf16.mxu0 %v13838_v61  ;;  %v10754_v0 = vld [vmem:[#allocation10 + $0x1a0] sm:$0xff]  }
 0x921   : > { %v14036_v51 = vpop.f32.mrb[64].mxu1  ;;  %9614 = vmatprep.subr.bf16.mxu0 %v10751_v35 }
 0x922   : > { %14707 = vst [vmem:[#allocation53_spill] sm:$0xff] %v14036_v51  ;;  %v14038_v49 = vpop.f32.mrb[65].mxu1  ;;  %v10755_v51 = vld [vmem:[#allocation10 + $0x1a8] sm:$0xff]  }
 0x923   : > { %v14040_v26 = vpop.f32.mrb[66].mxu1 }
 0x924   : > { %14708 = vst [vmem:[#allocation54_spill] sm:$0xff] %v14040_v26  ;;  %v14042_v10 = vpop.f32.mrb[67].mxu1  ;;  %9615 = vmatpush3.bf16.msra.mxu0 %v10751_v35  ;;  %v10757_v35 = vld [vmem:[#allocation10 + $0x1b8] sm:$0xff]  }
 0x925   : > { %14709 = vst [vmem:[#allocation55_spill] sm:$0xff] %v14042_v10  ;;  %9616 = vmatprep.subr.bf16.mxu0 %v10752_v53  ;;  %v10756_v10 = vld [vmem:[#allocation10 + $0x1b0] sm:$0xff]   ;;  %v10761_v26 = vld [vmem:[#allocation10 + $0x1d8] sm:$0xff]  }
 0x927   : > { %9585 = vmatmul.mubr.bf16.gmra.mrb[12].mxu0 %v13841_v36 }
 0x928   : > { %9588 = vmatprep.mubr.bf16.mxu0 %v13856_v1  ;;  %9617 = vmatpush3.bf16.msra.mxu0 %v10752_v53  ;;  %v10758_v53 = vld [vmem:[#allocation10 + $0x1c0] sm:$0xff]  }
 0x929   : > { %9618 = vmatprep.subr.bf16.mxu0 %v10753_v23 }
 0x92c   : > { %9619 = vmatpush3.bf16.msra.mxu0 %v10753_v23  ;;  %v14710_v23 = vld [vmem:[#allocation67_spill] sm:$0xff] }
 0x92d   : > { %9620 = vmatprep.subr.bf16.mxu0 %v10754_v0 }
 0x92f   : > { %9589 = vmatmul.mubr.bf16.gmra.mrb[16].mxu0 %v13859_v45 }
 0x930   : > { %9592 = vmatprep.mubr.bf16.mxu0 %v13874_v21  ;;  %9621 = vmatpush3.bf16.msra.mxu0 %v10754_v0  ;;  %v10759_v0 = vld [vmem:[#allocation10 + $0x1c8] sm:$0xff]  }
 0x931   : > { %9622 = vmatprep.subr.bf16.mxu0 %v10755_v51 }
 0x934   : > { %9623 = vmatpush3.bf16.msra.mxu0 %v10755_v51  ;;  %v5160_v51 = vsel %vm12513_vm13, %v13779_v20, 0  ;;  %v10762_v20 = vld [vmem:[#allocation10 + $0x1e0] sm:$0xff]  }
 0x935   : > { %9624 = vmatprep.subr.bf16.mxu0 %v10756_v10 }
 0x937   : > { %9593 = vmatmul.mubr.bf16.gmra.mrb[20].mxu0 %v13877_v19 }
 0x938   : > { %9596 = vmatprep.mubr.bf16.mxu0 %v13892_v22  ;;  %9625 = vmatpush3.bf16.msra.mxu0 %v10756_v10  ;;  %v14060_v10 = vmul.bf16 %v5160_v51, %v14710_v23 }
 0x939   : > { %9626 = vmatprep.subr.bf16.mxu0 %v10757_v35 }
 0x93c   : > { %9627 = vmatpush3.bf16.msra.mxu0 %v10757_v35  ;;  %v10760_v35 = vld [vmem:[#allocation10 + $0x1d0] sm:$0xff]  }
 0x93d   : > { %9660 = vmatprep.subr.bf16.mxu0 %v10758_v53 }
 0x93f   : > { %9597 = vmatmul.mubr.bf16.gmra.mrb[24].mxu0 %v13895_v56 }
 0x940   : > { %9600 = vmatprep.mubr.bf16.mxu0 %v13910_v47 }
 0x947   : > { %9601 = vmatmul.mubr.bf16.gmra.mrb[28].mxu0 %v13913_v13 }
 0x948   : > { %9604 = vmatprep.mubr.bf16.mxu0 %v13926_v7 }
 0x94f   : > { %9605 = vmatmul.mubr.bf16.gmra.mrb[32].mxu0 %v13929_v60 }
 0x950   : > { %9608 = vmatprep.mubr.bf16.mxu0 %v13938_v42 }
 0x957   : > { %9609 = vmatmul.mubr.bf16.gmra.mrb[36].mxu0 %v14060_v10 }
 0x958   : > { %9628 = vmatprep.mubr.bf16.mxu0 %v13583_v33  ;;  %v10763_v33 = vld [vmem:[#allocation10 + $0x1e8] sm:$0xff]  }
 0x95f   : > { %9629 = vmatmul.mubr.bf16.vlgmr.msra.gmra.mrb[8].mxu0 %v13606_v2  ;;  %v10764_v2 = vld [vmem:[#allocation10 + $0x1f0] sm:$0xff]  }
 0x960   : > { %9661 = vmatpush3.bf16.msra.mxu0 %v10758_v53  ;;  %9632 = vmatprep.mubr.bf16.mxu0 %v13626_v28  ;;  %v10765_v28 = vld [vmem:[#allocation10 + $0x1f8] sm:$0xff]  }
 0x961   : > { %9662 = vmatprep.subr.bf16.mxu0 %v10759_v0 }
 0x964   : > { %9663 = vmatpush3.bf16.msra.mxu0 %v10759_v0 }
 0x965   : > { %9664 = vmatprep.subr.bf16.mxu0 %v10760_v35 }
 0x967   : > { %9633 = vmatmul.mubr.bf16.gmra.mrb[12].mxu0 %v13655_v12  ;;  %v10766_v12 = vld [vmem:[#allocation10 + $0x200] sm:$0xff]  }
 0x968   : > { %9636 = vmatprep.mubr.bf16.mxu0 %v13661_v16  ;;  %9665 = vmatpush3.bf16.msra.mxu0 %v10760_v35  ;;  %v5077_v16 = vsel %vm12276_vm7, %v13776_v11, 0  ;;  %v14722_v11 = vld [vmem:[#allocation31_spill] sm:$0xff] }
 0x969   : > { %9666 = vmatprep.subr.bf16.mxu0 %v10761_v26 }
 0x96c   : > { %9667 = vmatpush3.bf16.msra.mxu0 %v10761_v26 }
 0x96d   : > { %9668 = vmatprep.subr.bf16.mxu0 %v10762_v20 }
 0x96f   : > { %9637 = vmatmul.mubr.bf16.gmra.mrb[16].mxu0 %v13690_v57  ;;  %v14711_v57 = vld [vmem:[#allocation36_spill] sm:$0xff] }
 0x970   : > { %9640 = vmatprep.mubr.bf16.mxu0 %v13696_v30  ;;  %9669 = vmatpush3.bf16.msra.mxu0 %v10762_v20  ;;  %v5094_v30 = vmul.bf16 %v5077_v16, %v14711_v57  ;;  %v14735_v20 = vld [vmem:[#allocation39_spill] sm:$0xff] }
 0x971   : > { %9670 = vmatprep.subr.bf16.mxu0 %v10763_v33 }
 0x974   : > { %9671 = vmatpush3.bf16.msra.mxu0 %v10763_v33 }
 0x975   : > { %9672 = vmatprep.subr.bf16.mxu0 %v10764_v2 }
 0x977   : > { %9641 = vmatmul.mubr.bf16.gmra.mrb[20].mxu0 %v13724_v32  ;;  %v10769_v32 = vld [vmem:[#allocation10 + $0x218] sm:$0xff]  }
 0x978   : > { %9644 = vmatprep.mubr.bf16.mxu0 %v13731_v27  ;;  %9673 = vmatpush3.bf16.msra.mxu0 %v10764_v2  ;;  %v14720_v27 = vld [vmem:[#allocation27_spill] sm:$0xff] }
 0x979   : > { %9674 = vmatprep.subr.bf16.mxu0 %v10765_v28 }
 0x97c   : > { %9675 = vmatpush3.bf16.msra.mxu0 %v10765_v28 }
 0x97d   : > { %9708 = vmatprep.subr.bf16.mxu0 %v10766_v12 }
 0x97f   : > { %9645 = vmatmul.mubr.bf16.gmra.mrb[24].mxu0 %v13752_v8  ;;  %v10767_v8 = vld [vmem:[#allocation10 + $0x208] sm:$0xff]  }
 0x980   : > { %9648 = vmatprep.mubr.bf16.mxu0 %v13757_v39  ;;  %v14723_v39 = vld [vmem:[#allocation33_spill] sm:$0xff] }
 0x987   : > { %9649 = vmatmul.mubr.bf16.gmra.mrb[28].mxu0 %v13782_v62  ;;  %v10768_v62 = vld [vmem:[#allocation10 + $0x210] sm:$0xff]  }
 0x988   : > { %9652 = vmatprep.mubr.bf16.mxu0 %v13786_v6  ;;  %v14724_v6 = vld [vmem:[#allocation18_spill] sm:$0xff] }
 0x98f   : > { %9653 = vmatmul.mubr.bf16.gmra.mrb[32].mxu0 %v13804_v63  ;;  %v14726_v63 = vld [vmem:[#allocation22_spill] sm:$0xff] }
 0x990   : > { %9656 = vmatprep.mubr.bf16.mxu0 %v13958_v48 }
 0x997   : > { %9657 = vmatmul.mubr.bf16.gmra.mrb[36].mxu0 %v5094_v30 }
 0x998   : > { %9676 = vmatprep.mubr.bf16.mxu0 %v13533_v5  ;;  %v10771_v5 = vld [vmem:[#allocation10 + $0x228] sm:$0xff]  }
 0x99f   : > { %9677 = vmatmul.mubr.bf16.vlgmr.msra.gmra.mrb[8].mxu0 %v13546_v40  ;;  %v10772_v40 = vld [vmem:[#allocation10 + $0x230] sm:$0xff]  }
 0x9a0   : > { %9709 = vmatpush3.bf16.msra.mxu0 %v10766_v12  ;;  %9680 = vmatprep.mubr.bf16.mxu0 %v13564_v25  ;;  %v10773_v25 = vld [vmem:[#allocation10 + $0x238] sm:$0xff]  }
 0x9a1   : > { %9710 = vmatprep.subr.bf16.mxu0 %v10767_v8 }
 0x9a4   : > { %9711 = vmatpush3.bf16.msra.mxu0 %v10767_v8 }
 0x9a5   : > { %9712 = vmatprep.subr.bf16.mxu0 %v10768_v62 }
 0x9a7   : > { %9681 = vmatmul.mubr.bf16.gmra.mrb[12].mxu0 %v13579_v59  ;;  %v10774_v59 = vld [vmem:[%s14712_s14] sm:$0xff]  }
 0x9a8   : > { %9684 = vmatprep.mubr.bf16.mxu0 %v13594_v15  ;;  %9713 = vmatpush3.bf16.msra.mxu0 %v10768_v62  ;;  %v14713_v15 = vmov 0  }
 0x9a9   : > { %9714 = vmatprep.subr.bf16.mxu0 %v10769_v32 }
 0x9ac   : > { %9715 = vmatpush3.bf16.msra.mxu0 %v10769_v32 }
 0x9ad   : > { %9716 = vmatprep.subr.bf16.mxu0 %v10770_v34 }
 0x9af   : > { %9685 = vmatmul.mubr.bf16.gmra.mrb[16].mxu0 %v13610_v38  ;;  %v10775_v38 = vld [vmem:[%s14712_s14 + $0x8] sm:$0xff]  }
 0x9b0   : > { %9688 = vmatprep.mubr.bf16.mxu0 %v13613_v55  ;;  %9717 = vmatpush3.bf16.msra.mxu0 %v10770_v34  ;;  %v10776_v55 = vld [vmem:[%s14712_s14 + $0x10] sm:$0xff]  }
 0x9b1   : > { %9718 = vmatprep.subr.bf16.mxu0 %v10771_v5 }
 0x9b4   : > { %9719 = vmatpush3.bf16.msra.mxu0 %v10771_v5  ;;  %v14737_v5 = vld [vmem:[#allocation41_spill] sm:$0xff] }
 0x9b5   : > { %9720 = vmatprep.subr.bf16.mxu0 %v10772_v40 }
 0x9b7   : > { %9689 = vmatmul.mubr.bf16.gmra.mrb[20].mxu0 %v13639_v50  ;;  %v10777_v50 = vld [vmem:[%s14712_s14 + $0x18] sm:$0xff]  }
 0x9b8   : > { %9692 = vmatprep.mubr.bf16.mxu0 %v13643_v29  ;;  %9721 = vmatpush3.bf16.msra.mxu0 %v10772_v40  ;;  %v14714_v29 = vld [vmem:[#allocation35_spill] sm:$0xff] }
 0x9b9   : > { %9722 = vmatprep.subr.bf16.mxu0 %v10773_v25 }
 0x9bc   : > { %9723 = vmatpush3.bf16.msra.mxu0 %v10773_v25 }
 0x9bd   : > { %9756 = vmatprep.subr.bf16.mxu0 %v10774_v59 }
 0x9bf   : > { %9693 = vmatmul.mubr.bf16.gmra.mrb[24].mxu0 %v13678_v52  ;;  %v14716_v52 = vld [vmem:[#allocation19_spill] sm:$0xff] }
 0x9c0   : > { %9696 = vmatprep.mubr.bf16.mxu0 %v13683_v17  ;;  %v14717_v17 = vld [vmem:[#allocation21_spill] sm:$0xff] }
 0x9c7   : > { %9697 = vmatmul.mubr.bf16.gmra.mrb[28].mxu0 %v13712_v44  ;;  %v14718_v44 = vld [vmem:[#allocation23_spill] sm:$0xff] }
 0x9c8   : > { %9700 = vmatprep.mubr.bf16.mxu0 %v13717_v54  ;;  %v14719_v54 = vld [vmem:[#allocation25_spill] sm:$0xff] }
 0x9cf   : > { %9701 = vmatmul.mubr.bf16.gmra.mrb[32].mxu0 %v13743_v3  ;;  %v14721_v3 = vld [vmem:[#allocation29_spill] sm:$0xff] }
 0x9d0   : > { %9704 = vmatprep.mubr.bf16.mxu0 %v13675_v24  ;;  %v14715_v24 = vmul.bf16 0, %v14714_v29 }
 0x9d7   : > { %9705 = vmatmul.mubr.bf16.gmra.mrb[36].mxu0 %v14713_v15  ;;  %v14738_v15 = vld [vmem:[#allocation42_spill] sm:$0xff] }
 0x9d8   : > { %9724 = vmatprep.mubr.bf16.mxu0 %v13822_v14  ;;  %v14727_v14 = vld [vmem:[#allocation24_spill] sm:$0xff] }
 0x9df   : > { %9725 = vmatmul.mubr.bf16.vlgmr.msra.gmra.mrb[8].mxu0 %v13838_v61  ;;  %v14728_v61 = vld [vmem:[#allocation26_spill] sm:$0xff] }
 0x9e0   : > { %9757 = vmatpush3.bf16.msra.mxu0 %v10774_v59  ;;  %9728 = vmatprep.mubr.bf16.mxu0 %v13841_v36  ;;  %v14729_v36 = vld [vmem:[#allocation28_spill] sm:$0xff] }
 0x9e1   : > { %9758 = vmatprep.subr.bf16.mxu0 %v10775_v38 }
 0x9e4   : > { %9759 = vmatpush3.bf16.msra.mxu0 %v10775_v38 }
 0x9e5   : > { %9760 = vmatprep.subr.bf16.mxu0 %v10776_v55 }
 0x9e7   : > { %9729 = vmatmul.mubr.bf16.gmra.mrb[12].mxu0 %v13856_v1  ;;  %v14730_v1 = vld [vmem:[#allocation30_spill] sm:$0xff] }
 0x9e8   : > { %9732 = vmatprep.mubr.bf16.mxu0 %v13859_v45  ;;  %9761 = vmatpush3.bf16.msra.mxu0 %v10776_v55  ;;  %v14731_v45 = vld [vmem:[#allocation32_spill] sm:$0xff] }
 0x9e9   : > { %9762 = vmatprep.subr.bf16.mxu0 %v10777_v50 }
 0x9ec   : > { %9763 = vmatpush3.bf16.msra.mxu0 %v10777_v50  ;;  %v14739_v50 = vld [vmem:[#allocation43_spill] sm:$0xff] }
 0x9ef   : > { %9733 = vmatmul.mubr.bf16.gmra.mrb[16].mxu0 %v13874_v21  ;;  %v14162_v21 = vld [vmem:[%s14732_s11] ss:$0 sm:$0xff]  ;;  %s11192_s11 = sshll.u32 %s11278_s15, 4  ;;  %s11193_s11 = int_to_ptr.vmem [resolvable:$false] %s11192_s11 }
 0x9f0   : > { %9736 = vmatprep.mubr.bf16.mxu0 %v13877_v19  ;;  %v9966_v19 = vadd.f32 %v13970_v46, %v14162_v21  ;;  %v9972_v53 = vadd.f32 %v13976_v9, %v14162_v21  ;;  %v9978_v33 = vadd.f32 %v14735_v20, %v14162_v21  ;;  %v14736_v9 = vld [vmem:[#allocation40_spill] sm:$0xff]  ;;  %v9984_v40 = vadd.f32 %v14737_v5, %v14162_v21  ;;  %s11194_s19 = scalar_lea.vmem %s11193_s11, 8192  ;;  %p11195_p12 = scmp.lt.s32.totalorder %s14305_s22, %s11193_s11 }
 0x9f1   : > { %v9981_v2 = vadd.f32 %v14162_v21, %v14736_v9  ;;  %v9987_v38 = vadd.f32 %v14162_v21, %v14738_v15  ;;  %v9990_v29 = vadd.f32 %v14739_v50, %v14162_v21  ;;  %v14747_v9 = vld [vmem:[#allocation74_spill] sm:$0xff]  ;;  %p11196_p1 = scmp.lt.s32.totalorder %s11194_s19, %s11188_s25 }
 0x9f3   : > { %p11197_p2 = por %p11196_p1, %p11195_p12 }
 0x9f5   : > { %p11198_p13 = pnand %p11197_p2, %p11191_p7 }
 0x9f7   : > { %9737 = vmatmul.mubr.bf16.gmra.mrb[20].mxu0 %v13892_v22  ;;  %v9969_v22 = vadd.f32 %v14162_v21, %v13972_v41 }
 0x9f8   : > { %9740 = vmatprep.mubr.bf16.mxu0 %v13895_v56  ;;  %v14171_v56 = vld [vmem:[%s14733_s23] ss:$0 sm:$0xff] }
 0x9f9   : > { %v9967_v48 = vadd.f32 %v9966_v19, %v14171_v56  ;;  %v9970_v41 = vadd.f32 %v9969_v22, %v14171_v56  ;;  %v9973_v28 = vadd.f32 %v9972_v53, %v14171_v56  ;;  %v9979_v8 = vadd.f32 %v9978_v33, %v14171_v56  ;;  %v14743_v22 = vld [vmem:[#allocation34_spill] sm:$0xff] }
 0x9fa   : > { %v9982_v34 = vadd.f32 %v9981_v2, %v14171_v56  ;;  %v10014_v2 = vadd.f32 %v14747_v9, %v14162_v21 }
 0x9ff   : > { %9741 = vmatmul.mubr.bf16.gmra.mrb[24].mxu0 %v13910_v47  ;;  %v9960_v47 = vadd.f32 %v13966_v18, %v14162_v21 }
 0xa00   : > { %9744 = vmatprep.mubr.bf16.mxu0 %v13913_v13  ;;  %v9963_v13 = vadd.f32 %v14162_v21, %v13968_v31 }
 0xa07   : > { %9745 = vmatmul.mubr.bf16.gmra.mrb[28].mxu0 %v13926_v7 }
 0xa08   : > { %9748 = vmatprep.mubr.bf16.mxu0 %v13929_v60 }
 0xa0f   : > { %9749 = vmatmul.mubr.bf16.gmra.mrb[32].mxu0 %v13938_v42 }
 0xa10   : > { %9752 = vmatprep.mubr.bf16.mxu0 %v14060_v10  ;;  %v14734_v10 = vld [vmem:[#allocation37_spill] sm:$0xff] }
 0xa11   : > { %v9975_v31 = vadd.f32 %v14162_v21, %v14734_v10 }
 0xa13   : > { %v9976_v16 = vadd.f32 %v9975_v31, %v14171_v56 }
 0xa17   : > { %9753 = vmatmul.mubr.bf16.gmra.mrb[36].mxu0 %v14715_v24  ;;  %v14740_v24 = vld [vmem:[#allocation44_spill] sm:$0xff] }
 0xa18   : > { %9764 = vmatprep.mubr.msk.bf16.mxu0 %vm1458_vm2, %v14716_v52  ;;  %v9993_v52 = vadd.f32 %v14162_v21, %v14740_v24 }
 0xa1f   : > { %9765 = vmatmul.mubr.msk.bf16.vlgmr.msra.gmra.mrb[8].mxu0 %vm1458_vm2, %v14717_v17  ;;  %v9985_v17 = vadd.f32 %v9984_v40, %v14171_v56 }
 0xa20   : > { %9768 = vmatprep.mubr.msk.bf16.mxu0 %vm1458_vm2, %v14718_v44 }
 0xa27   : > { %9769 = vmatmul.mubr.msk.bf16.gmra.mrb[12].mxu0 %vm1458_vm2, %v14719_v54  ;;  %v9988_v54 = vadd.f32 %v9987_v38, %v14171_v56  ;;  %v14749_v38 = vld [vmem:[#allocation48_spill] sm:$0xff] }
 0xa28   : > { %9772 = vmatprep.mubr.msk.bf16.mxu0 %vm1458_vm2, %v14720_v27 }
 0xa2f   : > { %9773 = vmatmul.mubr.msk.bf16.gmra.mrb[16].mxu0 %vm1458_vm2, %v14721_v3 }
 0xa30   : > { %9776 = vmatprep.mubr.msk.bf16.mxu0 %vm1458_vm2, %v14722_v11  ;;  %v9991_v11 = vadd.f32 %v9990_v29, %v14171_v56  ;;  %v14750_v29 = vld [vmem:[#allocation49_spill] sm:$0xff] }
 0xa31   : > { %v10026_v24 = vadd.f32 %v14750_v29, %v14162_v21 }
 0xa37   : > { %9777 = vmatmul.mubr.msk.bf16.gmra.mrb[20].mxu0 %vm1458_vm2, %v14723_v39 }
 0xa38   : > { %9780 = vmatprep.mubr.msk.bf16.mxu0 %vm1458_vm2, %v14724_v6 }
 0xa3f   : > { %9781 = vmatmul.mubr.msk.bf16.gmra.mrb[24].mxu0 %vm1458_vm2, %v14725_v58  ;;  %v9994_v58 = vadd.f32 %v9993_v52, %v14171_v56  ;;  %v14751_v52 = vld [vmem:[#allocation50_spill] sm:$0xff] }
 0xa40   : > { %9784 = vmatprep.mubr.msk.bf16.mxu0 %vm1458_vm2, %v14726_v63  ;;  %v14741_v63 = vld [vmem:[#allocation38_spill] sm:$0xff] }
 0xa47   : > { %9785 = vmatmul.mubr.msk.bf16.gmra.mrb[28].mxu0 %vm1458_vm2, %v14727_v14  ;;  %v9996_v14 = vadd.f32 %v14741_v63, %v14162_v21  ;;  %v14752_v63 = vld [vmem:[#allocation51_spill] sm:$0xff] }
 0xa48   : > { %9788 = vmatprep.mubr.msk.bf16.mxu0 %vm1458_vm2, %v14728_v61 }
 0xa4f   : > { %9789 = vmatmul.mubr.msk.bf16.gmra.mrb[32].mxu0 %vm1458_vm2, %v14729_v36 }
 0xa50   : > { %9792 = vmatprep.mubr.msk.bf16.mxu0 %vm1458_vm2, %v14730_v1  ;;  %v14742_v1 = vld [vmem:[#allocation45_spill] sm:$0xff] }
 0xa57   : > { %9793 = vmatmul.mubr.msk.bf16.gmra.mrb[36].mxu0 %vm1458_vm2, %v14731_v45  ;;  %v9999_v45 = vadd.f32 %v14162_v21, %v14742_v1  ;;  %v10035_v1 = vadd.f32 %v14162_v21, %v14028_v43 }
 0xaf2   : > { %v9766_v7 = vpop.f32.mrb[8].mxu0 }
 0xaf3   : > { %v9961_v60 = vadd.f32 %v9960_v47, %v9766_v7  ;;  %v7610_v42 = vpop.f32.mrb[9].mxu0  ;;  %v10002_v47 = vadd.f32 %v14743_v22, %v14162_v21 }
 0xaf4   : > { %v9964_v46 = vadd.f32 %v9963_v13, %v7610_v42  ;;  %v9767_v26 = vpop.f32.mrb[10].mxu0  ;;  %v14744_v13 = vld [vmem:[#allocation72_spill] sm:$0xff] }
 0xaf5   : > { %v9962_v51 = vadd.f32 %v9961_v60, %v14171_v56  ;;  %v9968_v23 = vadd.f32 %v9967_v48, %v9767_v26  ;;  %v7613_v18 = vpop.f32.mrb[11].mxu0  ;;  %v10005_v7 = vadd.f32 %v14162_v21, %v14744_v13  ;;  %v9997_v60 = vadd.f32 %v9996_v14, %v14171_v56 }
 0xaf6   : > { %v9965_v0 = vadd.f32 %v9964_v46, %v14171_v56  ;;  %v9971_v35 = vadd.f32 %v9970_v41, %v7613_v18  ;;  %v10000_v48 = vadd.f32 %v9999_v45, %v14171_v56  ;;  %v10003_v41 = vadd.f32 %v10002_v47, %v14171_v56  ;;  %v14745_v18 = vld [vmem:[#allocation73_spill] sm:$0xff] }
 0xaf7   : > { %7771 = vst [vmem:[%s14189_s16 + $0x10] sm:$0xff] %v9962_v51  ;;  %7772 = vst [vmem:[%s14189_s16 + $0x18] sm:$0xff] %v9968_v23  ;;  %v10006_v23 = vadd.f32 %v10005_v7, %v14171_v56  ;;  %v10008_v10 = vadd.f32 %v14745_v18, %v14162_v21  ;;  %v10032_v14 = vadd.f32 %v14752_v63, %v14162_v21 }
 0xaf8   : > { %7769 = vst [vmem:[%s14189_s16] sm:$0xff] %v9965_v0  ;;  %7770 = vst [vmem:[%s14189_s16 + $0x8] sm:$0xff] %v9971_v35  ;;  %v14746_v35 = vld [vmem:[#allocation46_spill] sm:$0xff]  ;;  %v10041_v47 = vadd.f32 %v14162_v21, %v14032_v4  ;;  %v14754_v4 = vld [vmem:[#allocation53_spill] sm:$0xff]  ;;  %v10047_v18 = vadd.f32 %v14162_v21, %v14038_v49 }
 0xaf9   : > { %v10011_v20 = vadd.f32 %v14162_v21, %v14746_v35  ;;  %v10033_v13 = vadd.f32 %v10032_v14, %v14171_v56  ;;  %v14756_v35 = vld [vmem:[#allocation55_spill] sm:$0xff] }
 0xafa   : > { %v9770_v12 = vpop.f32.mrb[12].mxu0 }
 0xafb   : > { %v9974_v57 = vadd.f32 %v9973_v28, %v9770_v12  ;;  %v7626_v30 = vpop.f32.mrb[13].mxu0  ;;  %v14748_v28 = vld [vmem:[#allocation47_spill] sm:$0xff] }
 0xafc   : > { %v9977_v62 = vadd.f32 %v9976_v16, %v7626_v30  ;;  %v9771_v32 = vpop.f32.mrb[14].mxu0  ;;  %v10017_v12 = vadd.f32 %v14162_v21, %v14748_v28  ;;  %v10009_v16 = vadd.f32 %v10008_v10, %v14171_v56  ;;  %v10012_v30 = vadd.f32 %v10011_v20, %v14171_v56 }
 0xafd   : > { %7775 = vst [vmem:[%s14189_s16 + $0x30] sm:$0xff] %v9974_v57  ;;  %v9980_v25 = vadd.f32 %v9979_v8, %v9771_v32  ;;  %v7629_v59 = vpop.f32.mrb[15].mxu0  ;;  %v10015_v32 = vadd.f32 %v10014_v2, %v14171_v56  ;;  %v10053_v20 = vadd.f32 %v14162_v21, %v14756_v35  ;;  %v10048_v2 = vadd.f32 %v10047_v18, %v14171_v56 }
 0xafe   : > { %7773 = vst [vmem:[%s14189_s16 + $0x20] sm:$0xff] %v9977_v62  ;;  %v9983_v55 = vadd.f32 %v9982_v34, %v7629_v59  ;;  %v10018_v40 = vadd.f32 %v10017_v12, %v14171_v56 }
 0xaff   : > { %7776 = vst [vmem:[%s14189_s16 + $0x38] sm:$0xff] %v9980_v25  ;;  %v10020_v25 = vadd.f32 %v14016_v37, %v14162_v21 }
 0xb00   : > { %7774 = vst [vmem:[%s14189_s16 + $0x28] sm:$0xff] %v9983_v55  ;;  %v10023_v55 = vadd.f32 %v14162_v21, %v14749_v38 }
 0xb01   : > { %v10021_v37 = vadd.f32 %v10020_v25, %v14171_v56 }
 0xb02   : > { %v9774_v44 = vpop.f32.mrb[16].mxu0 }
 0xb03   : > { %v9986_v27 = vadd.f32 %v9985_v17, %v9774_v44  ;;  %v7642_v3 = vpop.f32.mrb[17].mxu0  ;;  %v10029_v17 = vadd.f32 %v14162_v21, %v14751_v52 }
 0xb04   : > { %v9989_v39 = vadd.f32 %v9988_v54, %v7642_v3  ;;  %v9775_v6 = vpop.f32.mrb[18].mxu0  ;;  %v10024_v54 = vadd.f32 %v10023_v55, %v14171_v56 }
 0xb05   : > { %7779 = vst [vmem:[%s14189_s16 + $0x50] sm:$0xff] %v9986_v27  ;;  %v9992_v61 = vadd.f32 %v9991_v11, %v9775_v6  ;;  %v7645_v36 = vpop.f32.mrb[19].mxu0  ;;  %v10027_v11 = vadd.f32 %v10026_v24, %v14171_v56 }
 0xb06   : > { %7777 = vst [vmem:[%s14189_s16 + $0x40] sm:$0xff] %v9989_v39  ;;  %v9995_v19 = vadd.f32 %v9994_v58, %v7645_v36  ;;  %v10030_v58 = vadd.f32 %v10029_v17, %v14171_v56 }
 0xb07   : > { %7780 = vst [vmem:[%s14189_s16 + $0x58] sm:$0xff] %v9992_v61 }
 0xb08   : > { %7778 = vst [vmem:[%s14189_s16 + $0x48] sm:$0xff] %v9995_v19  ;;  %v14753_v19 = vld [vmem:[#allocation52_spill] sm:$0xff] }
 0xb09   : > { %v10038_v22 = vadd.f32 %v14753_v19, %v14162_v21 }
 0xb0a   : > { %v9778_v42 = vpop.f32.mrb[20].mxu0 }
 0xb0b   : > { %v9998_v46 = vadd.f32 %v9997_v60, %v9778_v42  ;;  %v7658_v26 = vpop.f32.mrb[21].mxu0  ;;  %v10036_v60 = vadd.f32 %v10035_v1, %v14171_v56 }
 0xb0c   : > { %v10001_v53 = vadd.f32 %v10000_v48, %v7658_v26  ;;  %v9779_v51 = vpop.f32.mrb[22].mxu0  ;;  %v10039_v48 = vadd.f32 %v10038_v22, %v14171_v56 }
 0xb0d   : > { %7783 = vst [vmem:[%s14189_s16 + $0x70] sm:$0xff] %v9998_v46  ;;  %v10004_v31 = vadd.f32 %v10003_v41, %v9779_v51  ;;  %v7661_v0 = vpop.f32.mrb[23].mxu0  ;;  %v10042_v41 = vadd.f32 %v10041_v47, %v14171_v56 }
 0xb0e   : > { %7781 = vst [vmem:[%s14189_s16 + $0x60] sm:$0xff] %v10001_v53  ;;  %v10007_v33 = vadd.f32 %v10006_v23, %v7661_v0  ;;  %v10044_v53 = vadd.f32 %v14754_v4, %v14162_v21 }
 0xb0f   : > { %7784 = vst [vmem:[%s14189_s16 + $0x78] sm:$0xff] %v10004_v31  ;;  %v14755_v31 = vld [vmem:[#allocation54_spill] sm:$0xff] }
 0xb10   : > { %7782 = vst [vmem:[%s14189_s16 + $0x68] sm:$0xff] %v10007_v33  ;;  %v10050_v0 = vadd.f32 %v14755_v31, %v14162_v21  ;;  %v10045_v33 = vadd.f32 %v10044_v53, %v14171_v56  ;;  %v10054_v21 = vadd.f32 %v10053_v20, %v14171_v56 }
 0xb12   : > { %v9782_v57 = vpop.f32.mrb[24].mxu0  ;;  %v10051_v12 = vadd.f32 %v10050_v0, %v14171_v56 }
 0xb13   : > { %v10010_v8 = vadd.f32 %v10009_v16, %v9782_v57  ;;  %v7674_v62 = vpop.f32.mrb[25].mxu0 }
 0xb14   : > { %v10013_v34 = vadd.f32 %v10012_v30, %v7674_v62  ;;  %v9783_v5 = vpop.f32.mrb[26].mxu0 }
 0xb15   : > { %7787 = vst [vmem:[%s14189_s16 + $0x90] sm:$0xff] %v10010_v8  ;;  %v10016_v59 = vadd.f32 %v10015_v32, %v9783_v5  ;;  %v7677_v15 = vpop.f32.mrb[27].mxu0 }
 0xb16   : > { %7785 = vst [vmem:[%s14189_s16 + $0x80] sm:$0xff] %v10013_v34  ;;  %v10019_v50 = vadd.f32 %v10018_v40, %v7677_v15 }
 0xb17   : > { %7788 = vst [vmem:[%s14189_s16 + $0x98] sm:$0xff] %v10016_v59 }
 0xb18   : > { %7786 = vst [vmem:[%s14189_s16 + $0x88] sm:$0xff] %v10019_v50 }
 0xb1a   : > { %v9786_v44 = vpop.f32.mrb[28].mxu0 }
 0xb1b   : > { %v10022_v27 = vadd.f32 %v10021_v37, %v9786_v44  ;;  %v7690_v3 = vpop.f32.mrb[29].mxu0 }
 0xb1c   : > { %v10025_v39 = vadd.f32 %v10024_v54, %v7690_v3  ;;  %v9787_v6 = vpop.f32.mrb[30].mxu0 }
 0xb1d   : > { %7791 = vst [vmem:[%s14189_s16 + $0xb0] sm:$0xff] %v10022_v27  ;;  %v10028_v61 = vadd.f32 %v10027_v11, %v9787_v6  ;;  %v7693_v36 = vpop.f32.mrb[31].mxu0 }
 0xb1e   : > { %7789 = vst [vmem:[%s14189_s16 + $0xa0] sm:$0xff] %v10025_v39  ;;  %v10031_v45 = vadd.f32 %v10030_v58, %v7693_v36 }
 0xb1f   : > { %7792 = vst [vmem:[%s14189_s16 + $0xb8] sm:$0xff] %v10028_v61 }
 0xb20   : > { %7790 = vst [vmem:[%s14189_s16 + $0xa8] sm:$0xff] %v10031_v45 }
 0xb22   : > { %v9790_v7 = vpop.f32.mrb[32].mxu0 }
 0xb23   : > { %v10034_v42 = vadd.f32 %v10033_v13, %v9790_v7  ;;  %v7706_v43 = vpop.f32.mrb[33].mxu0 }
 0xb24   : > { %v10037_v46 = vadd.f32 %v10036_v60, %v7706_v43  ;;  %v9791_v26 = vpop.f32.mrb[34].mxu0 }
 0xb25   : > { %7795 = vst [vmem:[%s14189_s16 + $0xd0] sm:$0xff] %v10034_v42  ;;  %v10040_v51 = vadd.f32 %v10039_v48, %v9791_v26  ;;  %v7709_v23 = vpop.f32.mrb[35].mxu0 }
 0xb26   : > { %7793 = vst [vmem:[%s14189_s16 + $0xc0] sm:$0xff] %v10037_v46  ;;  %v10043_v10 = vadd.f32 %v10042_v41, %v7709_v23 }
 0xb27   : > { %7796 = vst [vmem:[%s14189_s16 + $0xd8] sm:$0xff] %v10040_v51 }
 0xb28   : > { %7794 = vst [vmem:[%s14189_s16 + $0xc8] sm:$0xff] %v10043_v10 }
 0xb2a   : > { %v9794_v9 = vpop.f32.mrb[36].mxu0 }
 0xb2b   : > { %v10046_v49 = vadd.f32 %v10045_v33, %v9794_v9  ;;  %v7722_v28 = vpop.f32.mrb[37].mxu0 }
 0xb2c   : > { %v10049_v16 = vadd.f32 %v10048_v2, %v7722_v28  ;;  %v9795_v57 = vpop.f32.mrb[38].mxu0 }
 0xb2d   : > { %7799 = vst [vmem:[%s14189_s16 + $0xf0] sm:$0xff] %v10046_v49  ;;  %v10052_v30 = vadd.f32 %v10051_v12, %v9795_v57  ;;  %v7725_v8 = vpop.f32.mrb[39].mxu0 }
 0xb2e   : > { %7797 = vst [vmem:[%s14189_s16 + $0xe0] sm:$0xff] %v10049_v16  ;;  %v10055_v62 = vadd.f32 %v10054_v21, %v7725_v8 }
 0xb2f   : > { %7800 = vst [vmem:[%s14189_s16 + $0xf8] sm:$0xff] %v10052_v30 }
 0xb30   : > { %7798 = vst [vmem:[%s14189_s16 + $0xe8] sm:$0xff] %v10055_v62 }
 0xb31   : > { %11201 = shalt.err (!%p11198_p13)
}
 0xb32   : > { %s11202_s8 = scalar_lea.hbm %s14303_s30, 4096  ;;  %s11206_s21 = scalar_lea.hbm %s14757_s17, 8192 }
 0xb33   : > { %p11203_p9 = scmp.ne.s32.totalorder %s14303_s30, %s11202_s8  ;;  %p11207_p4 = scmp.lt.u32.totalorder %s14303_s30, %s14757_s17 }
 0xb34   : > { %p11208_p8 = scmp.lt.u32.totalorder %s11206_s21, %s11202_s8  ;;  %p11210_p3 = scmp.lt.u32.totalorder %s11202_s8, %s14303_s30 }
 0xb35   : > { %p11204_p0 = pnand %p11203_p9, %p11516_p10 }
 0xb36   : > { %p11209_p6 = por %p11208_p8, %p11207_p4 }
 0xb37   : > { %p11205_p11 = pneg %p11204_p0 }
 0xb38   : > { %p11211_p5 = por %p11210_p3, %p11209_p6 }
 0xb3a   : > { %p11212_p7 = pnand %p11211_p5, %p11205_p11 }
 0xb3c   : > { %11215 = shalt.err (!%p11212_p7)
}
 0xb3d   : > { %s11279_s25 = smov 128   ;;  %s11280_s15 = smov 8  }
 0xb3e   : > { %10586 = dma.vmem_to_hbm [thread:$0]  (%p11516_p10), %s14305_s22, 4096, %s14303_s30, %s7802_s29, %s11279_s25, %s11279_s25, %s11280_s15  }
 0xb3f PF: > { %s14758_s11 = sld [smem:[#allocation16_spill]]  ;;  %s14759_s19 = sld [smem:[#allocation17_spill]] }
 0xb40   : > { %p14761_p1 = scmp.ge.s32.totalorder %s11262_s28, 2 }
 0xb45   : > { %s7830_s23 = sand.u32 1, %s14758_s11   ;;  %p14760_p12 = scmp.ne.s32.totalorder %s14759_s19, 0 }
 0xb46   : > { %s7831_s8 = scalar_lea.sflag [#allocation4], %s7830_s23 }
 0xb47   : > { %p10606_p2 = pnand %p14761_p1, %p14760_p12 }
 0xb49   : > { %11245 = dma.done.wait (!%p10606_p2), %s7831_s8, 4096  }
 0xb4a   : > { %11247 = vsyncadd (!%p10606_p2), %s7831_s8, 4294963200  ;;  %p28_p13 = scmp.ge.s32.totalorder %s11506_s13, 4   ;;  %s14762_s25 = smov %s11254_s26 }
 0xb4b   : > { %s14763_s26 = smov %s11258_s27  ;;  %s14764_s27 = smov %s11522_s12 }
 0xb4c   : > { %s14765_s28 = smov %s11506_s13  ;;  %30 = sbr.rel (!%p28_p13) target bundleno = 13 (0xd), region = 149 }
 0xb53   :  { %7836 = vsyncpa [#allocation3], 1 }
 0xb54   :  { %7838 = vsyncpa [#allocation3 + $0x1], 1 }
 0xb55   :  { %7839 = vsyncpa [#allocation6], 1 }
 0xb56   :  { %7840 = vsyncpa [#allocation9], 1 }
 0xb57   :  { %7841 = vsyncpa [#allocation4], 1 }
 0xb58   :  { %7843 = vsyncpa [#allocation4 + $0x1], 1 }

</bundles_post_ra>
